<compile_context>
chip_gen: v5e
topology: v5e:2x2
jax: 0.10.0
libtpu: 0.0.40
codegen_flags: <defaults>
</compile_context>

<pallas_src>
import functools

import jax
import jax.numpy as jnp
from jax import lax
from jax.experimental import pallas as pl
from jax.experimental.pallas import tpu as pltpu


def _conv_bn_lrelu_kernel(x_ref, halo0_ref, halo1_ref, w_ref, shift_ref,
                          o_ref, xs_ref, *, Nb, Sh, W, Cin, Cout, Cout_p,
                          neg_slope):
    """Fused 3x3 conv + folded-BN/bias + LeakyReLU for one (Nb, Sh) stripe.

    x_ref:     (Nb, Sh,  W+2, Cin)  padded-input rows [s*Sh, s*Sh+Sh)
    halo0_ref: (Nb, 1,   W+2, Cin)  padded-input row   s*Sh+Sh
    halo1_ref: (Nb, 1,   W+2, Cin)  padded-input row   s*Sh+Sh+1
    w_ref:     (9, Cin, Cout_p)     BN-folded conv weights (tap-major)
    shift_ref: (1, Cout_p)          beta + scale*(bias - running_mean), f32
    o_ref:     (Nb, Sh, W, Cout)    output tile (true Cout, no channel pad)
    xs_ref:    (Nb, Sh+2, W+2, Cin) VMEM scratch: stripe + 2 halo rows
    """
    # Assemble stripe + halo in VMEM.  The conv zero padding already lives in
    # the (wrapper-padded) HBM copy, so there is no per-step zero-fill here.
    xs_ref[:, :Sh, :, :] = x_ref[...]
    xs_ref[:, Sh:Sh + 1, :, :] = halo0_ref[...]
    xs_ref[:, Sh + 1:Sh + 2, :, :] = halo1_ref[...]

    # 3x3 conv as 9 accumulating MXU dots (f32 accumulation); no lane-axis
    # concatenate / im2col temporary.
    M = Nb * Sh * W
    acc = None
    for kh in range(3):
        for kw in range(3):
            tap = xs_ref[:, kh:kh + Sh, kw:kw + W, :].reshape(M, Cin)
            part = jnp.dot(tap, w_ref[kh * 3 + kw],
                           preferred_element_type=jnp.float32)
            acc = part if acc is None else acc + part

    # Folded conv-bias + BatchNorm shift, then LeakyReLU (f32 tail).
    y = acc + shift_ref[...]
    y = jnp.where(y >= 0, y, neg_slope * y)
    # Store only the true Cout channels (no HBM channel padding).
    o_ref[...] = y[:, :Cout].reshape(Nb, Sh, W, Cout).astype(o_ref.dtype)


def _vmem_bytes(Nb, Sh, W, Cin, Cout, Cout_p, in_b, out_b):
    """Rough per-step VMEM working-set estimate (double-buffered blocks)."""
    Wp = W + 2
    m = Nb * Sh * W
    total = 2 * Nb * Sh * Wp * Cin * in_b          # stripe input block x2
    total += 2 * 2 * Nb * Wp * Cin * in_b          # two halo rows x2
    total += Nb * (Sh + 2) * Wp * Cin * in_b       # xs scratch
    total += 2 * 9 * Cin * Cout_p * in_b           # weights (resident)
    total += 2 * Cout_p * 4                        # shift
    total += 2 * m * Cout * out_b                  # output block x2
    total += m * Cout_p * 4                        # f32 accumulator
    total += 2 * m * Cin * in_b                    # tap temporaries
    return total


def _pick_tiles(N, H, W, Cin, Cout, Cout_p, in_b, out_b, *,
                target_rows=1024, max_rows=2048,
                vmem_budget=12 * 1024 * 1024):
    """Pick (batch_block, stripe_h) targeting M in [~512, 2048] rows and a
    ~12 MiB working set (safe on v5e/v6e defaults and v7x's 64 MiB VMEM)."""
    rows_per_image = H * W
    if rows_per_image >= target_rows:
        Nb = 1
    else:
        Nb = min(N, max(1, target_rows // rows_per_image))
    divisors = sorted((d for d in range(1, H + 1) if H % d == 0), reverse=True)
    Sh = divisors[-1]                              # == 1, always-valid fallback
    for d in divisors:
        if Nb * d * W > max_rows:
            continue
        if _vmem_bytes(Nb, d, W, Cin, Cout, Cout_p, in_b, out_b) <= vmem_budget:
            Sh = d
            break
    return Nb, Sh


def conv_dropout_norm_nonlin_nhwc(x_nhwc, weight_oihw, bias, gamma, beta,
                                  running_mean, running_var, *,
                                  eps=1e-5, neg_slope=0.01,
                                  compute_dtype=jnp.bfloat16,
                                  out_dtype=None,
                                  block_batch=None, stripe_h=None):
    """Inference forward, NHWC in / NHWC out (preferred between layers)."""
    N, H, W, Cin = x_nhwc.shape
    Cout = weight_oihw.shape[0]
    if out_dtype is None:
        out_dtype = x_nhwc.dtype
    # Lane-dense matmul N inside VMEM only; HBM output keeps the true Cout.
    Cout_p = ((Cout + 127) // 128) * 128

    # Fold eval-mode BatchNorm into the conv:
    #   y = conv(x, w)*scale + (beta + scale*(bias - running_mean))
    scale = gamma / jnp.sqrt(running_var + eps)                     # (Cout,)
    w_taps = jnp.transpose(weight_oihw, (2, 3, 1, 0)).reshape(9, Cin, Cout)
    w_folded = (w_taps * scale[None, None, :]).astype(compute_dtype)
    w_p = jnp.zeros((9, Cin, Cout_p), compute_dtype).at[:, :, :Cout].set(
        w_folded)
    shift = (beta + scale * (bias - running_mean)).astype(jnp.float32)
    shift_p = jnp.zeros((1, Cout_p), jnp.float32).at[0, :Cout].set(shift)

    in_bytes = jnp.dtype(compute_dtype).itemsize
    out_bytes = jnp.dtype(out_dtype).itemsize
    Nb, Sh = _pick_tiles(N, H, W, Cin, Cout, Cout_p, in_bytes, out_bytes)
    if block_batch is not None:
        Nb = block_batch
    if stripe_h is not None:
        Sh = stripe_h
    assert H % Sh == 0, "stripe_h must divide H"

    n_pad = -(-N // Nb) * Nb
    # Conv zero-padding (and batch padding) done once here, fused by XLA with
    # the dtype cast; the kernel then needs no per-step zero-fill.  Casting to
    # the MXU compute dtype halves HBM->VMEM traffic on the bf16 path.
    x = jnp.pad(x_nhwc.astype(compute_dtype),
                ((0, n_pad - N), (1, 1), (1, 1), (0, 0)))
    Wp = W + 2

    kernel = functools.partial(
        _conv_bn_lrelu_kernel, Nb=Nb, Sh=Sh, W=W, Cin=Cin, Cout=Cout,
        Cout_p=Cout_p, neg_slope=neg_slope)

    grid = (n_pad // Nb, H // Sh)
    flops = 2 * n_pad * H * W * 9 * Cin * Cout_p
    bytes_accessed = (n_pad * (H + 2) * Wp * Cin * in_bytes
                      + 9 * Cin * Cout_p * in_bytes + Cout_p * 4
                      + n_pad * H * W * Cout * out_bytes)

    out = pl.pallas_call(
        kernel,
        out_shape=jax.ShapeDtypeStruct((n_pad, H, W, Cout), out_dtype),
        grid_spec=pltpu.PrefetchScalarGridSpec(
            num_scalar_prefetch=0,
            grid=grid,
            in_specs=[
                # Stripe body: padded rows [s*Sh, s*Sh+Sh).
                pl.BlockSpec((Nb, Sh, Wp, Cin), lambda n, s: (n, s, 0, 0)),
                # Two bottom-halo rows (1-row blocks -> block idx == row idx).
                pl.BlockSpec((Nb, 1, Wp, Cin),
                             lambda n, s: (n, (s + 1) * Sh, 0, 0)),
                pl.BlockSpec((Nb, 1, Wp, Cin),
                             lambda n, s: (n, (s + 1) * Sh + 1, 0, 0)),
                # Weights / shift: constant index map -> stay resident.
                pl.BlockSpec((9, Cin, Cout_p), lambda n, s: (0, 0, 0)),
                pl.BlockSpec((1, Cout_p), lambda n, s: (0, 0)),
            ],
            out_specs=pl.BlockSpec((Nb, Sh, W, Cout),
                                   lambda n, s: (n, s, 0, 0)),
            scratch_shapes=[
                pltpu.VMEM((Nb, Sh + 2, Wp, Cin), compute_dtype),
            ],
        ),
        compiler_params=pltpu.CompilerParams(
            # Disjoint output tiles -> both axes shardable across v7x's 2 TCs.
            dimension_semantics=("parallel", "parallel"),
            # Above v5e/v6e default scoped limits, below v7x's 64 MiB phys.
            vmem_limit_bytes=48 * 1024 * 1024),
        cost_estimate=pl.CostEstimate(flops=flops, transcendentals=0,
                                      bytes_accessed=bytes_accessed),
    )(x, x, x, w_p, shift_p)

    return out[:N] if n_pad != N else out


def conv_dropout_norm_nonlin(x_nchw, weight_oihw, bias, gamma, beta,
                             running_mean, running_var, *,
                             eps=1e-5, neg_slope=0.01,
                             compute_dtype=jnp.bfloat16, out_dtype=None,
                             block_batch=None, stripe_h=None):
    """Module-compatible NCHW wrapper.  Prefer the NHWC entry point when
    chaining layers (avoids two full-tensor HBM transpose passes per call)."""
    x_nhwc = jnp.transpose(x_nchw, (0, 2, 3, 1))
    out_nhwc = conv_dropout_norm_nonlin_nhwc(
        x_nhwc, weight_oihw, bias, gamma, beta, running_mean, running_var,
        eps=eps, neg_slope=neg_slope, compute_dtype=compute_dtype,
        out_dtype=out_dtype, block_batch=block_batch, stripe_h=stripe_h)
    return jnp.transpose(out_nhwc, (0, 3, 1, 2))


def _reference(x_nchw, weight_oihw, bias, gamma, beta, running_mean,
               running_var, eps=1e-5, neg_slope=0.01):
    y = lax.conv_general_dilated(
        x_nchw, weight_oihw, window_strides=(1, 1),
        padding=((1, 1), (1, 1)),
        dimension_numbers=("NCHW", "OIHW", "NCHW"))
    y = y + bias[None, :, None, None]
    y = (y - running_mean[None, :, None, None]) / jnp.sqrt(
        running_var + eps)[None, :, None, None]
    y = y * gamma[None, :, None, None] + beta[None, :, None, None]
    return jnp.where(y >= 0, y, neg_slope * y)


if __name__ == "__main__":
    key = jax.random.PRNGKey(0)
    N, Cin, Cout, H, W = 2, 4, 8, 16, 16

    k = jax.random.split(key, 7)
    x = jax.random.normal(k[0], (N, Cin, H, W), jnp.float32)
    weight = jax.random.normal(k[1], (Cout, Cin, 3, 3), jnp.float32) * 0.1
    bias = jax.random.normal(k[2], (Cout,), jnp.float32) * 0.1
    gamma = 1.0 + 0.1 * jax.random.normal(k[3], (Cout,), jnp.float32)
    beta = 0.1 * jax.random.normal(k[4], (Cout,), jnp.float32)
    running_mean = 0.1 * jax.random.normal(k[5], (Cout,), jnp.float32)
    running_var = jax.random.uniform(k[6], (Cout,), jnp.float32, 0.5, 1.5)

    ref = _reference(x, weight, bias, gamma, beta, running_mean, running_var)

    # Fast path: bf16 MXU operands, f32 accumulation / tail, auto tiling.
    out = conv_dropout_norm_nonlin(x, weight, bias, gamma, beta,
                                   running_mean, running_var)
    out = jax.block_until_ready(out)
    assert out.shape == (N, Cout, H, W)
    assert jnp.allclose(out, ref, atol=5e-2, rtol=5e-2), \
        "bf16-path mismatch vs reference"

    # f32 path: validates the folded-BN / 9-dot restructuring almost exactly.
    out_f32 = conv_dropout_norm_nonlin(x, weight, bias, gamma, beta,
                                       running_mean, running_var,
                                       compute_dtype=jnp.float32)
    out_f32 = jax.block_until_ready(out_f32)
    assert jnp.allclose(out_f32, ref, atol=1e-4, rtol=1e-4), \
        "f32-path mismatch vs reference"

    # f32 path with a non-trivial grid (2 batch blocks x 4 H-stripes) to
    # exercise the halo handling across interior stripe boundaries.
    out_striped = conv_dropout_norm_nonlin(x, weight, bias, gamma, beta,
                                           running_mean, running_var,
                                           compute_dtype=jnp.float32,
                                           block_batch=1, stripe_h=4)
    out_striped = jax.block_until_ready(out_striped)
    assert jnp.allclose(out_striped, ref, atol=1e-4, rtol=1e-4), \
        "striped-path mismatch vs reference"

    print("KERNEL_OK")
</pallas_src>

<mosaic_0001>
module attributes {stable_mosaic.version = 11 : i64} {
  func.func @_conv_bn_lrelu_kernel(%arg0: i32, %arg1: i32, %arg2: memref<2x16x18x4xbf16, #tpu.memory_space<vmem>>, %arg3: memref<2x1x18x4xbf16, #tpu.memory_space<vmem>>, %arg4: memref<2x1x18x4xbf16, #tpu.memory_space<vmem>>, %arg5: memref<9x4x128xbf16, #tpu.memory_space<vmem>>, %arg6: memref<1x128xf32, #tpu.memory_space<vmem>>, %arg7: memref<2x16x16x8xf32, #tpu.memory_space<vmem>>, %arg8: memref<2x18x18x4xbf16, #tpu.memory_space<vmem>>) attributes {dimension_semantics = [#tpu.dimension_semantics<parallel>, #tpu.dimension_semantics<parallel>], iteration_bounds = array<i64: 1, 1>, scalar_prefetch = 0 : i64, scratch_operands = 1 : i64, tpu.core_type = #tpu.core_type<tc>, window_params = [{transform_indices = @transform_0, window_bounds = array<i64: 2, 16, 18, 4>}, {transform_indices = @transform_1, window_bounds = array<i64: 2, 1, 18, 4>}, {transform_indices = @transform_2, window_bounds = array<i64: 2, 1, 18, 4>}, {pipeline_mode = #tpu.pipeline_mode<synchronous>, transform_indices = @transform_3, window_bounds = array<i64: 9, 4, 128>}, {pipeline_mode = #tpu.pipeline_mode<synchronous>, transform_indices = @transform_4, window_bounds = array<i64: 1, 128>}, {transform_indices = @transform_5, window_bounds = array<i64: 2, 16, 16, 8>}]} {
    %c0 = arith.constant 0 : index
    %c0_0 = arith.constant 0 : index
    %c0_1 = arith.constant 0 : index
    %c0_2 = arith.constant 0 : index
    %0 = vector.load %arg2[%c0, %c0_0, %c0_1, %c0_2] : memref<2x16x18x4xbf16, #tpu.memory_space<vmem>>, vector<2x16x18x4xbf16>
    %c0_3 = arith.constant 0 : index
    %c0_4 = arith.constant 0 : index
    %c0_5 = arith.constant 0 : index
    %c0_6 = arith.constant 0 : index
    %1 = vector.load %arg8[%c0_3, %c0_4, %c0_5, %c0_6] : memref<2x18x18x4xbf16, #tpu.memory_space<vmem>>, vector<2x16x18x4xbf16>
    tpu.vector_store %arg8[%c0_3, %c0_4, %c0_5, %c0_6], %0 {strides = array<i32>} : memref<2x18x18x4xbf16, #tpu.memory_space<vmem>>, vector<2x16x18x4xbf16>,
    %c0_7 = arith.constant 0 : index
    %c0_8 = arith.constant 0 : index
    %c0_9 = arith.constant 0 : index
    %c0_10 = arith.constant 0 : index
    %2 = vector.load %arg3[%c0_7, %c0_8, %c0_9, %c0_10] : memref<2x1x18x4xbf16, #tpu.memory_space<vmem>>, vector<2x1x18x4xbf16>
    %c0_11 = arith.constant 0 : index
    %c16 = arith.constant 16 : index
    %c0_12 = arith.constant 0 : index
    %c0_13 = arith.constant 0 : index
    %3 = vector.load %arg8[%c0_11, %c16, %c0_12, %c0_13] : memref<2x18x18x4xbf16, #tpu.memory_space<vmem>>, vector<2x1x18x4xbf16>
    tpu.vector_store %arg8[%c0_11, %c16, %c0_12, %c0_13], %2 {strides = array<i32>} : memref<2x18x18x4xbf16, #tpu.memory_space<vmem>>, vector<2x1x18x4xbf16>,
    %c0_14 = arith.constant 0 : index
    %c0_15 = arith.constant 0 : index
    %c0_16 = arith.constant 0 : index
    %c0_17 = arith.constant 0 : index
    %4 = vector.load %arg4[%c0_14, %c0_15, %c0_16, %c0_17] : memref<2x1x18x4xbf16, #tpu.memory_space<vmem>>, vector<2x1x18x4xbf16>
    %c0_18 = arith.constant 0 : index
    %c17 = arith.constant 17 : index
    %c0_19 = arith.constant 0 : index
    %c0_20 = arith.constant 0 : index
    %5 = vector.load %arg8[%c0_18, %c17, %c0_19, %c0_20] : memref<2x18x18x4xbf16, #tpu.memory_space<vmem>>, vector<2x1x18x4xbf16>
    tpu.vector_store %arg8[%c0_18, %c17, %c0_19, %c0_20], %4 {strides = array<i32>} : memref<2x18x18x4xbf16, #tpu.memory_space<vmem>>, vector<2x1x18x4xbf16>,
    %c0_21 = arith.constant 0 : index
    %c0_22 = arith.constant 0 : index
    %c0_23 = arith.constant 0 : index
    %c0_24 = arith.constant 0 : index
    %6 = vector.load %arg8[%c0_21, %c0_22, %c0_23, %c0_24] : memref<2x18x18x4xbf16, #tpu.memory_space<vmem>>, vector<2x16x16x4xbf16>
    %7 = vector.shape_cast %6 : vector<2x16x16x4xbf16> to vector<512x4xbf16>
    %c0_25 = arith.constant 0 : index
    %c0_26 = arith.constant 0 : index
    %c0_27 = arith.constant 0 : index
    %8 = vector.load %arg5[%c0_25, %c0_26, %c0_27] : memref<9x4x128xbf16, #tpu.memory_space<vmem>>, vector<1x4x128xbf16>
    %9 = vector.shape_cast %8 : vector<1x4x128xbf16> to vector<4x128xbf16>
    %cst = arith.constant dense<0.000000e+00> : vector<512x128xf32>
    %10 = tpu.matmul %7, %9, %cst {dimension_numbers = #tpu.dot_dimension_numbers<[1], [0], [0], [1], [0, 0, 1, 1], [], []>} : vector<512x4xbf16>, vector<4x128xbf16>, vector<512x128xf32> -> vector<512x128xf32>
    %c0_28 = arith.constant 0 : index
    %c0_29 = arith.constant 0 : index
    %c1 = arith.constant 1 : index
    %c0_30 = arith.constant 0 : index
    %11 = vector.load %arg8[%c0_28, %c0_29, %c1, %c0_30] : memref<2x18x18x4xbf16, #tpu.memory_space<vmem>>, vector<2x16x16x4xbf16>
    %12 = vector.shape_cast %11 : vector<2x16x16x4xbf16> to vector<512x4xbf16>
    %c1_31 = arith.constant 1 : index
    %c0_32 = arith.constant 0 : index
    %c0_33 = arith.constant 0 : index
    %13 = vector.load %arg5[%c1_31, %c0_32, %c0_33] : memref<9x4x128xbf16, #tpu.memory_space<vmem>>, vector<1x4x128xbf16>
    %14 = vector.shape_cast %13 : vector<1x4x128xbf16> to vector<4x128xbf16>
    %cst_34 = arith.constant dense<0.000000e+00> : vector<512x128xf32>
    %15 = tpu.matmul %12, %14, %cst_34 {dimension_numbers = #tpu.dot_dimension_numbers<[1], [0], [0], [1], [0, 0, 1, 1], [], []>} : vector<512x4xbf16>, vector<4x128xbf16>, vector<512x128xf32> -> vector<512x128xf32>
    %16 = arith.addf %10, %15 : vector<512x128xf32>
    %c0_35 = arith.constant 0 : index
    %c0_36 = arith.constant 0 : index
    %c2 = arith.constant 2 : index
    %c0_37 = arith.constant 0 : index
    %17 = vector.load %arg8[%c0_35, %c0_36, %c2, %c0_37] : memref<2x18x18x4xbf16, #tpu.memory_space<vmem>>, vector<2x16x16x4xbf16>
    %18 = vector.shape_cast %17 : vector<2x16x16x4xbf16> to vector<512x4xbf16>
    %c2_38 = arith.constant 2 : index
    %c0_39 = arith.constant 0 : index
    %c0_40 = arith.constant 0 : index
    %19 = vector.load %arg5[%c2_38, %c0_39, %c0_40] : memref<9x4x128xbf16, #tpu.memory_space<vmem>>, vector<1x4x128xbf16>
    %20 = vector.shape_cast %19 : vector<1x4x128xbf16> to vector<4x128xbf16>
    %cst_41 = arith.constant dense<0.000000e+00> : vector<512x128xf32>
    %21 = tpu.matmul %18, %20, %cst_41 {dimension_numbers = #tpu.dot_dimension_numbers<[1], [0], [0], [1], [0, 0, 1, 1], [], []>} : vector<512x4xbf16>, vector<4x128xbf16>, vector<512x128xf32> -> vector<512x128xf32>
    %22 = arith.addf %16, %21 : vector<512x128xf32>
    %c0_42 = arith.constant 0 : index
    %c1_43 = arith.constant 1 : index
    %c0_44 = arith.constant 0 : index
    %c0_45 = arith.constant 0 : index
    %23 = vector.load %arg8[%c0_42, %c1_43, %c0_44, %c0_45] : memref<2x18x18x4xbf16, #tpu.memory_space<vmem>>, vector<2x16x16x4xbf16>
    %24 = vector.shape_cast %23 : vector<2x16x16x4xbf16> to vector<512x4xbf16>
    %c3 = arith.constant 3 : index
    %c0_46 = arith.constant 0 : index
    %c0_47 = arith.constant 0 : index
    %25 = vector.load %arg5[%c3, %c0_46, %c0_47] : memref<9x4x128xbf16, #tpu.memory_space<vmem>>, vector<1x4x128xbf16>
    %26 = vector.shape_cast %25 : vector<1x4x128xbf16> to vector<4x128xbf16>
    %cst_48 = arith.constant dense<0.000000e+00> : vector<512x128xf32>
    %27 = tpu.matmul %24, %26, %cst_48 {dimension_numbers = #tpu.dot_dimension_numbers<[1], [0], [0], [1], [0, 0, 1, 1], [], []>} : vector<512x4xbf16>, vector<4x128xbf16>, vector<512x128xf32> -> vector<512x128xf32>
    %28 = arith.addf %22, %27 : vector<512x128xf32>
    %c0_49 = arith.constant 0 : index
    %c1_50 = arith.constant 1 : index
    %c1_51 = arith.constant 1 : index
    %c0_52 = arith.constant 0 : index
    %29 = vector.load %arg8[%c0_49, %c1_50, %c1_51, %c0_52] : memref<2x18x18x4xbf16, #tpu.memory_space<vmem>>, vector<2x16x16x4xbf16>
    %30 = vector.shape_cast %29 : vector<2x16x16x4xbf16> to vector<512x4xbf16>
    %c4 = arith.constant 4 : index
    %c0_53 = arith.constant 0 : index
    %c0_54 = arith.constant 0 : index
    %31 = vector.load %arg5[%c4, %c0_53, %c0_54] : memref<9x4x128xbf16, #tpu.memory_space<vmem>>, vector<1x4x128xbf16>
    %32 = vector.shape_cast %31 : vector<1x4x128xbf16> to vector<4x128xbf16>
    %cst_55 = arith.constant dense<0.000000e+00> : vector<512x128xf32>
    %33 = tpu.matmul %30, %32, %cst_55 {dimension_numbers = #tpu.dot_dimension_numbers<[1], [0], [0], [1], [0, 0, 1, 1], [], []>} : vector<512x4xbf16>, vector<4x128xbf16>, vector<512x128xf32> -> vector<512x128xf32>
    %34 = arith.addf %28, %33 : vector<512x128xf32>
    %c0_56 = arith.constant 0 : index
    %c1_57 = arith.constant 1 : index
    %c2_58 = arith.constant 2 : index
    %c0_59 = arith.constant 0 : index
    %35 = vector.load %arg8[%c0_56, %c1_57, %c2_58, %c0_59] : memref<2x18x18x4xbf16, #tpu.memory_space<vmem>>, vector<2x16x16x4xbf16>
    %36 = vector.shape_cast %35 : vector<2x16x16x4xbf16> to vector<512x4xbf16>
    %c5 = arith.constant 5 : index
    %c0_60 = arith.constant 0 : index
    %c0_61 = arith.constant 0 : index
    %37 = vector.load %arg5[%c5, %c0_60, %c0_61] : memref<9x4x128xbf16, #tpu.memory_space<vmem>>, vector<1x4x128xbf16>
    %38 = vector.shape_cast %37 : vector<1x4x128xbf16> to vector<4x128xbf16>
    %cst_62 = arith.constant dense<0.000000e+00> : vector<512x128xf32>
    %39 = tpu.matmul %36, %38, %cst_62 {dimension_numbers = #tpu.dot_dimension_numbers<[1], [0], [0], [1], [0, 0, 1, 1], [], []>} : vector<512x4xbf16>, vector<4x128xbf16>, vector<512x128xf32> -> vector<512x128xf32>
    %40 = arith.addf %34, %39 : vector<512x128xf32>
    %c0_63 = arith.constant 0 : index
    %c2_64 = arith.constant 2 : index
    %c0_65 = arith.constant 0 : index
    %c0_66 = arith.constant 0 : index
    %41 = vector.load %arg8[%c0_63, %c2_64, %c0_65, %c0_66] : memref<2x18x18x4xbf16, #tpu.memory_space<vmem>>, vector<2x16x16x4xbf16>
    %42 = vector.shape_cast %41 : vector<2x16x16x4xbf16> to vector<512x4xbf16>
    %c6 = arith.constant 6 : index
    %c0_67 = arith.constant 0 : index
    %c0_68 = arith.constant 0 : index
    %43 = vector.load %arg5[%c6, %c0_67, %c0_68] : memref<9x4x128xbf16, #tpu.memory_space<vmem>>, vector<1x4x128xbf16>
    %44 = vector.shape_cast %43 : vector<1x4x128xbf16> to vector<4x128xbf16>
    %cst_69 = arith.constant dense<0.000000e+00> : vector<512x128xf32>
    %45 = tpu.matmul %42, %44, %cst_69 {dimension_numbers = #tpu.dot_dimension_numbers<[1], [0], [0], [1], [0, 0, 1, 1], [], []>} : vector<512x4xbf16>, vector<4x128xbf16>, vector<512x128xf32> -> vector<512x128xf32>
    %46 = arith.addf %40, %45 : vector<512x128xf32>
    %c0_70 = arith.constant 0 : index
    %c2_71 = arith.constant 2 : index
    %c1_72 = arith.constant 1 : index
    %c0_73 = arith.constant 0 : index
    %47 = vector.load %arg8[%c0_70, %c2_71, %c1_72, %c0_73] : memref<2x18x18x4xbf16, #tpu.memory_space<vmem>>, vector<2x16x16x4xbf16>
    %48 = vector.shape_cast %47 : vector<2x16x16x4xbf16> to vector<512x4xbf16>
    %c7 = arith.constant 7 : index
    %c0_74 = arith.constant 0 : index
    %c0_75 = arith.constant 0 : index
    %49 = vector.load %arg5[%c7, %c0_74, %c0_75] : memref<9x4x128xbf16, #tpu.memory_space<vmem>>, vector<1x4x128xbf16>
    %50 = vector.shape_cast %49 : vector<1x4x128xbf16> to vector<4x128xbf16>
    %cst_76 = arith.constant dense<0.000000e+00> : vector<512x128xf32>
    %51 = tpu.matmul %48, %50, %cst_76 {dimension_numbers = #tpu.dot_dimension_numbers<[1], [0], [0], [1], [0, 0, 1, 1], [], []>} : vector<512x4xbf16>, vector<4x128xbf16>, vector<512x128xf32> -> vector<512x128xf32>
    %52 = arith.addf %46, %51 : vector<512x128xf32>
    %c0_77 = arith.constant 0 : index
    %c2_78 = arith.constant 2 : index
    %c2_79 = arith.constant 2 : index
    %c0_80 = arith.constant 0 : index
    %53 = vector.load %arg8[%c0_77, %c2_78, %c2_79, %c0_80] : memref<2x18x18x4xbf16, #tpu.memory_space<vmem>>, vector<2x16x16x4xbf16>
    %54 = vector.shape_cast %53 : vector<2x16x16x4xbf16> to vector<512x4xbf16>
    %c8 = arith.constant 8 : index
    %c0_81 = arith.constant 0 : index
    %c0_82 = arith.constant 0 : index
    %55 = vector.load %arg5[%c8, %c0_81, %c0_82] : memref<9x4x128xbf16, #tpu.memory_space<vmem>>, vector<1x4x128xbf16>
    %56 = vector.shape_cast %55 : vector<1x4x128xbf16> to vector<4x128xbf16>
    %cst_83 = arith.constant dense<0.000000e+00> : vector<512x128xf32>
    %57 = tpu.matmul %54, %56, %cst_83 {dimension_numbers = #tpu.dot_dimension_numbers<[1], [0], [0], [1], [0, 0, 1, 1], [], []>} : vector<512x4xbf16>, vector<4x128xbf16>, vector<512x128xf32> -> vector<512x128xf32>
    %58 = arith.addf %52, %57 : vector<512x128xf32>
    %c0_84 = arith.constant 0 : index
    %c0_85 = arith.constant 0 : index
    %59 = vector.load %arg6[%c0_84, %c0_85] : memref<1x128xf32, #tpu.memory_space<vmem>>, vector<1x128xf32>
    %60 = vector.broadcast %59 : vector<1x128xf32> to vector<512x128xf32>
    %61 = arith.addf %58, %60 : vector<512x128xf32>
    %cst_86 = arith.constant 0.000000e+00 : f32
    %62 = vector.broadcast %cst_86 : f32 to vector<512x128xf32>
    %63 = arith.cmpf oge, %61, %62 : vector<512x128xf32>
    %cst_87 = arith.constant 0.00999999977 : f32
    %64 = vector.broadcast %cst_87 : f32 to vector<512x128xf32>
    %65 = arith.mulf %64, %61 : vector<512x128xf32>
    %66 = arith.select %63, %61, %65 : vector<512x128xi1>, vector<512x128xf32>
    %67 = vector.extract_strided_slice %66 {offsets = [0, 0], sizes = [512, 8], strides = [1, 1]} : vector<512x128xf32> to vector<512x8xf32>
    %68 = vector.shape_cast %67 : vector<512x8xf32> to vector<2x16x16x8xf32>
    %c0_88 = arith.constant 0 : index
    %c0_89 = arith.constant 0 : index
    %c0_90 = arith.constant 0 : index
    %c0_91 = arith.constant 0 : index
    %69 = vector.load %arg7[%c0_88, %c0_89, %c0_90, %c0_91] : memref<2x16x16x8xf32, #tpu.memory_space<vmem>>, vector<2x16x16x8xf32>
    tpu.vector_store %arg7[%c0_88, %c0_89, %c0_90, %c0_91], %68 {strides = array<i32>} : memref<2x16x16x8xf32, #tpu.memory_space<vmem>>, vector<2x16x16x8xf32>,
    return
  }
  func.func @transform_0(%arg0: i32, %arg1: i32) -> (i32, i32, i32, i32) {
    %c0_i32 = arith.constant 0 : i32
    %c0_i32_0 = arith.constant 0 : i32
    %c0_i32_1 = arith.constant 0 : i32
    return %arg0, %arg1, %c0_i32, %c0_i32_0 : i32, i32, i32, i32
  }
  func.func @transform_1(%arg0: i32, %arg1: i32) -> (i32, i32, i32, i32) {
    %c1_i32 = arith.constant 1 : i32
    %0 = arith.addi %arg1, %c1_i32 : i32
    %c16_i32 = arith.constant 16 : i32
    %1 = arith.muli %0, %c16_i32 : i32
    %c0_i32 = arith.constant 0 : i32
    %c0_i32_0 = arith.constant 0 : i32
    %c0_i32_1 = arith.constant 0 : i32
    return %arg0, %1, %c0_i32, %c0_i32_0 : i32, i32, i32, i32
  }
  func.func @transform_2(%arg0: i32, %arg1: i32) -> (i32, i32, i32, i32) {
    %c1_i32 = arith.constant 1 : i32
    %0 = arith.addi %arg1, %c1_i32 : i32
    %c16_i32 = arith.constant 16 : i32
    %1 = arith.muli %0, %c16_i32 : i32
    %c1_i32_0 = arith.constant 1 : i32
    %2 = arith.addi %1, %c1_i32_0 : i32
    %c0_i32 = arith.constant 0 : i32
    %c0_i32_1 = arith.constant 0 : i32
    %c0_i32_2 = arith.constant 0 : i32
    return %arg0, %2, %c0_i32, %c0_i32_1 : i32, i32, i32, i32
  }
  func.func @transform_3(%arg0: i32, %arg1: i32) -> (i32, i32, i32) {
    %c0_i32 = arith.constant 0 : i32
    %c0_i32_0 = arith.constant 0 : i32
    %c0_i32_1 = arith.constant 0 : i32
    %c0_i32_2 = arith.constant 0 : i32
    return %c0_i32, %c0_i32_0, %c0_i32_1 : i32, i32, i32
  }
  func.func @transform_4(%arg0: i32, %arg1: i32) -> (i32, i32) {
    %c0_i32 = arith.constant 0 : i32
    %c0_i32_0 = arith.constant 0 : i32
    %c0_i32_1 = arith.constant 0 : i32
    return %c0_i32, %c0_i32_0 : i32, i32
  }
  func.func @transform_5(%arg0: i32, %arg1: i32) -> (i32, i32, i32, i32) {
    %c0_i32 = arith.constant 0 : i32
    %c0_i32_0 = arith.constant 0 : i32
    %c0_i32_1 = arith.constant 0 : i32
    return %arg0, %arg1, %c0_i32, %c0_i32_0 : i32, i32, i32, i32
  }
}

</mosaic_0001>

<bundles_post_ra>
// kernel: tpu_custom_call.1
= control target key start
LH: loop header
LB: loop body
LE: loop exit
PB: predicated region body
PF: predicated region fallthrough
CT: control target
= control target key end

     0   :  { %vm1869_vm0 = vcmask 1041408   ;;  %vm682_vm1 = vcmask 27648   ;;  %vm685_vm2 = vcmask 24576   ;;  %vm903_vm3 = vsmask.f32 3328  ;;  %s12374_s0 = inlined_call_operand.vmem [shape: bf16[2,18,18,4], index: 0, kind: input, shape index: {}]   ;;  %s12375_s1 = inlined_call_operand.vmem [shape: bf16[2,18,18,4], index: 1, kind: input, shape index: {}]   ;;  %s12376_s2 = inlined_call_operand.vmem [shape: bf16[2,18,18,4], index: 2, kind: input, shape index: {}]   ;;  %s12377_s3 = inlined_call_operand.vmem [shape: bf16[9,4,128], index: 3, kind: input, shape index: {}]   ;;  %s12378_s4 = inlined_call_operand.vmem [shape: f32[1,128], index: 4, kind: input, shape index: {}]   ;;  %s12379_s5 = inlined_call_operand.vmem [shape: f32[2,16,16,8], index: 5, kind: output, shape index: {}]  }
   0x1   :  { %v8848_v0 = vld [vmem:[%s12377_s3 + $0x2] sm:$0x3]  ;;  %v80_v2 = vld [vmem:[%s12374_s0 + $0x68] sm:$0xff]   ;;  %v124_v4 = vld [vmem:[%s12374_s0 + $0xd8] sm:$0xff]   ;;  %vm904_vm4 = vsmask.f32 7440 }
   0x2   :  { %v76_v1 = vld [vmem:[%s12374_s0 + $0x60] sm:$0xff]   ;;  %v1871_v3 = vsel %vm1869_vm0, %v8848_v0, 0  ;;  %81 = vst [vmem:[#allocation3 + $0x68] sm:$0xff] %v80_v2   ;;  %v172_v6 = vld [vmem:[%s12374_s0 + $0x138] sm:$0xff]   ;;  %v32_v9 = vld [vmem:[%s12374_s0 + $0x8] sm:$0xff]   ;;  %vm1772_vm5 = vcmask 31744  }
   0x3   :  { %77 = vst [vmem:[#allocation3 + $0x60] sm:$0xff] %v76_v1   ;;  %9720 = vmatpush.bf16.msra.mxu1 %v1871_v3  ;;  %9721 = vmatpush.bf16.msra.mxu2 %v1871_v3  ;;  %v128_v5 = vld [vmem:[%s12374_s0 + $0xe0] sm:$0xff]   ;;  %v84_v25 = vld [vmem:[%s12374_s0 + $0x70] sm:$0xff]   ;;  %v132_v29 = vld [vmem:[%s12374_s0 + $0xe8] sm:$0xff]   ;;  %vm2566_vm7 = vcmask 1042432   ;;  %vm2567_vm8 = vcmask 1046532  }
   0x4   :  { %9722 = vmatpush.bf16.msra.mxu3 %v1871_v3  ;;  %1880 = vmatpush.bf16.msra.mxu0 %v1871_v3  ;;  %125 = vst [vmem:[#allocation3 + $0xc0] sm:$0xff] %v124_v4   ;;  %v176_v7 = vld [vmem:[%s12374_s0 + $0x140] sm:$0xff]   ;;  %v180_v37 = vld [vmem:[%s12374_s0 + $0x148] sm:$0xff]   ;;  %vm9938_vm6 = vmor %vm903_vm3, %vm904_vm4  ;;  %vm8753_vm11 = vcmask 64512  }
   0x5   :  { %129 = vst [vmem:[#allocation3 + $0xc8] sm:$0xff] %v128_v5   ;;  %v28_v8 = vld [vmem:[%s12374_s0] sm:$0xff]   ;;  %v36_v60 = vld [vmem:[%s12374_s0 + $0x10] sm:$0xff]   ;;  %vm10330_vm9 = vmor %vm2566_vm7, %vm2567_vm8 }
   0x6   :  { %173 = vst [vmem:[#allocation3 + $0x120] sm:$0xff] %v172_v6   ;;  %v9073_v13 = vld [vmem:[%s12377_s3 + $0x4] sm:$0x3]  ;;  %v9106_v22 = vld [vmem:[%s12377_s3 + $0x6] sm:$0x3] }
   0x7   :  { %177 = vst [vmem:[#allocation3 + $0x128] sm:$0xff] %v176_v7   ;;  %v2988_v17 = vsel %vm1869_vm0, %v9073_v13, 0  ;;  %v3547_v24 = vsel %vm1869_vm0, %v9106_v22, 0 }
   0x8   :  { %29 = vst [vmem:[#allocation3] sm:$0xff] %v28_v8   ;;  %2997 = vmatpush.bf16.msrb.mxu2 %v2988_v17  ;;  %3556 = vmatpush.bf16.msrb.mxu3 %v3547_v24 }
   0x9   :  { %33 = vst [vmem:[#allocation3 + $0x8] sm:$0xff] %v32_v9   ;;  %v612_v12 = vld [vmem:[#allocation3 + $0x68] sm:$0x1]  ;;  %v613_v1 = vld [vmem:[#allocation3 + $0x6c] sm:$0xf] }
   0xa   :  { %v610_v10 = vld [vmem:[#allocation3 + $0x60] sm:$0xf]  ;;  %v611_v11 = vld [vmem:[#allocation3 + $0x64] sm:$0xf]  ;;  %710 = vst.msk [vmem:[#allocation2 + $0x68] sm:$0x1] %vm685_vm2, %v612_v12 }
   0xb   :  { %708 = vst.msk [vmem:[#allocation2 + $0x60] sm:$0xf] %vm682_vm1, %v610_v10  ;;  %v634_v14 = vld [vmem:[#allocation3 + $0xc0] sm:$0xf]  ;;  %v635_v15 = vld [vmem:[#allocation3 + $0xc4] sm:$0xf] }
   0xc   :  { %709 = vst.msk [vmem:[#allocation2 + $0x64] sm:$0xf] %vm682_vm1, %v611_v11  ;;  %v636_v16 = vld [vmem:[#allocation3 + $0xc8] sm:$0x1] }
   0xd   :  { %732 = vst.msk [vmem:[#allocation2 + $0xd8] sm:$0xf] %vm682_vm1, %v634_v14  ;;  %v658_v18 = vld [vmem:[#allocation3 + $0x120] sm:$0xf]  ;;  %v659_v19 = vld [vmem:[#allocation3 + $0x124] sm:$0xf] }
   0xe   :  { %733 = vst.msk [vmem:[#allocation2 + $0xdc] sm:$0xf] %vm682_vm1, %v635_v15  ;;  %v660_v20 = vld [vmem:[#allocation3 + $0x128] sm:$0x1] }
   0xf   :  { %734 = vst.msk [vmem:[#allocation2 + $0xe0] sm:$0x1] %vm685_vm2, %v636_v16  ;;  %v586_v21 = vld [vmem:[#allocation3] sm:$0xf]  ;;  %v587_v43 = vld [vmem:[#allocation3 + $0x4] sm:$0xf] }
  0x10   :  { %756 = vst.msk [vmem:[#allocation2 + $0x138] sm:$0xf] %vm682_vm1, %v658_v18  ;;  %v588_v49 = vld [vmem:[#allocation3 + $0x8] sm:$0x1]  ;;  %v870_v16 = vld [vmem:[%s12377_s3] sm:$0x3] }
  0x11   :  { %757 = vst.msk [vmem:[#allocation2 + $0x13c] sm:$0xf] %vm682_vm1, %v659_v19  ;;  %v879_v30 = vld [vmem:[#allocation2 + $0x68] sm:$0x1] }
  0x12   :  { %v822_v23 = vld [vmem:[#allocation2 + $0x60] sm:$0xf]  ;;  %758 = vst.msk [vmem:[#allocation2 + $0x140] sm:$0x1] %vm685_vm2, %v660_v20  ;;  %v1118_v35 = vshll.u32 %v879_v30, 16 }
  0x13   :  { %v823_v26 = vld [vmem:[#allocation2 + $0x64] sm:$0xf]  ;;  %v1099_v27 = vshrl.u32 %v822_v23, 16  ;;  %v1102_v28 = vshll.u32 %v822_v23, 16  ;;  %683 = vst.msk [vmem:[#allocation2] sm:$0xf] %vm682_vm1, %v586_v21 }
  0x14   :  { %v1108_v31 = vshll.u32 %v823_v26, 16  ;;  %v1112_v32 = vshrl.u32 %v823_v26, 16  ;;  %v838_v36 = vld [vmem:[#allocation2 + $0xd8] sm:$0xf]  ;;  %v1120_v45 = vrot.slane %v1118_v35, 5  ;;  %85 = vst [vmem:[#allocation3 + $0x70] sm:$0xff] %v84_v25  }
  0x15   :  { %v1101_v33 = vrot.slane %v1099_v27, 4  ;;  %v1104_v34 = vrot.slane %v1102_v28, 5  ;;  %v839_v40 = vld [vmem:[#allocation2 + $0xdc] sm:$0xf]  ;;  %v1291_v41 = vshrl.u32 %v838_v36, 16  ;;  %v1294_v42 = vshll.u32 %v838_v36, 16 }
  0x16   :  { %v1110_v38 = vrot.slane %v1108_v31, 5  ;;  %v1114_v39 = vrot.slane %v1112_v32, 4  ;;  %v887_v46 = vld [vmem:[#allocation2 + $0xe0] sm:$0x1]  ;;  %v1300_v47 = vshll.u32 %v839_v40, 16  ;;  %v1304_v48 = vshrl.u32 %v839_v40, 16 }
  0x17   :  { %v1105_v44 = vor.u32 %v1104_v34, %v1101_v33  ;;  %v1293_v52 = vrot.slane %v1291_v41, 4  ;;  %v1296_v53 = vrot.slane %v1294_v42, 5  ;;  %v1310_v54 = vshll.u32 %v887_v46, 16  ;;  %v854_v55 = vld [vmem:[#allocation2 + $0x138] sm:$0xf]  ;;  %133 = vst [vmem:[#allocation3 + $0xd0] sm:$0xff] %v132_v29  }
  0x18   :  { %v1115_v51 = vor.u32 %v1114_v39, %v1110_v38  ;;  %v1302_v57 = vrot.slane %v1300_v47, 5  ;;  %v1306_v58 = vrot.slane %v1304_v48, 4  ;;  %v855_v59 = vld [vmem:[#allocation2 + $0x13c] sm:$0xf]  ;;  %v1483_v0 = vshrl.u32 %v854_v55, 16  ;;  %181 = vst [vmem:[#allocation3 + $0x130] sm:$0xff] %v180_v37  }
  0x19   :  { %v1106_v56 = vrot.slane %v1105_v44, 4  ;;  %v1297_v62 = vor.u32 %v1296_v53, %v1293_v52  ;;  %v1312_v63 = vrot.slane %v1310_v54, 5  ;;  %v895_v4 = vld [vmem:[#allocation2 + $0x140] sm:$0x1]  ;;  %v1486_v5 = vshll.u32 %v854_v55, 16  ;;  %37 = vst [vmem:[#allocation3 + $0x10] sm:$0xff] %v36_v60  }
  0x1a   :  { %v1116_v61 = vrot.slane %v1115_v51, 4  ;;  %v1307_v3 = vor.u32 %v1306_v58, %v1302_v57  ;;  %v1492_v6 = vshll.u32 %v855_v59, 16  ;;  %684 = vst.msk [vmem:[#allocation2 + $0x4] sm:$0xf] %vm682_vm1, %v587_v43  ;;  %v1485_v10 = vrot.slane %v1483_v0, 4  ;;  %v88_v27 = vld [vmem:[%s12374_s0 + $0x78] sm:$0xff]  }
  0x1b   :  { %v1111_v2 = vsel %vm9938_vm6, %v1106_v56, %v1110_v38  ;;  %v1298_v9 = vrot.slane %v1297_v62, 4  ;;  %686 = vst.msk [vmem:[#allocation2 + $0x8] sm:$0x1] %vm685_vm2, %v588_v49  ;;  %v806_v11 = vld [vmem:[#allocation2] sm:$0xf]  ;;  %v1488_v14 = vrot.slane %v1486_v5, 5 }
  0x1c   :  { %v1121_v7 = vsel %vm9938_vm6, %v1116_v61, %v1120_v45  ;;  %v1692_v8 = vunpack.c.l.b16 %v1111_v2  ;;  %v1308_v13 = vrot.slane %v1307_v3, 4  ;;  %v1494_v15 = vrot.slane %v1492_v6, 5  ;;  %v9267_v20 = vld [vmem:[%s12377_s3 + $0x8] sm:$0x3]  ;;  %v614_v21 = vld [vmem:[#allocation3 + $0x70] sm:$0xf] }
  0x1d   :  { %v1693_v12 = vunpack.c.l.b16 %v1121_v7  ;;  %v1303_v17 = vsel %vm9938_vm6, %v1298_v9, %v1302_v57  ;;  %v1496_v18 = vshrl.u32 %v855_v59, 16  ;;  %v1502_v19 = vshll.u32 %v895_v4, 16  ;;  %v615_v26 = vld [vmem:[#allocation3 + $0x74] sm:$0x1]  ;;  %711 = vst.msk [vmem:[#allocation2 + $0x6c] sm:$0xf] %vm682_vm1, %v613_v1 }
  0x1e   :  { %v1313_v23 = vsel %vm9938_vm6, %v1308_v13, %v1312_v63  ;;  %v1708_v24 = vunpack.c.l.b16 %v1303_v17  ;;  %v1489_v25 = vor.u32 %v1488_v14, %v1485_v10  ;;  %v907_v31 = vshrl.u32 %v806_v11, 16  ;;  %712 = vst.msk [vmem:[#allocation2 + $0x70] sm:$0xf] %vm682_vm1, %v614_v21  ;;  %v637_v32 = vld [vmem:[#allocation3 + $0xcc] sm:$0xf]  ;;  %v92_v33 = vld [vmem:[%s12374_s0 + $0x80] sm:$0xff]  }
  0x1f   :  { %v1748_v22 = vpack.c.b16 %v1693_v12, %v1692_v8  ;;  %v1709_v28 = vunpack.c.l.b16 %v1313_v23  ;;  %v1498_v29 = vrot.slane %v1496_v18, 4  ;;  %v1504_v30 = vrot.slane %v1502_v19, 5  ;;  %713 = vst.msk [vmem:[#allocation2 + $0x74] sm:$0x1] %vm685_vm2, %v615_v26  ;;  %v638_v42 = vld [vmem:[#allocation3 + $0xd0] sm:$0xf] }
  0x20   :  { %v1490_v34 = vrot.slane %v1489_v25, 4  ;;  %v910_v35 = vshll.u32 %v806_v11, 16  ;;  %v2299_v36 = vsel %vm1869_vm0, %v870_v16, 0  ;;  %v4841_v37 = vsel %vm1869_vm0, %v9267_v20, 0  ;;  %89 = vst [vmem:[#allocation3 + $0x78] sm:$0xff] %v88_v27   ;;  %v136_v52 = vld [vmem:[%s12374_s0 + $0xf0] sm:$0xff]  }
  0x21   :  { %8857 = vmatmul.msk.bf16.vlgmr.msra.gmra.mxu1 %vm1772_vm5, %v1748_v22  ;;  %v1756_v38 = vpack.c.b16 %v1709_v28, %v1708_v24  ;;  %v1499_v39 = vor.u32 %v1498_v29, %v1494_v15  ;;  %v807_v40 = vld [vmem:[#allocation2 + $0x4] sm:$0xf]  ;;  %v909_v41 = vrot.slane %v907_v31, 4  ;;  %4850 = vmatpush.bf16.msrb.mxu0 %v4841_v37  ;;  %93 = vst [vmem:[#allocation3 + $0x80] sm:$0xff] %v92_v33   ;;  %v661_v57 = vld [vmem:[#allocation3 + $0x12c] sm:$0xf] }
  0x22   :  { %2308 = vmatpush.bf16.msrb.mxu1 %v2299_v36  ;;  %v1495_v43 = vsel %vm9938_vm6, %v1490_v34, %v1494_v15  ;;  %v871_v44 = vld [vmem:[#allocation2 + $0x8] sm:$0x1]  ;;  %v912_v45 = vrot.slane %v910_v35, 5  ;;  %v916_v46 = vshll.u32 %v807_v40, 16  ;;  %v920_v47 = vshrl.u32 %v807_v40, 16  ;;  %137 = vst [vmem:[#allocation3 + $0xd8] sm:$0xff] %v136_v52  }
  0x23   :  { %8865 = vmatmul.msk.bf16.vlgmr.msra.gmra.mxu2 %vm1772_vm5, %v1756_v38  ;;  %v1500_v48 = vrot.slane %v1499_v39, 4  ;;  %v926_v49 = vshll.u32 %v871_v44, 16  ;;  %v639_v51 = vld [vmem:[#allocation3 + $0xd4] sm:$0x1]  ;;  %v1724_v53 = vunpack.c.l.b16 %v1495_v43  ;;  %735 = vst.msk [vmem:[#allocation2 + $0xe4] sm:$0xf] %vm682_vm1, %v637_v32 }
  0x24   :  { %v913_v54 = vor.u32 %v912_v45, %v909_v41  ;;  %v918_v55 = vrot.slane %v916_v46, 5  ;;  %v922_v56 = vrot.slane %v920_v47, 4  ;;  %v824_v60 = vld [vmem:[#allocation2 + $0x6c] sm:$0xf]  ;;  %736 = vst.msk [vmem:[#allocation2 + $0xe8] sm:$0xf] %vm682_vm1, %v638_v42 }
  0x25   :  { %v1505_v58 = vsel %vm9938_vm6, %v1500_v48, %v1504_v30  ;;  %v928_v59 = vrot.slane %v926_v49, 5  ;;  %v825_v0 = vld [vmem:[#allocation2 + $0x70] sm:$0xf]  ;;  %v1123_v1 = vshrl.u32 %v824_v60, 16  ;;  %737 = vst.msk [vmem:[#allocation2 + $0xec] sm:$0x1] %vm685_vm2, %v639_v51 }
  0x26   :  { %v1725_v61 = vunpack.c.l.b16 %v1505_v58  ;;  %v914_v62 = vrot.slane %v913_v54, 4  ;;  %v923_v63 = vor.u32 %v922_v56, %v918_v55  ;;  %v880_v2 = vld [vmem:[#allocation2 + $0x74] sm:$0x1]  ;;  %v1126_v3 = vshll.u32 %v824_v60, 16  ;;  %v662_v10 = vld [vmem:[#allocation3 + $0x130] sm:$0xf] }
  0x27   :  { %v1132_v4 = vshll.u32 %v825_v0, 16  ;;  %v1136_v5 = vshrl.u32 %v825_v0, 16  ;;  %v1125_v9 = vrot.slane %v1123_v1, 4  ;;  %v663_v11 = vld [vmem:[#allocation3 + $0x134] sm:$0x1]  ;;  %v140_v16 = vld [vmem:[%s12374_s0 + $0xf8] sm:$0xff]  }
  0x28   :  { %v1764_v6 = vpack.c.b16 %v1725_v61, %v1724_v53  ;;  %v919_v7 = vsel %vm9938_vm6, %v914_v62, %v918_v55  ;;  %v924_v8 = vrot.slane %v923_v63, 4  ;;  %v1128_v13 = vrot.slane %v1126_v3, 5  ;;  %759 = vst.msk [vmem:[#allocation2 + $0x144] sm:$0xf] %vm682_vm1, %v661_v57  ;;  %v589_v19 = vld [vmem:[#allocation3 + $0xc] sm:$0xf] }
  0x29   :  { %v1676_v12 = vunpack.c.l.b16 %v919_v7  ;;  %v1134_v14 = vrot.slane %v1132_v4, 5  ;;  %v1138_v15 = vrot.slane %v1136_v5, 4  ;;  %v1142_v18 = vshll.u32 %v880_v2, 16  ;;  %760 = vst.msk [vmem:[#allocation2 + $0x148] sm:$0xf] %vm682_vm1, %v662_v10  ;;  %v184_v20 = vld [vmem:[%s12374_s0 + $0x150] sm:$0xff]  }
  0x2a   :  { %8873 = vmatmul.msk.bf16.vlgmr.msra.gmra.mxu3 %vm1772_vm5, %v1764_v6  ;;  %v929_v17 = vsel %vm9938_vm6, %v924_v8, %v928_v59  ;;  %v1129_v22 = vor.u32 %v1128_v13, %v1125_v9  ;;  %v840_v24 = vld [vmem:[#allocation2 + $0xe4] sm:$0xf]  ;;  %761 = vst.msk [vmem:[#allocation2 + $0x14c] sm:$0x1] %vm685_vm2, %v663_v11  ;;  %v590_v25 = vld [vmem:[#allocation3 + $0x10] sm:$0xf] }
  0x2b   :  { %v1677_v21 = vunpack.c.l.b16 %v929_v17  ;;  %v1139_v23 = vor.u32 %v1138_v15, %v1134_v14  ;;  %v1144_v26 = vrot.slane %v1142_v18, 5  ;;  %v841_v27 = vld [vmem:[#allocation2 + $0xe8] sm:$0xf]  ;;  %v1315_v28 = vshrl.u32 %v840_v24, 16  ;;  %141 = vst [vmem:[#allocation3 + $0xe0] sm:$0xff] %v140_v16   ;;  %v188_v49 = vld [vmem:[%s12374_s0 + $0x158] sm:$0xff]  }
  0x2c   :  { %v1318_v29 = vshll.u32 %v840_v24, 16  ;;  %v1130_v31 = vrot.slane %v1129_v22, 4  ;;  %v888_v33 = vld [vmem:[#allocation2 + $0xec] sm:$0x1]  ;;  %v1324_v34 = vshll.u32 %v841_v27, 16  ;;  %185 = vst [vmem:[#allocation3 + $0x138] sm:$0xff] %v184_v20  }
  0x2d   :  { %v1740_v30 = vpack.c.b16 %v1677_v21, %v1676_v12  ;;  %v1140_v32 = vrot.slane %v1139_v23, 4  ;;  %v1317_v35 = vrot.slane %v1315_v28, 4  ;;  %v1328_v37 = vshrl.u32 %v841_v27, 16  ;;  %v591_v42 = vld [vmem:[#allocation3 + $0x14] sm:$0x1]  ;;  %189 = vst [vmem:[#allocation3 + $0x140] sm:$0xff] %v188_v49  }
  0x2e   :  { %v1320_v36 = vrot.slane %v1318_v29, 5  ;;  %v1334_v38 = vshll.u32 %v888_v33, 16  ;;  %v1135_v39 = vsel %vm9938_vm6, %v1130_v31, %v1134_v14  ;;  %v1326_v41 = vrot.slane %v1324_v34, 5  ;;  %687 = vst.msk [vmem:[#allocation2 + $0xc] sm:$0xf] %vm682_vm1, %v589_v19  ;;  %v40_v5 = vld [vmem:[%s12374_s0 + $0x18] sm:$0xff]  }
  0x2f   :  { %8849 = vmatmul.msk.bf16.vlgmr.msra.gmra.mxu0 %vm1772_vm5, %v1740_v30  ;;  %v1145_v40 = vsel %vm9938_vm6, %v1140_v32, %v1144_v26  ;;  %v1694_v43 = vunpack.c.l.b16 %v1135_v39  ;;  %v1330_v46 = vrot.slane %v1328_v37, 4  ;;  %v856_v47 = vld [vmem:[#allocation2 + $0x144] sm:$0xf]  ;;  %688 = vst.msk [vmem:[#allocation2 + $0x10] sm:$0xf] %vm682_vm1, %v590_v25 }
  0x30   :  { %v1695_v44 = vunpack.c.l.b16 %v1145_v40  ;;  %v1321_v45 = vor.u32 %v1320_v36, %v1317_v35  ;;  %v616_v48 = vld [vmem:[#allocation3 + $0x78] sm:$0xf]  ;;  %v1336_v51 = vrot.slane %v1334_v38, 5  ;;  %v1507_v53 = vshrl.u32 %v856_v47, 16  ;;  %689 = vst.msk [vmem:[#allocation2 + $0x14] sm:$0x1] %vm685_vm2, %v591_v42 }
  0x31   :  { %v857_v52 = vld [vmem:[#allocation2 + $0x148] sm:$0xf]  ;;  %v1510_v54 = vshll.u32 %v856_v47, 16  ;;  %v1331_v57 = vor.u32 %v1330_v46, %v1326_v41  ;;  %v896_v58 = vld [vmem:[#allocation2 + $0x14c] sm:$0x1]  ;;  %41 = vst [vmem:[#allocation3 + $0x18] sm:$0xff] %v40_v5  }
  0x32   :  { %v1749_v55 = vpack.c.b16 %v1695_v44, %v1694_v43  ;;  %v1322_v56 = vrot.slane %v1321_v45, 4  ;;  %v1516_v59 = vshll.u32 %v857_v52, 16  ;;  %v1509_v60 = vrot.slane %v1507_v53, 4  ;;  %v617_v0 = vld [vmem:[#allocation3 + $0x7c] sm:$0xf]  ;;  %v44_v32 = vld [vmem:[%s12374_s0 + $0x20] sm:$0xff]  }
  0x33   :  { %v1512_v61 = vrot.slane %v1510_v54, 5  ;;  %v1520_v62 = vshrl.u32 %v857_v52, 16  ;;  %v1526_v63 = vshll.u32 %v896_v58, 16  ;;  %v1332_v2 = vrot.slane %v1331_v57, 4  ;;  %v618_v4 = vld [vmem:[#allocation3 + $0x80] sm:$0x1] }
  0x34   :  { %8858 = vmatmul.msk.bf16.gmra.mxu1 %vm1772_vm5, %v1749_v55  ;;  %v1327_v1 = vsel %vm9938_vm6, %v1322_v56, %v1326_v41  ;;  %v1518_v3 = vrot.slane %v1516_v59, 5  ;;  %714 = vst.msk [vmem:[#allocation2 + $0x78] sm:$0xf] %vm682_vm1, %v616_v48  ;;  %v640_v10 = vld [vmem:[#allocation3 + $0xd8] sm:$0xf] }
  0x35   :  { %v1710_v6 = vunpack.c.l.b16 %v1327_v1  ;;  %v1513_v7 = vor.u32 %v1512_v61, %v1509_v60  ;;  %v1522_v8 = vrot.slane %v1520_v62, 4  ;;  %v1528_v9 = vrot.slane %v1526_v63, 5  ;;  %v808_v12 = vld [vmem:[#allocation2 + $0xc] sm:$0xf]  ;;  %715 = vst.msk [vmem:[#allocation2 + $0x7c] sm:$0xf] %vm682_vm1, %v617_v0 }
  0x36   :  { %v1337_v11 = vsel %vm9938_vm6, %v1332_v2, %v1336_v51  ;;  %v641_v13 = vld [vmem:[#allocation3 + $0xdc] sm:$0xf]  ;;  %v809_v17 = vld [vmem:[#allocation2 + $0x10] sm:$0xf]  ;;  %v931_v18 = vshrl.u32 %v808_v12, 16  ;;  %v934_v19 = vshll.u32 %v808_v12, 16 }
  0x37   :  { %v1711_v14 = vunpack.c.l.b16 %v1337_v11  ;;  %v1514_v15 = vrot.slane %v1513_v7, 4  ;;  %v1523_v16 = vor.u32 %v1522_v8, %v1518_v3  ;;  %716 = vst.msk [vmem:[#allocation2 + $0x80] sm:$0x1] %vm685_vm2, %v618_v4  ;;  %v940_v20 = vshll.u32 %v809_v17, 16  ;;  %v642_v22 = vld [vmem:[#allocation3 + $0xe0] sm:$0x1] }
  0x38   :  { %v944_v21 = vshrl.u32 %v809_v17, 16  ;;  %v872_v26 = vld [vmem:[#allocation2 + $0x14] sm:$0x1]  ;;  %v933_v27 = vrot.slane %v931_v18, 4  ;;  %738 = vst.msk [vmem:[#allocation2 + $0xf0] sm:$0xf] %vm682_vm1, %v640_v10 }
  0x39   :  { %v1757_v23 = vpack.c.b16 %v1711_v14, %v1710_v6  ;;  %v1519_v24 = vsel %vm9938_vm6, %v1514_v15, %v1518_v3  ;;  %v1524_v25 = vrot.slane %v1523_v16, 4  ;;  %v936_v29 = vrot.slane %v934_v19, 5  ;;  %739 = vst.msk [vmem:[#allocation2 + $0xf4] sm:$0xf] %vm682_vm1, %v641_v13  ;;  %v664_v35 = vld [vmem:[#allocation3 + $0x138] sm:$0xf] }
  0x3a   :  { %v1726_v28 = vunpack.c.l.b16 %v1519_v24  ;;  %v942_v30 = vrot.slane %v940_v20, 5  ;;  %v946_v31 = vrot.slane %v944_v21, 4  ;;  %v950_v34 = vshll.u32 %v872_v26, 16  ;;  %740 = vst.msk [vmem:[#allocation2 + $0xf8] sm:$0x1] %vm685_vm2, %v642_v22  ;;  %v96_v36 = vld [vmem:[%s12374_s0 + $0x88] sm:$0xff]  }
  0x3b   :  { %8866 = vmatmul.msk.bf16.gmra.mxu2 %vm1772_vm5, %v1757_v23  ;;  %v1529_v33 = vsel %vm9938_vm6, %v1524_v25, %v1528_v9  ;;  %v937_v38 = vor.u32 %v936_v29, %v933_v27  ;;  %v826_v40 = vld [vmem:[#allocation2 + $0x78] sm:$0xf]  ;;  %v665_v41 = vld [vmem:[#allocation3 + $0x13c] sm:$0xf]  ;;  %v666_v42 = vld [vmem:[#allocation3 + $0x140] sm:$0x1] }
  0x3c   :  { %v1727_v37 = vunpack.c.l.b16 %v1529_v33  ;;  %v947_v39 = vor.u32 %v946_v31, %v942_v30  ;;  %v952_v43 = vrot.slane %v950_v34, 5  ;;  %v827_v44 = vld [vmem:[#allocation2 + $0x7c] sm:$0xf]  ;;  %v1147_v45 = vshrl.u32 %v826_v40, 16  ;;  %45 = vst [vmem:[#allocation3 + $0x20] sm:$0xff] %v44_v32   ;;  %v144_v21 = vld [vmem:[%s12374_s0 + $0x100] sm:$0xff]  }
  0x3d   :  { %v1150_v46 = vshll.u32 %v826_v40, 16  ;;  %v938_v48 = vrot.slane %v937_v38, 4  ;;  %v1156_v52 = vshll.u32 %v827_v44, 16  ;;  %97 = vst [vmem:[#allocation3 + $0x88] sm:$0xff] %v96_v36   ;;  %v1160_v55 = vshrl.u32 %v827_v44, 16 }
  0x3e   :  { %v1765_v47 = vpack.c.b16 %v1727_v37, %v1726_v28  ;;  %v948_v49 = vrot.slane %v947_v39, 4  ;;  %v881_v51 = vld [vmem:[#allocation2 + $0x80] sm:$0x1]  ;;  %v1149_v53 = vrot.slane %v1147_v45, 4  ;;  %762 = vst.msk [vmem:[#allocation2 + $0x150] sm:$0xf] %vm682_vm1, %v664_v35 }
  0x3f   :  { %v1152_v54 = vrot.slane %v1150_v46, 5  ;;  %v1166_v56 = vshll.u32 %v881_v51, 16  ;;  %v943_v57 = vsel %vm9938_vm6, %v938_v48, %v942_v30  ;;  %v1158_v59 = vrot.slane %v1156_v52, 5  ;;  %v842_v60 = vld [vmem:[#allocation2 + $0xf0] sm:$0xf]  ;;  %145 = vst [vmem:[#allocation3 + $0xe8] sm:$0xff] %v144_v21  }
  0x40   :  { %8874 = vmatmul.msk.bf16.gmra.mxu3 %vm1772_vm5, %v1765_v47  ;;  %v953_v58 = vsel %vm9938_vm6, %v948_v49, %v952_v43  ;;  %763 = vst.msk [vmem:[#allocation2 + $0x154] sm:$0xf] %vm682_vm1, %v665_v41  ;;  %v1678_v61 = vunpack.c.l.b16 %v943_v57  ;;  %v1162_v0 = vrot.slane %v1160_v55, 4  ;;  %v843_v1 = vld [vmem:[#allocation2 + $0xf4] sm:$0xf]  ;;  %v1339_v4 = vshrl.u32 %v842_v60, 16 }
  0x41   :  { %v1679_v62 = vunpack.c.l.b16 %v953_v58  ;;  %v1153_v63 = vor.u32 %v1152_v54, %v1149_v53  ;;  %764 = vst.msk [vmem:[#allocation2 + $0x158] sm:$0x1] %vm685_vm2, %v666_v42  ;;  %v1168_v2 = vrot.slane %v1166_v56, 5  ;;  %v889_v3 = vld [vmem:[#allocation2 + $0xf8] sm:$0x1]  ;;  %v1342_v5 = vshll.u32 %v842_v60, 16 }
  0x42   :  { %v1348_v6 = vshll.u32 %v843_v1, 16  ;;  %v1163_v9 = vor.u32 %v1162_v0, %v1158_v59  ;;  %v1352_v10 = vshrl.u32 %v843_v1, 16  ;;  %v592_v11 = vld [vmem:[#allocation3 + $0x18] sm:$0xf]  ;;  %v593_v12 = vld [vmem:[#allocation3 + $0x1c] sm:$0xf] }
  0x43   :  { %v1741_v7 = vpack.c.b16 %v1679_v62, %v1678_v61  ;;  %v1154_v8 = vrot.slane %v1153_v63, 4  ;;  %v1341_v13 = vrot.slane %v1339_v4, 4  ;;  %v1344_v14 = vrot.slane %v1342_v5, 5  ;;  %v594_v17 = vld [vmem:[#allocation3 + $0x20] sm:$0x1]  ;;  %v192_v46 = vld [vmem:[%s12374_s0 + $0x160] sm:$0xff]  }
  0x44   :  { %v1350_v15 = vrot.slane %v1348_v6, 5  ;;  %v1358_v16 = vshll.u32 %v889_v3, 16  ;;  %v1164_v19 = vrot.slane %v1163_v9, 4  ;;  %v1354_v20 = vrot.slane %v1352_v10, 4  ;;  %690 = vst.msk [vmem:[#allocation2 + $0x18] sm:$0xf] %vm682_vm1, %v592_v11 }
  0x45   :  { %8850 = vmatmul.msk.bf16.gmra.mxu0 %vm1772_vm5, %v1741_v7  ;;  %v1159_v18 = vsel %vm9938_vm6, %v1154_v8, %v1158_v59  ;;  %v1345_v23 = vor.u32 %v1344_v14, %v1341_v13  ;;  %v858_v25 = vld [vmem:[#allocation2 + $0x150] sm:$0xf]  ;;  %691 = vst.msk [vmem:[#allocation2 + $0x1c] sm:$0xf] %vm682_vm1, %v593_v12  ;;  %v619_v40 = vld [vmem:[#allocation3 + $0x84] sm:$0xf] }
  0x46   :  { %v1696_v22 = vunpack.c.l.b16 %v1159_v18  ;;  %v1360_v24 = vrot.slane %v1358_v16, 5  ;;  %v1169_v26 = vsel %vm9938_vm6, %v1164_v19, %v1168_v2  ;;  %v1355_v27 = vor.u32 %v1354_v20, %v1350_v15  ;;  %692 = vst.msk [vmem:[#allocation2 + $0x20] sm:$0x1] %vm685_vm2, %v594_v17  ;;  %v620_v45 = vld [vmem:[#allocation3 + $0x88] sm:$0xf]  ;;  %v48_v53 = vld [vmem:[%s12374_s0 + $0x28] sm:$0xff]  }
  0x47   :  { %v859_v28 = vld [vmem:[#allocation2 + $0x154] sm:$0xf]  ;;  %v1531_v29 = vshrl.u32 %v858_v25, 16  ;;  %v1534_v30 = vshll.u32 %v858_v25, 16  ;;  %v1697_v31 = vunpack.c.l.b16 %v1169_v26  ;;  %v1346_v32 = vrot.slane %v1345_v23, 4  ;;  %193 = vst [vmem:[#allocation3 + $0x148] sm:$0xff] %v192_v46  }
  0x48   :  { %v897_v33 = vld [vmem:[#allocation2 + $0x158] sm:$0x1]  ;;  %v1540_v34 = vshll.u32 %v859_v28, 16  ;;  %v1544_v35 = vshrl.u32 %v859_v28, 16  ;;  %v1356_v36 = vrot.slane %v1355_v27, 4  ;;  %49 = vst [vmem:[#allocation3 + $0x28] sm:$0xff] %v48_v53  }
  0x49   :  { %v1533_v37 = vrot.slane %v1531_v29, 4  ;;  %v1536_v38 = vrot.slane %v1534_v30, 5  ;;  %v1550_v39 = vshll.u32 %v897_v33, 16  ;;  %v1750_v41 = vpack.c.b16 %v1697_v31, %v1696_v22  ;;  %v621_v52 = vld [vmem:[#allocation3 + $0x8c] sm:$0x1]  ;;  %v100_v12 = vld [vmem:[%s12374_s0 + $0x90] sm:$0xff]  }
  0x4a   :  { %v1351_v42 = vsel %vm9938_vm6, %v1346_v32, %v1350_v15  ;;  %v1542_v43 = vrot.slane %v1540_v34, 5  ;;  %v1546_v44 = vrot.slane %v1544_v35, 4  ;;  %v1361_v47 = vsel %vm9938_vm6, %v1356_v36, %v1360_v24  ;;  %717 = vst.msk [vmem:[#allocation2 + $0x84] sm:$0xf] %vm682_vm1, %v619_v40  ;;  %v643_v57 = vld [vmem:[#allocation3 + $0xe4] sm:$0xf] }
  0x4b   :  { %v1712_v48 = vunpack.c.l.b16 %v1351_v42  ;;  %v1537_v49 = vor.u32 %v1536_v38, %v1533_v37  ;;  %v1552_v51 = vrot.slane %v1550_v39, 5  ;;  %8859 = vmatmul.msk.bf16.gmra.mxu1 %vm1772_vm5, %v1750_v41  ;;  %v1713_v54 = vunpack.c.l.b16 %v1361_v47  ;;  %v810_v56 = vld [vmem:[#allocation2 + $0x18] sm:$0xf]  ;;  %718 = vst.msk [vmem:[#allocation2 + $0x88] sm:$0xf] %vm682_vm1, %v620_v45  ;;  %v148_v47 = vld [vmem:[%s12374_s0 + $0x108] sm:$0xff]  }
  0x4c   :  { %v1547_v55 = vor.u32 %v1546_v44, %v1542_v43  ;;  %v811_v59 = vld [vmem:[#allocation2 + $0x1c] sm:$0xf]  ;;  %v955_v60 = vshrl.u32 %v810_v56, 16  ;;  %v958_v61 = vshll.u32 %v810_v56, 16  ;;  %719 = vst.msk [vmem:[#allocation2 + $0x8c] sm:$0x1] %vm685_vm2, %v621_v52 }
  0x4d   :  { %v1538_v58 = vrot.slane %v1537_v49, 4  ;;  %v1758_v62 = vpack.c.b16 %v1713_v54, %v1712_v48  ;;  %v873_v0 = vld [vmem:[#allocation2 + $0x20] sm:$0x1]  ;;  %v964_v1 = vshll.u32 %v811_v59, 16  ;;  %v968_v2 = vshrl.u32 %v811_v59, 16  ;;  %101 = vst [vmem:[#allocation3 + $0x90] sm:$0xff] %v100_v12  }
  0x4e   :  { %v1548_v63 = vrot.slane %v1547_v55, 4  ;;  %v957_v4 = vrot.slane %v955_v60, 4  ;;  %v960_v5 = vrot.slane %v958_v61, 5  ;;  %v974_v6 = vshll.u32 %v873_v0, 16  ;;  %v644_v11 = vld [vmem:[#allocation3 + $0xe8] sm:$0xf] }
  0x4f   :  { %v1543_v3 = vsel %vm9938_vm6, %v1538_v58, %v1542_v43  ;;  %8867 = vmatmul.msk.bf16.gmra.mxu2 %vm1772_vm5, %v1758_v62  ;;  %v966_v9 = vrot.slane %v964_v1, 5  ;;  %v970_v10 = vrot.slane %v968_v2, 4  ;;  %v645_v16 = vld [vmem:[#allocation3 + $0xec] sm:$0x1]  ;;  %741 = vst.msk [vmem:[#allocation2 + $0xfc] sm:$0xf] %vm682_vm1, %v643_v57 }
  0x50   :  { %v1553_v7 = vsel %vm9938_vm6, %v1548_v63, %v1552_v51  ;;  %v1728_v8 = vunpack.c.l.b16 %v1543_v3  ;;  %v961_v14 = vor.u32 %v960_v5, %v957_v4  ;;  %v976_v15 = vrot.slane %v974_v6, 5  ;;  %742 = vst.msk [vmem:[#allocation2 + $0x100] sm:$0xf] %vm682_vm1, %v644_v11  ;;  %v667_v19 = vld [vmem:[#allocation3 + $0x144] sm:$0xf]  ;;  %v104_v28 = vld [vmem:[%s12374_s0 + $0x98] sm:$0xff]  }
  0x51   :  { %v1729_v13 = vunpack.c.l.b16 %v1553_v7  ;;  %v971_v17 = vor.u32 %v970_v10, %v966_v9  ;;  %v828_v18 = vld [vmem:[#allocation2 + $0x84] sm:$0xf]  ;;  %743 = vst.msk [vmem:[#allocation2 + $0x104] sm:$0x1] %vm685_vm2, %v645_v16  ;;  %v668_v32 = vld [vmem:[#allocation3 + $0x148] sm:$0xf] }
  0x52   :  { %v962_v21 = vrot.slane %v961_v14, 4  ;;  %v829_v22 = vld [vmem:[#allocation2 + $0x88] sm:$0xf]  ;;  %v1171_v23 = vshrl.u32 %v828_v18, 16  ;;  %v1174_v24 = vshll.u32 %v828_v18, 16  ;;  %105 = vst [vmem:[#allocation3 + $0x98] sm:$0xff] %v104_v28  }
  0x53   :  { %v1766_v20 = vpack.c.b16 %v1729_v13, %v1728_v8  ;;  %v972_v25 = vrot.slane %v971_v17, 4  ;;  %v1180_v26 = vshll.u32 %v829_v22, 16  ;;  %v1184_v27 = vshrl.u32 %v829_v22, 16  ;;  %v669_v33 = vld [vmem:[#allocation3 + $0x14c] sm:$0x1]  ;;  %149 = vst [vmem:[#allocation3 + $0xf0] sm:$0xff] %v148_v47  }
  0x54   :  { %v967_v29 = vsel %vm9938_vm6, %v962_v21, %v966_v9  ;;  %v1173_v30 = vrot.slane %v1171_v23, 4  ;;  %v1176_v31 = vrot.slane %v1174_v24, 5  ;;  %v595_v34 = vld [vmem:[#allocation3 + $0x24] sm:$0xf]  ;;  %v882_v37 = vld [vmem:[#allocation2 + $0x8c] sm:$0x1] }
  0x55   :  { %8875 = vmatmul.msk.bf16.gmra.mxu3 %vm1772_vm5, %v1766_v20  ;;  %v977_v35 = vsel %vm9938_vm6, %v972_v25, %v976_v15  ;;  %v1680_v36 = vunpack.c.l.b16 %v967_v29  ;;  %v1182_v38 = vrot.slane %v1180_v26, 5  ;;  %v1186_v39 = vrot.slane %v1184_v27, 4  ;;  %765 = vst.msk [vmem:[#allocation2 + $0x15c] sm:$0xf] %vm682_vm1, %v667_v19  ;;  %v596_v43 = vld [vmem:[#allocation3 + $0x28] sm:$0xf] }
  0x56   :  { %v1681_v40 = vunpack.c.l.b16 %v977_v35  ;;  %v1177_v41 = vor.u32 %v1176_v31, %v1173_v30  ;;  %v1190_v42 = vshll.u32 %v882_v37, 16  ;;  %766 = vst.msk [vmem:[#allocation2 + $0x160] sm:$0xf] %vm682_vm1, %v668_v32  ;;  %v844_v45 = vld [vmem:[#allocation2 + $0xfc] sm:$0xf]  ;;  %v152_v25 = vld [vmem:[%s12374_s0 + $0x110] sm:$0xff]  }
  0x57   :  { %v1187_v44 = vor.u32 %v1186_v39, %v1182_v38  ;;  %767 = vst.msk [vmem:[#allocation2 + $0x164] sm:$0x1] %vm685_vm2, %v669_v33  ;;  %v597_v46 = vld [vmem:[#allocation3 + $0x2c] sm:$0x1]  ;;  %v845_v52 = vld [vmem:[#allocation2 + $0x100] sm:$0xf] }
  0x58   :  { %v1742_v48 = vpack.c.b16 %v1681_v40, %v1680_v36  ;;  %v1178_v49 = vrot.slane %v1177_v41, 4  ;;  %v1192_v51 = vrot.slane %v1190_v42, 5  ;;  %v1363_v53 = vshrl.u32 %v844_v45, 16  ;;  %693 = vst.msk [vmem:[#allocation2 + $0x24] sm:$0xf] %vm682_vm1, %v595_v34  ;;  %v196_v41 = vld [vmem:[%s12374_s0 + $0x168] sm:$0xff]  }
  0x59   :  { %v1188_v54 = vrot.slane %v1187_v44, 4  ;;  %v1366_v55 = vshll.u32 %v844_v45, 16  ;;  %v1372_v56 = vshll.u32 %v845_v52, 16  ;;  %v1376_v57 = vshrl.u32 %v845_v52, 16  ;;  %v890_v59 = vld [vmem:[#allocation2 + $0x104] sm:$0x1] }
  0x5a   :  { %8851 = vmatmul.msk.bf16.gmra.mxu0 %vm1772_vm5, %v1742_v48  ;;  %v1183_v58 = vsel %vm9938_vm6, %v1178_v49, %v1182_v38  ;;  %v1365_v60 = vrot.slane %v1363_v53, 4  ;;  %694 = vst.msk [vmem:[#allocation2 + $0x28] sm:$0xf] %vm682_vm1, %v596_v43  ;;  %v622_v1 = vld [vmem:[#allocation3 + $0x90] sm:$0xf]  ;;  %v1382_v4 = vshll.u32 %v890_v59, 16 }
  0x5b   :  { %v1193_v61 = vsel %vm9938_vm6, %v1188_v54, %v1192_v51  ;;  %v1698_v62 = vunpack.c.l.b16 %v1183_v58  ;;  %v1368_v63 = vrot.slane %v1366_v55, 5  ;;  %v1374_v0 = vrot.slane %v1372_v56, 5  ;;  %695 = vst.msk [vmem:[#allocation2 + $0x2c] sm:$0x1] %vm685_vm2, %v597_v46  ;;  %v623_v10 = vld [vmem:[#allocation3 + $0x94] sm:$0xf] }
  0x5c   :  { %v1699_v2 = vunpack.c.l.b16 %v1193_v61  ;;  %v1378_v3 = vrot.slane %v1376_v57, 4  ;;  %v860_v5 = vld [vmem:[#allocation2 + $0x15c] sm:$0xf]  ;;  %v1384_v13 = vrot.slane %v1382_v4, 5  ;;  %720 = vst.msk [vmem:[#allocation2 + $0x90] sm:$0xf] %vm682_vm1, %v622_v1 }
  0x5d   :  { %v1369_v6 = vor.u32 %v1368_v63, %v1365_v60  ;;  %v861_v7 = vld [vmem:[#allocation2 + $0x160] sm:$0xf]  ;;  %v1555_v8 = vshrl.u32 %v860_v5, 16  ;;  %v1558_v9 = vshll.u32 %v860_v5, 16  ;;  %v624_v20 = vld [vmem:[#allocation3 + $0x98] sm:$0x1] }
  0x5e   :  { %v1751_v11 = vpack.c.b16 %v1699_v2, %v1698_v62  ;;  %v1379_v12 = vor.u32 %v1378_v3, %v1374_v0  ;;  %v898_v14 = vld [vmem:[#allocation2 + $0x164] sm:$0x1]  ;;  %v1564_v15 = vshll.u32 %v861_v7, 16  ;;  %v1568_v19 = vshrl.u32 %v861_v7, 16  ;;  %721 = vst.msk [vmem:[#allocation2 + $0x94] sm:$0xf] %vm682_vm1, %v623_v10 }
  0x5f   :  { %v1370_v16 = vrot.slane %v1369_v6, 4  ;;  %v1557_v17 = vrot.slane %v1555_v8, 4  ;;  %v1560_v18 = vrot.slane %v1558_v9, 5  ;;  %v1574_v23 = vshll.u32 %v898_v14, 16  ;;  %v812_v24 = vld [vmem:[#allocation2 + $0x24] sm:$0xf] }
  0x60   :  { %8860 = vmatmul.msk.bf16.gmra.mxu1 %vm1772_vm5, %v1751_v11  ;;  %v1380_v21 = vrot.slane %v1379_v12, 4  ;;  %v1566_v22 = vrot.slane %v1564_v15, 5  ;;  %v1570_v28 = vrot.slane %v1568_v19, 4  ;;  %v979_v30 = vshrl.u32 %v812_v24, 16  ;;  %722 = vst.msk [vmem:[#allocation2 + $0x98] sm:$0x1] %vm685_vm2, %v624_v20 }
  0x61   :  { %v1375_v26 = vsel %vm9938_vm6, %v1370_v16, %v1374_v0  ;;  %v1561_v27 = vor.u32 %v1560_v18, %v1557_v17  ;;  %v813_v29 = vld [vmem:[#allocation2 + $0x28] sm:$0xf]  ;;  %v1576_v33 = vrot.slane %v1574_v23, 5  ;;  %v982_v35 = vshll.u32 %v812_v24, 16  ;;  %153 = vst [vmem:[#allocation3 + $0xf8] sm:$0xff] %v152_v25   ;;  %v200_v52 = vld [vmem:[%s12374_s0 + $0x170] sm:$0xff]  }
  0x62   :  { %v1385_v31 = vsel %vm9938_vm6, %v1380_v21, %v1384_v13  ;;  %v1714_v32 = vunpack.c.l.b16 %v1375_v26  ;;  %v874_v34 = vld [vmem:[#allocation2 + $0x2c] sm:$0x1]  ;;  %v1571_v38 = vor.u32 %v1570_v28, %v1566_v22  ;;  %v981_v39 = vrot.slane %v979_v30, 4  ;;  %v646_v40 = vld [vmem:[#allocation3 + $0xf0] sm:$0xf]  ;;  %197 = vst [vmem:[#allocation3 + $0x150] sm:$0xff] %v196_v41  }
  0x63   :  { %v1715_v36 = vunpack.c.l.b16 %v1385_v31  ;;  %v1562_v37 = vrot.slane %v1561_v27, 4  ;;  %v984_v42 = vrot.slane %v982_v35, 5  ;;  %v988_v43 = vshll.u32 %v813_v29, 16  ;;  %v647_v46 = vld [vmem:[#allocation3 + $0xf4] sm:$0xf]  ;;  %v52_v60 = vld [vmem:[%s12374_s0 + $0x30] sm:$0xff]  }
  0x64   :  { %v992_v44 = vshrl.u32 %v813_v29, 16  ;;  %v998_v45 = vshll.u32 %v874_v34, 16  ;;  %v1572_v49 = vrot.slane %v1571_v38, 4  ;;  %v830_v51 = vld [vmem:[#allocation2 + $0x90] sm:$0xf]  ;;  %201 = vst [vmem:[#allocation3 + $0x158] sm:$0xff] %v200_v52  }
  0x65   :  { %v1759_v47 = vpack.c.b16 %v1715_v36, %v1714_v32  ;;  %v1567_v48 = vsel %vm9938_vm6, %v1562_v37, %v1566_v22  ;;  %744 = vst.msk [vmem:[#allocation2 + $0x108] sm:$0xf] %vm682_vm1, %v646_v40  ;;  %v985_v54 = vor.u32 %v984_v42, %v981_v39  ;;  %v990_v55 = vrot.slane %v988_v43, 5  ;;  %v831_v1 = vld [vmem:[#allocation2 + $0x94] sm:$0xf]  ;;  %v56_v2 = vld [vmem:[%s12374_s0 + $0x38] sm:$0xff]  }
  0x66   :  { %v1730_v53 = vunpack.c.l.b16 %v1567_v48  ;;  %v994_v56 = vrot.slane %v992_v44, 4  ;;  %745 = vst.msk [vmem:[#allocation2 + $0x10c] sm:$0xf] %vm682_vm1, %v647_v46  ;;  %v1577_v57 = vsel %vm9938_vm6, %v1572_v49, %v1576_v33  ;;  %v1195_v58 = vshrl.u32 %v830_v51, 16  ;;  %v108_v13 = vld [vmem:[%s12374_s0 + $0xa0] sm:$0xff]   ;;  %v156_v18 = vld [vmem:[%s12374_s0 + $0x118] sm:$0xff]  }
  0x67   :  { %8868 = vmatmul.msk.bf16.gmra.mxu2 %vm1772_vm5, %v1759_v47  ;;  %v1198_v59 = vshll.u32 %v830_v51, 16  ;;  %v1731_v61 = vunpack.c.l.b16 %v1577_v57  ;;  %v986_v62 = vrot.slane %v985_v54, 4  ;;  %v1000_v0 = vrot.slane %v998_v45, 5  ;;  %v883_v3 = vld [vmem:[#allocation2 + $0x98] sm:$0x1]  ;;  %53 = vst [vmem:[#allocation3 + $0x30] sm:$0xff] %v52_v60  }
  0x68   :  { %v995_v63 = vor.u32 %v994_v56, %v990_v55  ;;  %v1197_v4 = vrot.slane %v1195_v58, 4  ;;  %v1204_v6 = vshll.u32 %v831_v1, 16  ;;  %v1208_v7 = vshrl.u32 %v831_v1, 16  ;;  %v648_v12 = vld [vmem:[#allocation3 + $0xf8] sm:$0x1]  ;;  %57 = vst [vmem:[#allocation3 + $0x38] sm:$0xff] %v56_v2  }
  0x69   :  { %v1200_v5 = vrot.slane %v1198_v59, 5  ;;  %v1767_v8 = vpack.c.b16 %v1731_v61, %v1730_v53  ;;  %v991_v9 = vsel %vm9938_vm6, %v986_v62, %v990_v55  ;;  %v1214_v11 = vshll.u32 %v883_v3, 16  ;;  %746 = vst.msk [vmem:[#allocation2 + $0x110] sm:$0x1] %vm685_vm2, %v648_v12  ;;  %v670_v30 = vld [vmem:[#allocation3 + $0x150] sm:$0xf] }
  0x6a   :  { %v996_v10 = vrot.slane %v995_v63, 4  ;;  %v1682_v14 = vunpack.c.l.b16 %v991_v9  ;;  %v1206_v16 = vrot.slane %v1204_v6, 5  ;;  %v1210_v17 = vrot.slane %v1208_v7, 4  ;;  %109 = vst [vmem:[#allocation3 + $0xa0] sm:$0xff] %v108_v13   ;;  %v671_v35 = vld [vmem:[#allocation3 + $0x154] sm:$0xf] }
  0x6b   :  { %v1201_v15 = vor.u32 %v1200_v5, %v1197_v4  ;;  %8876 = vmatmul.msk.bf16.gmra.mxu3 %vm1772_vm5, %v1767_v8  ;;  %v1216_v20 = vrot.slane %v1214_v11, 5  ;;  %157 = vst [vmem:[#allocation3 + $0x100] sm:$0xff] %v156_v18   ;;  %v672_v36 = vld [vmem:[#allocation3 + $0x158] sm:$0x1]  ;;  %v625_v48 = vld [vmem:[#allocation3 + $0x9c] sm:$0xf] }
  0x6c   :  { %v1001_v19 = vsel %vm9938_vm6, %v996_v10, %v1000_v0  ;;  %v846_v21 = vld [vmem:[#allocation2 + $0x108] sm:$0xf]  ;;  %v1211_v24 = vor.u32 %v1210_v17, %v1206_v16  ;;  %768 = vst.msk [vmem:[#allocation2 + $0x168] sm:$0xf] %vm682_vm1, %v670_v30  ;;  %v649_v59 = vld [vmem:[#allocation3 + $0xfc] sm:$0xf] }
  0x6d   :  { %v1683_v22 = vunpack.c.l.b16 %v1001_v19  ;;  %v1202_v23 = vrot.slane %v1201_v15, 4  ;;  %v847_v25 = vld [vmem:[#allocation2 + $0x10c] sm:$0xf]  ;;  %v1387_v26 = vshrl.u32 %v846_v21, 16  ;;  %v1390_v27 = vshll.u32 %v846_v21, 16  ;;  %v204_v63 = vld [vmem:[%s12374_s0 + $0x178] sm:$0xff]  }
  0x6e   :  { %v1396_v28 = vshll.u32 %v847_v25, 16  ;;  %v1400_v29 = vshrl.u32 %v847_v25, 16  ;;  %v1212_v33 = vrot.slane %v1211_v24, 4  ;;  %769 = vst.msk [vmem:[#allocation2 + $0x16c] sm:$0xf] %vm682_vm1, %v671_v35  ;;  %v60_v0 = vld [vmem:[%s12374_s0 + $0x40] sm:$0xff]  }
  0x6f   :  { %v1743_v31 = vpack.c.b16 %v1683_v22, %v1682_v14  ;;  %v1207_v32 = vsel %vm9938_vm6, %v1202_v23, %v1206_v16  ;;  %v1389_v34 = vrot.slane %v1387_v26, 4  ;;  %v1392_v38 = vrot.slane %v1390_v27, 5  ;;  %v598_v42 = vld [vmem:[#allocation3 + $0x30] sm:$0xf]  ;;  %v599_v43 = vld [vmem:[#allocation3 + $0x34] sm:$0xf] }
  0x70   :  { %v1700_v37 = vunpack.c.l.b16 %v1207_v32  ;;  %v1398_v39 = vrot.slane %v1396_v28, 5  ;;  %v1402_v40 = vrot.slane %v1400_v29, 4  ;;  %v1217_v41 = vsel %vm9938_vm6, %v1212_v33, %v1216_v20  ;;  %v891_v45 = vld [vmem:[#allocation2 + $0x110] sm:$0x1]  ;;  %770 = vst.msk [vmem:[#allocation2 + $0x170] sm:$0x1] %vm685_vm2, %v672_v36 }
  0x71   :  { %8852 = vmatmul.msk.bf16.gmra.mxu0 %vm1772_vm5, %v1743_v31  ;;  %v1701_v44 = vunpack.c.l.b16 %v1217_v41  ;;  %v1393_v46 = vor.u32 %v1392_v38, %v1389_v34  ;;  %v1406_v49 = vshll.u32 %v891_v45, 16  ;;  %v600_v51 = vld [vmem:[#allocation3 + $0x38] sm:$0x1]  ;;  %696 = vst.msk [vmem:[#allocation2 + $0x30] sm:$0xf] %vm682_vm1, %v598_v42  ;;  %v116_v35 = vld [vmem:[%s12374_s0 + $0xb0] sm:$0xff]  }
  0x72   :  { %v1403_v47 = vor.u32 %v1402_v40, %v1398_v39  ;;  %697 = vst.msk [vmem:[#allocation2 + $0x34] sm:$0xf] %vm682_vm1, %v599_v43  ;;  %v626_v55 = vld [vmem:[#allocation3 + $0xa0] sm:$0xf]  ;;  %v627_v57 = vld [vmem:[#allocation3 + $0xa4] sm:$0x1] }
  0x73   :  { %v1752_v52 = vpack.c.b16 %v1701_v44, %v1700_v37  ;;  %v1394_v53 = vrot.slane %v1393_v46, 4  ;;  %v1408_v56 = vrot.slane %v1406_v49, 5  ;;  %698 = vst.msk [vmem:[#allocation2 + $0x38] sm:$0x1] %vm685_vm2, %v600_v51  ;;  %v862_v62 = vld [vmem:[#allocation2 + $0x168] sm:$0xf] }
  0x74   :  { %v1404_v54 = vrot.slane %v1403_v47, 4  ;;  %723 = vst.msk [vmem:[#allocation2 + $0x9c] sm:$0xf] %vm682_vm1, %v625_v48  ;;  %v1579_v3 = vshrl.u32 %v862_v62, 16  ;;  %v1582_v4 = vshll.u32 %v862_v62, 16  ;;  %v112_v5 = vld [vmem:[%s12374_s0 + $0xa8] sm:$0xff]  }
  0x75   :  { %8861 = vmatmul.msk.bf16.gmra.mxu1 %vm1772_vm5, %v1752_v52  ;;  %v1399_v58 = vsel %vm9938_vm6, %v1394_v53, %v1398_v39  ;;  %724 = vst.msk [vmem:[#allocation2 + $0xa0] sm:$0xf] %vm682_vm1, %v626_v55  ;;  %v863_v2 = vld [vmem:[#allocation2 + $0x16c] sm:$0xf]  ;;  %v650_v18 = vld [vmem:[#allocation3 + $0x100] sm:$0xf] }
  0x76   :  { %v1409_v60 = vsel %vm9938_vm6, %v1404_v54, %v1408_v56  ;;  %v1716_v61 = vunpack.c.l.b16 %v1399_v58  ;;  %725 = vst.msk [vmem:[#allocation2 + $0xa4] sm:$0x1] %vm685_vm2, %v627_v57  ;;  %v1588_v7 = vshll.u32 %v863_v2, 16  ;;  %v1592_v8 = vshrl.u32 %v863_v2, 16  ;;  %v651_v24 = vld [vmem:[#allocation3 + $0x104] sm:$0x1] }
  0x77   :  { %v1717_v1 = vunpack.c.l.b16 %v1409_v60  ;;  %v899_v6 = vld [vmem:[#allocation2 + $0x170] sm:$0x1]  ;;  %747 = vst.msk [vmem:[#allocation2 + $0x114] sm:$0xf] %vm682_vm1, %v649_v59  ;;  %v1581_v10 = vrot.slane %v1579_v3, 4  ;;  %v1584_v11 = vrot.slane %v1582_v4, 5 }
  0x78   :  { %v1598_v12 = vshll.u32 %v899_v6, 16  ;;  %v814_v13 = vld [vmem:[#allocation2 + $0x30] sm:$0xf]  ;;  %205 = vst [vmem:[#allocation3 + $0x160] sm:$0xff] %v204_v63   ;;  %v1590_v14 = vrot.slane %v1588_v7, 5  ;;  %v1594_v15 = vrot.slane %v1592_v8, 4 }
  0x79   :  { %v1760_v9 = vpack.c.b16 %v1717_v1, %v1716_v61  ;;  %v815_v16 = vld [vmem:[#allocation2 + $0x34] sm:$0xf]  ;;  %v1003_v17 = vshrl.u32 %v814_v13, 16  ;;  %v1585_v19 = vor.u32 %v1584_v11, %v1581_v10  ;;  %v1006_v22 = vshll.u32 %v814_v13, 16  ;;  %61 = vst [vmem:[#allocation3 + $0x40] sm:$0xff] %v60_v0   ;;  %v160_v10 = vld [vmem:[%s12374_s0 + $0x120] sm:$0xff]  }
  0x7a   :  { %v1600_v20 = vrot.slane %v1598_v12, 5  ;;  %v875_v21 = vld [vmem:[#allocation2 + $0x38] sm:$0x1]  ;;  %v1012_v23 = vshll.u32 %v815_v16, 16  ;;  %v1595_v25 = vor.u32 %v1594_v15, %v1590_v14  ;;  %v1016_v27 = vshrl.u32 %v815_v16, 16  ;;  %113 = vst [vmem:[#allocation3 + $0xa8] sm:$0xff] %v112_v5  }
  0x7b   :  { %8869 = vmatmul.msk.bf16.gmra.mxu2 %vm1772_vm5, %v1760_v9  ;;  %v1005_v26 = vrot.slane %v1003_v17, 4  ;;  %v1022_v28 = vshll.u32 %v875_v21, 16  ;;  %v832_v29 = vld [vmem:[#allocation2 + $0x9c] sm:$0xf]  ;;  %v1586_v30 = vrot.slane %v1585_v19, 4  ;;  %v1008_v31 = vrot.slane %v1006_v22, 5 }
  0x7c   :  { %v1014_v32 = vrot.slane %v1012_v23, 5  ;;  %v833_v33 = vld [vmem:[#allocation2 + $0xa0] sm:$0xf]  ;;  %v673_v34 = vld [vmem:[#allocation3 + $0x15c] sm:$0xf]  ;;  %v1596_v36 = vrot.slane %v1595_v25, 4 }
  0x7d   :  { %v1018_v37 = vrot.slane %v1016_v27, 4  ;;  %v1024_v38 = vrot.slane %v1022_v28, 5  ;;  %v884_v39 = vld [vmem:[#allocation2 + $0xa4] sm:$0x1]  ;;  %v1219_v40 = vshrl.u32 %v832_v29, 16  ;;  %v1591_v41 = vsel %vm9938_vm6, %v1586_v30, %v1590_v14  ;;  %117 = vst [vmem:[#allocation3 + $0xb0] sm:$0xff] %v116_v35  }
  0x7e   :  { %v1009_v42 = vor.u32 %v1008_v31, %v1005_v26  ;;  %v1222_v43 = vshll.u32 %v832_v29, 16  ;;  %v1228_v44 = vshll.u32 %v833_v33, 16  ;;  %748 = vst.msk [vmem:[#allocation2 + $0x118] sm:$0xf] %vm682_vm1, %v650_v18  ;;  %v848_v45 = vld [vmem:[#allocation2 + $0x114] sm:$0xf]  ;;  %v1601_v46 = vsel %vm9938_vm6, %v1596_v36, %v1600_v20 }
  0x7f   :  { %v1732_v47 = vunpack.c.l.b16 %v1591_v41  ;;  %v1019_v48 = vor.u32 %v1018_v37, %v1014_v32  ;;  %v1221_v49 = vrot.slane %v1219_v40, 4  ;;  %749 = vst.msk [vmem:[#allocation2 + $0x11c] sm:$0x1] %vm685_vm2, %v651_v24  ;;  %v674_v51 = vld [vmem:[#allocation3 + $0x160] sm:$0xf]  ;;  %v1733_v53 = vunpack.c.l.b16 %v1601_v46  ;;  %v164_v14 = vld [vmem:[%s12374_s0 + $0x128] sm:$0xff]  }
  0x80   :  { %v601_v52 = vld [vmem:[#allocation3 + $0x3c] sm:$0xf]  ;;  %v1010_v54 = vrot.slane %v1009_v42, 4  ;;  %v1224_v55 = vrot.slane %v1222_v43, 5  ;;  %v675_v56 = vld [vmem:[#allocation3 + $0x164] sm:$0x1] }
  0x81   :  { %v1020_v57 = vrot.slane %v1019_v48, 4  ;;  %v1230_v58 = vrot.slane %v1228_v44, 5  ;;  %v1232_v59 = vshrl.u32 %v833_v33, 16  ;;  %v1238_v60 = vshll.u32 %v884_v39, 16  ;;  %771 = vst.msk [vmem:[#allocation2 + $0x174] sm:$0xf] %vm682_vm1, %v673_v34 }
  0x82   :  { %v1768_v61 = vpack.c.b16 %v1733_v53, %v1732_v47  ;;  %v1015_v62 = vsel %vm9938_vm6, %v1010_v54, %v1014_v32  ;;  %v1225_v63 = vor.u32 %v1224_v55, %v1221_v49  ;;  %v1411_v0 = vshrl.u32 %v848_v45, 16  ;;  %772 = vst.msk [vmem:[#allocation2 + $0x178] sm:$0xf] %vm682_vm1, %v674_v51  ;;  %v602_v1 = vld [vmem:[#allocation3 + $0x40] sm:$0xf]  ;;  %v208_v23 = vld [vmem:[%s12374_s0 + $0x180] sm:$0xff]  }
  0x83   :  { %v1025_v2 = vsel %vm9938_vm6, %v1020_v57, %v1024_v38  ;;  %v1684_v3 = vunpack.c.l.b16 %v1015_v62  ;;  %v1234_v4 = vrot.slane %v1232_v59, 4  ;;  %773 = vst.msk [vmem:[#allocation2 + $0x17c] sm:$0x1] %vm685_vm2, %v675_v56  ;;  %v603_v5 = vld [vmem:[#allocation3 + $0x44] sm:$0x1]  ;;  %v1414_v9 = vshll.u32 %v848_v45, 16 }
  0x84   :  { %8877 = vmatmul.msk.bf16.gmra.mxu3 %vm1772_vm5, %v1768_v61  ;;  %v1685_v6 = vunpack.c.l.b16 %v1025_v2  ;;  %v1226_v7 = vrot.slane %v1225_v63, 4  ;;  %v1413_v8 = vrot.slane %v1411_v0, 4  ;;  %699 = vst.msk [vmem:[#allocation2 + $0x3c] sm:$0xf] %vm682_vm1, %v601_v52  ;;  %v1240_v12 = vrot.slane %v1238_v60, 5  ;;  %v212_v46 = vld [vmem:[%s12374_s0 + $0x188] sm:$0xff]  }
  0x85   :  { %v1235_v11 = vor.u32 %v1234_v4, %v1230_v58  ;;  %v849_v13 = vld [vmem:[#allocation2 + $0x118] sm:$0xf]  ;;  %700 = vst.msk [vmem:[#allocation2 + $0x40] sm:$0xf] %vm682_vm1, %v602_v1  ;;  %v1416_v18 = vrot.slane %v1414_v9, 5  ;;  %v64_v61 = vld [vmem:[%s12374_s0 + $0x48] sm:$0xff]  }
  0x86   :  { %v1744_v15 = vpack.c.b16 %v1685_v6, %v1684_v3  ;;  %v1231_v16 = vsel %vm9938_vm6, %v1226_v7, %v1230_v58  ;;  %v892_v17 = vld [vmem:[#allocation2 + $0x11c] sm:$0x1]  ;;  %v1420_v19 = vshll.u32 %v849_v13, 16  ;;  %701 = vst.msk [vmem:[#allocation2 + $0x44] sm:$0x1] %vm685_vm2, %v603_v5  ;;  %v1424_v21 = vshrl.u32 %v849_v13, 16 }
  0x87   :  { %v1236_v20 = vrot.slane %v1235_v11, 4  ;;  %v1430_v22 = vshll.u32 %v892_v17, 16  ;;  %161 = vst [vmem:[#allocation3 + $0x108] sm:$0xff] %v160_v10   ;;  %v1702_v24 = vunpack.c.l.b16 %v1231_v16  ;;  %v1417_v25 = vor.u32 %v1416_v18, %v1413_v8  ;;  %v628_v28 = vld [vmem:[#allocation3 + $0xa8] sm:$0xf]  ;;  %v68_v17 = vld [vmem:[%s12374_s0 + $0x50] sm:$0xff]  }
  0x88   :  { %8853 = vmatmul.msk.bf16.gmra.mxu0 %vm1772_vm5, %v1744_v15  ;;  %v1422_v26 = vrot.slane %v1420_v19, 5  ;;  %v864_v27 = vld [vmem:[#allocation2 + $0x174] sm:$0xf]  ;;  %v1426_v30 = vrot.slane %v1424_v21, 4  ;;  %v629_v34 = vld [vmem:[#allocation3 + $0xac] sm:$0xf] }
  0x89   :  { %v1241_v29 = vsel %vm9938_vm6, %v1236_v20, %v1240_v12  ;;  %v1432_v31 = vrot.slane %v1430_v22, 5  ;;  %v865_v32 = vld [vmem:[#allocation2 + $0x178] sm:$0xf]  ;;  %v1603_v33 = vshrl.u32 %v864_v27, 16  ;;  %165 = vst [vmem:[#allocation3 + $0x110] sm:$0xff] %v164_v14   ;;  %v1418_v36 = vrot.slane %v1417_v25, 4 }
  0x8a   :  { %v1703_v35 = vunpack.c.l.b16 %v1241_v29  ;;  %v900_v37 = vld [vmem:[#allocation2 + $0x17c] sm:$0x1]  ;;  %v1606_v38 = vshll.u32 %v864_v27, 16  ;;  %v1612_v39 = vshll.u32 %v865_v32, 16  ;;  %v630_v40 = vld [vmem:[#allocation3 + $0xb0] sm:$0x1]  ;;  %v1427_v41 = vor.u32 %v1426_v30, %v1422_v26 }
  0x8b   :  { %209 = vst [vmem:[#allocation3 + $0x168] sm:$0xff] %v208_v23   ;;  %v1605_v42 = vrot.slane %v1603_v33, 4  ;;  %v1616_v43 = vshrl.u32 %v865_v32, 16  ;;  %v1622_v44 = vshll.u32 %v900_v37, 16  ;;  %v816_v45 = vld [vmem:[#allocation2 + $0x3c] sm:$0xf]  ;;  %v1423_v48 = vsel %vm9938_vm6, %v1418_v36, %v1422_v26 }
  0x8c   :  { %v1753_v47 = vpack.c.b16 %v1703_v35, %v1702_v24  ;;  %v1608_v49 = vrot.slane %v1606_v38, 5  ;;  %v1614_v51 = vrot.slane %v1612_v39, 5  ;;  %v817_v52 = vld [vmem:[#allocation2 + $0x40] sm:$0xf]  ;;  %726 = vst.msk [vmem:[#allocation2 + $0xa8] sm:$0xf] %vm682_vm1, %v628_v28  ;;  %v1718_v54 = vunpack.c.l.b16 %v1423_v48 }
  0x8d   :  { %v1428_v53 = vrot.slane %v1427_v41, 4  ;;  %v1618_v55 = vrot.slane %v1616_v43, 4  ;;  %v876_v56 = vld [vmem:[#allocation2 + $0x44] sm:$0x1]  ;;  %213 = vst [vmem:[#allocation3 + $0x170] sm:$0xff] %v212_v46   ;;  %v1624_v58 = vrot.slane %v1622_v44, 5 }
  0x8e   :  { %8862 = vmatmul.msk.bf16.gmra.mxu1 %vm1772_vm5, %v1753_v47  ;;  %v1609_v57 = vor.u32 %v1608_v49, %v1605_v42  ;;  %v1027_v59 = vshrl.u32 %v816_v45, 16  ;;  %v1030_v60 = vshll.u32 %v816_v45, 16  ;;  %727 = vst.msk [vmem:[#allocation2 + $0xac] sm:$0xf] %vm682_vm1, %v629_v34  ;;  %v1036_v0 = vshll.u32 %v817_v52, 16  ;;  %v168_v45 = vld [vmem:[%s12374_s0 + $0x130] sm:$0xff]  }
  0x8f   :  { %v1433_v62 = vsel %vm9938_vm6, %v1428_v53, %v1432_v31  ;;  %v1619_v63 = vor.u32 %v1618_v55, %v1614_v51  ;;  %v1040_v1 = vshrl.u32 %v817_v52, 16  ;;  %728 = vst.msk [vmem:[#allocation2 + $0xb0] sm:$0x1] %vm685_vm2, %v630_v40  ;;  %v652_v2 = vld [vmem:[#allocation3 + $0x108] sm:$0xf]  ;;  %v1046_v11 = vshll.u32 %v876_v56, 16 }
  0x90   :  { %v1719_v3 = vunpack.c.l.b16 %v1433_v62  ;;  %v1610_v4 = vrot.slane %v1609_v57, 4  ;;  %v1029_v5 = vrot.slane %v1027_v59, 4  ;;  %v1032_v6 = vrot.slane %v1030_v60, 5  ;;  %v653_v7 = vld [vmem:[#allocation3 + $0x10c] sm:$0xf]  ;;  %65 = vst [vmem:[#allocation3 + $0x48] sm:$0xff] %v64_v61  }
  0x91   :  { %v1620_v8 = vrot.slane %v1619_v63, 4  ;;  %v1038_v9 = vrot.slane %v1036_v0, 5  ;;  %v1042_v10 = vrot.slane %v1040_v1, 4  ;;  %v654_v12 = vld [vmem:[#allocation3 + $0x110] sm:$0x1]  ;;  %v1048_v21 = vrot.slane %v1046_v11, 5 }
  0x92   :  { %v1761_v13 = vpack.c.b16 %v1719_v3, %v1718_v54  ;;  %v1615_v14 = vsel %vm9938_vm6, %v1610_v4, %v1614_v51  ;;  %v1033_v15 = vor.u32 %v1032_v6, %v1029_v5  ;;  %750 = vst.msk [vmem:[#allocation2 + $0x120] sm:$0xf] %vm682_vm1, %v652_v2  ;;  %v676_v16 = vld [vmem:[#allocation3 + $0x168] sm:$0xf]  ;;  %v677_v29 = vld [vmem:[#allocation3 + $0x16c] sm:$0xf] }
  0x93   :  { %v1625_v18 = vsel %vm9938_vm6, %v1620_v8, %v1624_v58  ;;  %v1734_v19 = vunpack.c.l.b16 %v1615_v14  ;;  %v1043_v20 = vor.u32 %v1042_v10, %v1038_v9  ;;  %v834_v22 = vld [vmem:[#allocation2 + $0xa8] sm:$0xf]  ;;  %751 = vst.msk [vmem:[#allocation2 + $0x124] sm:$0xf] %vm682_vm1, %v653_v7  ;;  %v120_v40 = vld [vmem:[%s12374_s0 + $0xb8] sm:$0xff]   ;;  %v216_v4 = vld [vmem:[%s12374_s0 + $0x190] sm:$0xff]  }
  0x94   :  { %8870 = vmatmul.msk.bf16.gmra.mxu2 %vm1772_vm5, %v1761_v13  ;;  %v1735_v23 = vunpack.c.l.b16 %v1625_v18  ;;  %v1034_v24 = vrot.slane %v1033_v15, 4  ;;  %v1243_v25 = vshrl.u32 %v834_v22, 16  ;;  %v1246_v26 = vshll.u32 %v834_v22, 16  ;;  %752 = vst.msk [vmem:[#allocation2 + $0x128] sm:$0x1] %vm685_vm2, %v654_v12 }
  0x95   :  { %v1044_v27 = vrot.slane %v1043_v20, 4  ;;  %v835_v28 = vld [vmem:[#allocation2 + $0xac] sm:$0xf]  ;;  %69 = vst [vmem:[#allocation3 + $0x50] sm:$0xff] %v68_v17   ;;  %v678_v35 = vld [vmem:[#allocation3 + $0x170] sm:$0x1] }
  0x96   :  { %v1769_v30 = vpack.c.b16 %v1735_v23, %v1734_v19  ;;  %v1039_v31 = vsel %vm9938_vm6, %v1034_v24, %v1038_v9  ;;  %v885_v32 = vld [vmem:[#allocation2 + $0xb0] sm:$0x1]  ;;  %v1245_v33 = vrot.slane %v1243_v25, 4  ;;  %v1248_v34 = vrot.slane %v1246_v26, 5  ;;  %774 = vst.msk [vmem:[#allocation2 + $0x180] sm:$0xf] %vm682_vm1, %v676_v16 }
  0x97   :  { %v1049_v36 = vsel %vm9938_vm6, %v1044_v27, %v1048_v21  ;;  %v1686_v37 = vunpack.c.l.b16 %v1039_v31  ;;  %v1252_v38 = vshll.u32 %v835_v28, 16  ;;  %v1256_v39 = vshrl.u32 %v835_v28, 16  ;;  %775 = vst.msk [vmem:[#allocation2 + $0x184] sm:$0xf] %vm682_vm1, %v677_v29  ;;  %v604_v44 = vld [vmem:[#allocation3 + $0x48] sm:$0xf] }
  0x98   :  { %8878 = vmatmul.msk.bf16.gmra.mxu3 %vm1772_vm5, %v1769_v30  ;;  %v1687_v41 = vunpack.c.l.b16 %v1049_v36  ;;  %v1249_v42 = vor.u32 %v1248_v34, %v1245_v33  ;;  %v1262_v43 = vshll.u32 %v885_v32, 16  ;;  %776 = vst.msk [vmem:[#allocation2 + $0x188] sm:$0x1] %vm685_vm2, %v678_v35  ;;  %v605_v49 = vld [vmem:[#allocation3 + $0x4c] sm:$0xf] }
  0x99   :  { %v1254_v46 = vrot.slane %v1252_v38, 5  ;;  %v1258_v47 = vrot.slane %v1256_v39, 4  ;;  %v850_v48 = vld [vmem:[#allocation2 + $0x120] sm:$0xf]  ;;  %121 = vst [vmem:[#allocation3 + $0xb8] sm:$0xff] %v120_v40   ;;  %v72_v20 = vld [vmem:[%s12374_s0 + $0x58] sm:$0xff]  }
  0x9a   :  { %v1745_v51 = vpack.c.b16 %v1687_v41, %v1686_v37  ;;  %v1250_v52 = vrot.slane %v1249_v42, 4  ;;  %v1264_v53 = vrot.slane %v1262_v43, 5  ;;  %v851_v54 = vld [vmem:[#allocation2 + $0x124] sm:$0xf]  ;;  %v1435_v55 = vshrl.u32 %v850_v48, 16  ;;  %169 = vst [vmem:[#allocation3 + $0x118] sm:$0xff] %v168_v45  }
  0x9b   :  { %v1259_v56 = vor.u32 %v1258_v47, %v1254_v46  ;;  %v893_v57 = vld [vmem:[#allocation2 + $0x128] sm:$0x1]  ;;  %v1438_v58 = vshll.u32 %v850_v48, 16  ;;  %v1444_v59 = vshll.u32 %v851_v54, 16  ;;  %v1448_v60 = vshrl.u32 %v851_v54, 16  ;;  %217 = vst [vmem:[#allocation3 + $0x178] sm:$0xff] %v216_v4  }
  0x9c   :  { %8854 = vmatmul.msk.bf16.gmra.mxu0 %vm1772_vm5, %v1745_v51  ;;  %v1255_v61 = vsel %vm9938_vm6, %v1250_v52, %v1254_v46  ;;  %v1437_v62 = vrot.slane %v1435_v55, 4  ;;  %v1454_v63 = vshll.u32 %v893_v57, 16  ;;  %v606_v0 = vld [vmem:[#allocation3 + $0x50] sm:$0x1]  ;;  %702 = vst.msk [vmem:[#allocation2 + $0x48] sm:$0xf] %vm682_vm1, %v604_v44 }
  0x9d   :  { %v1260_v1 = vrot.slane %v1259_v56, 4  ;;  %v1440_v2 = vrot.slane %v1438_v58, 5  ;;  %v1446_v3 = vrot.slane %v1444_v59, 5  ;;  %v1704_v5 = vunpack.c.l.b16 %v1255_v61  ;;  %v866_v8 = vld [vmem:[#allocation2 + $0x180] sm:$0xf]  ;;  %73 = vst [vmem:[#allocation3 + $0x58] sm:$0xff] %v72_v20  }
  0x9e   :  { %v1450_v6 = vrot.slane %v1448_v60, 4  ;;  %v1456_v7 = vrot.slane %v1454_v63, 5  ;;  %703 = vst.msk [vmem:[#allocation2 + $0x4c] sm:$0xf] %vm682_vm1, %v605_v49  ;;  %v867_v11 = vld [vmem:[#allocation2 + $0x184] sm:$0xf] }
  0x9f   :  { %v1265_v9 = vsel %vm9938_vm6, %v1260_v1, %v1264_v53  ;;  %v1441_v10 = vor.u32 %v1440_v2, %v1437_v62  ;;  %v1627_v12 = vshrl.u32 %v866_v8, 16  ;;  %v1630_v13 = vshll.u32 %v866_v8, 16  ;;  %704 = vst.msk [vmem:[#allocation2 + $0x50] sm:$0x1] %vm685_vm2, %v606_v0  ;;  %v901_v16 = vld [vmem:[#allocation2 + $0x188] sm:$0x1] }
  0xa0   :  { %v1705_v14 = vunpack.c.l.b16 %v1265_v9  ;;  %v1451_v15 = vor.u32 %v1450_v6, %v1446_v3  ;;  %v1636_v17 = vshll.u32 %v867_v11, 16  ;;  %v1640_v18 = vshrl.u32 %v867_v11, 16  ;;  %v631_v19 = vld [vmem:[#allocation3 + $0xb4] sm:$0xf]  ;;  %v632_v25 = vld [vmem:[#allocation3 + $0xb8] sm:$0xf] }
  0xa1   :  { %v1442_v21 = vrot.slane %v1441_v10, 4  ;;  %v1629_v22 = vrot.slane %v1627_v12, 4  ;;  %v1632_v23 = vrot.slane %v1630_v13, 5  ;;  %v1646_v24 = vshll.u32 %v901_v16, 16  ;;  %v633_v30 = vld [vmem:[#allocation3 + $0xbc] sm:$0x1] }
  0xa2   :  { %v1754_v26 = vpack.c.b16 %v1705_v14, %v1704_v5  ;;  %v1452_v27 = vrot.slane %v1451_v15, 4  ;;  %v1638_v28 = vrot.slane %v1636_v17, 5  ;;  %v1642_v29 = vrot.slane %v1640_v18, 4  ;;  %729 = vst.msk [vmem:[#allocation2 + $0xb4] sm:$0xf] %vm682_vm1, %v631_v19 }
  0xa3   :  { %v1447_v31 = vsel %vm9938_vm6, %v1442_v21, %v1446_v3  ;;  %v1633_v32 = vor.u32 %v1632_v23, %v1629_v22  ;;  %v1648_v33 = vrot.slane %v1646_v24, 5  ;;  %v655_v34 = vld [vmem:[#allocation3 + $0x114] sm:$0xf]  ;;  %v818_v38 = vld [vmem:[#allocation2 + $0x48] sm:$0xf] }
  0xa4   :  { %8863 = vmatmul.msk.bf16.gmra.mxu1 %vm1772_vm5, %v1754_v26  ;;  %v1457_v35 = vsel %vm9938_vm6, %v1452_v27, %v1456_v7  ;;  %v1720_v36 = vunpack.c.l.b16 %v1447_v31  ;;  %v1643_v37 = vor.u32 %v1642_v29, %v1638_v28  ;;  %730 = vst.msk [vmem:[#allocation2 + $0xb8] sm:$0xf] %vm682_vm1, %v632_v25  ;;  %v656_v39 = vld [vmem:[#allocation3 + $0x118] sm:$0xf]  ;;  %v1051_v43 = vshrl.u32 %v818_v38, 16  ;;  %v10290_v29 = vpop.f32.mrf.mxu1 }
  0xa5   :  { %v1721_v40 = vunpack.c.l.b16 %v1457_v35  ;;  %v1634_v41 = vrot.slane %v1633_v32, 4  ;;  %v10266_v42 = vld [vmem:[#allocation2 + $0x4c] sm:$0xf]  ;;  %v1054_v44 = vshll.u32 %v818_v38, 16  ;;  %731 = vst.msk [vmem:[#allocation2 + $0xbc] sm:$0x1] %vm685_vm2, %v633_v30 }
  0xa6   :  { %v1644_v45 = vrot.slane %v1643_v37, 4  ;;  %v10268_v46 = vld [vmem:[#allocation2 + $0x50] sm:$0x1]  ;;  %v1060_v47 = vshll.u32 %v10266_v42, 16  ;;  %v1064_v48 = vshrl.u32 %v10266_v42, 16  ;;  %v1053_v52 = vrot.slane %v1051_v43, 4 }
  0xa7   :  { %v1762_v49 = vpack.c.b16 %v1721_v40, %v1720_v36  ;;  %v1639_v51 = vsel %vm9938_vm6, %v1634_v41, %v1638_v28  ;;  %v1056_v53 = vrot.slane %v1054_v44, 5  ;;  %v657_v54 = vld [vmem:[#allocation3 + $0x11c] sm:$0x1]  ;;  %753 = vst.msk [vmem:[#allocation2 + $0x12c] sm:$0xf] %vm682_vm1, %v655_v34  ;;  %v1070_v62 = vshll.u32 %v10268_v46, 16 }
  0xa8   :  { %v1649_v55 = vsel %vm9938_vm6, %v1644_v45, %v1648_v33  ;;  %v1736_v56 = vunpack.c.l.b16 %v1639_v51  ;;  %v1062_v57 = vrot.slane %v1060_v47, 5  ;;  %v1066_v58 = vrot.slane %v1064_v48, 4  ;;  %v679_v59 = vld [vmem:[#allocation3 + $0x174] sm:$0xf]  ;;  %754 = vst.msk [vmem:[#allocation2 + $0x130] sm:$0xf] %vm682_vm1, %v656_v39 }
  0xa9   :  { %8871 = vmatmul.msk.bf16.gmra.mxu2 %vm1772_vm5, %v1762_v49  ;;  %v1737_v60 = vunpack.c.l.b16 %v1649_v55  ;;  %v1057_v61 = vor.u32 %v1056_v53, %v1053_v52  ;;  %v680_v63 = vld [vmem:[#allocation3 + $0x178] sm:$0xf]  ;;  %v836_v1 = vld [vmem:[#allocation2 + $0xb4] sm:$0xf]  ;;  %755 = vst.msk [vmem:[#allocation2 + $0x134] sm:$0x1] %vm685_vm2, %v657_v54 }
  0xaa   :  { %v1067_v0 = vor.u32 %v1066_v58, %v1062_v57  ;;  %v681_v2 = vld [vmem:[#allocation3 + $0x17c] sm:$0x1]  ;;  %v1072_v5 = vrot.slane %v1070_v62, 5  ;;  %v1267_v7 = vshrl.u32 %v836_v1, 16  ;;  %v1270_v9 = vshll.u32 %v836_v1, 16 }
  0xab   :  { %v1770_v3 = vpack.c.b16 %v1737_v60, %v1736_v56  ;;  %v1058_v4 = vrot.slane %v1057_v61, 4  ;;  %v837_v6 = vld [vmem:[#allocation2 + $0xb8] sm:$0xf]  ;;  %777 = vst.msk [vmem:[#allocation2 + $0x18c] sm:$0xf] %vm682_vm1, %v679_v59 }
  0xac   :  { %v1068_v8 = vrot.slane %v1067_v0, 4  ;;  %v1276_v10 = vshll.u32 %v837_v6, 16  ;;  %v1280_v11 = vshrl.u32 %v837_v6, 16  ;;  %v1269_v13 = vrot.slane %v1267_v7, 4  ;;  %778 = vst.msk [vmem:[#allocation2 + $0x190] sm:$0xf] %vm682_vm1, %v680_v63 }
  0xad   :  { %8879 = vmatmul.msk.bf16.gmra.mxu3 %vm1772_vm5, %v1770_v3  ;;  %v1063_v12 = vsel %vm9938_vm6, %v1058_v4, %v1062_v57  ;;  %v886_v16 = vld [vmem:[#allocation2 + $0xbc] sm:$0x1]  ;;  %v1272_v17 = vrot.slane %v1270_v9, 5  ;;  %779 = vst.msk [vmem:[#allocation2 + $0x194] sm:$0x1] %vm685_vm2, %v681_v2  ;;  %v10302_v9 = vpop.f32.mrf.mxu2 }
  0xae   :  { %v1073_v14 = vsel %vm9938_vm6, %v1068_v8, %v1072_v5  ;;  %v1688_v15 = vunpack.c.l.b16 %v1063_v12  ;;  %v1278_v18 = vrot.slane %v1276_v10, 5  ;;  %v1282_v20 = vrot.slane %v1280_v11, 4  ;;  %v852_v22 = vld [vmem:[#allocation2 + $0x12c] sm:$0xf]  ;;  %v607_v23 = vld [vmem:[#allocation3 + $0x54] sm:$0xf] }
  0xaf   :  { %v1689_v19 = vunpack.c.l.b16 %v1073_v14  ;;  %v1286_v21 = vshll.u32 %v886_v16, 16  ;;  %v1273_v24 = vor.u32 %v1272_v17, %v1269_v13  ;;  %v853_v25 = vld [vmem:[#allocation2 + $0x130] sm:$0xf]  ;;  %v1459_v26 = vshrl.u32 %v852_v22, 16  ;;  %v608_v28 = vld [vmem:[#allocation3 + $0x58] sm:$0xf]  ;;  %v10307_v14 = vpop.f32.mrf.mxu0 }
  0xb0   :  { %v1462_v27 = vshll.u32 %v852_v22, 16  ;;  %v1283_v31 = vor.u32 %v1282_v20, %v1278_v18  ;;  %v894_v33 = vld [vmem:[#allocation2 + $0x134] sm:$0x1]  ;;  %v1468_v34 = vshll.u32 %v853_v25, 16  ;;  %v609_v35 = vld [vmem:[#allocation3 + $0x5c] sm:$0x1] }
  0xb1   :  { %v1746_v30 = vpack.c.b16 %v1689_v19, %v1688_v15  ;;  %v1288_v32 = vrot.slane %v1286_v21, 5  ;;  %v1274_v36 = vrot.slane %v1273_v24, 4  ;;  %v1461_v37 = vrot.slane %v1459_v26, 4  ;;  %705 = vst.msk [vmem:[#allocation2 + $0x54] sm:$0xf] %vm682_vm1, %v607_v23  ;;  %v10309_v15 = vpop.f32.mrf.mxu1  ;;  %v10313_v21 = vpop.f32.mrf.mxu3 }
  0xb2   :  { %v1464_v38 = vrot.slane %v1462_v27, 5  ;;  %v1472_v39 = vshrl.u32 %v853_v25, 16  ;;  %v1284_v40 = vrot.slane %v1283_v31, 4  ;;  %v1470_v41 = vrot.slane %v1468_v34, 5  ;;  %v868_v44 = vld [vmem:[#allocation2 + $0x18c] sm:$0xf] }
  0xb3   :  { %8855 = vmatmul.msk.bf16.gmra.mxu0 %vm1772_vm5, %v1746_v30  ;;  %v1478_v43 = vshll.u32 %v894_v33, 16  ;;  %v1279_v45 = vsel %vm9938_vm6, %v1274_v36, %v1278_v18  ;;  %v869_v49 = vld [vmem:[#allocation2 + $0x190] sm:$0xf]  ;;  %v1651_v51 = vshrl.u32 %v868_v44, 16  ;;  %706 = vst.msk [vmem:[#allocation2 + $0x58] sm:$0xf] %vm682_vm1, %v608_v28 }
  0xb4   :  { %v1465_v47 = vor.u32 %v1464_v38, %v1461_v37  ;;  %v1474_v48 = vrot.slane %v1472_v39, 4  ;;  %v1289_v52 = vsel %vm9938_vm6, %v1284_v40, %v1288_v32  ;;  %v1706_v53 = vunpack.c.l.b16 %v1279_v45  ;;  %v902_v55 = vld [vmem:[#allocation2 + $0x194] sm:$0x1]  ;;  %707 = vst.msk [vmem:[#allocation2 + $0x5c] sm:$0x1] %vm685_vm2, %v609_v35 }
  0xb5   :  { %v1480_v54 = vrot.slane %v1478_v43, 5  ;;  %v1654_v56 = vshll.u32 %v868_v44, 16  ;;  %v1707_v57 = vunpack.c.l.b16 %v1289_v52  ;;  %v1653_v60 = vrot.slane %v1651_v51, 4  ;;  %v2470_v20 = vld [vmem:[#allocation2] sm:$0xe]  ;;  %12382 = vst [vmem:[#allocation6_spill] sm:$0xff] %v10313_v21 }
  0xb6   :  { %v1466_v58 = vrot.slane %v1465_v47, 4  ;;  %v1475_v59 = vor.u32 %v1474_v48, %v1470_v41  ;;  %v1660_v62 = vshll.u32 %v869_v49, 16  ;;  %v1664_v63 = vshrl.u32 %v869_v49, 16  ;;  %v9365_v32 = vld [vmem:[%s12377_s3 + $0xc] sm:$0x3] }
  0xb7   :  { %v1656_v61 = vrot.slane %v1654_v56, 5  ;;  %v1670_v0 = vshll.u32 %v902_v55, 16  ;;  %v1755_v1 = vpack.c.b16 %v1707_v57, %v1706_v53  ;;  %v3782_v37 = vld [vmem:[#allocation2 + $0xc] sm:$0xf]  ;;  %v3783_v38 = vld [vmem:[#allocation2 + $0x10] sm:$0xf]  ;;  %v10335_v57 = vpop.f32.mrf.mxu2 }
  0xb8   :  { %v1471_v2 = vsel %vm9938_vm6, %v1466_v58, %v1470_v41  ;;  %v1476_v3 = vrot.slane %v1475_v59, 4  ;;  %v1662_v6 = vrot.slane %v1660_v62, 5  ;;  %v1666_v7 = vrot.slane %v1664_v63, 4  ;;  %v820_v8 = vld [vmem:[#allocation2 + $0x54] sm:$0xf] }
  0xb9   :  { %v1722_v4 = vunpack.c.l.b16 %v1471_v2  ;;  %v1657_v5 = vor.u32 %v1656_v61, %v1653_v60  ;;  %8864 = vmatmul.msk.bf16.gmra.mxu1 %vm1772_vm5, %v1755_v1  ;;  %v1672_v11 = vrot.slane %v1670_v0, 5  ;;  %v1075_v12 = vshrl.u32 %v820_v8, 16  ;;  %v9724_v39 = vld [vmem:[#allocation2 + $0x8] sm:$0x1]  ;;  %v9725_v51 = vld [vmem:[#allocation2 + $0x4] sm:$0xf]  ;;  %v10339_v61 = vpop.f32.mrf.mxu1 }
  0xba   :  { %v1481_v10 = vsel %vm9938_vm6, %v1476_v3, %v1480_v54  ;;  %v1078_v13 = vshll.u32 %v820_v8, 16  ;;  %v1667_v18 = vor.u32 %v1666_v7, %v1662_v6  ;;  %v10311_v19 = vld [vmem:[#allocation2 + $0x58] sm:$0xf]  ;;  %v2574_v40 = vrot.slane %v9724_v39, 5  ;;  %v3784_v1 = vld [vmem:[#allocation2 + $0x14] sm:$0x1]  ;;  %v10349_v8 = vpop.f32.mrf.mxu0 }
  0xbb   :  { %v1723_v16 = vunpack.c.l.b16 %v1481_v10  ;;  %v1658_v17 = vrot.slane %v1657_v5, 4  ;;  %v10315_v22 = vld [vmem:[#allocation2 + $0x5c] sm:$0x1]  ;;  %v1077_v23 = vrot.slane %v1075_v12, 4  ;;  %v1084_v25 = vshll.u32 %v10311_v19, 16 }
  0xbc   :  { %v1080_v24 = vrot.slane %v1078_v13, 5  ;;  %v1088_v26 = vshrl.u32 %v10311_v19, 16  ;;  %v1668_v30 = vrot.slane %v1667_v18, 4  ;;  %v1094_v31 = vshll.u32 %v10315_v22, 16  ;;  %v9526_v7 = vld [vmem:[%s12377_s3 + $0xe] sm:$0x3]  ;;  %v10356_v13 = vpop.f32.mrf.mxu3 }
  0xbd   :  { %v1763_v27 = vpack.c.b16 %v1723_v16, %v1722_v4  ;;  %v1663_v28 = vsel %vm9938_vm6, %v1658_v17, %v1662_v6  ;;  %v1086_v35 = vrot.slane %v1084_v25, 5  ;;  %v9041_v44 = vrot.slane %v2470_v20, 9  ;;  %v9332_v12 = vld [vmem:[%s12377_s3 + $0xa] sm:$0x3]  ;;  %12385 = vst [vmem:[#allocation7_spill] sm:$0xff] %v10356_v13  ;;  %v9624_v16 = vld [vmem:[#allocation2] sm:$0xff] }
  0xbe   :  { %v1738_v33 = vunpack.c.l.b16 %v1663_v28  ;;  %v1081_v34 = vor.u32 %v1080_v24, %v1077_v23  ;;  %v1090_v36 = vrot.slane %v1088_v26, 4  ;;  %v1673_v41 = vsel %vm9938_vm6, %v1668_v30, %v1672_v11  ;;  %v9591_v23 = vld [vmem:[%s12377_s3 + $0x10] sm:$0x3]  ;;  %v3786_v39 = vld [vmem:[#allocation2 + $0x1c] sm:$0xf] }
  0xbf   :  { %8872 = vmatmul.msk.bf16.gmra.mxu2 %vm1772_vm5, %v1763_v27  ;;  %v1096_v43 = vrot.slane %v1094_v31, 5  ;;  %v1739_v45 = vunpack.c.l.b16 %v1673_v41  ;;  %v2571_v52 = vrot.slane %v9725_v51, 5  ;;  %v6182_v53 = vsel %vm1869_vm0, %v9365_v32, 0 }
  0xc0   :  { %v1082_v47 = vrot.slane %v1081_v34, 4  ;;  %v1091_v48 = vor.u32 %v1090_v36, %v1086_v35  ;;  %v3879_v54 = vshrl.u32 %v3782_v37, 16  ;;  %v3882_v55 = vshll.u32 %v3782_v37, 16  ;;  %6191 = vmatpush.bf16.msra.mxu2 %v6182_v53  ;;  %v10366_v36 = vpop.f32.mrf.mxu2 }
  0xc1   :  { %v3888_v56 = vshll.u32 %v3783_v38, 16  ;;  %v1771_v58 = vpack.c.b16 %v1739_v45, %v1738_v33  ;;  %v2572_v63 = vsel %vm10330_vm9, %v9041_v44, %v2571_v52  ;;  %v2573_v0 = vrot.slane %v2571_v52, 4  ;;  %12386 = vst [vmem:[#allocation8_spill] sm:$0xff] %v10366_v36  ;;  %v10368_v37 = vpop.f32.mrf.mxu1  ;;  %v2471_v44 = vld [vmem:[#allocation2 + $0xc] sm:$0xe] }
  0xc2   :  { %v1087_v59 = vsel %vm9938_vm6, %v1082_v47, %v1086_v35  ;;  %v1092_v60 = vrot.slane %v1091_v48, 4  ;;  %v3881_v2 = vrot.slane %v3879_v54, 4  ;;  %v3884_v4 = vrot.slane %v3882_v55, 5  ;;  %v3785_v35 = vld [vmem:[#allocation2 + $0x18] sm:$0xf]  ;;  %v10374_v48 = vpop.f32.mrf.mxu0  ;;  %v9656_v55 = vld [vmem:[#allocation2 + $0xc] sm:$0xff] }
  0xc3   :  { %v1690_v62 = vunpack.c.l.b16 %v1087_v59  ;;  %8880 = vmatmul.msk.bf16.gmra.mxu3 %vm1772_vm5, %v1771_v58  ;;  %v3890_v5 = vrot.slane %v3888_v56, 5  ;;  %v3892_v6 = vshrl.u32 %v3783_v38, 16  ;;  %v2575_v11 = vsel %vm10330_vm9, %v2573_v0, %v2574_v40  ;;  %v9726_v40 = vld [vmem:[#allocation2 + $0x10] sm:$0xf]  ;;  %v9727_v59 = vld [vmem:[#allocation2 + $0x14] sm:$0x1] }
  0xc4   :  { %v1097_v3 = vsel %vm9938_vm6, %v1092_v60, %v1096_v43  ;;  %v3885_v17 = vor.u32 %v3884_v4, %v3881_v2  ;;  %v3898_v20 = vshll.u32 %v3784_v1, 16  ;;  %v2795_v25 = vunpack.c.l.b16 %v2572_v63  ;;  %v10377_v54 = vpop.f32.mrf.mxu3  ;;  %v3787_v4 = vld [vmem:[#allocation2 + $0x20] sm:$0x1]  ;;  %v3814_v36 = vld [vmem:[#allocation2 + $0x8c] sm:$0x1] }
  0xc5   :  { %v1691_v10 = vunpack.c.l.b16 %v1097_v3  ;;  %v3894_v18 = vrot.slane %v3892_v6, 4  ;;  %v2796_v26 = vunpack.c.l.b16 %v2575_v11  ;;  %v7476_v27 = vsel %vm1869_vm0, %v9526_v7, 0  ;;  %12387 = vst [vmem:[#allocation9_spill] sm:$0xff] %v10377_v54 }
  0xc6   :  { %7485 = vmatpush.bf16.msra.mxu3 %v7476_v27  ;;  %v5623_v30 = vsel %vm1869_vm0, %v9332_v12, 0  ;;  %v3886_v31 = vrot.slane %v3885_v17, 4  ;;  %v8258_v32 = vsel %vm1869_vm0, %v9591_v23, 0  ;;  %v3900_v34 = vrot.slane %v3898_v20, 5  ;;  %v9625_v12 = vld [vmem:[#allocation2 + $0xc] sm:$0xff] }
  0xc7   :  { %v1747_v24 = vpack.c.b16 %v1691_v10, %v1690_v62  ;;  %v3895_v28 = vor.u32 %v3894_v18, %v3890_v5  ;;  %5632 = vmatpush.bf16.msra.mxu1 %v5623_v30  ;;  %8267 = vmatpush.bf16.msra.mxu0 %v8258_v32  ;;  %v2859_v38 = vpack.c.b16 %v2796_v26, %v2795_v25  ;;  %v2578_v41 = vrot.slane %v9726_v40, 5  ;;  %v3788_v26 = vld [vmem:[#allocation2 + $0x24] sm:$0xf]  ;;  %v3789_v27 = vld [vmem:[#allocation2 + $0x28] sm:$0xf] }
  0xc8   :  { %v3891_v43 = vsel %vm9938_vm6, %v3886_v31, %v3890_v5  ;;  %v3903_v45 = vshrl.u32 %v3785_v35, 16  ;;  %v3906_v51 = vshll.u32 %v3785_v35, 16  ;;  %v3912_v52 = vshll.u32 %v3786_v39, 16  ;;  %v10386_v10 = vpop.f32.mrf.mxu2  ;;  %v2472_v35 = vld [vmem:[#allocation2 + $0x18] sm:$0xe] }
  0xc9   :  { %8856 = vmatmul.msk.bf16.gmra.mxu0 %vm1772_vm5, %v1747_v24  ;;  %9009 = vmatmul.msk.bf16.vlgmr.msrb.gmra.mxu1 %vm1772_vm5, %v9624_v16  ;;  %v3896_v33 = vrot.slane %v3895_v28, 4  ;;  %v3916_v53 = vshrl.u32 %v3786_v39, 16  ;;  %v9042_v56 = vrot.slane %v2471_v44, 9  ;;  %v2580_v58 = vrot.slane %v2578_v41, 4  ;;  %v10379_v5 = vpop.f32.mrf.mxu1  ;;  %12388 = vst [vmem:[#allocation10_spill] sm:$0xff] %v10386_v10 }
  0xca   :  { %v2581_v60 = vrot.slane %v9727_v59, 5  ;;  %v4648_v62 = vunpack.c.l.b16 %v3891_v43  ;;  %v3905_v0 = vrot.slane %v3903_v45, 4  ;;  %v3908_v1 = vrot.slane %v3906_v51, 5  ;;  %v10388_v24 = vpop.f32.mrf.mxu0  ;;  %v3811_v10 = vld [vmem:[#allocation2 + $0x80] sm:$0x1] }
  0xcb   :  { %v3901_v47 = vsel %vm9938_vm6, %v3896_v33, %v3900_v34  ;;  %v3914_v2 = vrot.slane %v3912_v52, 5  ;;  %v3918_v3 = vrot.slane %v3916_v53, 4  ;;  %v2579_v6 = vsel %vm10330_vm9, %v9042_v56, %v2578_v41  ;;  %v9728_v33 = vld [vmem:[#allocation2 + $0x1c] sm:$0xf]  ;;  %v9729_v53 = vld [vmem:[#allocation2 + $0x20] sm:$0x1] }
  0xcc   :  { %v4649_v63 = vunpack.c.l.b16 %v3901_v47  ;;  %v2582_v7 = vsel %vm10330_vm9, %v2580_v58, %v2581_v60  ;;  %v3909_v16 = vor.u32 %v3908_v1, %v3905_v0  ;;  %v3922_v18 = vshll.u32 %v3787_v4, 16  ;;  %v10391_v25 = vpop.f32.mrf.mxu3  ;;  %v9657_v56 = vld [vmem:[#allocation2 + $0x18] sm:$0xff]  ;;  %v3790_v1 = vld [vmem:[#allocation2 + $0x2c] sm:$0x1] }
  0xcd   :  { %v3919_v17 = vor.u32 %v3918_v3, %v3914_v2  ;;  %v2797_v20 = vunpack.c.l.b16 %v2579_v6  ;;  %v2798_v23 = vunpack.c.l.b16 %v2582_v7  ;;  %12389 = vst [vmem:[#allocation11_spill] sm:$0xff] %v10391_v25  ;;  %v2585_v34 = vrot.slane %v9728_v33, 5 }
  0xce   :  { %v4712_v11 = vpack.c.b16 %v4649_v63, %v4648_v62  ;;  %v3910_v28 = vrot.slane %v3909_v16, 4  ;;  %v3924_v31 = vrot.slane %v3922_v18, 5  ;;  %v3930_v39 = vshll.u32 %v3788_v26, 16 }
  0xcf   :  { %9074 = vmatmul.msk.bf16.vlgmr.msrb.gmra.mxu2 %vm1772_vm5, %v2859_v38  ;;  %v3920_v30 = vrot.slane %v3919_v17, 4  ;;  %v2860_v32 = vpack.c.b16 %v2798_v23, %v2797_v20  ;;  %v3927_v38 = vshrl.u32 %v3788_v26, 16  ;;  %v3936_v40 = vshll.u32 %v3789_v27, 16  ;;  %v9626_v17 = vld [vmem:[#allocation2 + $0x18] sm:$0xff] }
  0xd0   :  { %v3940_v41 = vshrl.u32 %v3789_v27, 16  ;;  %v3915_v44 = vsel %vm9938_vm6, %v3910_v28, %v3914_v2  ;;  %v9043_v51 = vrot.slane %v2472_v35, 9  ;;  %v2587_v52 = vrot.slane %v2585_v34, 4 }
  0xd1   :  { %v10394_v43 = vpop.f32.mrf.mxu1  ;;  %v3925_v45 = vsel %vm9938_vm6, %v3920_v30, %v3924_v31  ;;  %v3929_v58 = vrot.slane %v3927_v38, 4  ;;  %v3932_v59 = vrot.slane %v3930_v39, 5  ;;  %v3938_v60 = vrot.slane %v3936_v40, 5  ;;  %v3791_v31 = vld [vmem:[#allocation2 + $0x30] sm:$0xf] }
  0xd2   :  { %v10400_v47 = vpop.f32.mrf.mxu2  ;;  %v3942_v62 = vrot.slane %v3940_v41, 4  ;;  %v4650_v63 = vunpack.c.l.b16 %v3915_v44  ;;  %v4651_v0 = vunpack.c.l.b16 %v3925_v45  ;;  %v2586_v3 = vsel %vm10330_vm9, %v9043_v51, %v2585_v34  ;;  %v9730_v39 = vld [vmem:[#allocation2 + $0x28] sm:$0xf]  ;;  %v2473_v44 = vld [vmem:[#allocation2 + $0x24] sm:$0xe] }
  0xd3   :  { %9235 = vmatmul.msk.bf16.vlgmr.msrb.gmra.mxu3 %vm1772_vm5, %v9656_v55  ;;  %12390 = vst [vmem:[#allocation12_spill] sm:$0xff] %v10400_v47  ;;  %v2588_v55 = vrot.slane %v9729_v53, 5  ;;  %v3933_v7 = vor.u32 %v3932_v59, %v3929_v58  ;;  %v2799_v18 = vunpack.c.l.b16 %v2586_v3  ;;  %v2592_v40 = vrot.slane %v9730_v39, 5  ;;  %v9658_v58 = vld [vmem:[#allocation2 + $0x24] sm:$0xff] }
  0xd4   :  { %v4713_v16 = vpack.c.b16 %v4651_v0, %v4650_v63  ;;  %v3951_v45 = vshrl.u32 %v3791_v31, 16  ;;  %v3954_v51 = vshll.u32 %v3791_v31, 16  ;;  %v9627_v31 = vld [vmem:[#allocation2 + $0x24] sm:$0xff] }
  0xd5   :  { %v2589_v6 = vsel %vm10330_vm9, %v2587_v52, %v2588_v55  ;;  %v3934_v26 = vrot.slane %v3933_v7, 4  ;;  %v9731_v55 = vld [vmem:[#allocation2 + $0x2c] sm:$0x1]  ;;  %v2594_v63 = vrot.slane %v2592_v40, 4 }
  0xd6   :  { %v2800_v20 = vunpack.c.l.b16 %v2589_v6  ;;  %v3953_v0 = vrot.slane %v3951_v45, 4 }
  0xd7   :  { %v10403_v2 = vpop.f32.mrf.mxu0  ;;  %v3939_v34 = vsel %vm9938_vm6, %v3934_v26, %v3938_v60 }
  0xd8   :  { %v10407_v4 = vpop.f32.mrf.mxu3  ;;  %v2861_v33 = vpack.c.b16 %v2800_v20, %v2799_v18  ;;  %v4652_v59 = vunpack.c.l.b16 %v3939_v34 }
  0xd9   :  { %9268 = vmatmul.msk.bf16.vlgmr.msrb.gmra.mxu0 %vm1772_vm5, %v4712_v11  ;;  %9010 = vmatmul.msk.bf16.gmra.mxu1 %vm1772_vm5, %v9625_v12  ;;  %12391 = vst [vmem:[#allocation13_spill] sm:$0xff] %v10407_v4  ;;  %v3943_v11 = vor.u32 %v3942_v62, %v3938_v60  ;;  %v3946_v12 = vshll.u32 %v3790_v1, 16  ;;  %v9044_v62 = vrot.slane %v2473_v44, 9  ;;  %v3956_v1 = vrot.slane %v3954_v51, 5  ;;  %v3794_v51 = vld [vmem:[#allocation2 + $0x3c] sm:$0xf] }
  0xda   :  { %v10414_v30 = vpop.f32.mrf.mxu2 }
  0xdb   :  { %v3944_v27 = vrot.slane %v3943_v11, 4  ;;  %v3948_v28 = vrot.slane %v3946_v12, 5  ;;  %12392 = vst [vmem:[#allocation14_spill] sm:$0xff] %v10414_v30  ;;  %v3793_v11 = vld [vmem:[#allocation2 + $0x38] sm:$0x1]  ;;  %v3957_v20 = vor.u32 %v3956_v1, %v3953_v0 }
  0xdd   :  { %v10412_v23 = vpop.f32.mrf.mxu1  ;;  %v3949_v35 = vsel %vm9938_vm6, %v3944_v27, %v3948_v28  ;;  %v3970_v27 = vshll.u32 %v3793_v11, 16 }
  0xde   :  { %v4653_v60 = vunpack.c.l.b16 %v3949_v35  ;;  %v3958_v35 = vrot.slane %v3957_v20, 4 }
  0xdf   :  { %9075 = vmatmul.msk.bf16.gmra.mxu2 %vm1772_vm5, %v2860_v32  ;;  %v3792_v32 = vld [vmem:[#allocation2 + $0x34] sm:$0xf]  ;;  %v10422_v38 = vpop.f32.mrf.mxu0  ;;  %v3972_v44 = vrot.slane %v3970_v27, 5 }
  0xe0   :  { %v10424_v41 = vpop.f32.mrf.mxu3  ;;  %v3960_v52 = vshll.u32 %v3792_v32, 16  ;;  %v3964_v53 = vshrl.u32 %v3792_v32, 16  ;;  %v4714_v18 = vpack.c.b16 %v4653_v60, %v4652_v59  ;;  %v2474_v60 = vld [vmem:[#allocation2 + $0x30] sm:$0xe] }
  0xe1   :  { %12393 = vst [vmem:[#allocation15_spill] sm:$0xff] %v10424_v41 }
  0xe2   :  { %v3962_v3 = vrot.slane %v3960_v52, 5  ;;  %v3966_v6 = vrot.slane %v3964_v53, 4  ;;  %v3795_v52 = vld [vmem:[#allocation2 + $0x40] sm:$0xf] }
  0xe3   :  { %9236 = vmatmul.msk.bf16.gmra.mxu3 %vm1772_vm5, %v9657_v56  ;;  %v2595_v56 = vrot.slane %v9731_v55, 5  ;;  %v9732_v55 = vld [vmem:[#allocation2 + $0x34] sm:$0xf]  ;;  %v3984_v0 = vshll.u32 %v3795_v52, 16  ;;  %v3988_v1 = vshrl.u32 %v3795_v52, 16 }
  0xe4   :  { %v3967_v26 = vor.u32 %v3966_v6, %v3962_v3  ;;  %v9733_v6 = vld [vmem:[#allocation2 + $0x38] sm:$0x1] }
  0xe5   :  { %v10427_v7 = vpop.f32.mrf.mxu1  ;;  %v2602_v11 = vrot.slane %v9733_v6, 5  ;;  %v3798_v6 = vld [vmem:[#allocation2 + $0x4c] sm:$0xf] }
  0xe6   :  { %v3968_v39 = vrot.slane %v3967_v26, 4 }
  0xe8   :  { %v3973_v59 = vsel %vm9938_vm6, %v3968_v39, %v3972_v44  ;;  %v3796_v39 = vld [vmem:[#allocation2 + $0x44] sm:$0x1] }
  0xe9   :  { %9269 = vmatmul.msk.bf16.gmra.mxu0 %vm1772_vm5, %v4713_v16  ;;  %9011 = vmatmul.msk.bf16.gmra.mxu1 %vm1772_vm5, %v9626_v17  ;;  %v2593_v16 = vsel %vm10330_vm9, %v9044_v62, %v2592_v40  ;;  %v2596_v17 = vsel %vm10330_vm9, %v2594_v63, %v2595_v56  ;;  %v2599_v56 = vrot.slane %v9732_v55, 5  ;;  %v3975_v62 = vshrl.u32 %v3794_v51, 16  ;;  %v9628_v55 = vld [vmem:[#allocation2 + $0x30] sm:$0xff] }
  0xea   :  { %v10429_v12 = vpop.f32.mrf.mxu2  ;;  %v2801_v32 = vunpack.c.l.b16 %v2593_v16  ;;  %v3978_v63 = vshll.u32 %v3794_v51, 16  ;;  %v9659_v16 = vld [vmem:[#allocation2 + $0x30] sm:$0xff]  ;;  %v4655_v27 = vunpack.c.l.b16 %v3973_v59 }
  0xeb   :  { %12394 = vst [vmem:[#allocation16_spill] sm:$0xff] %v10429_v12  ;;  %v2601_v20 = vrot.slane %v2599_v56, 4 }
  0xee   :  { %v10436_v28 = vpop.f32.mrf.mxu0  ;;  %v10438_v34 = vpop.f32.mrf.mxu3 }
  0xef   :  { %9076 = vmatmul.msk.bf16.gmra.mxu2 %vm1772_vm5, %v2861_v33  ;;  %v2802_v33 = vunpack.c.l.b16 %v2596_v17  ;;  %12395 = vst [vmem:[#allocation17_spill] sm:$0xff] %v10438_v34 }
  0xf1   :  { %v2862_v40 = vpack.c.b16 %v2802_v33, %v2801_v32  ;;  %v3980_v32 = vrot.slane %v3978_v63, 5  ;;  %v3986_v33 = vrot.slane %v3984_v0, 5 }
  0xf2   :  { %v10442_v45 = vpop.f32.mrf.mxu1  ;;  %v10444_v53 = vpop.f32.mrf.mxu2 }
  0xf3   :  { %9237 = vmatmul.msk.bf16.gmra.mxu3 %vm1772_vm5, %v9658_v58  ;;  %12396 = vst [vmem:[#allocation18_spill] sm:$0xff] %v10444_v53  ;;  %v3963_v58 = vsel %vm9938_vm6, %v3958_v35, %v3962_v3  ;;  %v3990_v35 = vrot.slane %v3988_v1, 4  ;;  %v3797_v1 = vld [vmem:[#allocation2 + $0x48] sm:$0xf] }
  0xf4   :  { %v4654_v26 = vunpack.c.l.b16 %v3963_v58 }
  0xf5   :  { %v3991_v59 = vor.u32 %v3990_v35, %v3986_v33  ;;  %v3999_v35 = vshrl.u32 %v3797_v1, 16 }
  0xf6   :  { %v10451_v17 = vpop.f32.mrf.mxu0  ;;  %v10453_v3 = vpop.f32.mrf.mxu3  ;;  %v4715_v51 = vpack.c.b16 %v4655_v27, %v4654_v26  ;;  %v9734_v27 = vld [vmem:[#allocation2 + $0x40] sm:$0xf] }
  0xf7   :  { %12397 = vst [vmem:[#allocation19_spill] sm:$0xff] %v10453_v3 }
  0xf9   :  { %9270 = vmatmul.msk.bf16.gmra.mxu0 %vm1772_vm5, %v4714_v18  ;;  %9012 = vmatmul.msk.bf16.gmra.mxu1 %vm1772_vm5, %v9627_v31  ;;  %v9045_v18 = vrot.slane %v2474_v60, 9  ;;  %v3977_v31 = vrot.slane %v3975_v62, 4  ;;  %v3994_v60 = vshll.u32 %v3796_v39, 16  ;;  %v4002_v39 = vshll.u32 %v3797_v1, 16 }
  0xfa   :  { %v10460_v52 = vpop.f32.mrf.mxu1  ;;  %v4001_v1 = vrot.slane %v3999_v35, 4 }
  0xfb   :  { %v2600_v44 = vsel %vm10330_vm9, %v9045_v18, %v2599_v56  ;;  %v3981_v58 = vor.u32 %v3980_v32, %v3977_v31  ;;  %v3996_v18 = vrot.slane %v3994_v60, 5  ;;  %v2606_v31 = vrot.slane %v9734_v27, 5  ;;  %v2475_v32 = vld [vmem:[#allocation2 + $0x3c] sm:$0xe] }
  0xfc   :  { %v2803_v63 = vunpack.c.l.b16 %v2600_v44  ;;  %v4008_v44 = vshll.u32 %v3798_v6, 16  ;;  %v9046_v60 = vrot.slane %v2475_v32, 9 }
  0xfd   :  { %v3982_v56 = vrot.slane %v3981_v58, 4 }
  0xfe   :  { %v10462_v62 = vpop.f32.mrf.mxu2 }
  0xff   :  { %9077 = vmatmul.msk.bf16.gmra.mxu2 %vm1772_vm5, %v2862_v40  ;;  %v2603_v40 = vsel %vm10330_vm9, %v2601_v20, %v2602_v11  ;;  %12398 = vst [vmem:[#allocation20_spill] sm:$0xff] %v10462_v62  ;;  %v3992_v11 = vrot.slane %v3991_v59, 4 }
 0x100   :  { %v2804_v0 = vunpack.c.l.b16 %v2603_v40  ;;  %v4012_v40 = vshrl.u32 %v3798_v6, 16  ;;  %v4010_v6 = vrot.slane %v4008_v44, 5  ;;  %v9629_v44 = vld [vmem:[#allocation2 + $0x3c] sm:$0xff] }
 0x101   :  { %v3997_v3 = vsel %vm9938_vm6, %v3992_v11, %v3996_v18  ;;  %v2607_v11 = vsel %vm10330_vm9, %v9046_v60, %v2606_v31 }
 0x102   :  { %v2863_v20 = vpack.c.b16 %v2804_v0, %v2803_v63  ;;  %v2608_v63 = vrot.slane %v2606_v31, 4  ;;  %v9660_v0 = vld [vmem:[#allocation2 + $0x3c] sm:$0xff]  ;;  %v4014_v34 = vrot.slane %v4012_v40, 4  ;;  %v2805_v40 = vunpack.c.l.b16 %v2607_v11 }
 0x103   :  { %9238 = vmatmul.msk.bf16.gmra.mxu3 %vm1772_vm5, %v9659_v16 }
 0x105   :  { %v10465_v16 = vpop.f32.mrf.mxu0 }
 0x106   :  { %v10477_v27 = vpop.f32.mrf.mxu2 }
 0x107   :  { %v10468_v26 = vpop.f32.mrf.mxu3  ;;  %12400 = vst [vmem:[#allocation22_spill] sm:$0xff] %v10477_v27 }
 0x108   :  { %12399 = vst [vmem:[#allocation21_spill] sm:$0xff] %v10468_v26  ;;  %v4004_v26 = vrot.slane %v4002_v39, 5 }
 0x109   :  { %9271 = vmatmul.msk.bf16.gmra.mxu0 %vm1772_vm5, %v4715_v51  ;;  %9013 = vmatmul.msk.bf16.gmra.mxu1 %vm1772_vm5, %v9628_v55  ;;  %v3987_v51 = vsel %vm9938_vm6, %v3982_v56, %v3986_v33  ;;  %v9735_v55 = vld [vmem:[#allocation2 + $0x44] sm:$0x1]  ;;  %v4657_v33 = vunpack.c.l.b16 %v3997_v3  ;;  %v3799_v56 = vld [vmem:[#allocation2 + $0x50] sm:$0x1] }
 0x10a   :  { %v2609_v58 = vrot.slane %v9735_v55, 5  ;;  %v4656_v41 = vunpack.c.l.b16 %v3987_v51  ;;  %v4005_v32 = vor.u32 %v4004_v26, %v4001_v1  ;;  %v4015_v55 = vor.u32 %v4014_v34, %v4010_v6  ;;  %v3800_v26 = vld [vmem:[#allocation2 + $0x54] sm:$0xf]  ;;  %v3801_v34 = vld [vmem:[#allocation2 + $0x58] sm:$0xf] }
 0x10b   :  { %v10475_v59 = vpop.f32.mrf.mxu1  ;;  %v4018_v4 = vshll.u32 %v3799_v56, 16  ;;  %v4023_v1 = vshrl.u32 %v3800_v26, 16  ;;  %v4032_v56 = vshll.u32 %v3801_v34, 16  ;;  %v4036_v11 = vshrl.u32 %v3801_v34, 16 }
 0x10c   :  { %v4716_v35 = vpack.c.b16 %v4657_v33, %v4656_v41  ;;  %v4006_v51 = vrot.slane %v4005_v32, 4  ;;  %v4016_v25 = vrot.slane %v4015_v55, 4  ;;  %v4026_v33 = vshll.u32 %v3800_v26, 16  ;;  %v3802_v26 = vld [vmem:[#allocation2 + $0x5c] sm:$0x1] }
 0x10d   :  { %v10482_v18 = vpop.f32.mrf.mxu0  ;;  %v4020_v54 = vrot.slane %v4018_v4, 5  ;;  %v2476_v4 = vld [vmem:[#allocation2 + $0x48] sm:$0xe]  ;;  %v2616_v32 = vrot.slane %v10268_v46, 5 }
 0x10e   :  { %v4011_v41 = vsel %vm9938_vm6, %v4006_v51, %v4010_v6  ;;  %v4038_v51 = vrot.slane %v4036_v11, 4 }
 0x10f   :  { %9078 = vmatmul.msk.bf16.gmra.mxu2 %vm1772_vm5, %v2863_v20  ;;  %v2610_v20 = vsel %vm10330_vm9, %v2608_v63, %v2609_v58  ;;  %v10486_v39 = vpop.f32.mrf.mxu3  ;;  %v4021_v63 = vsel %vm9938_vm6, %v4016_v25, %v4020_v54  ;;  %v4658_v6 = vunpack.c.l.b16 %v4011_v41  ;;  %v4025_v25 = vrot.slane %v4023_v1, 4 }
 0x110   :  { %12401 = vst [vmem:[#allocation23_spill] sm:$0xff] %v10486_v39  ;;  %v2806_v3 = vunpack.c.l.b16 %v2610_v20  ;;  %v4042_v1 = vshll.u32 %v3802_v26, 16 }
 0x112   :  { %v2864_v58 = vpack.c.b16 %v2806_v3, %v2805_v40  ;;  %v9047_v40 = vrot.slane %v2476_v4, 9  ;;  %v4034_v3 = vrot.slane %v4032_v56, 5 }
 0x113   :  { %9239 = vmatmul.msk.bf16.gmra.mxu3 %vm1772_vm5, %v9660_v0  ;;  %v10489_v31 = vpop.f32.mrf.mxu1  ;;  %v2613_v0 = vrot.slane %v10266_v42, 5  ;;  %v4028_v42 = vrot.slane %v4026_v33, 5  ;;  %v9630_v33 = vld [vmem:[#allocation2 + $0x48] sm:$0xff] }
 0x114   :  { %v4039_v4 = vor.u32 %v4038_v51, %v4034_v3 }
 0x115   :  { %v2615_v54 = vrot.slane %v2613_v0, 4  ;;  %v2614_v46 = vsel %vm10330_vm9, %v9047_v40, %v2613_v0 }
 0x116   :  { %v2807_v56 = vunpack.c.l.b16 %v2614_v46  ;;  %v4040_v21 = vrot.slane %v4039_v4, 4 }
 0x117   :  { %v10492_v60 = vpop.f32.mrf.mxu2 }
 0x118   :  { %12402 = vst [vmem:[#allocation24_spill] sm:$0xff] %v10492_v60 }
 0x119   :  { %9272 = vmatmul.msk.bf16.gmra.mxu0 %vm1772_vm5, %v4716_v35  ;;  %9014 = vmatmul.msk.bf16.gmra.mxu1 %vm1772_vm5, %v9629_v44  ;;  %v10499_v20 = vpop.f32.mrf.mxu0  ;;  %v9661_v35 = vld [vmem:[#allocation2 + $0x48] sm:$0xff]  ;;  %v4659_v44 = vunpack.c.l.b16 %v4021_v63  ;;  %v4029_v63 = vor.u32 %v4028_v42, %v4025_v25  ;;  %v2477_v42 = vld [vmem:[#allocation2 + $0x54] sm:$0xe] }
 0x11a   :  { %v9048_v4 = vrot.slane %v2477_v42, 9 }
 0x11b   :  { %v10503_v55 = vpop.f32.mrf.mxu3  ;;  %v4717_v41 = vpack.c.b16 %v4659_v44, %v4658_v6  ;;  %v4030_v13 = vrot.slane %v4029_v63, 4  ;;  %v3804_v6 = vld [vmem:[#allocation2 + $0x64] sm:$0xf]  ;;  %v2620_v44 = vrot.slane %v10311_v19, 5  ;;  %v2623_v63 = vrot.slane %v10315_v22, 5  ;;  %v9662_v19 = vld [vmem:[#allocation2 + $0x54] sm:$0xff] }
 0x11c   :  { %12403 = vst [vmem:[#allocation25_spill] sm:$0xff] %v10503_v55 }
 0x11d   :  { %v4035_v40 = vsel %vm9938_vm6, %v4030_v13, %v4034_v3 }
 0x11e   :  { %v4660_v13 = vunpack.c.l.b16 %v4035_v40  ;;  %v9631_v40 = vld [vmem:[#allocation2 + $0x54] sm:$0xff] }
 0x11f   :  { %9079 = vmatmul.msk.bf16.gmra.mxu2 %vm1772_vm5, %v2864_v58  ;;  %v10508_v34 = vpop.f32.mrf.mxu2  ;;  %v2617_v58 = vsel %vm10330_vm9, %v2615_v54, %v2616_v32  ;;  %v3803_v32 = vld [vmem:[#allocation2 + $0x60] sm:$0xf] }
 0x120   :  { %12404 = vst [vmem:[#allocation26_spill] sm:$0xff] %v10508_v34  ;;  %v2808_v11 = vunpack.c.l.b16 %v2617_v58  ;;  %v4044_v34 = vrot.slane %v4042_v1, 5  ;;  %v4047_v26 = vshrl.u32 %v3803_v32, 16  ;;  %v4050_v46 = vshll.u32 %v3803_v32, 16  ;;  %v3805_v32 = vld [vmem:[#allocation2 + $0x68] sm:$0x1] }
 0x121   :  { %v10505_v39 = vpop.f32.mrf.mxu1  ;;  %v10514_v55 = vpop.f32.mrf.mxu0  ;;  %v4056_v58 = vshll.u32 %v3804_v6, 16  ;;  %v2622_v1 = vrot.slane %v2620_v44, 4 }
 0x122   :  { %v2865_v0 = vpack.c.b16 %v2808_v11, %v2807_v56  ;;  %v4045_v54 = vsel %vm9938_vm6, %v4040_v21, %v4044_v34  ;;  %v4049_v21 = vrot.slane %v4047_v26, 4  ;;  %v4052_v34 = vrot.slane %v4050_v46, 5 }
 0x123   :  { %9240 = vmatmul.msk.bf16.gmra.mxu3 %vm1772_vm5, %v9661_v35  ;;  %v10517_v35 = vpop.f32.mrf.mxu3  ;;  %v4661_v3 = vunpack.c.l.b16 %v4045_v54  ;;  %v4058_v56 = vrot.slane %v4056_v58, 5  ;;  %v2624_v22 = vsel %vm10330_vm9, %v2622_v1, %v2623_v63  ;;  %v3807_v1 = vld [vmem:[#allocation2 + $0x70] sm:$0xf] }
 0x124   :  { %12405 = vst [vmem:[#allocation27_spill] sm:$0xff] %v10517_v35  ;;  %v4053_v54 = vor.u32 %v4052_v34, %v4049_v21  ;;  %v2810_v58 = vunpack.c.l.b16 %v2624_v22 }
 0x129   :  { %9273 = vmatmul.msk.bf16.gmra.mxu0 %vm1772_vm5, %v4717_v41  ;;  %9015 = vmatmul.msk.bf16.gmra.mxu1 %vm1772_vm5, %v9630_v33  ;;  %v10525_v25 = vpop.f32.mrf.mxu1  ;;  %v4060_v41 = vshrl.u32 %v3804_v6, 16  ;;  %v4718_v6 = vpack.c.b16 %v4661_v3, %v4660_v13  ;;  %v9736_v3 = vld [vmem:[#allocation2 + $0x64] sm:$0xf] }
 0x12a   :  { %v2627_v21 = vrot.slane %v9736_v3, 5 }
 0x12b   :  { %v4062_v11 = vrot.slane %v4060_v41, 4 }
 0x12c   :  { %v10527_v51 = vpop.f32.mrf.mxu2 }
 0x12d   :  { %12406 = vst [vmem:[#allocation28_spill] sm:$0xff] %v10527_v51  ;;  %v4063_v42 = vor.u32 %v4062_v11, %v4058_v56  ;;  %v4066_v51 = vshll.u32 %v3805_v32, 16  ;;  %v2478_v11 = vld [vmem:[#allocation2 + $0x60] sm:$0xe] }
 0x12e   :  { %v9049_v3 = vrot.slane %v2478_v11, 9 }
 0x12f   :  { %9080 = vmatmul.msk.bf16.gmra.mxu2 %vm1772_vm5, %v2865_v0  ;;  %v2621_v0 = vsel %vm10330_vm9, %v9048_v4, %v2620_v44  ;;  %v4064_v44 = vrot.slane %v4063_v42, 4  ;;  %v4068_v4 = vrot.slane %v4066_v51, 5  ;;  %v4084_v51 = vshrl.u32 %v3807_v1, 16  ;;  %v9737_v42 = vld [vmem:[#allocation2 + $0x68] sm:$0x1] }
 0x130   :  { %v10531_v33 = vpop.f32.mrf.mxu0  ;;  %v10533_v35 = vpop.f32.mrf.mxu3  ;;  %v2809_v46 = vunpack.c.l.b16 %v2621_v0 }
 0x131   :  { %12407 = vst [vmem:[#allocation29_spill] sm:$0xff] %v10533_v35  ;;  %v3806_v35 = vld [vmem:[#allocation2 + $0x6c] sm:$0xf] }
 0x132   :  { %v2866_v63 = vpack.c.b16 %v2810_v58, %v2809_v46  ;;  %v4071_v32 = vshrl.u32 %v3806_v35, 16  ;;  %v4074_v0 = vshll.u32 %v3806_v35, 16  ;;  %v2630_v46 = vrot.slane %v9737_v42, 5  ;;  %v9663_v58 = vld [vmem:[#allocation2 + $0x60] sm:$0xff] }
 0x133   :  { %9241 = vmatmul.msk.bf16.gmra.mxu3 %vm1772_vm5, %v9662_v19  ;;  %v4054_v19 = vrot.slane %v4053_v54, 4 }
 0x134   :  { %v10542_v41 = vpop.f32.mrf.mxu2  ;;  %v4073_v35 = vrot.slane %v4071_v32, 4  ;;  %v4076_v27 = vrot.slane %v4074_v0, 5 }
 0x135   :  { %12408 = vst [vmem:[#allocation30_spill] sm:$0xff] %v10542_v41  ;;  %v4059_v22 = vsel %vm9938_vm6, %v4054_v19, %v4058_v56  ;;  %v4086_v19 = vrot.slane %v4084_v51, 4 }
 0x136   :  { %v10540_v26 = vpop.f32.mrf.mxu1  ;;  %v4662_v41 = vunpack.c.l.b16 %v4059_v22  ;;  %v4077_v11 = vor.u32 %v4076_v27, %v4073_v35  ;;  %v9632_v22 = vld [vmem:[#allocation2 + $0x60] sm:$0xff]  ;;  %v3809_v27 = vld [vmem:[#allocation2 + $0x78] sm:$0xf] }
 0x138   :  { %v10546_v13 = vpop.f32.mrf.mxu0  ;;  %v10548_v34 = vpop.f32.mrf.mxu3 }
 0x139   :  { %9274 = vmatmul.msk.bf16.gmra.mxu0 %vm1772_vm5, %v4718_v6  ;;  %9016 = vmatmul.msk.bf16.gmra.mxu1 %vm1772_vm5, %v9631_v40  ;;  %12409 = vst [vmem:[#allocation31_spill] sm:$0xff] %v10548_v34  ;;  %v4069_v6 = vsel %vm9938_vm6, %v4064_v44, %v4068_v4  ;;  %v4080_v40 = vshll.u32 %v3807_v1, 16  ;;  %v2629_v34 = vrot.slane %v2627_v21, 4  ;;  %v3808_v44 = vld [vmem:[#allocation2 + $0x74] sm:$0x1]  ;;  %v2628_v4 = vsel %vm10330_vm9, %v9049_v3, %v2627_v21 }
 0x13a   :  { %v4663_v60 = vunpack.c.l.b16 %v4069_v6  ;;  %v4090_v0 = vshll.u32 %v3808_v44, 16  ;;  %v2811_v51 = vunpack.c.l.b16 %v2628_v4  ;;  %v4095_v44 = vshrl.u32 %v3809_v27, 16 }
 0x13b   :  { %v4082_v56 = vrot.slane %v4080_v40, 5  ;;  %v4098_v4 = vshll.u32 %v3809_v27, 16 }
 0x13c   :  { %v4719_v1 = vpack.c.b16 %v4663_v60, %v4662_v41  ;;  %v4092_v60 = vrot.slane %v4090_v0, 5  ;;  %v9739_v0 = vld [vmem:[#allocation2 + $0x74] sm:$0x1]  ;;  %v4097_v12 = vrot.slane %v4095_v44, 4  ;;  %v4114_v44 = vshll.u32 %v3811_v10, 16 }
 0x13d   :  { %v4087_v32 = vor.u32 %v4086_v19, %v4082_v56  ;;  %v2479_v19 = vld [vmem:[#allocation2 + $0x6c] sm:$0xe]  ;;  %v4100_v30 = vrot.slane %v4098_v4, 5 }
 0x13e   :  { %v10555_v54 = vpop.f32.mrf.mxu1 }
 0x13f   :  { %9081 = vmatmul.msk.bf16.gmra.mxu2 %vm1772_vm5, %v2866_v63  ;;  %v2631_v63 = vsel %vm10330_vm9, %v2629_v34, %v2630_v46  ;;  %v4088_v21 = vrot.slane %v4087_v32, 4  ;;  %v3810_v34 = vld [vmem:[#allocation2 + $0x7c] sm:$0xf]  ;;  %v9738_v46 = vld [vmem:[#allocation2 + $0x70] sm:$0xf] }
 0x140   :  { %v2634_v3 = vrot.slane %v9738_v46, 5  ;;  %v9664_v46 = vld [vmem:[#allocation2 + $0x6c] sm:$0xff] }
 0x142   :  { %v10557_v62 = vpop.f32.mrf.mxu2 }
 0x143   :  { %12410 = vst [vmem:[#allocation32_spill] sm:$0xff] %v10557_v62  ;;  %9242 = vmatmul.msk.bf16.gmra.mxu3 %vm1772_vm5, %v9663_v58  ;;  %v2812_v62 = vunpack.c.l.b16 %v2631_v63  ;;  %v4078_v58 = vrot.slane %v4077_v11, 4  ;;  %v4104_v11 = vshll.u32 %v3810_v34, 16 }
 0x145   :  { %v2867_v41 = vpack.c.b16 %v2812_v62, %v2811_v51  ;;  %v4083_v35 = vsel %vm9938_vm6, %v4078_v58, %v4082_v56  ;;  %v2637_v51 = vrot.slane %v9739_v0, 5  ;;  %v9050_v56 = vrot.slane %v2479_v19, 9 }
 0x146   :  { %v10564_v42 = vpop.f32.mrf.mxu0  ;;  %v10566_v6 = vpop.f32.mrf.mxu3  ;;  %v2636_v58 = vrot.slane %v2634_v3, 4  ;;  %v4101_v0 = vor.u32 %v4100_v30, %v4097_v12  ;;  %v3812_v30 = vld [vmem:[#allocation2 + $0x84] sm:$0xf] }
 0x147   :  { %12411 = vst [vmem:[#allocation33_spill] sm:$0xff] %v10566_v6  ;;  %v2310_v40 = vpop.f32.mrf.mxu1  ;;  %v4664_v6 = vunpack.c.l.b16 %v4083_v35 }
 0x148   :  { %v2311_v27 = vadd.f32 %v2310_v40, %v10307_v14  ;;  %v2638_v35 = vsel %vm10330_vm9, %v2636_v58, %v2637_v51  ;;  %v9633_v14 = vld [vmem:[#allocation2 + $0x6c] sm:$0xff]  ;;  %v9740_v58 = vld [vmem:[#allocation2 + $0x7c] sm:$0xf] }
 0x149   :  { %9275 = vmatmul.msk.bf16.gmra.mxu0 %vm1772_vm5, %v4719_v1  ;;  %9017 = vmatmul.msk.bf16.gmra.mxu1 %vm1772_vm5, %v9632_v22  ;;  %v4093_v1 = vsel %vm9938_vm6, %v4088_v21, %v4092_v60  ;;  %v4108_v22 = vshrl.u32 %v3810_v34, 16  ;;  %v4106_v21 = vrot.slane %v4104_v11, 5 }
 0x14a   :  { %v10569_v53 = vpop.f32.mrf.mxu2 }
 0x14b   :  { %12412 = vst [vmem:[#allocation34_spill] sm:$0xff] %v10569_v53  ;;  %v4665_v53 = vunpack.c.l.b16 %v4093_v1  ;;  %v4110_v60 = vrot.slane %v4108_v22, 4  ;;  %v2814_v22 = vunpack.c.l.b16 %v2638_v35  ;;  %v4119_v35 = vshrl.u32 %v3812_v30, 16 }
 0x14d   :  { %v4720_v19 = vpack.c.b16 %v4665_v53, %v4664_v6  ;;  %v4111_v40 = vor.u32 %v4110_v60, %v4106_v21  ;;  %v4116_v53 = vrot.slane %v4114_v44, 5  ;;  %v2641_v60 = vrot.slane %v9740_v58, 5 }
 0x14e   :  { %v10574_v63 = vpop.f32.mrf.mxu0  ;;  %v10578_v32 = vpop.f32.mrf.mxu3 }
 0x14f   :  { %12413 = vst [vmem:[#allocation35_spill] sm:$0xff] %v10578_v32  ;;  %9082 = vmatmul.msk.bf16.gmra.mxu2 %vm1772_vm5, %v2867_v41  ;;  %v2312_v62 = vpop.f32.mrf.mxu1  ;;  %v2635_v41 = vsel %vm10330_vm9, %v9050_v56, %v2634_v3  ;;  %v4112_v51 = vrot.slane %v4111_v40, 4  ;;  %v3813_v56 = vld [vmem:[#allocation2 + $0x88] sm:$0xf]  ;;  %v9741_v40 = vld [vmem:[#allocation2 + $0x80] sm:$0x1] }
 0x150   :  { %v2813_v11 = vunpack.c.l.b16 %v2635_v41  ;;  %v2480_v41 = vld [vmem:[#allocation2 + $0x78] sm:$0xe] }
 0x152   :  { %v2999_v47 = vpop.f32.mrf.mxu2  ;;  %v2868_v10 = vpack.c.b16 %v2814_v22, %v2813_v11  ;;  %v9665_v22 = vld [vmem:[#allocation2 + $0x78] sm:$0xff] }
 0x153   :  { %v3159_v34 = vadd.f32 %v2999_v47, %v2311_v27  ;;  %9243 = vmatmul.msk.bf16.gmra.mxu3 %vm1772_vm5, %v9664_v46  ;;  %v2313_v46 = vadd.f32 %v2312_v62, %v10349_v8  ;;  %v4102_v27 = vrot.slane %v4101_v0, 4  ;;  %v4122_v8 = vshll.u32 %v3812_v30, 16 }
 0x154   :  { %v4128_v0 = vshll.u32 %v3813_v56, 16  ;;  %v4121_v30 = vrot.slane %v4119_v35, 4 }
 0x155   :  { %v4124_v58 = vrot.slane %v4122_v8, 5  ;;  %v4138_v8 = vshll.u32 %v3814_v36, 16 }
 0x156   :  { %v4852_v32 = vpop.f32.mrf.mxu0  ;;  %v3558_v4 = vpop.f32.mrf.mxu3 }
 0x157   :  { %v2315_v1 = vpop.f32.mrf.mxu1  ;;  %v3718_v47 = vadd.f32 %v3558_v4, %v3159_v34  ;;  %v4107_v34 = vsel %vm9938_vm6, %v4102_v27, %v4106_v21  ;;  %v2643_v21 = vrot.slane %v2641_v60, 4 }
 0x158   :  { %v2316_v27 = vadd.f32 %v2315_v1, %v10374_v48  ;;  %v4125_v48 = vor.u32 %v4124_v58, %v4121_v30 }
 0x159   :  { %9276 = vmatmul.msk.bf16.gmra.mxu0 %vm1772_vm5, %v4720_v19  ;;  %9018 = vmatmul.msk.bf16.gmra.mxu1 %vm1772_vm5, %v9633_v14  ;;  %v10590_v12 = vadd.f32 %v4852_v32, %v3718_v47  ;;  %v4117_v19 = vsel %vm9938_vm6, %v4112_v51, %v4116_v53  ;;  %v4132_v14 = vshrl.u32 %v3813_v56, 16  ;;  %v2644_v32 = vrot.slane %v9741_v40, 5 }
 0x15a   :  { %v3001_v3 = vpop.f32.mrf.mxu2  ;;  %v4666_v47 = vunpack.c.l.b16 %v4107_v34  ;;  %v4130_v51 = vrot.slane %v4128_v0, 5 }
 0x15b   :  { %12414 = vst [vmem:[#allocation36_spill] sm:$0xff] %v10590_v12  ;;  %v3160_v6 = vadd.f32 %v3001_v3, %v2313_v46  ;;  %v9051_v46 = vrot.slane %v2480_v41, 9  ;;  %v4667_v3 = vunpack.c.l.b16 %v4117_v19  ;;  %v4134_v53 = vrot.slane %v4132_v14, 4  ;;  %v9634_v41 = vld [vmem:[#allocation2 + $0x78] sm:$0xff] }
 0x15d   :  { %v4721_v34 = vpack.c.b16 %v4667_v3, %v4666_v47  ;;  %v4135_v35 = vor.u32 %v4134_v53, %v4130_v51  ;;  %v3815_v47 = vld [vmem:[#allocation2 + $0x90] sm:$0xf]  ;;  %v9742_v3 = vld [vmem:[#allocation2 + $0x88] sm:$0xf]  ;;  %v2481_v53 = vld [vmem:[#allocation2 + $0x84] sm:$0xe] }
 0x15e   :  { %v4854_v62 = vpop.f32.mrf.mxu0  ;;  %v3560_v44 = vpop.f32.mrf.mxu3  ;;  %v2648_v30 = vrot.slane %v9742_v3, 5 }
 0x15f   :  { %9083 = vmatmul.msk.bf16.gmra.mxu2 %vm1772_vm5, %v2868_v10  ;;  %v2317_v4 = vpop.f32.mrf.mxu1  ;;  %v3719_v11 = vadd.f32 %v3560_v44, %v3160_v6  ;;  %v2642_v6 = vsel %vm10330_vm9, %v9051_v46, %v2641_v60  ;;  %v2645_v10 = vsel %vm10330_vm9, %v2643_v21, %v2644_v32  ;;  %v4136_v32 = vrot.slane %v4135_v35, 4 }
 0x160   :  { %v2816_v14 = vunpack.c.l.b16 %v2645_v10  ;;  %v2318_v44 = vadd.f32 %v2317_v4, %v10388_v24  ;;  %v4146_v24 = vshll.u32 %v3815_v47, 16 }
 0x161   :  { %v10598_v56 = vadd.f32 %v4854_v62, %v3719_v11  ;;  %v2815_v62 = vunpack.c.l.b16 %v2642_v6  ;;  %v4126_v11 = vrot.slane %v4125_v48, 4  ;;  %v9743_v48 = vld [vmem:[#allocation2 + $0x8c] sm:$0x1] }
 0x162   :  { %v3004_v12 = vpop.f32.mrf.mxu2 }
 0x163   :  { %v3161_v40 = vadd.f32 %v3004_v12, %v2316_v27  ;;  %9244 = vmatmul.msk.bf16.gmra.mxu3 %vm1772_vm5, %v9665_v22  ;;  %v4140_v22 = vrot.slane %v4138_v8, 5  ;;  %v2869_v36 = vpack.c.b16 %v2816_v14, %v2815_v62  ;;  %v3816_v27 = vld [vmem:[#allocation2 + $0x94] sm:$0xf]  ;;  %v4131_v58 = vsel %vm9938_vm6, %v4126_v11, %v4130_v51 }
 0x164   :  { %v4152_v10 = vshll.u32 %v3816_v27, 16  ;;  %v4668_v62 = vunpack.c.l.b16 %v4131_v58  ;;  %v9052_v14 = vrot.slane %v2481_v53, 9  ;;  %v2650_v51 = vrot.slane %v2648_v30, 4  ;;  %v9635_v53 = vld [vmem:[#allocation2 + $0x84] sm:$0xff] }
 0x165   :  { %v4141_v6 = vsel %vm9938_vm6, %v4136_v32, %v4140_v22 }
 0x166   :  { %v4857_v1 = vpop.f32.mrf.mxu0  ;;  %v3563_v19 = vpop.f32.mrf.mxu3  ;;  %v4154_v32 = vrot.slane %v4152_v10, 5 }
 0x167   :  { %v2320_v0 = vpop.f32.mrf.mxu1  ;;  %v3720_v12 = vadd.f32 %v3563_v19, %v3161_v40  ;;  %v4143_v40 = vshrl.u32 %v3815_v47, 16  ;;  %v9666_v19 = vld [vmem:[#allocation2 + $0x84] sm:$0xff] }
 0x169   :  { %9277 = vmatmul.msk.bf16.gmra.mxu0 %vm1772_vm5, %v4721_v34  ;;  %9019 = vmatmul.msk.bf16.gmra.mxu1 %vm1772_vm5, %v9634_v41  ;;  %v10608_v46 = vadd.f32 %v4857_v1, %v3720_v12  ;;  %v4156_v34 = vshrl.u32 %v3816_v27, 16  ;;  %v2651_v1 = vrot.slane %v9743_v48, 5  ;;  %v2321_v12 = vadd.f32 %v2320_v0, %v10403_v2  ;;  %v3817_v48 = vld [vmem:[#allocation2 + $0x98] sm:$0x1] }
 0x16a   :  { %v3006_v60 = vpop.f32.mrf.mxu2  ;;  %v4145_v11 = vrot.slane %v4143_v40, 4 }
 0x16b   :  { %v3162_v21 = vadd.f32 %v3006_v60, %v2318_v44  ;;  %v4669_v44 = vunpack.c.l.b16 %v4141_v6  ;;  %v4148_v60 = vrot.slane %v4146_v24, 5  ;;  %v4158_v22 = vrot.slane %v4156_v34, 4 }
 0x16c   :  { %v4162_v24 = vshll.u32 %v3817_v48, 16 }
 0x16d   :  { %v4722_v58 = vpack.c.b16 %v4669_v44, %v4668_v62  ;;  %v4149_v2 = vor.u32 %v4148_v60, %v4145_v11  ;;  %v4159_v40 = vor.u32 %v4158_v22, %v4154_v32  ;;  %v3819_v11 = vld [vmem:[#allocation2 + $0xa0] sm:$0xf]  ;;  %v9744_v60 = vld [vmem:[#allocation2 + $0x94] sm:$0xf] }
 0x16e   :  { %v4859_v4 = vpop.f32.mrf.mxu0  ;;  %v3565_v41 = vpop.f32.mrf.mxu3  ;;  %v4164_v62 = vrot.slane %v4162_v24, 5 }
 0x16f   :  { %9084 = vmatmul.msk.bf16.gmra.mxu2 %vm1772_vm5, %v2869_v36  ;;  %v2322_v35 = vpop.f32.mrf.mxu1  ;;  %v3721_v8 = vadd.f32 %v3565_v41, %v3162_v21  ;;  %v2649_v21 = vsel %vm10330_vm9, %v9052_v14, %v2648_v30  ;;  %v2652_v36 = vsel %vm10330_vm9, %v2650_v51, %v2651_v1  ;;  %v4160_v1 = vrot.slane %v4159_v40, 4  ;;  %v3818_v14 = vld [vmem:[#allocation2 + $0x9c] sm:$0xf] }
 0x170   :  { %v2818_v34 = vunpack.c.l.b16 %v2652_v36  ;;  %v4167_v48 = vshrl.u32 %v3818_v14, 16  ;;  %v4176_v36 = vshll.u32 %v3819_v11, 16 }
 0x171   :  { %v10616_v27 = vadd.f32 %v4859_v4, %v3721_v8  ;;  %v2817_v4 = vunpack.c.l.b16 %v2649_v21  ;;  %v2323_v8 = vadd.f32 %v2322_v35, %v10422_v38  ;;  %v4170_v38 = vshll.u32 %v3818_v14, 16 }
 0x172   :  { %v3009_v47 = vpop.f32.mrf.mxu2  ;;  %v4165_v21 = vsel %vm9938_vm6, %v4160_v1, %v4164_v62  ;;  %v4178_v1 = vrot.slane %v4176_v36, 5 }
 0x173   :  { %v3163_v3 = vadd.f32 %v3009_v47, %v2321_v12  ;;  %9245 = vmatmul.msk.bf16.gmra.mxu3 %vm1772_vm5, %v9666_v19  ;;  %v4150_v19 = vrot.slane %v4149_v2, 4  ;;  %v2870_v44 = vpack.c.b16 %v2818_v34, %v2817_v4  ;;  %v2655_v47 = vrot.slane %v9744_v60, 5  ;;  %v9745_v2 = vld [vmem:[#allocation2 + $0x98] sm:$0x1] }
 0x175   :  { %v4155_v22 = vsel %vm9938_vm6, %v4150_v19, %v4154_v32  ;;  %v2657_v32 = vrot.slane %v2655_v47, 4  ;;  %v4169_v19 = vrot.slane %v4167_v48, 4 }
 0x176   :  { %v4862_v0 = vpop.f32.mrf.mxu0  ;;  %v3568_v6 = vpop.f32.mrf.mxu3  ;;  %v4670_v4 = vunpack.c.l.b16 %v4155_v22 }
 0x177   :  { %v2325_v10 = vpop.f32.mrf.mxu1  ;;  %v3722_v41 = vadd.f32 %v3568_v6, %v3163_v3  ;;  %v2482_v3 = vld [vmem:[#allocation2 + $0x90] sm:$0xe] }
 0x178   :  { %v9667_v6 = vld [vmem:[#allocation2 + $0x90] sm:$0xff]  ;;  %v9053_v34 = vrot.slane %v2482_v3, 9 }
 0x179   :  { %9278 = vmatmul.msk.bf16.gmra.mxu0 %vm1772_vm5, %v4722_v58  ;;  %9020 = vmatmul.msk.bf16.gmra.mxu1 %vm1772_vm5, %v9635_v53  ;;  %v10626_v51 = vadd.f32 %v4862_v0, %v3722_v41  ;;  %v4180_v58 = vshrl.u32 %v3819_v11, 16  ;;  %v2658_v0 = vrot.slane %v9745_v2, 5  ;;  %v2326_v41 = vadd.f32 %v2325_v10, %v10436_v28  ;;  %v3820_v2 = vld [vmem:[#allocation2 + $0xa4] sm:$0x1]  ;;  %v9636_v3 = vld [vmem:[#allocation2 + $0x90] sm:$0xff] }
 0x17a   :  { %v3011_v30 = vpop.f32.mrf.mxu2 }
 0x17b   :  { %v3164_v12 = vadd.f32 %v3011_v30, %v2323_v8  ;;  %v4671_v8 = vunpack.c.l.b16 %v4165_v21  ;;  %v4172_v30 = vrot.slane %v4170_v38, 5  ;;  %v4182_v62 = vrot.slane %v4180_v58, 4 }
 0x17c   :  { %v4186_v38 = vshll.u32 %v3820_v2, 16 }
 0x17d   :  { %v4723_v22 = vpack.c.b16 %v4671_v8, %v4670_v4  ;;  %v4173_v28 = vor.u32 %v4172_v30, %v4169_v19  ;;  %v4183_v48 = vor.u32 %v4182_v62, %v4178_v1  ;;  %v3822_v19 = vld [vmem:[#allocation2 + $0xac] sm:$0xf]  ;;  %v8836_v30 = vld [vmem:[%s12375_s1 + $0xc0] sm:$0xff]  }
 0x17e   :  { %v4864_v35 = vpop.f32.mrf.mxu0  ;;  %v3570_v53 = vpop.f32.mrf.mxu3  ;;  %v4188_v4 = vrot.slane %v4186_v38, 5  ;;  %457 = vst [vmem:[#allocation4] sm:$0xff] %v8836_v30  }
 0x17f   :  { %9085 = vmatmul.msk.bf16.gmra.mxu2 %vm1772_vm5, %v2870_v44  ;;  %v2327_v40 = vpop.f32.mrf.mxu1  ;;  %v3723_v24 = vadd.f32 %v3570_v53, %v3164_v12  ;;  %v2656_v12 = vsel %vm10330_vm9, %v9053_v34, %v2655_v47  ;;  %v2659_v44 = vsel %vm10330_vm9, %v2657_v32, %v2658_v0  ;;  %v4184_v0 = vrot.slane %v4183_v48, 4  ;;  %v3821_v34 = vld [vmem:[#allocation2 + $0xa8] sm:$0xf] }
 0x180   :  { %v2820_v58 = vunpack.c.l.b16 %v2659_v44  ;;  %v4194_v2 = vshll.u32 %v3821_v34, 16 }
 0x181   :  { %v10634_v11 = vadd.f32 %v4864_v35, %v3723_v24  ;;  %v2819_v35 = vunpack.c.l.b16 %v2656_v12  ;;  %v2328_v24 = vadd.f32 %v2327_v40, %v10451_v17  ;;  %v2483_v40 = vld [vmem:[#allocation2 + $0x9c] sm:$0xe]  ;;  %v4189_v44 = vsel %vm9938_vm6, %v4184_v0, %v4188_v4 }
 0x182   :  { %v3014_v14 = vpop.f32.mrf.mxu2  ;;  %v4196_v4 = vrot.slane %v4194_v2, 5 }
 0x183   :  { %v3165_v60 = vadd.f32 %v3014_v14, %v2326_v41  ;;  %9246 = vmatmul.msk.bf16.gmra.mxu3 %vm1772_vm5, %v9667_v6  ;;  %v4174_v6 = vrot.slane %v4173_v28, 4  ;;  %v2871_v8 = vpack.c.b16 %v2820_v58, %v2819_v35  ;;  %v9746_v14 = vld [vmem:[#allocation2 + $0xa0] sm:$0xf]  ;;  %v4204_v28 = vshrl.u32 %v3822_v19, 16 }
 0x184   :  { %v2662_v62 = vrot.slane %v9746_v14, 5  ;;  %v9668_v35 = vld [vmem:[#allocation2 + $0x9c] sm:$0xff]  ;;  %v3823_v14 = vld [vmem:[#allocation2 + $0xb0] sm:$0x1] }
 0x185   :  { %v4179_v17 = vsel %vm9938_vm6, %v4174_v6, %v4178_v1  ;;  %v4206_v30 = vrot.slane %v4204_v28, 4 }
 0x186   :  { %v4867_v10 = vpop.f32.mrf.mxu0  ;;  %v3573_v21 = vpop.f32.mrf.mxu3  ;;  %v4672_v58 = vunpack.c.l.b16 %v4179_v17  ;;  %v2664_v1 = vrot.slane %v2662_v62, 4  ;;  %v780_v17 = vld [vmem:[#allocation4] sm:$0xf] }
 0x187   :  { %v2330_v36 = vpop.f32.mrf.mxu1  ;;  %v3724_v53 = vadd.f32 %v3573_v21, %v3165_v60  ;;  %v4191_v60 = vshrl.u32 %v3821_v34, 16  ;;  %787 = vst.msk [vmem:[#allocation2 + $0xc0] sm:$0xf] %vm682_vm1, %v780_v17 }
 0x188   :  { %v2331_v6 = vadd.f32 %v2330_v36, %v10465_v16 }
 0x189   :  { %9279 = vmatmul.msk.bf16.gmra.mxu0 %vm1772_vm5, %v4723_v22  ;;  %9021 = vmatmul.msk.bf16.gmra.mxu1 %vm1772_vm5, %v9636_v3  ;;  %v10644_v32 = vadd.f32 %v4867_v10, %v3724_v53  ;;  %v4200_v22 = vshll.u32 %v3822_v19, 16  ;;  %v9747_v10 = vld [vmem:[#allocation2 + $0xa4] sm:$0x1]  ;;  %v9054_v53 = vrot.slane %v2483_v40, 9  ;;  %v4193_v0 = vrot.slane %v4191_v60, 4 }
 0x18a   :  { %v3016_v47 = vpop.f32.mrf.mxu2  ;;  %v2665_v3 = vrot.slane %v9747_v10, 5  ;;  %v781_v40 = vld [vmem:[#allocation4 + $0x4] sm:$0xf] }
 0x18b   :  { %v3166_v41 = vadd.f32 %v3016_v47, %v2328_v24  ;;  %v8838_v24 = vld [vmem:[%s12375_s1 + $0xc8] sm:$0xf]  ;;  %v4673_v47 = vunpack.c.l.b16 %v4189_v44  ;;  %v4202_v19 = vrot.slane %v4200_v22, 5  ;;  %v2663_v10 = vsel %vm10330_vm9, %v9054_v53, %v2662_v62  ;;  %788 = vst.msk [vmem:[#allocation2 + $0xc4] sm:$0xf] %vm682_vm1, %v781_v40 }
 0x18c   :  { %461 = vst [vmem:[#allocation4 + $0x8] sm:$0xf] %v8838_v24  ;;  %v2666_v16 = vsel %vm10330_vm9, %v2664_v1, %v2665_v3  ;;  %v4197_v60 = vor.u32 %v4196_v4, %v4193_v0  ;;  %v4210_v22 = vshll.u32 %v3823_v14, 16 }
 0x18d   :  { %v4724_v36 = vpack.c.b16 %v4673_v47, %v4672_v58  ;;  %v4207_v44 = vor.u32 %v4206_v30, %v4202_v19  ;;  %v3824_v47 = vld [vmem:[#allocation2 + $0xb4] sm:$0xf]  ;;  %v3825_v30 = vld [vmem:[#allocation2 + $0xb8] sm:$0xf] }
 0x18e   :  { %v4869_v12 = vpop.f32.mrf.mxu0  ;;  %v3575_v48 = vpop.f32.mrf.mxu3  ;;  %v4198_v3 = vrot.slane %v4197_v60, 4  ;;  %v4212_v1 = vrot.slane %v4210_v22, 5  ;;  %v4218_v40 = vshll.u32 %v3824_v47, 16  ;;  %v4228_v60 = vshrl.u32 %v3825_v30, 16 }
 0x18f   :  { %9086 = vmatmul.msk.bf16.gmra.mxu2 %vm1772_vm5, %v2871_v8  ;;  %v2332_v38 = vpop.f32.mrf.mxu1  ;;  %v3725_v21 = vadd.f32 %v3575_v48, %v3166_v41  ;;  %v4208_v53 = vrot.slane %v4207_v44, 4 }
 0x190   :  { %v2333_v62 = vadd.f32 %v2332_v38, %v10482_v18  ;;  %v4203_v17 = vsel %vm9938_vm6, %v4198_v3, %v4202_v19  ;;  %v2484_v18 = vld [vmem:[#allocation2 + $0xa8] sm:$0xe]  ;;  %v4215_v38 = vshrl.u32 %v3824_v47, 16 }
 0x191   :  { %v10658_v8 = vadd.f32 %v4869_v12, %v3725_v21  ;;  %v9637_v12 = vld [vmem:[#allocation2 + $0x9c] sm:$0xff]  ;;  %v2821_v21 = vunpack.c.l.b16 %v2663_v10 }
 0x192   :  { %v3019_v34 = vpop.f32.mrf.mxu2  ;;  %v4217_v3 = vrot.slane %v4215_v38, 4 }
 0x193   :  { %v3167_v41 = vadd.f32 %v3019_v34, %v2331_v6  ;;  %9247 = vmatmul.msk.bf16.gmra.mxu3 %vm1772_vm5, %v9668_v35  ;;  %v2822_v35 = vunpack.c.l.b16 %v2666_v16  ;;  %v782_v6 = vld [vmem:[#allocation4 + $0x8] sm:$0x1]  ;;  %v4213_v16 = vsel %vm9938_vm6, %v4208_v53, %v4212_v1  ;;  %v4230_v1 = vrot.slane %v4228_v60, 4 }
 0x194   :  { %789 = vst.msk [vmem:[#allocation2 + $0xc8] sm:$0x1] %vm685_vm2, %v782_v6 }
 0x195   :  { %v2872_v34 = vpack.c.b16 %v2822_v35, %v2821_v21  ;;  %v9669_v21 = vld [vmem:[#allocation2 + $0xa8] sm:$0xff]  ;;  %v4674_v35 = vunpack.c.l.b16 %v4203_v17 }
 0x196   :  { %v4872_v2 = vpop.f32.mrf.mxu0  ;;  %v3578_v28 = vpop.f32.mrf.mxu3 }
 0x197   :  { %v2335_v48 = vpop.f32.mrf.mxu1  ;;  %v3726_v24 = vadd.f32 %v3578_v28, %v3167_v41  ;;  %v9748_v41 = vld [vmem:[#allocation2 + $0xac] sm:$0xf] }
 0x198   :  { %v2669_v14 = vrot.slane %v9748_v41, 5  ;;  %v2336_v6 = vadd.f32 %v2335_v48, %v10499_v20 }
 0x199   :  { %9280 = vmatmul.msk.bf16.gmra.mxu0 %vm1772_vm5, %v4724_v36  ;;  %9022 = vmatmul.msk.bf16.gmra.mxu1 %vm1772_vm5, %v9637_v12  ;;  %v10671_v0 = vadd.f32 %v4872_v2, %v3726_v24  ;;  %v4224_v36 = vshll.u32 %v3825_v30, 16  ;;  %v9749_v12 = vld [vmem:[#allocation2 + $0xb0] sm:$0x1]  ;;  %v9055_v24 = vrot.slane %v2484_v18, 9  ;;  %v9638_v18 = vld [vmem:[#allocation2 + $0xa8] sm:$0xff] }
 0x19a   :  { %v3021_v58 = vpop.f32.mrf.mxu2  ;;  %v2672_v2 = vrot.slane %v9749_v12, 5  ;;  %v2671_v19 = vrot.slane %v2669_v14, 4  ;;  %v3826_v12 = vld [vmem:[#allocation2 + $0xbc] sm:$0x1] }
 0x19b   :  { %v3168_v4 = vadd.f32 %v3021_v58, %v2333_v62  ;;  %v4675_v62 = vunpack.c.l.b16 %v4213_v16  ;;  %v4220_v58 = vrot.slane %v4218_v40, 5  ;;  %v4226_v53 = vrot.slane %v4224_v36, 5 }
 0x19c   :  { %v4234_v40 = vshll.u32 %v3826_v12, 16 }
 0x19d   :  { %v4725_v17 = vpack.c.b16 %v4675_v62, %v4674_v35  ;;  %v4221_v20 = vor.u32 %v4220_v58, %v4217_v3  ;;  %v4231_v38 = vor.u32 %v4230_v1, %v4226_v53  ;;  %v3828_v3 = vld [vmem:[#allocation2 + $0xc4] sm:$0xf]  ;;  %v9750_v58 = vld [vmem:[#allocation2 + $0xb8] sm:$0xf] }
 0x19e   :  { %v4874_v10 = vpop.f32.mrf.mxu0  ;;  %v3580_v44 = vpop.f32.mrf.mxu3  ;;  %v4236_v35 = vrot.slane %v4234_v40, 5 }
 0x19f   :  { %9087 = vmatmul.msk.bf16.gmra.mxu2 %vm1772_vm5, %v2872_v34  ;;  %v2337_v22 = vpop.f32.mrf.mxu1  ;;  %v3727_v28 = vadd.f32 %v3580_v44, %v3168_v4  ;;  %v2670_v4 = vsel %vm10330_vm9, %v9055_v24, %v2669_v14  ;;  %v2673_v34 = vsel %vm10330_vm9, %v2671_v19, %v2672_v2  ;;  %v4232_v2 = vrot.slane %v4231_v38, 4  ;;  %v3827_v24 = vld [vmem:[#allocation2 + $0xc0] sm:$0xf] }
 0x1a0   :  { %v2824_v60 = vunpack.c.l.b16 %v2673_v34  ;;  %v4239_v12 = vshrl.u32 %v3827_v24, 16  ;;  %v4248_v34 = vshll.u32 %v3828_v3, 16 }
 0x1a1   :  { %v10679_v30 = vadd.f32 %v4874_v10, %v3727_v28  ;;  %v2823_v10 = vunpack.c.l.b16 %v2670_v4  ;;  %v2338_v28 = vadd.f32 %v2337_v22, %v10514_v55  ;;  %v4242_v55 = vshll.u32 %v3827_v24, 16 }
 0x1a2   :  { %v3024_v47 = vpop.f32.mrf.mxu2  ;;  %v4237_v4 = vsel %vm9938_vm6, %v4232_v2, %v4236_v35  ;;  %v4250_v2 = vrot.slane %v4248_v34, 5 }
 0x1a3   :  { %v3169_v41 = vadd.f32 %v3024_v47, %v2336_v6  ;;  %9248 = vmatmul.msk.bf16.gmra.mxu3 %vm1772_vm5, %v9669_v21  ;;  %v4222_v21 = vrot.slane %v4221_v20, 4  ;;  %v2873_v62 = vpack.c.b16 %v2824_v60, %v2823_v10  ;;  %v2676_v47 = vrot.slane %v9750_v58, 5  ;;  %v9751_v20 = vld [vmem:[#allocation2 + $0xbc] sm:$0x1] }
 0x1a5   :  { %v4227_v1 = vsel %vm9938_vm6, %v4222_v21, %v4226_v53  ;;  %v2678_v53 = vrot.slane %v2676_v47, 4  ;;  %v4241_v21 = vrot.slane %v4239_v12, 4 }
 0x1a6   :  { %v4877_v48 = vpop.f32.mrf.mxu0  ;;  %v3583_v16 = vpop.f32.mrf.mxu3  ;;  %v4676_v10 = vunpack.c.l.b16 %v4227_v1 }
 0x1a7   :  { %v2340_v36 = vpop.f32.mrf.mxu1  ;;  %v3728_v44 = vadd.f32 %v3583_v16, %v3169_v41  ;;  %v2485_v41 = vld [vmem:[#allocation2 + $0xb4] sm:$0xe] }
 0x1a8   :  { %v9670_v16 = vld [vmem:[#allocation2 + $0xb4] sm:$0xff]  ;;  %v9056_v60 = vrot.slane %v2485_v41, 9 }
 0x1a9   :  { %9281 = vmatmul.msk.bf16.gmra.mxu0 %vm1772_vm5, %v4725_v17  ;;  %9023 = vmatmul.msk.bf16.gmra.mxu1 %vm1772_vm5, %v9638_v18  ;;  %v10689_v19 = vadd.f32 %v4877_v48, %v3728_v44  ;;  %v4252_v17 = vshrl.u32 %v3828_v3, 16  ;;  %v2679_v48 = vrot.slane %v9751_v20, 5  ;;  %v2341_v44 = vadd.f32 %v2340_v36, %v10531_v33  ;;  %v3829_v20 = vld [vmem:[#allocation2 + $0xc8] sm:$0x1]  ;;  %v9639_v41 = vld [vmem:[#allocation2 + $0xb4] sm:$0xff] }
 0x1aa   :  { %v3026_v14 = vpop.f32.mrf.mxu2 }
 0x1ab   :  { %v3170_v6 = vadd.f32 %v3026_v14, %v2338_v28  ;;  %v4677_v28 = vunpack.c.l.b16 %v4237_v4  ;;  %v4244_v14 = vrot.slane %v4242_v55, 5  ;;  %v4254_v35 = vrot.slane %v4252_v17, 4 }
 0x1ac   :  { %v4258_v55 = vshll.u32 %v3829_v20, 16 }
 0x1ad   :  { %v4726_v1 = vpack.c.b16 %v4677_v28, %v4676_v10  ;;  %v4245_v33 = vor.u32 %v4244_v14, %v4241_v21  ;;  %v4255_v12 = vor.u32 %v4254_v35, %v4250_v2  ;;  %v3831_v21 = vld [vmem:[#allocation2 + $0xe8] sm:$0xf]  ;;  %v9752_v14 = vld [vmem:[#allocation2 + $0xdc] sm:$0xf] }
 0x1ae   :  { %v4879_v22 = vpop.f32.mrf.mxu0  ;;  %v3585_v18 = vpop.f32.mrf.mxu3  ;;  %v4260_v10 = vrot.slane %v4258_v55, 5 }
 0x1af   :  { %9088 = vmatmul.msk.bf16.gmra.mxu2 %vm1772_vm5, %v2873_v62  ;;  %v2342_v38 = vpop.f32.mrf.mxu1  ;;  %v3729_v40 = vadd.f32 %v3585_v18, %v3170_v6  ;;  %v2677_v6 = vsel %vm10330_vm9, %v9056_v60, %v2676_v47  ;;  %v2680_v62 = vsel %vm10330_vm9, %v2678_v53, %v2679_v48  ;;  %v4256_v48 = vrot.slane %v4255_v12, 4  ;;  %v3830_v60 = vld [vmem:[#allocation2 + $0xe4] sm:$0xf] }
 0x1b0   :  { %v2826_v17 = vunpack.c.l.b16 %v2680_v62  ;;  %v4263_v20 = vshrl.u32 %v3830_v60, 16  ;;  %v4272_v62 = vshll.u32 %v3831_v21, 16 }
 0x1b1   :  { %v10697_v3 = vadd.f32 %v4879_v22, %v3729_v40  ;;  %v2825_v22 = vunpack.c.l.b16 %v2677_v6  ;;  %v2343_v40 = vadd.f32 %v2342_v38, %v10546_v13  ;;  %v4266_v13 = vshll.u32 %v3830_v60, 16 }
 0x1b2   :  { %v3029_v24 = vpop.f32.mrf.mxu2  ;;  %v4261_v6 = vsel %vm9938_vm6, %v4256_v48, %v4260_v10  ;;  %v4274_v48 = vrot.slane %v4272_v62, 5 }
 0x1b3   :  { %v3171_v58 = vadd.f32 %v3029_v24, %v2341_v44  ;;  %9249 = vmatmul.msk.bf16.gmra.mxu3 %vm1772_vm5, %v9670_v16  ;;  %v4246_v16 = vrot.slane %v4245_v33, 4  ;;  %v2874_v28 = vpack.c.b16 %v2826_v17, %v2825_v22  ;;  %v2683_v24 = vrot.slane %v9752_v14, 5  ;;  %v9753_v33 = vld [vmem:[#allocation2 + $0xe0] sm:$0x1] }
 0x1b5   :  { %v4251_v35 = vsel %vm9938_vm6, %v4246_v16, %v4250_v2  ;;  %v2685_v2 = vrot.slane %v2683_v24, 4  ;;  %v4265_v16 = vrot.slane %v4263_v20, 4 }
 0x1b6   :  { %v4882_v36 = vpop.f32.mrf.mxu0  ;;  %v3588_v4 = vpop.f32.mrf.mxu3  ;;  %v4678_v22 = vunpack.c.l.b16 %v4251_v35 }
 0x1b7   :  { %v2345_v34 = vpop.f32.mrf.mxu1  ;;  %v3730_v18 = vadd.f32 %v3588_v4, %v3171_v58  ;;  %v2486_v58 = vld [vmem:[#allocation2 + $0xd8] sm:$0xe]  ;;  %v9671_v4 = vld [vmem:[#allocation2 + $0xc0] sm:$0xff] }
 0x1b8   :  { %v9057_v17 = vrot.slane %v2486_v58, 9  ;;  %v9640_v58 = vld [vmem:[#allocation2 + $0xd8] sm:$0xff] }
 0x1b9   :  { %9282 = vmatmul.msk.bf16.gmra.mxu0 %vm1772_vm5, %v4726_v1  ;;  %9024 = vmatmul.msk.bf16.gmra.mxu1 %vm1772_vm5, %v9639_v41  ;;  %v10707_v53 = vadd.f32 %v4882_v36, %v3730_v18  ;;  %v4276_v1 = vshrl.u32 %v3831_v21, 16  ;;  %v2686_v36 = vrot.slane %v9753_v33, 5  ;;  %v2346_v18 = vadd.f32 %v2345_v34, %v10564_v42  ;;  %v3832_v33 = vld [vmem:[#allocation2 + $0xec] sm:$0x1] }
 0x1ba   :  { %v3031_v47 = vpop.f32.mrf.mxu2 }
 0x1bb   :  { %v3172_v44 = vadd.f32 %v3031_v47, %v2343_v40  ;;  %v4679_v40 = vunpack.c.l.b16 %v4261_v6  ;;  %v4268_v47 = vrot.slane %v4266_v13, 5  ;;  %v4278_v10 = vrot.slane %v4276_v1, 4 }
 0x1bc   :  { %v4282_v13 = vshll.u32 %v3832_v33, 16 }
 0x1bd   :  { %v4727_v35 = vpack.c.b16 %v4679_v40, %v4678_v22  ;;  %v4269_v42 = vor.u32 %v4268_v47, %v4265_v16  ;;  %v4279_v20 = vor.u32 %v4278_v10, %v4274_v48  ;;  %v3834_v16 = vld [vmem:[#allocation2 + $0xf4] sm:$0xf]  ;;  %v9754_v47 = vld [vmem:[#allocation2 + $0xe8] sm:$0xf] }
 0x1be   :  { %v4884_v38 = vpop.f32.mrf.mxu0  ;;  %v3590_v41 = vpop.f32.mrf.mxu3  ;;  %v4284_v22 = vrot.slane %v4282_v13, 5 }
 0x1bf   :  { %9089 = vmatmul.msk.bf16.gmra.mxu2 %vm1772_vm5, %v2874_v28  ;;  %v2347_v12 = vpop.f32.mrf.mxu1  ;;  %v3731_v55 = vadd.f32 %v3590_v41, %v3172_v44  ;;  %v2684_v44 = vsel %vm10330_vm9, %v9057_v17, %v2683_v24  ;;  %v2687_v28 = vsel %vm10330_vm9, %v2685_v2, %v2686_v36  ;;  %v4280_v36 = vrot.slane %v4279_v20, 4  ;;  %v3833_v17 = vld [vmem:[#allocation2 + $0xf0] sm:$0xf] }
 0x1c0   :  { %v2828_v1 = vunpack.c.l.b16 %v2687_v28  ;;  %v4287_v33 = vshrl.u32 %v3833_v17, 16  ;;  %v4296_v28 = vshll.u32 %v3834_v16, 16 }
 0x1c1   :  { %v10715_v21 = vadd.f32 %v4884_v38, %v3731_v55  ;;  %v2827_v38 = vunpack.c.l.b16 %v2684_v44  ;;  %v2348_v55 = vadd.f32 %v2347_v12, %v10574_v63  ;;  %v4290_v63 = vshll.u32 %v3833_v17, 16 }
 0x1c2   :  { %v3034_v60 = vpop.f32.mrf.mxu2  ;;  %v4285_v44 = vsel %vm9938_vm6, %v4280_v36, %v4284_v22  ;;  %v4298_v36 = vrot.slane %v4296_v28, 5 }
 0x1c3   :  { %v3173_v14 = vadd.f32 %v3034_v60, %v2346_v18  ;;  %9250 = vmatmul.msk.bf16.gmra.mxu3 %vm1772_vm5, %v9671_v4  ;;  %v4270_v4 = vrot.slane %v4269_v42, 4  ;;  %v2875_v40 = vpack.c.b16 %v2828_v1, %v2827_v38  ;;  %v2690_v60 = vrot.slane %v9754_v47, 5  ;;  %v9755_v42 = vld [vmem:[#allocation2 + $0xec] sm:$0x1] }
 0x1c5   :  { %v4275_v10 = vsel %vm9938_vm6, %v4270_v4, %v4274_v48  ;;  %v2692_v48 = vrot.slane %v2690_v60, 4  ;;  %v4289_v4 = vrot.slane %v4287_v33, 4 }
 0x1c6   :  { %v4887_v34 = vpop.f32.mrf.mxu0  ;;  %v3593_v6 = vpop.f32.mrf.mxu3  ;;  %v4680_v38 = vunpack.c.l.b16 %v4275_v10 }
 0x1c7   :  { %v2350_v62 = vpop.f32.mrf.mxu1  ;;  %v3732_v41 = vadd.f32 %v3593_v6, %v3173_v14  ;;  %v2487_v14 = vld [vmem:[#allocation2 + $0xe4] sm:$0xe] }
 0x1c8   :  { %v9672_v6 = vld [vmem:[#allocation2 + $0xe4] sm:$0xff]  ;;  %v9058_v1 = vrot.slane %v2487_v14, 9 }
 0x1c9   :  { %9283 = vmatmul.msk.bf16.gmra.mxu0 %vm1772_vm5, %v4727_v35  ;;  %9025 = vmatmul.msk.bf16.gmra.mxu1 %vm1772_vm5, %v9640_v58  ;;  %v10725_v2 = vadd.f32 %v4887_v34, %v3732_v41  ;;  %v4300_v35 = vshrl.u32 %v3834_v16, 16  ;;  %v2693_v34 = vrot.slane %v9755_v42, 5  ;;  %v2351_v41 = vadd.f32 %v2350_v62, %v10290_v29  ;;  %v3835_v42 = vld [vmem:[#allocation2 + $0xf8] sm:$0x1]  ;;  %v9641_v14 = vld [vmem:[#allocation2 + $0xe4] sm:$0xff] }
 0x1ca   :  { %v3036_v24 = vpop.f32.mrf.mxu2 }
 0x1cb   :  { %v3174_v18 = vadd.f32 %v3036_v24, %v2348_v55  ;;  %v4681_v55 = vunpack.c.l.b16 %v4285_v44  ;;  %v4292_v24 = vrot.slane %v4290_v63, 5  ;;  %v4302_v22 = vrot.slane %v4300_v35, 4 }
 0x1cc   :  { %v4306_v63 = vshll.u32 %v3835_v42, 16 }
 0x1cd   :  { %v4728_v10 = vpack.c.b16 %v4681_v55, %v4680_v38  ;;  %v4293_v29 = vor.u32 %v4292_v24, %v4289_v4  ;;  %v4303_v33 = vor.u32 %v4302_v22, %v4298_v36  ;;  %v3837_v4 = vld [vmem:[#allocation2 + $0x100] sm:$0xf]  ;;  %v9756_v24 = vld [vmem:[#allocation2 + $0xf4] sm:$0xf] }
 0x1ce   :  { %v4889_v12 = vpop.f32.mrf.mxu0  ;;  %v3595_v58 = vpop.f32.mrf.mxu3  ;;  %v4308_v38 = vrot.slane %v4306_v63, 5 }
 0x1cf   :  { %9090 = vmatmul.msk.bf16.gmra.mxu2 %vm1772_vm5, %v2875_v40  ;;  %v2352_v20 = vpop.f32.mrf.mxu1  ;;  %v3733_v13 = vadd.f32 %v3595_v58, %v3174_v18  ;;  %v2691_v18 = vsel %vm10330_vm9, %v9058_v1, %v2690_v60  ;;  %v2694_v40 = vsel %vm10330_vm9, %v2692_v48, %v2693_v34  ;;  %v4304_v34 = vrot.slane %v4303_v33, 4  ;;  %v3836_v1 = vld [vmem:[#allocation2 + $0xfc] sm:$0xf] }
 0x1d0   :  { %v2830_v35 = vunpack.c.l.b16 %v2694_v40  ;;  %v4311_v42 = vshrl.u32 %v3836_v1, 16  ;;  %v4320_v40 = vshll.u32 %v3837_v4, 16 }
 0x1d1   :  { %v10733_v16 = vadd.f32 %v4889_v12, %v3733_v13  ;;  %v2829_v12 = vunpack.c.l.b16 %v2691_v18  ;;  %v2353_v13 = vadd.f32 %v2352_v20, %v10309_v15  ;;  %v4314_v15 = vshll.u32 %v3836_v1, 16 }
 0x1d2   :  { %v3039_v17 = vpop.f32.mrf.mxu2  ;;  %v4309_v18 = vsel %vm9938_vm6, %v4304_v34, %v4308_v38  ;;  %v4322_v34 = vrot.slane %v4320_v40, 5 }
 0x1d3   :  { %v3175_v47 = vadd.f32 %v3039_v17, %v2351_v41  ;;  %9251 = vmatmul.msk.bf16.gmra.mxu3 %vm1772_vm5, %v9672_v6  ;;  %v4294_v6 = vrot.slane %v4293_v29, 4  ;;  %v2876_v55 = vpack.c.b16 %v2830_v35, %v2829_v12  ;;  %v2697_v17 = vrot.slane %v9756_v24, 5  ;;  %v9757_v29 = vld [vmem:[#allocation2 + $0xf8] sm:$0x1] }
 0x1d5   :  { %v4299_v22 = vsel %vm9938_vm6, %v4294_v6, %v4298_v36  ;;  %v2699_v36 = vrot.slane %v2697_v17, 4  ;;  %v4313_v6 = vrot.slane %v4311_v42, 4 }
 0x1d6   :  { %v4892_v62 = vpop.f32.mrf.mxu0  ;;  %v3598_v44 = vpop.f32.mrf.mxu3  ;;  %v4682_v12 = vunpack.c.l.b16 %v4299_v22 }
 0x1d7   :  { %v2355_v28 = vpop.f32.mrf.mxu1  ;;  %v3734_v58 = vadd.f32 %v3598_v44, %v3175_v47  ;;  %v2488_v47 = vld [vmem:[#allocation2 + $0xf0] sm:$0xe] }
 0x1d8   :  { %v9673_v44 = vld [vmem:[#allocation2 + $0xf0] sm:$0xff]  ;;  %v9059_v35 = vrot.slane %v2488_v47, 9 }
 0x1d9   :  { %9284 = vmatmul.msk.bf16.gmra.mxu0 %vm1772_vm5, %v4728_v10  ;;  %9026 = vmatmul.msk.bf16.gmra.mxu1 %vm1772_vm5, %v9641_v14  ;;  %v10743_v48 = vadd.f32 %v4892_v62, %v3734_v58  ;;  %v4324_v10 = vshrl.u32 %v3837_v4, 16  ;;  %v2700_v62 = vrot.slane %v9757_v29, 5  ;;  %v2356_v58 = vadd.f32 %v2355_v28, %v10339_v61  ;;  %v3838_v29 = vld [vmem:[#allocation2 + $0x104] sm:$0x1]  ;;  %v9642_v47 = vld [vmem:[#allocation2 + $0xf0] sm:$0xff] }
 0x1da   :  { %v3041_v60 = vpop.f32.mrf.mxu2 }
 0x1db   :  { %v3176_v41 = vadd.f32 %v3041_v60, %v2353_v13  ;;  %v4683_v13 = vunpack.c.l.b16 %v4309_v18  ;;  %v4316_v60 = vrot.slane %v4314_v15, 5  ;;  %v4326_v38 = vrot.slane %v4324_v10, 4 }
 0x1dc   :  { %v4330_v15 = vshll.u32 %v3838_v29, 16 }
 0x1dd   :  { %v4729_v22 = vpack.c.b16 %v4683_v13, %v4682_v12  ;;  %v4317_v61 = vor.u32 %v4316_v60, %v4313_v6  ;;  %v4327_v42 = vor.u32 %v4326_v38, %v4322_v34  ;;  %v3840_v6 = vld [vmem:[#allocation2 + $0x10c] sm:$0xf]  ;;  %v9758_v60 = vld [vmem:[#allocation2 + $0x100] sm:$0xf] }
 0x1de   :  { %v4894_v20 = vpop.f32.mrf.mxu0  ;;  %v3600_v14 = vpop.f32.mrf.mxu3  ;;  %v4332_v12 = vrot.slane %v4330_v15, 5 }
 0x1df   :  { %9091 = vmatmul.msk.bf16.gmra.mxu2 %vm1772_vm5, %v2876_v55  ;;  %v2357_v33 = vpop.f32.mrf.mxu1  ;;  %v3735_v63 = vadd.f32 %v3600_v14, %v3176_v41  ;;  %v2698_v41 = vsel %vm10330_vm9, %v9059_v35, %v2697_v17  ;;  %v2701_v55 = vsel %vm10330_vm9, %v2699_v36, %v2700_v62  ;;  %v4328_v62 = vrot.slane %v4327_v42, 4  ;;  %v3839_v35 = vld [vmem:[#allocation2 + $0x108] sm:$0xf] }
 0x1e0   :  { %v2832_v10 = vunpack.c.l.b16 %v2701_v55  ;;  %v4335_v29 = vshrl.u32 %v3839_v35, 16  ;;  %v4344_v55 = vshll.u32 %v3840_v6, 16 }
 0x1e1   :  { %v10751_v4 = vadd.f32 %v4894_v20, %v3735_v63  ;;  %v2831_v20 = vunpack.c.l.b16 %v2698_v41  ;;  %v2358_v63 = vadd.f32 %v2357_v33, %v10368_v37  ;;  %v4338_v37 = vshll.u32 %v3839_v35, 16 }
 0x1e2   :  { %v3044_v1 = vpop.f32.mrf.mxu2  ;;  %v4333_v41 = vsel %vm9938_vm6, %v4328_v62, %v4332_v12  ;;  %v4346_v62 = vrot.slane %v4344_v55, 5 }
 0x1e3   :  { %v3177_v24 = vadd.f32 %v3044_v1, %v2356_v58  ;;  %9252 = vmatmul.msk.bf16.gmra.mxu3 %vm1772_vm5, %v9673_v44  ;;  %v4318_v44 = vrot.slane %v4317_v61, 4  ;;  %v2877_v13 = vpack.c.b16 %v2832_v10, %v2831_v20  ;;  %v2704_v1 = vrot.slane %v9758_v60, 5  ;;  %v9759_v61 = vld [vmem:[#allocation2 + $0x104] sm:$0x1] }
 0x1e5   :  { %v4323_v38 = vsel %vm9938_vm6, %v4318_v44, %v4322_v34  ;;  %v2706_v34 = vrot.slane %v2704_v1, 4  ;;  %v4337_v44 = vrot.slane %v4335_v29, 4 }
 0x1e6   :  { %v4897_v28 = vpop.f32.mrf.mxu0  ;;  %v3603_v18 = vpop.f32.mrf.mxu3  ;;  %v4684_v20 = vunpack.c.l.b16 %v4323_v38 }
 0x1e7   :  { %v2360_v40 = vpop.f32.mrf.mxu1  ;;  %v3736_v14 = vadd.f32 %v3603_v18, %v3177_v24  ;;  %v2489_v24 = vld [vmem:[#allocation2 + $0xfc] sm:$0xe] }
 0x1e8   :  { %v9674_v18 = vld [vmem:[#allocation2 + $0xfc] sm:$0xff]  ;;  %v9060_v10 = vrot.slane %v2489_v24, 9 }
 0x1e9   :  { %9285 = vmatmul.msk.bf16.gmra.mxu0 %vm1772_vm5, %v4729_v22  ;;  %9027 = vmatmul.msk.bf16.gmra.mxu1 %vm1772_vm5, %v9642_v47  ;;  %v10761_v36 = vadd.f32 %v4897_v28, %v3736_v14  ;;  %v4348_v22 = vshrl.u32 %v3840_v6, 16  ;;  %v2707_v28 = vrot.slane %v9759_v61, 5  ;;  %v2361_v14 = vadd.f32 %v2360_v40, %v10379_v5  ;;  %v3841_v61 = vld [vmem:[#allocation2 + $0x110] sm:$0x1]  ;;  %v9643_v24 = vld [vmem:[#allocation2 + $0xfc] sm:$0xff] }
 0x1ea   :  { %v3046_v17 = vpop.f32.mrf.mxu2 }
 0x1eb   :  { %v3178_v58 = vadd.f32 %v3046_v17, %v2358_v63  ;;  %v4685_v63 = vunpack.c.l.b16 %v4333_v41  ;;  %v4340_v17 = vrot.slane %v4338_v37, 5  ;;  %v4350_v12 = vrot.slane %v4348_v22, 4 }
 0x1ec   :  { %v4354_v37 = vshll.u32 %v3841_v61, 16 }
 0x1ed   :  { %v4730_v38 = vpack.c.b16 %v4685_v63, %v4684_v20  ;;  %v4341_v5 = vor.u32 %v4340_v17, %v4337_v44  ;;  %v4351_v29 = vor.u32 %v4350_v12, %v4346_v62  ;;  %v3843_v44 = vld [vmem:[#allocation2 + $0x118] sm:$0xf]  ;;  %v9760_v17 = vld [vmem:[#allocation2 + $0x10c] sm:$0xf] }
 0x1ee   :  { %v4899_v33 = vpop.f32.mrf.mxu0  ;;  %v3605_v47 = vpop.f32.mrf.mxu3  ;;  %v4356_v20 = vrot.slane %v4354_v37, 5 }
 0x1ef   :  { %9092 = vmatmul.msk.bf16.gmra.mxu2 %vm1772_vm5, %v2877_v13  ;;  %v2362_v42 = vpop.f32.mrf.mxu1  ;;  %v3737_v15 = vadd.f32 %v3605_v47, %v3178_v58  ;;  %v2705_v58 = vsel %vm10330_vm9, %v9060_v10, %v2704_v1  ;;  %v2708_v13 = vsel %vm10330_vm9, %v2706_v34, %v2707_v28  ;;  %v4352_v28 = vrot.slane %v4351_v29, 4  ;;  %v3842_v10 = vld [vmem:[#allocation2 + $0x114] sm:$0xf] }
 0x1f0   :  { %v2834_v22 = vunpack.c.l.b16 %v2708_v13  ;;  %v4359_v61 = vshrl.u32 %v3842_v10, 16  ;;  %v4368_v13 = vshll.u32 %v3843_v44, 16 }
 0x1f1   :  { %v10769_v6 = vadd.f32 %v4899_v33, %v3737_v15  ;;  %v2833_v33 = vunpack.c.l.b16 %v2705_v58  ;;  %v2363_v15 = vadd.f32 %v2362_v42, %v10394_v43  ;;  %v4362_v43 = vshll.u32 %v3842_v10, 16 }
 0x1f2   :  { %v3049_v35 = vpop.f32.mrf.mxu2  ;;  %v4357_v58 = vsel %vm9938_vm6, %v4352_v28, %v4356_v20  ;;  %v4370_v28 = vrot.slane %v4368_v13, 5 }
 0x1f3   :  { %v3179_v60 = vadd.f32 %v3049_v35, %v2361_v14  ;;  %9253 = vmatmul.msk.bf16.gmra.mxu3 %vm1772_vm5, %v9674_v18  ;;  %v4342_v18 = vrot.slane %v4341_v5, 4  ;;  %v2878_v63 = vpack.c.b16 %v2834_v22, %v2833_v33  ;;  %v2711_v35 = vrot.slane %v9760_v17, 5  ;;  %v9761_v5 = vld [vmem:[#allocation2 + $0x110] sm:$0x1] }
 0x1f5   :  { %v4347_v12 = vsel %vm9938_vm6, %v4342_v18, %v4346_v62  ;;  %v2713_v62 = vrot.slane %v2711_v35, 4  ;;  %v4361_v18 = vrot.slane %v4359_v61, 4 }
 0x1f6   :  { %v4902_v40 = vpop.f32.mrf.mxu0  ;;  %v3608_v41 = vpop.f32.mrf.mxu3  ;;  %v4686_v33 = vunpack.c.l.b16 %v4347_v12 }
 0x1f7   :  { %v2365_v55 = vpop.f32.mrf.mxu1  ;;  %v3738_v47 = vadd.f32 %v3608_v41, %v3179_v60  ;;  %v2490_v60 = vld [vmem:[#allocation2 + $0x108] sm:$0xe] }
 0x1f8   :  { %v9675_v41 = vld [vmem:[#allocation2 + $0x108] sm:$0xff]  ;;  %v9061_v22 = vrot.slane %v2490_v60, 9 }
 0x1f9   :  { %9286 = vmatmul.msk.bf16.gmra.mxu0 %vm1772_vm5, %v4730_v38  ;;  %9028 = vmatmul.msk.bf16.gmra.mxu1 %vm1772_vm5, %v9643_v24  ;;  %v10779_v34 = vadd.f32 %v4902_v40, %v3738_v47  ;;  %v4372_v38 = vshrl.u32 %v3843_v44, 16  ;;  %v2714_v40 = vrot.slane %v9761_v5, 5  ;;  %v2366_v47 = vadd.f32 %v2365_v55, %v10412_v23  ;;  %v3844_v5 = vld [vmem:[#allocation2 + $0x11c] sm:$0x1]  ;;  %v9644_v60 = vld [vmem:[#allocation2 + $0x108] sm:$0xff] }
 0x1fa   :  { %v3051_v1 = vpop.f32.mrf.mxu2 }
 0x1fb   :  { %v3180_v14 = vadd.f32 %v3051_v1, %v2363_v15  ;;  %v4687_v15 = vunpack.c.l.b16 %v4357_v58  ;;  %v4364_v1 = vrot.slane %v4362_v43, 5  ;;  %v4374_v20 = vrot.slane %v4372_v38, 4 }
 0x1fc   :  { %v4378_v43 = vshll.u32 %v3844_v5, 16 }
 0x1fd   :  { %v4731_v12 = vpack.c.b16 %v4687_v15, %v4686_v33  ;;  %v4365_v23 = vor.u32 %v4364_v1, %v4361_v18  ;;  %v4375_v61 = vor.u32 %v4374_v20, %v4370_v28  ;;  %v3846_v18 = vld [vmem:[#allocation2 + $0x124] sm:$0xf]  ;;  %v9762_v1 = vld [vmem:[#allocation2 + $0x118] sm:$0xf] }
 0x1fe   :  { %v4904_v42 = vpop.f32.mrf.mxu0  ;;  %v3610_v24 = vpop.f32.mrf.mxu3  ;;  %v4380_v33 = vrot.slane %v4378_v43, 5 }
 0x1ff   :  { %9093 = vmatmul.msk.bf16.gmra.mxu2 %vm1772_vm5, %v2878_v63  ;;  %v2367_v29 = vpop.f32.mrf.mxu1  ;;  %v3739_v37 = vadd.f32 %v3610_v24, %v3180_v14  ;;  %v2712_v14 = vsel %vm10330_vm9, %v9061_v22, %v2711_v35  ;;  %v2715_v63 = vsel %vm10330_vm9, %v2713_v62, %v2714_v40  ;;  %v4376_v40 = vrot.slane %v4375_v61, 4  ;;  %v3845_v22 = vld [vmem:[#allocation2 + $0x120] sm:$0xf] }
 0x200   :  { %v2836_v38 = vunpack.c.l.b16 %v2715_v63  ;;  %v4383_v5 = vshrl.u32 %v3845_v22, 16  ;;  %v4392_v63 = vshll.u32 %v3846_v18, 16 }
 0x201   :  { %v10787_v44 = vadd.f32 %v4904_v42, %v3739_v37  ;;  %v2835_v42 = vunpack.c.l.b16 %v2712_v14  ;;  %v2368_v37 = vadd.f32 %v2367_v29, %v10427_v7  ;;  %v4386_v7 = vshll.u32 %v3845_v22, 16 }
 0x202   :  { %v3054_v10 = vpop.f32.mrf.mxu2  ;;  %v4381_v14 = vsel %vm9938_vm6, %v4376_v40, %v4380_v33  ;;  %v4394_v40 = vrot.slane %v4392_v63, 5 }
 0x203   :  { %v3181_v17 = vadd.f32 %v3054_v10, %v2366_v47  ;;  %9254 = vmatmul.msk.bf16.gmra.mxu3 %vm1772_vm5, %v9675_v41  ;;  %v4366_v41 = vrot.slane %v4365_v23, 4  ;;  %v2879_v15 = vpack.c.b16 %v2836_v38, %v2835_v42  ;;  %v2718_v10 = vrot.slane %v9762_v1, 5  ;;  %v9763_v23 = vld [vmem:[#allocation2 + $0x11c] sm:$0x1] }
 0x205   :  { %v4371_v20 = vsel %vm9938_vm6, %v4366_v41, %v4370_v28  ;;  %v2720_v28 = vrot.slane %v2718_v10, 4  ;;  %v4385_v41 = vrot.slane %v4383_v5, 4 }
 0x206   :  { %v4907_v55 = vpop.f32.mrf.mxu0  ;;  %v3613_v58 = vpop.f32.mrf.mxu3  ;;  %v4688_v42 = vunpack.c.l.b16 %v4371_v20 }
 0x207   :  { %v2370_v13 = vpop.f32.mrf.mxu1  ;;  %v3740_v24 = vadd.f32 %v3613_v58, %v3181_v17  ;;  %v2491_v17 = vld [vmem:[#allocation2 + $0x114] sm:$0xe] }
 0x208   :  { %v9676_v58 = vld [vmem:[#allocation2 + $0x114] sm:$0xff]  ;;  %v9062_v38 = vrot.slane %v2491_v17, 9 }
 0x209   :  { %9287 = vmatmul.msk.bf16.gmra.mxu0 %vm1772_vm5, %v4731_v12  ;;  %9029 = vmatmul.msk.bf16.gmra.mxu1 %vm1772_vm5, %v9644_v60  ;;  %v10797_v62 = vadd.f32 %v4907_v55, %v3740_v24  ;;  %v4396_v12 = vshrl.u32 %v3846_v18, 16  ;;  %v2721_v55 = vrot.slane %v9763_v23, 5  ;;  %v2371_v24 = vadd.f32 %v2370_v13, %v10442_v45  ;;  %v3847_v23 = vld [vmem:[#allocation2 + $0x128] sm:$0x1]  ;;  %v9645_v17 = vld [vmem:[#allocation2 + $0x114] sm:$0xff] }
 0x20a   :  { %v3056_v35 = vpop.f32.mrf.mxu2 }
 0x20b   :  { %v3182_v47 = vadd.f32 %v3056_v35, %v2368_v37  ;;  %v4689_v37 = vunpack.c.l.b16 %v4381_v14  ;;  %v4388_v35 = vrot.slane %v4386_v7, 5  ;;  %v4398_v33 = vrot.slane %v4396_v12, 4 }
 0x20c   :  { %v4402_v7 = vshll.u32 %v3847_v23, 16 }
 0x20d   :  { %v4732_v20 = vpack.c.b16 %v4689_v37, %v4688_v42  ;;  %v4389_v45 = vor.u32 %v4388_v35, %v4385_v41  ;;  %v4399_v5 = vor.u32 %v4398_v33, %v4394_v40  ;;  %v3849_v41 = vld [vmem:[#allocation2 + $0x130] sm:$0xf]  ;;  %v9764_v35 = vld [vmem:[#allocation2 + $0x124] sm:$0xf] }
 0x20e   :  { %v4909_v29 = vpop.f32.mrf.mxu0  ;;  %v3615_v60 = vpop.f32.mrf.mxu3  ;;  %v4404_v42 = vrot.slane %v4402_v7, 5 }
 0x20f   :  { %9094 = vmatmul.msk.bf16.gmra.mxu2 %vm1772_vm5, %v2879_v15  ;;  %v2372_v61 = vpop.f32.mrf.mxu1  ;;  %v3741_v43 = vadd.f32 %v3615_v60, %v3182_v47  ;;  %v2719_v47 = vsel %vm10330_vm9, %v9062_v38, %v2718_v10  ;;  %v2722_v15 = vsel %vm10330_vm9, %v2720_v28, %v2721_v55  ;;  %v4400_v55 = vrot.slane %v4399_v5, 4  ;;  %v3848_v38 = vld [vmem:[#allocation2 + $0x12c] sm:$0xf] }
 0x210   :  { %v2838_v12 = vunpack.c.l.b16 %v2722_v15  ;;  %v4407_v23 = vshrl.u32 %v3848_v38, 16  ;;  %v4416_v15 = vshll.u32 %v3849_v41, 16 }
 0x211   :  { %v10805_v18 = vadd.f32 %v4909_v29, %v3741_v43  ;;  %v2837_v29 = vunpack.c.l.b16 %v2719_v47  ;;  %v2373_v43 = vadd.f32 %v2372_v61, %v10460_v52  ;;  %v4410_v52 = vshll.u32 %v3848_v38, 16 }
 0x212   :  { %v3059_v22 = vpop.f32.mrf.mxu2  ;;  %v4405_v47 = vsel %vm9938_vm6, %v4400_v55, %v4404_v42  ;;  %v4418_v55 = vrot.slane %v4416_v15, 5 }
 0x213   :  { %v3183_v1 = vadd.f32 %v3059_v22, %v2371_v24  ;;  %9255 = vmatmul.msk.bf16.gmra.mxu3 %vm1772_vm5, %v9676_v58  ;;  %v4390_v58 = vrot.slane %v4389_v45, 4  ;;  %v2880_v37 = vpack.c.b16 %v2838_v12, %v2837_v29  ;;  %v2725_v22 = vrot.slane %v9764_v35, 5  ;;  %v9765_v45 = vld [vmem:[#allocation2 + $0x128] sm:$0x1] }
 0x215   :  { %v4395_v33 = vsel %vm9938_vm6, %v4390_v58, %v4394_v40  ;;  %v2727_v40 = vrot.slane %v2725_v22, 4  ;;  %v4409_v58 = vrot.slane %v4407_v23, 4 }
 0x216   :  { %v4912_v13 = vpop.f32.mrf.mxu0  ;;  %v3618_v14 = vpop.f32.mrf.mxu3  ;;  %v4690_v29 = vunpack.c.l.b16 %v4395_v33 }
 0x217   :  { %v2375_v63 = vpop.f32.mrf.mxu1  ;;  %v3742_v60 = vadd.f32 %v3618_v14, %v3183_v1  ;;  %v2492_v1 = vld [vmem:[#allocation2 + $0x120] sm:$0xe] }
 0x218   :  { %v9677_v14 = vld [vmem:[#allocation2 + $0x120] sm:$0xff]  ;;  %v9063_v12 = vrot.slane %v2492_v1, 9 }
 0x219   :  { %9288 = vmatmul.msk.bf16.gmra.mxu0 %vm1772_vm5, %v4732_v20  ;;  %9030 = vmatmul.msk.bf16.gmra.mxu1 %vm1772_vm5, %v9645_v17  ;;  %v10815_v28 = vadd.f32 %v4912_v13, %v3742_v60  ;;  %v4420_v20 = vshrl.u32 %v3849_v41, 16  ;;  %v2728_v13 = vrot.slane %v9765_v45, 5  ;;  %v2376_v60 = vadd.f32 %v2375_v63, %v10475_v59  ;;  %v3850_v45 = vld [vmem:[#allocation2 + $0x134] sm:$0x1]  ;;  %v9646_v1 = vld [vmem:[#allocation2 + $0x120] sm:$0xff] }
 0x21a   :  { %v3061_v10 = vpop.f32.mrf.mxu2 }
 0x21b   :  { %v3184_v24 = vadd.f32 %v3061_v10, %v2373_v43  ;;  %v4691_v43 = vunpack.c.l.b16 %v4405_v47  ;;  %v4412_v10 = vrot.slane %v4410_v52, 5  ;;  %v4422_v42 = vrot.slane %v4420_v20, 4 }
 0x21c   :  { %v4426_v52 = vshll.u32 %v3850_v45, 16 }
 0x21d   :  { %v4733_v33 = vpack.c.b16 %v4691_v43, %v4690_v29  ;;  %v4413_v59 = vor.u32 %v4412_v10, %v4409_v58  ;;  %v4423_v23 = vor.u32 %v4422_v42, %v4418_v55  ;;  %v3852_v58 = vld [vmem:[#allocation2 + $0x13c] sm:$0xf]  ;;  %v9766_v10 = vld [vmem:[#allocation2 + $0x130] sm:$0xf] }
 0x21e   :  { %v4914_v61 = vpop.f32.mrf.mxu0  ;;  %v3620_v17 = vpop.f32.mrf.mxu3  ;;  %v4428_v29 = vrot.slane %v4426_v52, 5 }
 0x21f   :  { %9095 = vmatmul.msk.bf16.gmra.mxu2 %vm1772_vm5, %v2880_v37  ;;  %v2377_v5 = vpop.f32.mrf.mxu1  ;;  %v3743_v7 = vadd.f32 %v3620_v17, %v3184_v24  ;;  %v2726_v24 = vsel %vm10330_vm9, %v9063_v12, %v2725_v22  ;;  %v2729_v37 = vsel %vm10330_vm9, %v2727_v40, %v2728_v13  ;;  %v4424_v13 = vrot.slane %v4423_v23, 4  ;;  %v3851_v12 = vld [vmem:[#allocation2 + $0x138] sm:$0xf] }
 0x220   :  { %v2840_v20 = vunpack.c.l.b16 %v2729_v37  ;;  %v4431_v45 = vshrl.u32 %v3851_v12, 16  ;;  %v4440_v37 = vshll.u32 %v3852_v58, 16 }
 0x221   :  { %v10823_v41 = vadd.f32 %v4914_v61, %v3743_v7  ;;  %v2839_v61 = vunpack.c.l.b16 %v2726_v24  ;;  %v2378_v7 = vadd.f32 %v2377_v5, %v10489_v31  ;;  %v4434_v31 = vshll.u32 %v3851_v12, 16 }
 0x222   :  { %v3064_v38 = vpop.f32.mrf.mxu2  ;;  %v4429_v24 = vsel %vm9938_vm6, %v4424_v13, %v4428_v29  ;;  %v4442_v13 = vrot.slane %v4440_v37, 5 }
 0x223   :  { %v3185_v35 = vadd.f32 %v3064_v38, %v2376_v60  ;;  %9256 = vmatmul.msk.bf16.gmra.mxu3 %vm1772_vm5, %v9677_v14  ;;  %v4414_v14 = vrot.slane %v4413_v59, 4  ;;  %v2881_v43 = vpack.c.b16 %v2840_v20, %v2839_v61  ;;  %v2732_v38 = vrot.slane %v9766_v10, 5  ;;  %v9767_v59 = vld [vmem:[#allocation2 + $0x134] sm:$0x1] }
 0x225   :  { %v4419_v42 = vsel %vm9938_vm6, %v4414_v14, %v4418_v55  ;;  %v2734_v55 = vrot.slane %v2732_v38, 4  ;;  %v4433_v14 = vrot.slane %v4431_v45, 4 }
 0x226   :  { %v4917_v63 = vpop.f32.mrf.mxu0  ;;  %v3623_v47 = vpop.f32.mrf.mxu3  ;;  %v4692_v61 = vunpack.c.l.b16 %v4419_v42 }
 0x227   :  { %v2380_v15 = vpop.f32.mrf.mxu1  ;;  %v3744_v17 = vadd.f32 %v3623_v47, %v3185_v35  ;;  %v2493_v35 = vld [vmem:[#allocation2 + $0x12c] sm:$0xe] }
 0x228   :  { %v9678_v47 = vld [vmem:[#allocation2 + $0x12c] sm:$0xff]  ;;  %v9064_v20 = vrot.slane %v2493_v35, 9 }
 0x229   :  { %9289 = vmatmul.msk.bf16.gmra.mxu0 %vm1772_vm5, %v4733_v33  ;;  %9031 = vmatmul.msk.bf16.gmra.mxu1 %vm1772_vm5, %v9646_v1  ;;  %v10833_v40 = vadd.f32 %v4917_v63, %v3744_v17  ;;  %v4444_v33 = vshrl.u32 %v3852_v58, 16  ;;  %v2735_v63 = vrot.slane %v9767_v59, 5  ;;  %v2381_v17 = vadd.f32 %v2380_v15, %v10505_v39  ;;  %v3853_v59 = vld [vmem:[#allocation2 + $0x140] sm:$0x1]  ;;  %v9647_v35 = vld [vmem:[#allocation2 + $0x12c] sm:$0xff] }
 0x22a   :  { %v3066_v22 = vpop.f32.mrf.mxu2 }
 0x22b   :  { %v3186_v60 = vadd.f32 %v3066_v22, %v2378_v7  ;;  %v4693_v7 = vunpack.c.l.b16 %v4429_v24  ;;  %v4436_v22 = vrot.slane %v4434_v31, 5  ;;  %v4446_v29 = vrot.slane %v4444_v33, 4 }
 0x22c   :  { %v4450_v31 = vshll.u32 %v3853_v59, 16 }
 0x22d   :  { %v4734_v42 = vpack.c.b16 %v4693_v7, %v4692_v61  ;;  %v4437_v39 = vor.u32 %v4436_v22, %v4433_v14  ;;  %v4447_v45 = vor.u32 %v4446_v29, %v4442_v13  ;;  %v3855_v14 = vld [vmem:[#allocation2 + $0x148] sm:$0xf]  ;;  %v9768_v22 = vld [vmem:[#allocation2 + $0x13c] sm:$0xf] }
 0x22e   :  { %v4919_v5 = vpop.f32.mrf.mxu0  ;;  %v3625_v1 = vpop.f32.mrf.mxu3  ;;  %v4452_v61 = vrot.slane %v4450_v31, 5 }
 0x22f   :  { %9096 = vmatmul.msk.bf16.gmra.mxu2 %vm1772_vm5, %v2881_v43  ;;  %v2382_v23 = vpop.f32.mrf.mxu1  ;;  %v3745_v52 = vadd.f32 %v3625_v1, %v3186_v60  ;;  %v2733_v60 = vsel %vm10330_vm9, %v9064_v20, %v2732_v38  ;;  %v2736_v43 = vsel %vm10330_vm9, %v2734_v55, %v2735_v63  ;;  %v4448_v63 = vrot.slane %v4447_v45, 4  ;;  %v3854_v20 = vld [vmem:[#allocation2 + $0x144] sm:$0xf] }
 0x230   :  { %v2842_v33 = vunpack.c.l.b16 %v2736_v43  ;;  %v4455_v59 = vshrl.u32 %v3854_v20, 16  ;;  %v4464_v43 = vshll.u32 %v3855_v14, 16 }
 0x231   :  { %v10841_v58 = vadd.f32 %v4919_v5, %v3745_v52  ;;  %v2841_v5 = vunpack.c.l.b16 %v2733_v60  ;;  %v2383_v52 = vadd.f32 %v2382_v23, %v10525_v25  ;;  %v4458_v25 = vshll.u32 %v3854_v20, 16 }
 0x232   :  { %v3069_v12 = vpop.f32.mrf.mxu2  ;;  %v4453_v60 = vsel %vm9938_vm6, %v4448_v63, %v4452_v61  ;;  %v4466_v63 = vrot.slane %v4464_v43, 5 }
 0x233   :  { %v3187_v10 = vadd.f32 %v3069_v12, %v2381_v17  ;;  %9257 = vmatmul.msk.bf16.gmra.mxu3 %vm1772_vm5, %v9678_v47  ;;  %v4438_v47 = vrot.slane %v4437_v39, 4  ;;  %v2882_v7 = vpack.c.b16 %v2842_v33, %v2841_v5  ;;  %v2739_v12 = vrot.slane %v9768_v22, 5  ;;  %v9769_v39 = vld [vmem:[#allocation2 + $0x140] sm:$0x1] }
 0x235   :  { %v4443_v29 = vsel %vm9938_vm6, %v4438_v47, %v4442_v13  ;;  %v2741_v13 = vrot.slane %v2739_v12, 4  ;;  %v4457_v47 = vrot.slane %v4455_v59, 4 }
 0x236   :  { %v4922_v15 = vpop.f32.mrf.mxu0  ;;  %v3628_v24 = vpop.f32.mrf.mxu3  ;;  %v4694_v5 = vunpack.c.l.b16 %v4443_v29 }
 0x237   :  { %v2385_v37 = vpop.f32.mrf.mxu1  ;;  %v3746_v1 = vadd.f32 %v3628_v24, %v3187_v10  ;;  %v2494_v10 = vld [vmem:[#allocation2 + $0x138] sm:$0xe] }
 0x238   :  { %v9679_v24 = vld [vmem:[#allocation2 + $0x138] sm:$0xff]  ;;  %v9065_v33 = vrot.slane %v2494_v10, 9 }
 0x239   :  { %9290 = vmatmul.msk.bf16.gmra.mxu0 %vm1772_vm5, %v4734_v42  ;;  %9032 = vmatmul.msk.bf16.gmra.mxu1 %vm1772_vm5, %v9647_v35  ;;  %v10851_v55 = vadd.f32 %v4922_v15, %v3746_v1  ;;  %v4468_v42 = vshrl.u32 %v3855_v14, 16  ;;  %v2742_v15 = vrot.slane %v9769_v39, 5  ;;  %v2386_v1 = vadd.f32 %v2385_v37, %v10540_v26  ;;  %v3856_v39 = vld [vmem:[#allocation2 + $0x14c] sm:$0x1]  ;;  %v9648_v10 = vld [vmem:[#allocation2 + $0x138] sm:$0xff] }
 0x23a   :  { %v3071_v38 = vpop.f32.mrf.mxu2 }
 0x23b   :  { %12415 = vst [vmem:[#allocation37_spill] sm:$0xff] %v10851_v55  ;;  %v3188_v17 = vadd.f32 %v3071_v38, %v2383_v52  ;;  %v4695_v52 = vunpack.c.l.b16 %v4453_v60  ;;  %v4460_v38 = vrot.slane %v4458_v25, 5  ;;  %v4470_v61 = vrot.slane %v4468_v42, 4 }
 0x23c   :  { %v4474_v25 = vshll.u32 %v3856_v39, 16 }
 0x23d   :  { %v4735_v29 = vpack.c.b16 %v4695_v52, %v4694_v5  ;;  %v4461_v26 = vor.u32 %v4460_v38, %v4457_v47  ;;  %v4471_v59 = vor.u32 %v4470_v61, %v4466_v63  ;;  %v3858_v47 = vld [vmem:[#allocation2 + $0x154] sm:$0xf]  ;;  %v9770_v38 = vld [vmem:[#allocation2 + $0x148] sm:$0xf] }
 0x23e   :  { %v4924_v23 = vpop.f32.mrf.mxu0  ;;  %v3630_v35 = vpop.f32.mrf.mxu3  ;;  %v4476_v5 = vrot.slane %v4474_v25, 5 }
 0x23f   :  { %9097 = vmatmul.msk.bf16.gmra.mxu2 %vm1772_vm5, %v2882_v7  ;;  %v2387_v45 = vpop.f32.mrf.mxu1  ;;  %v3747_v31 = vadd.f32 %v3630_v35, %v3188_v17  ;;  %v2740_v17 = vsel %vm10330_vm9, %v9065_v33, %v2739_v12  ;;  %v2743_v7 = vsel %vm10330_vm9, %v2741_v13, %v2742_v15  ;;  %v4472_v15 = vrot.slane %v4471_v59, 4  ;;  %v3857_v33 = vld [vmem:[#allocation2 + $0x150] sm:$0xf] }
 0x240   :  { %v2844_v42 = vunpack.c.l.b16 %v2743_v7  ;;  %v4479_v39 = vshrl.u32 %v3857_v33, 16  ;;  %v4488_v7 = vshll.u32 %v3858_v47, 16 }
 0x241   :  { %v10859_v14 = vadd.f32 %v4924_v23, %v3747_v31  ;;  %v2843_v23 = vunpack.c.l.b16 %v2740_v17  ;;  %v2388_v31 = vadd.f32 %v2387_v45, %v10555_v54  ;;  %v4482_v54 = vshll.u32 %v3857_v33, 16 }
 0x242   :  { %v3074_v20 = vpop.f32.mrf.mxu2  ;;  %v4477_v17 = vsel %vm9938_vm6, %v4472_v15, %v4476_v5  ;;  %v4490_v15 = vrot.slane %v4488_v7, 5 }
 0x243   :  { %12416 = vst [vmem:[#allocation38_spill] sm:$0xff] %v10859_v14  ;;  %v3189_v22 = vadd.f32 %v3074_v20, %v2386_v1  ;;  %9258 = vmatmul.msk.bf16.gmra.mxu3 %vm1772_vm5, %v9679_v24  ;;  %v4462_v24 = vrot.slane %v4461_v26, 4  ;;  %v2883_v52 = vpack.c.b16 %v2844_v42, %v2843_v23  ;;  %v2746_v20 = vrot.slane %v9770_v38, 5  ;;  %v9771_v26 = vld [vmem:[#allocation2 + $0x14c] sm:$0x1] }
 0x245   :  { %v4467_v61 = vsel %vm9938_vm6, %v4462_v24, %v4466_v63  ;;  %v2748_v63 = vrot.slane %v2746_v20, 4  ;;  %v4481_v24 = vrot.slane %v4479_v39, 4 }
 0x246   :  { %v4927_v37 = vpop.f32.mrf.mxu0  ;;  %v3633_v60 = vpop.f32.mrf.mxu3  ;;  %v4696_v23 = vunpack.c.l.b16 %v4467_v61 }
 0x247   :  { %v2390_v43 = vpop.f32.mrf.mxu1  ;;  %v3748_v35 = vadd.f32 %v3633_v60, %v3189_v22  ;;  %v2495_v22 = vld [vmem:[#allocation2 + $0x144] sm:$0xe] }
 0x248   :  { %v9680_v60 = vld [vmem:[#allocation2 + $0x144] sm:$0xff]  ;;  %v9066_v42 = vrot.slane %v2495_v22, 9 }
 0x249   :  { %9291 = vmatmul.msk.bf16.gmra.mxu0 %vm1772_vm5, %v4735_v29  ;;  %9033 = vmatmul.msk.bf16.gmra.mxu1 %vm1772_vm5, %v9648_v10  ;;  %v10869_v13 = vadd.f32 %v4927_v37, %v3748_v35  ;;  %v4492_v29 = vshrl.u32 %v3858_v47, 16  ;;  %v2749_v37 = vrot.slane %v9771_v26, 5  ;;  %v2391_v35 = vadd.f32 %v2390_v43, %v10302_v9  ;;  %v3859_v26 = vld [vmem:[#allocation2 + $0x158] sm:$0x1]  ;;  %v9649_v22 = vld [vmem:[#allocation2 + $0x144] sm:$0xff] }
 0x24a   :  { %v3076_v12 = vpop.f32.mrf.mxu2 }
 0x24b   :  { %12417 = vst [vmem:[#allocation39_spill] sm:$0xff] %v10869_v13  ;;  %v3190_v1 = vadd.f32 %v3076_v12, %v2388_v31  ;;  %v4697_v31 = vunpack.c.l.b16 %v4477_v17  ;;  %v4484_v12 = vrot.slane %v4482_v54, 5  ;;  %v4494_v5 = vrot.slane %v4492_v29, 4 }
 0x24c   :  { %v4498_v54 = vshll.u32 %v3859_v26, 16 }
 0x24d   :  { %v4736_v61 = vpack.c.b16 %v4697_v31, %v4696_v23  ;;  %v4485_v9 = vor.u32 %v4484_v12, %v4481_v24  ;;  %v4495_v39 = vor.u32 %v4494_v5, %v4490_v15  ;;  %v3861_v24 = vld [vmem:[#allocation2 + $0x160] sm:$0xf]  ;;  %v9772_v12 = vld [vmem:[#allocation2 + $0x154] sm:$0xf] }
 0x24e   :  { %v4929_v45 = vpop.f32.mrf.mxu0  ;;  %v3635_v10 = vpop.f32.mrf.mxu3  ;;  %v4500_v23 = vrot.slane %v4498_v54, 5 }
 0x24f   :  { %9098 = vmatmul.msk.bf16.gmra.mxu2 %vm1772_vm5, %v2883_v52  ;;  %v2392_v59 = vpop.f32.mrf.mxu1  ;;  %v3749_v25 = vadd.f32 %v3635_v10, %v3190_v1  ;;  %v2747_v1 = vsel %vm10330_vm9, %v9066_v42, %v2746_v20  ;;  %v2750_v52 = vsel %vm10330_vm9, %v2748_v63, %v2749_v37  ;;  %v4496_v37 = vrot.slane %v4495_v39, 4  ;;  %v3860_v42 = vld [vmem:[#allocation2 + $0x15c] sm:$0xf] }
 0x250   :  { %v2846_v29 = vunpack.c.l.b16 %v2750_v52  ;;  %v4503_v26 = vshrl.u32 %v3860_v42, 16  ;;  %v4512_v52 = vshll.u32 %v3861_v24, 16 }
 0x251   :  { %v10877_v47 = vadd.f32 %v4929_v45, %v3749_v25  ;;  %v2845_v45 = vunpack.c.l.b16 %v2747_v1  ;;  %v2393_v25 = vadd.f32 %v2392_v59, %v10335_v57  ;;  %v4506_v57 = vshll.u32 %v3860_v42, 16 }
 0x252   :  { %v3079_v33 = vpop.f32.mrf.mxu2  ;;  %v4501_v1 = vsel %vm9938_vm6, %v4496_v37, %v4500_v23  ;;  %v4514_v37 = vrot.slane %v4512_v52, 5 }
 0x253   :  { %12418 = vst [vmem:[#allocation40_spill] sm:$0xff] %v10877_v47  ;;  %v3191_v38 = vadd.f32 %v3079_v33, %v2391_v35  ;;  %9259 = vmatmul.msk.bf16.gmra.mxu3 %vm1772_vm5, %v9680_v60  ;;  %v4486_v60 = vrot.slane %v4485_v9, 4  ;;  %v2884_v31 = vpack.c.b16 %v2846_v29, %v2845_v45  ;;  %v2753_v33 = vrot.slane %v9772_v12, 5  ;;  %v9773_v9 = vld [vmem:[#allocation2 + $0x158] sm:$0x1] }
 0x254   :  { %v4508_v42 = vrot.slane %v4506_v57, 5 }
 0x255   :  { %v4491_v5 = vsel %vm9938_vm6, %v4486_v60, %v4490_v15  ;;  %v2755_v15 = vrot.slane %v2753_v33, 4  ;;  %v4699_v60 = vunpack.c.l.b16 %v4501_v1 }
 0x256   :  { %v4932_v43 = vpop.f32.mrf.mxu0  ;;  %v3638_v17 = vpop.f32.mrf.mxu3  ;;  %v4698_v45 = vunpack.c.l.b16 %v4491_v5 }
 0x257   :  { %v2395_v7 = vpop.f32.mrf.mxu1  ;;  %v3750_v10 = vadd.f32 %v3638_v17, %v3191_v38  ;;  %v2496_v38 = vld [vmem:[#allocation2 + $0x150] sm:$0xe] }
 0x258   :  { %v9681_v17 = vld [vmem:[#allocation2 + $0x150] sm:$0xff]  ;;  %v9067_v29 = vrot.slane %v2496_v38, 9  ;;  %v4737_v5 = vpack.c.b16 %v4699_v60, %v4698_v45 }
 0x259   :  { %9292 = vmatmul.msk.bf16.gmra.mxu0 %vm1772_vm5, %v4736_v61  ;;  %9034 = vmatmul.msk.bf16.gmra.mxu1 %vm1772_vm5, %v9649_v22  ;;  %v10887_v63 = vadd.f32 %v4932_v43, %v3750_v10  ;;  %v4516_v61 = vshrl.u32 %v3861_v24, 16  ;;  %v2756_v43 = vrot.slane %v9773_v9, 5  ;;  %v12420_v10 = vld [vmem:[#allocation8_spill] sm:$0xff] }
 0x25a   :  { %v3081_v20 = vpop.f32.mrf.mxu2 }
 0x25b   :  { %12419 = vst [vmem:[#allocation41_spill] sm:$0xff] %v10887_v63  ;;  %v3192_v35 = vadd.f32 %v3081_v20, %v2393_v25  ;;  %v2396_v25 = vadd.f32 %v2395_v7, %v12420_v10  ;;  %v4505_v20 = vrot.slane %v4503_v26, 4  ;;  %v4518_v23 = vrot.slane %v4516_v61, 4  ;;  %v3862_v63 = vld [vmem:[#allocation2 + $0x164] sm:$0x1]  ;;  %v9650_v26 = vld [vmem:[#allocation2 + $0x150] sm:$0xff] }
 0x25c   :  { %v4522_v1 = vshll.u32 %v3862_v63, 16 }
 0x25d   :  { %v4509_v7 = vor.u32 %v4508_v42, %v4505_v20  ;;  %v4519_v57 = vor.u32 %v4518_v23, %v4514_v37  ;;  %v3864_v20 = vld [vmem:[#allocation2 + $0x16c] sm:$0xf]  ;;  %v9774_v42 = vld [vmem:[#allocation2 + $0x160] sm:$0xf] }
 0x25e   :  { %v4934_v59 = vpop.f32.mrf.mxu0  ;;  %v3640_v22 = vpop.f32.mrf.mxu3  ;;  %v4524_v45 = vrot.slane %v4522_v1, 5 }
 0x25f   :  { %9099 = vmatmul.msk.bf16.gmra.mxu2 %vm1772_vm5, %v2884_v31  ;;  %v2397_v39 = vpop.f32.mrf.mxu1  ;;  %v3751_v54 = vadd.f32 %v3640_v22, %v3192_v35  ;;  %v2754_v35 = vsel %vm10330_vm9, %v9067_v29, %v2753_v33  ;;  %v2757_v31 = vsel %vm10330_vm9, %v2755_v15, %v2756_v43  ;;  %v4520_v43 = vrot.slane %v4519_v57, 4  ;;  %v3863_v29 = vld [vmem:[#allocation2 + $0x168] sm:$0xf]  ;;  %v9775_v57 = vld [vmem:[#allocation2 + $0x164] sm:$0x1] }
 0x260   :  { %v2848_v22 = vunpack.c.l.b16 %v2757_v31 }
 0x261   :  { %v10895_v24 = vadd.f32 %v4934_v59, %v3751_v54  ;;  %v2847_v59 = vunpack.c.l.b16 %v2754_v35  ;;  %v4527_v35 = vshrl.u32 %v3863_v29, 16 }
 0x262   :  { %v3084_v12 = vpop.f32.mrf.mxu2 }
 0x263   :  { %12421 = vst [vmem:[#allocation8_spill] sm:$0xff] %v10895_v24  ;;  %v3193_v9 = vadd.f32 %v3084_v12, %v2396_v25  ;;  %9260 = vmatmul.msk.bf16.gmra.mxu3 %vm1772_vm5, %v9681_v17  ;;  %v12422_v17 = vld [vmem:[#allocation10_spill] sm:$0xff]  ;;  %v4510_v25 = vrot.slane %v4509_v7, 4  ;;  %v2885_v63 = vpack.c.b16 %v2848_v22, %v2847_v59  ;;  %v2760_v12 = vrot.slane %v9774_v42, 5  ;;  %v3865_v24 = vld [vmem:[#allocation2 + $0x170] sm:$0x1] }
 0x264   :  { %v2398_v10 = vadd.f32 %v2397_v39, %v12422_v17  ;;  %v4530_v39 = vshll.u32 %v3863_v29, 16  ;;  %v4536_v7 = vshll.u32 %v3864_v20, 16  ;;  %v9682_v22 = vld [vmem:[#allocation2 + $0x15c] sm:$0xff]  ;;  %v4529_v29 = vrot.slane %v4527_v35, 4 }
 0x265   :  { %v4515_v23 = vsel %vm9938_vm6, %v4510_v25, %v4514_v37  ;;  %v2762_v37 = vrot.slane %v2760_v12, 4  ;;  %v9651_v35 = vld [vmem:[#allocation2 + $0x15c] sm:$0xff] }
 0x266   :  { %v4937_v38 = vpop.f32.mrf.mxu0  ;;  %v3643_v52 = vpop.f32.mrf.mxu3  ;;  %v4532_v42 = vrot.slane %v4530_v39, 5 }
 0x267   :  { %v2400_v61 = vpop.f32.mrf.mxu1  ;;  %v3752_v54 = vadd.f32 %v3643_v52, %v3193_v9  ;;  %v2497_v9 = vld [vmem:[#allocation2 + $0x15c] sm:$0xe] }
 0x268   :  { %v9068_v17 = vrot.slane %v2497_v9, 9 }
 0x269   :  { %9293 = vmatmul.msk.bf16.gmra.mxu0 %vm1772_vm5, %v4737_v5  ;;  %9035 = vmatmul.msk.bf16.gmra.mxu1 %vm1772_vm5, %v9650_v26  ;;  %v10905_v15 = vadd.f32 %v4937_v38, %v3752_v54  ;;  %v4525_v5 = vsel %vm9938_vm6, %v4520_v43, %v4524_v45  ;;  %v4540_v26 = vshrl.u32 %v3864_v20, 16  ;;  %v2763_v38 = vrot.slane %v9775_v57, 5 }
 0x26a   :  { %v3086_v33 = vpop.f32.mrf.mxu2  ;;  %v4700_v54 = vunpack.c.l.b16 %v4515_v23  ;;  %v4538_v43 = vrot.slane %v4536_v7, 5 }
 0x26b   :  { %12423 = vst [vmem:[#allocation10_spill] sm:$0xff] %v10905_v15  ;;  %v3194_v60 = vadd.f32 %v3086_v33, %v2398_v10  ;;  %v12424_v10 = vld [vmem:[#allocation12_spill] sm:$0xff]  ;;  %v4701_v33 = vunpack.c.l.b16 %v4525_v5  ;;  %v4542_v45 = vrot.slane %v4540_v26, 4  ;;  %v4546_v5 = vshll.u32 %v3865_v24, 16 }
 0x26c   :  { %v2401_v25 = vadd.f32 %v2400_v61, %v12424_v10  ;;  %v4533_v61 = vor.u32 %v4532_v42, %v4529_v29  ;;  %v9776_v29 = vld [vmem:[#allocation2 + $0x16c] sm:$0xf] }
 0x26d   :  { %v4738_v23 = vpack.c.b16 %v4701_v33, %v4700_v54  ;;  %v4543_v39 = vor.u32 %v4542_v45, %v4538_v43  ;;  %v4548_v54 = vrot.slane %v4546_v5, 5  ;;  %v3867_v33 = vld [vmem:[#allocation2 + $0x178] sm:$0xf]  ;;  %v2767_v42 = vrot.slane %v9776_v29, 5  ;;  %v9777_v5 = vld [vmem:[#allocation2 + $0x170] sm:$0x1] }
 0x26e   :  { %v4939_v31 = vpop.f32.mrf.mxu0  ;;  %v3645_v1 = vpop.f32.mrf.mxu3  ;;  %v4534_v10 = vrot.slane %v4533_v61, 4  ;;  %v4560_v61 = vshll.u32 %v3867_v33, 16 }
 0x26f   :  { %9100 = vmatmul.msk.bf16.gmra.mxu2 %vm1772_vm5, %v2885_v63  ;;  %v2402_v52 = vpop.f32.mrf.mxu1  ;;  %v3753_v59 = vadd.f32 %v3645_v1, %v3194_v60  ;;  %v2761_v60 = vsel %vm10330_vm9, %v9068_v17, %v2760_v12  ;;  %v2764_v63 = vsel %vm10330_vm9, %v2762_v37, %v2763_v38  ;;  %v4544_v38 = vrot.slane %v4543_v39, 4  ;;  %v3866_v17 = vld [vmem:[#allocation2 + $0x174] sm:$0xf] }
 0x270   :  { %v2850_v1 = vunpack.c.l.b16 %v2764_v63  ;;  %v4539_v45 = vsel %vm9938_vm6, %v4534_v10, %v4538_v43  ;;  %v12428_v43 = vld [vmem:[#allocation16_spill] sm:$0xff] }
 0x271   :  { %v10913_v20 = vadd.f32 %v4939_v31, %v3753_v59  ;;  %v2849_v31 = vunpack.c.l.b16 %v2761_v60  ;;  %v12426_v59 = vld [vmem:[#allocation14_spill] sm:$0xff]  ;;  %v4551_v60 = vshrl.u32 %v3866_v17, 16  ;;  %v4549_v63 = vsel %vm9938_vm6, %v4544_v38, %v4548_v54 }
 0x272   :  { %v3089_v15 = vpop.f32.mrf.mxu2  ;;  %v4702_v10 = vunpack.c.l.b16 %v4539_v45  ;;  %v4562_v54 = vrot.slane %v4560_v61, 5 }
 0x273   :  { %12425 = vst [vmem:[#allocation12_spill] sm:$0xff] %v10913_v20  ;;  %v3195_v57 = vadd.f32 %v3089_v15, %v2401_v25  ;;  %9261 = vmatmul.msk.bf16.gmra.mxu3 %vm1772_vm5, %v9682_v22  ;;  %v2403_v22 = vadd.f32 %v2402_v52, %v12426_v59  ;;  %v2886_v24 = vpack.c.b16 %v2850_v1, %v2849_v31  ;;  %v9683_v1 = vld [vmem:[#allocation2 + $0x168] sm:$0xff]  ;;  %v2769_v59 = vrot.slane %v2767_v42, 4 }
 0x274   :  { %v4553_v29 = vrot.slane %v4551_v60, 4 }
 0x276   :  { %v4942_v9 = vpop.f32.mrf.mxu0  ;;  %v3648_v7 = vpop.f32.mrf.mxu3 }
 0x277   :  { %v2405_v26 = vpop.f32.mrf.mxu1  ;;  %v3754_v15 = vadd.f32 %v3648_v7, %v3195_v57  ;;  %v2498_v57 = vld [vmem:[#allocation2 + $0x168] sm:$0xe]  ;;  %v2770_v7 = vrot.slane %v9777_v5, 5 }
 0x279   :  { %9294 = vmatmul.msk.bf16.gmra.mxu0 %vm1772_vm5, %v4738_v23  ;;  %9036 = vmatmul.msk.bf16.gmra.mxu1 %vm1772_vm5, %v9651_v35  ;;  %v10923_v37 = vadd.f32 %v4942_v9, %v3754_v15  ;;  %v4554_v23 = vshll.u32 %v3866_v17, 16  ;;  %v4564_v35 = vshrl.u32 %v3867_v33, 16  ;;  %v9069_v15 = vrot.slane %v2498_v57, 9 }
 0x27a   :  { %v3091_v12 = vpop.f32.mrf.mxu2  ;;  %v2771_v57 = vsel %vm10330_vm9, %v2769_v59, %v2770_v7 }
 0x27b   :  { %12427 = vst [vmem:[#allocation14_spill] sm:$0xff] %v10923_v37  ;;  %v3196_v25 = vadd.f32 %v3091_v12, %v2403_v22  ;;  %v2406_v22 = vadd.f32 %v2405_v26, %v12428_v43  ;;  %v4703_v12 = vunpack.c.l.b16 %v4549_v63  ;;  %v4556_v38 = vrot.slane %v4554_v23, 5  ;;  %v9652_v63 = vld [vmem:[#allocation2 + $0x168] sm:$0xff] }
 0x27c   :  { %v4566_v17 = vrot.slane %v4564_v35, 4  ;;  %v2852_v5 = vunpack.c.l.b16 %v2771_v57 }
 0x27d   :  { %v4739_v26 = vpack.c.b16 %v4703_v12, %v4702_v10  ;;  %v4557_v60 = vor.u32 %v4556_v38, %v4553_v29  ;;  %v3870_v29 = vld [vmem:[#allocation2 + $0x184] sm:$0xf] }
 0x27e   :  { %v4944_v52 = vpop.f32.mrf.mxu0  ;;  %v3650_v39 = vpop.f32.mrf.mxu3 }
 0x27f   :  { %9101 = vmatmul.msk.bf16.gmra.mxu2 %vm1772_vm5, %v2886_v24  ;;  %v2407_v9 = vpop.f32.mrf.mxu1  ;;  %v3755_v31 = vadd.f32 %v3650_v39, %v3196_v25  ;;  %v3868_v24 = vld [vmem:[#allocation2 + $0x17c] sm:$0x1]  ;;  %v2768_v25 = vsel %vm10330_vm9, %v9069_v15, %v2767_v42  ;;  %v4567_v39 = vor.u32 %v4566_v17, %v4562_v54  ;;  %v4558_v7 = vrot.slane %v4557_v60, 4  ;;  %v9778_v17 = vld [vmem:[#allocation2 + $0x178] sm:$0xf] }
 0x280   :  { %v4570_v23 = vshll.u32 %v3868_v24, 16  ;;  %v2774_v24 = vrot.slane %v9778_v17, 5  ;;  %v4588_v60 = vshrl.u32 %v3870_v29, 16 }
 0x281   :  { %v10931_v33 = vadd.f32 %v4944_v52, %v3755_v31  ;;  %v2851_v52 = vunpack.c.l.b16 %v2768_v25  ;;  %v3869_v31 = vld [vmem:[#allocation2 + $0x180] sm:$0xf]  ;;  %v4568_v15 = vrot.slane %v4567_v39, 4  ;;  %v9779_v39 = vld [vmem:[#allocation2 + $0x17c] sm:$0x1] }
 0x282   :  { %v3094_v37 = vpop.f32.mrf.mxu2  ;;  %v4572_v59 = vrot.slane %v4570_v23, 5  ;;  %v4575_v38 = vshrl.u32 %v3869_v31, 16  ;;  %v4578_v25 = vshll.u32 %v3869_v31, 16  ;;  %v2777_v23 = vrot.slane %v9779_v39, 5  ;;  %v9684_v31 = vld [vmem:[#allocation2 + $0x174] sm:$0xff] }
 0x283   :  { %12429 = vst [vmem:[#allocation16_spill] sm:$0xff] %v10931_v33  ;;  %v3197_v20 = vadd.f32 %v3094_v37, %v2406_v22  ;;  %9262 = vmatmul.msk.bf16.gmra.mxu3 %vm1772_vm5, %v9683_v1  ;;  %v12430_v1 = vld [vmem:[#allocation18_spill] sm:$0xff]  ;;  %v2887_v12 = vpack.c.b16 %v2852_v5, %v2851_v52  ;;  %v4590_v39 = vrot.slane %v4588_v60, 4 }
 0x284   :  { %v2408_v43 = vadd.f32 %v2407_v9, %v12430_v1  ;;  %v2499_v9 = vld [vmem:[#allocation2 + $0x174] sm:$0xe]  ;;  %v4577_v5 = vrot.slane %v4575_v38, 4 }
 0x285   :  { %v9070_v1 = vrot.slane %v2499_v9, 9 }
 0x286   :  { %v4947_v45 = vpop.f32.mrf.mxu0  ;;  %v3653_v61 = vpop.f32.mrf.mxu3 }
 0x287   :  { %v2410_v35 = vpop.f32.mrf.mxu1  ;;  %v3756_v37 = vadd.f32 %v3653_v61, %v3197_v20  ;;  %v8839_v20 = vld [vmem:[%s12375_s1 + $0x198] sm:$0xff]  }
 0x288   :  { %463 = vst [vmem:[#allocation4 + $0xc] sm:$0xff] %v8839_v20  }
 0x289   :  { %9295 = vmatmul.msk.bf16.gmra.mxu0 %vm1772_vm5, %v4739_v26  ;;  %9037 = vmatmul.msk.bf16.gmra.mxu1 %vm1772_vm5, %v9652_v63  ;;  %v10941_v22 = vadd.f32 %v4947_v45, %v3756_v37  ;;  %v4563_v26 = vsel %vm9938_vm6, %v4558_v7, %v4562_v54  ;;  %v4573_v45 = vsel %vm9938_vm6, %v4568_v15, %v4572_v59  ;;  %v4584_v63 = vshll.u32 %v3870_v29, 16  ;;  %v8841_v54 = vld [vmem:[%s12375_s1 + $0x1a0] sm:$0xf]  ;;  %v12432_v7 = vld [vmem:[#allocation20_spill] sm:$0xff] }
 0x28a   :  { %v3096_v42 = vpop.f32.mrf.mxu2  ;;  %v2411_v15 = vadd.f32 %v2410_v35, %v12432_v7  ;;  %v4704_v59 = vunpack.c.l.b16 %v4563_v26  ;;  %v4705_v29 = vunpack.c.l.b16 %v4573_v45  ;;  %467 = vst [vmem:[#allocation4 + $0x14] sm:$0xf] %v8841_v54 }
 0x28b   :  { %12431 = vst [vmem:[#allocation18_spill] sm:$0xff] %v10941_v22  ;;  %v3198_v10 = vadd.f32 %v3096_v42, %v2408_v43  ;;  %v2776_v43 = vrot.slane %v2774_v24, 4  ;;  %v4580_v42 = vrot.slane %v4578_v25, 5  ;;  %v4586_v17 = vrot.slane %v4584_v63, 5  ;;  %v9653_v63 = vld [vmem:[#allocation2 + $0x174] sm:$0xff] }
 0x28c   :  { %v2775_v25 = vsel %vm10330_vm9, %v9070_v1, %v2774_v24  ;;  %v4740_v45 = vpack.c.b16 %v4705_v29, %v4704_v59  ;;  %v3872_v24 = vld [vmem:[#allocation2 + $0x18c] sm:$0xf]  ;;  %v3873_v29 = vld [vmem:[#allocation2 + $0x190] sm:$0xf] }
 0x28d   :  { %v2778_v35 = vsel %vm10330_vm9, %v2776_v43, %v2777_v23  ;;  %v4581_v26 = vor.u32 %v4580_v42, %v4577_v5  ;;  %v4591_v60 = vor.u32 %v4590_v39, %v4586_v17  ;;  %v12434_v23 = vld [vmem:[#allocation22_spill] sm:$0xff] }
 0x28e   :  { %v4949_v57 = vpop.f32.mrf.mxu0  ;;  %v3655_v61 = vpop.f32.mrf.mxu3 }
 0x28f   :  { %9102 = vmatmul.msk.bf16.gmra.mxu2 %vm1772_vm5, %v2887_v12  ;;  %v2412_v52 = vpop.f32.mrf.mxu1  ;;  %v3757_v37 = vadd.f32 %v3655_v61, %v3198_v10  ;;  %v3871_v10 = vld [vmem:[#allocation2 + $0x188] sm:$0x1]  ;;  %v783_v61 = vld [vmem:[#allocation4 + $0xc] sm:$0xf]  ;;  %v784_v9 = vld [vmem:[#allocation4 + $0x10] sm:$0xf] }
 0x290   :  { %790 = vst.msk [vmem:[#allocation2 + $0x198] sm:$0xf] %vm682_vm1, %v783_v61  ;;  %v2413_v5 = vadd.f32 %v2412_v52, %v12434_v23  ;;  %v4592_v42 = vrot.slane %v4591_v60, 4  ;;  %v2500_v52 = vld [vmem:[#allocation2 + $0x180] sm:$0xe] }
 0x291   :  { %v10955_v12 = vadd.f32 %v4949_v57, %v3757_v37  ;;  %791 = vst.msk [vmem:[#allocation2 + $0x19c] sm:$0xf] %vm682_vm1, %v784_v9  ;;  %v4594_v37 = vshll.u32 %v3871_v10, 16  ;;  %v785_v1 = vld [vmem:[#allocation4 + $0x14] sm:$0x1] }
 0x292   :  { %v3099_v20 = vpop.f32.mrf.mxu2  ;;  %792 = vst.msk [vmem:[#allocation2 + $0x1a0] sm:$0x1] %vm685_vm2, %v785_v1  ;;  %v9781_v60 = vld [vmem:[#allocation2 + $0x188] sm:$0x1] }
 0x293   :  { %12433 = vst [vmem:[#allocation20_spill] sm:$0xff] %v10955_v12  ;;  %v3199_v38 = vadd.f32 %v3099_v20, %v2411_v15  ;;  %9263 = vmatmul.msk.bf16.gmra.mxu3 %vm1772_vm5, %v9684_v31  ;;  %v2853_v15 = vunpack.c.l.b16 %v2775_v25  ;;  %v2854_v31 = vunpack.c.l.b16 %v2778_v35  ;;  %v4582_v12 = vrot.slane %v4581_v26, 4  ;;  %v9780_v25 = vld [vmem:[#allocation2 + $0x184] sm:$0xf] }
 0x294   :  { %v4596_v59 = vrot.slane %v4594_v37, 5  ;;  %v2781_v35 = vrot.slane %v9780_v25, 5  ;;  %v4602_v26 = vshll.u32 %v3872_v24, 16  ;;  %v2784_v37 = vrot.slane %v9781_v60, 5 }
 0x295   :  { %v2888_v61 = vpack.c.b16 %v2854_v31, %v2853_v15  ;;  %v4587_v9 = vsel %vm9938_vm6, %v4582_v12, %v4586_v17  ;;  %v9685_v17 = vld [vmem:[#allocation2 + $0x180] sm:$0xff]  ;;  %v9071_v12 = vrot.slane %v2500_v52, 9 }
 0x296   :  { %v4952_v57 = vpop.f32.mrf.mxu0  ;;  %v3658_v54 = vpop.f32.mrf.mxu3  ;;  %v4706_v15 = vunpack.c.l.b16 %v4587_v9 }
 0x297   :  { %v2415_v7 = vpop.f32.mrf.mxu1  ;;  %v3758_v20 = vadd.f32 %v3658_v54, %v3199_v38  ;;  %v4599_v38 = vshrl.u32 %v3872_v24, 16  ;;  %v4612_v54 = vshrl.u32 %v3873_v29, 16  ;;  %v4604_v24 = vrot.slane %v4602_v26, 5 }
 0x299   :  { %9296 = vmatmul.msk.bf16.gmra.mxu0 %vm1772_vm5, %v4740_v45  ;;  %9038 = vmatmul.msk.bf16.gmra.mxu1 %vm1772_vm5, %v9653_v63  ;;  %v10968_v39 = vadd.f32 %v4952_v57, %v3758_v20  ;;  %v4608_v45 = vshll.u32 %v3873_v29, 16  ;;  %v4597_v63 = vsel %vm9938_vm6, %v4592_v42, %v4596_v59  ;;  %v4601_v20 = vrot.slane %v4599_v38, 4  ;;  %v3874_v42 = vld [vmem:[#allocation2 + $0x194] sm:$0x1] }
 0x29a   :  { %v3101_v43 = vpop.f32.mrf.mxu2  ;;  %v4707_v29 = vunpack.c.l.b16 %v4597_v63  ;;  %v4614_v22 = vrot.slane %v4612_v54, 4 }
 0x29b   :  { %12435 = vst [vmem:[#allocation22_spill] sm:$0xff] %v10968_v39  ;;  %v3200_v10 = vadd.f32 %v3101_v43, %v2413_v5  ;;  %v2783_v5 = vrot.slane %v2781_v35, 4  ;;  %v12436_v43 = vld [vmem:[#allocation24_spill] sm:$0xff]  ;;  %v4610_v39 = vrot.slane %v4608_v45, 5  ;;  %v4605_v38 = vor.u32 %v4604_v24, %v4601_v20  ;;  %v9654_v45 = vld [vmem:[#allocation2 + $0x180] sm:$0xff] }
 0x29c   :  { %v2416_v25 = vadd.f32 %v2415_v7, %v12436_v43  ;;  %v4741_v9 = vpack.c.b16 %v4707_v29, %v4706_v15  ;;  %v4618_v7 = vshll.u32 %v3874_v42, 16  ;;  %v3876_v15 = vld [vmem:[#allocation2 + $0x19c] sm:$0xf]  ;;  %v2501_v29 = vld [vmem:[#allocation2 + $0x18c] sm:$0xe] }
 0x29d   :  { %v4615_v26 = vor.u32 %v4614_v22, %v4610_v39  ;;  %v3875_v22 = vld [vmem:[#allocation2 + $0x198] sm:$0xf]  ;;  %v9783_v42 = vld [vmem:[#allocation2 + $0x190] sm:$0xf] }
 0x29e   :  { %v4954_v1 = vpop.f32.mrf.mxu0  ;;  %v3660_v57 = vpop.f32.mrf.mxu3 }
 0x29f   :  { %9103 = vmatmul.msk.bf16.gmra.mxu2 %vm1772_vm5, %v2888_v61  ;;  %v2417_v31 = vpop.f32.mrf.mxu1  ;;  %v3759_v23 = vadd.f32 %v3660_v57, %v3200_v10  ;;  %v2782_v61 = vsel %vm10330_vm9, %v9071_v12, %v2781_v35  ;;  %v2785_v10 = vsel %vm10330_vm9, %v2783_v5, %v2784_v37  ;;  %v4616_v35 = vrot.slane %v4615_v26, 4 }
 0x2a0   :  { %v2855_v57 = vunpack.c.l.b16 %v2782_v61  ;;  %v4620_v12 = vrot.slane %v4618_v7, 5  ;;  %v2788_v61 = vrot.slane %v9783_v42, 5  ;;  %v4632_v26 = vshll.u32 %v3876_v15, 16  ;;  %v9686_v42 = vld [vmem:[#allocation2 + $0x18c] sm:$0xff] }
 0x2a1   :  { %v10976_v59 = vadd.f32 %v4954_v1, %v3759_v23  ;;  %v2856_v1 = vunpack.c.l.b16 %v2785_v10 }
 0x2a2   :  { %v3104_v33 = vpop.f32.mrf.mxu2  ;;  %v4634_v13 = vrot.slane %v4632_v26, 5 }
 0x2a3   :  { %12437 = vst [vmem:[#allocation24_spill] sm:$0xff] %v10976_v59  ;;  %v3201_v60 = vadd.f32 %v3104_v33, %v2416_v25  ;;  %9264 = vmatmul.msk.bf16.gmra.mxu3 %vm1772_vm5, %v9685_v17  ;;  %v4606_v33 = vrot.slane %v4605_v38, 4  ;;  %v12438_v17 = vld [vmem:[#allocation26_spill] sm:$0xff]  ;;  %v9782_v25 = vld [vmem:[#allocation2 + $0x10] sm:$0xf]  ;;  %v2889_v24 = vpack.c.b16 %v2856_v1, %v2855_v57  ;;  %v4623_v38 = vshrl.u32 %v3875_v22, 16 }
 0x2a4   :  { %v2418_v43 = vadd.f32 %v2417_v31, %v12438_v17  ;;  %v5206_v37 = vrot.slane %v9782_v25, 5  ;;  %v4621_v31 = vsel %vm9938_vm6, %v4616_v35, %v4620_v12  ;;  %v4636_v57 = vshrl.u32 %v3876_v15, 16  ;;  %v9785_v1 = vld [vmem:[#allocation2 + $0x194] sm:$0x1] }
 0x2a5   :  { %v4611_v10 = vsel %vm9938_vm6, %v4606_v33, %v4610_v39  ;;  %v2791_v25 = vrot.slane %v9785_v1, 5  ;;  %v5076_v39 = vld [vmem:[#allocation2 + $0xc] sm:$0xe]  ;;  %v4709_v12 = vunpack.c.l.b16 %v4621_v31  ;;  %v4625_v47 = vrot.slane %v4623_v38, 4  ;;  %v3877_v31 = vld [vmem:[#allocation2 + $0x1a0] sm:$0x1] }
 0x2a6   :  { %v4957_v52 = vpop.f32.mrf.mxu0  ;;  %v3663_v54 = vpop.f32.mrf.mxu3  ;;  %v5208_v7 = vrot.slane %v5206_v37, 4  ;;  %v4708_v35 = vunpack.c.l.b16 %v4611_v10  ;;  %v4638_v1 = vrot.slane %v4636_v57, 4  ;;  %v6417_v38 = vld [vmem:[#allocation2 + $0x18] sm:$0xf]  ;;  %v9655_v57 = vld [vmem:[#allocation2 + $0x18c] sm:$0xff] }
 0x2a7   :  { %v2420_v63 = vpop.f32.mrf.mxu1  ;;  %v3760_v23 = vadd.f32 %v3663_v54, %v3201_v60 }
 0x2a9   :  { %9297 = vmatmul.msk.bf16.gmra.mxu0 %vm1772_vm5, %v4741_v9  ;;  %9039 = vmatmul.msk.bf16.gmra.mxu1 %vm1772_vm5, %v9654_v45  ;;  %v10986_v60 = vadd.f32 %v4957_v52, %v3760_v23  ;;  %v4626_v9 = vshll.u32 %v3875_v22, 16  ;;  %v9784_v45 = vld [vmem:[#allocation2 + $0x14] sm:$0x1]  ;;  %v2790_v23 = vrot.slane %v2788_v61, 4  ;;  %v9300_v22 = vrot.slane %v5076_v39, 9 }
 0x2aa   :  { %v3106_v20 = vpop.f32.mrf.mxu2  ;;  %v5209_v54 = vrot.slane %v9784_v45, 5 }
 0x2ab   :  { %v3202_v5 = vadd.f32 %v3106_v20, %v2418_v43  ;;  %12439 = vst [vmem:[#allocation26_spill] sm:$0xff] %v10986_v60  ;;  %v9072_v43 = vrot.slane %v2501_v29, 9  ;;  %v12440_v60 = vld [vmem:[#allocation28_spill] sm:$0xff]  ;;  %v4628_v45 = vrot.slane %v4626_v9, 5  ;;  %v2792_v10 = vsel %vm10330_vm9, %v2790_v23, %v2791_v25 }
 0x2ac   :  { %v2421_v59 = vadd.f32 %v2420_v63, %v12440_v60  ;;  %v4742_v9 = vpack.c.b16 %v4709_v12, %v4708_v35 }
 0x2ad   :  { %v2789_v15 = vsel %vm10330_vm9, %v9072_v43, %v2788_v61  ;;  %v4629_v26 = vor.u32 %v4628_v45, %v4625_v47  ;;  %v12442_v47 = vld [vmem:[#allocation30_spill] sm:$0xff] }
 0x2ae   :  { %v4959_v17 = vpop.f32.mrf.mxu0  ;;  %v3665_v20 = vpop.f32.mrf.mxu3  ;;  %v2857_v39 = vunpack.c.l.b16 %v2789_v15 }
 0x2af   :  { %9104 = vmatmul.msk.bf16.gmra.mxu2 %vm1772_vm5, %v2889_v24  ;;  %v2422_v52 = vpop.f32.mrf.mxu1  ;;  %v3761_v33 = vadd.f32 %v3665_v20, %v3202_v5  ;;  %v5207_v24 = vsel %vm10330_vm9, %v9300_v22, %v5206_v37  ;;  %v5210_v5 = vsel %vm10330_vm9, %v5208_v7, %v5209_v54  ;;  %v2858_v7 = vunpack.c.l.b16 %v2792_v10  ;;  %v11007_v22 = vld [vmem:[#allocation2 + $0x1c] sm:$0xf] }
 0x2b0   :  { %v5430_v63 = vunpack.c.l.b16 %v5207_v24  ;;  %v5431_v60 = vunpack.c.l.b16 %v5210_v5  ;;  %v4642_v54 = vshll.u32 %v3877_v31, 16  ;;  %v6517_v24 = vshll.u32 %v6417_v38, 16 }
 0x2b1   :  { %v11005_v43 = vadd.f32 %v4959_v17, %v3761_v33  ;;  %v2423_v35 = vadd.f32 %v2422_v52, %v12442_v47  ;;  %v4630_v12 = vrot.slane %v4629_v26, 4  ;;  %v6523_v17 = vshll.u32 %v11007_v22, 16 }
 0x2b2   :  { %v3109_v29 = vpop.f32.mrf.mxu2  ;;  %v11003_v61 = vpack.c.b16 %v5431_v60, %v5430_v63  ;;  %v6527_v33 = vshrl.u32 %v11007_v22, 16  ;;  %v2890_v15 = vpack.c.b16 %v2858_v7, %v2857_v39  ;;  %v4644_v5 = vrot.slane %v4642_v54, 5 }
 0x2b3   :  { %v3203_v20 = vadd.f32 %v3109_v29, %v2421_v59  ;;  %9265 = vmatmul.msk.bf16.gmra.mxu3 %vm1772_vm5, %v9686_v42  ;;  %12441 = vst [vmem:[#allocation28_spill] sm:$0xff] %v11005_v43  ;;  %v4639_v59 = vor.u32 %v4638_v1, %v4634_v13  ;;  %v6514_v29 = vshrl.u32 %v6417_v38, 16  ;;  %v6519_v63 = vrot.slane %v6517_v24, 5 }
 0x2b4   :  { %v6525_v52 = vrot.slane %v6523_v17, 5  ;;  %v6529_v38 = vrot.slane %v6527_v33, 4 }
 0x2b5   :  { %v4640_v1 = vrot.slane %v4639_v59, 4  ;;  %v6516_v31 = vrot.slane %v6514_v29, 4  ;;  %v9687_v59 = vld [vmem:[#allocation2 + $0x198] sm:$0xff] }
 0x2b6   :  { %v4962_v37 = vpop.f32.mrf.mxu0  ;;  %v3668_v25 = vpop.f32.mrf.mxu3 }
 0x2b7   :  { %v2425_v23 = vpop.f32.mrf.mxu1  ;;  %v3762_v42 = vadd.f32 %v3668_v25, %v3203_v20  ;;  %v4635_v20 = vsel %vm9938_vm6, %v4630_v12, %v4634_v13  ;;  %v4645_v26 = vsel %vm9938_vm6, %v4640_v1, %v4644_v5  ;;  %v6419_v25 = vld [vmem:[#allocation2 + $0x20] sm:$0x1]  ;;  %v6520_v39 = vor.u32 %v6519_v63, %v6516_v31  ;;  %v7711_v5 = vld [vmem:[#allocation2 + $0x18] sm:$0xe]  ;;  %v11026_v63 = vld [vmem:[#allocation2 + $0x28] sm:$0xf] }
 0x2b8   :  { %v4710_v54 = vunpack.c.l.b16 %v4635_v20  ;;  %v4711_v24 = vunpack.c.l.b16 %v4645_v26  ;;  %v6533_v13 = vshll.u32 %v6419_v25, 16  ;;  %v7841_v31 = vrot.slane %v11007_v22, 5  ;;  %v9786_v26 = vld [vmem:[#allocation2 + $0x1c] sm:$0xf] }
 0x2b9   :  { %9298 = vmatmul.msk.bf16.gmra.mxu0 %vm1772_vm5, %v4742_v9  ;;  %9040 = vmatmul.msk.bf16.gmra.mxu1 %vm1772_vm5, %v9655_v57  ;;  %v11014_v60 = vadd.f32 %v4962_v37, %v3762_v42  ;;  %v12444_v37 = vld [vmem:[#allocation32_spill] sm:$0xff]  ;;  %v6530_v42 = vor.u32 %v6529_v38, %v6525_v52  ;;  %v6521_v17 = vrot.slane %v6520_v39, 4 }
 0x2ba   :  { %v3111_v45 = vpop.f32.mrf.mxu2  ;;  %v2426_v29 = vadd.f32 %v2425_v23, %v12444_v37  ;;  %v4743_v33 = vpack.c.b16 %v4711_v24, %v4710_v54  ;;  %v6535_v1 = vrot.slane %v6533_v13, 5  ;;  %v5077_v54 = vld [vmem:[#allocation2 + $0x18] sm:$0xe]  ;;  %v6547_v24 = vshll.u32 %v11026_v63, 16  ;;  %v9787_v13 = vld [vmem:[#allocation2 + $0x20] sm:$0x1] }
 0x2bb   :  { %v3204_v10 = vadd.f32 %v3111_v45, %v2423_v35  ;;  %12443 = vst [vmem:[#allocation30_spill] sm:$0xff] %v11014_v60  ;;  %v6531_v45 = vrot.slane %v6530_v42, 4  ;;  %v6526_v38 = vsel %vm9938_vm6, %v6521_v17, %v6525_v52  ;;  %v6551_v42 = vshrl.u32 %v11026_v63, 16 }
 0x2bc   :  { %v5216_v52 = vrot.slane %v9787_v13, 5  ;;  %v7844_v17 = vrot.slane %v6419_v25, 5  ;;  %v6549_v13 = vrot.slane %v6547_v24, 5  ;;  %v11044_v25 = vld [vmem:[#allocation2 + $0x2c] sm:$0x1] }
 0x2bd   :  { %v6536_v22 = vsel %vm9938_vm6, %v6531_v45, %v6535_v1  ;;  %v6553_v43 = vrot.slane %v6551_v42, 4 }
 0x2be   :  { %v4964_v9 = vpop.f32.mrf.mxu0  ;;  %v3670_v47 = vpop.f32.mrf.mxu3  ;;  %v7284_v45 = vunpack.c.l.b16 %v6536_v22 }
 0x2bf   :  { %9105 = vmatmul.msk.bf16.gmra.mxu2 %vm1772_vm5, %v2890_v15  ;;  %v2427_v57 = vpop.f32.mrf.mxu1  ;;  %v3763_v7 = vadd.f32 %v3670_v47, %v3204_v10  ;;  %v6420_v15 = vld [vmem:[#allocation2 + $0x24] sm:$0xf]  ;;  %v5213_v47 = vrot.slane %v9786_v26, 5  ;;  %v7283_v26 = vunpack.c.l.b16 %v6526_v38  ;;  %v6554_v42 = vor.u32 %v6553_v43, %v6549_v13 }
 0x2c0   :  { %v6538_v37 = vshrl.u32 %v6420_v15, 16  ;;  %v7848_v43 = vrot.slane %v11026_v63, 5 }
 0x2c1   :  { %v11023_v60 = vadd.f32 %v4964_v9, %v3763_v7  ;;  %v12446_v9 = vld [vmem:[#allocation34_spill] sm:$0xff] }
 0x2c2   :  { %v3114_v35 = vpop.f32.mrf.mxu2  ;;  %v2428_v7 = vadd.f32 %v2427_v57, %v12446_v9  ;;  %v6540_v1 = vrot.slane %v6538_v37, 4 }
 0x2c3   :  { %v3205_v12 = vadd.f32 %v3114_v35, %v2426_v29  ;;  %9266 = vmatmul.msk.bf16.gmra.mxu3 %vm1772_vm5, %v9687_v59  ;;  %12445 = vst [vmem:[#allocation32_spill] sm:$0xff] %v11023_v60  ;;  %v9559_v59 = vrot.slane %v7711_v5, 9  ;;  %v6541_v29 = vshll.u32 %v6420_v15, 16  ;;  %v9688_v15 = vld [vmem:[#allocation2 + $0x18] sm:$0xff] }
 0x2c5   :  { %v6543_v9 = vrot.slane %v6541_v29, 5  ;;  %v7842_v60 = vsel %vm10330_vm9, %v9559_v59, %v7841_v31  ;;  %v12448_v29 = vld [vmem:[#allocation6_spill] sm:$0xff] }
 0x2c6   :  { %v4967_v10 = vpop.f32.mrf.mxu0  ;;  %v3673_v23 = vpop.f32.mrf.mxu3  ;;  %v8065_v59 = vunpack.c.l.b16 %v7842_v60 }
 0x2c7   :  { %v2430_v20 = vpop.f32.mrf.mxu1  ;;  %v3764_v39 = vadd.f32 %v3673_v23, %v3205_v12  ;;  %v7843_v12 = vrot.slane %v7841_v31, 4  ;;  %v5215_v23 = vrot.slane %v5213_v47, 4  ;;  %v7347_v31 = vpack.c.b16 %v7284_v45, %v7283_v26  ;;  %v11057_v45 = vld [vmem:[#allocation2 + $0x34] sm:$0xf] }
 0x2c8   :  { %v6544_v37 = vor.u32 %v6543_v9, %v6540_v1  ;;  %v2431_v22 = vadd.f32 %v2430_v20, %v12448_v29 }
 0x2c9   :  { %9299 = vmatmul.msk.bf16.gmra.mxu0 %vm1772_vm5, %v4743_v33  ;;  %9333 = vmatmul.msk.bf16.vlgmr.msra.gmra.mxu1 %vm1772_vm5, %v11003_v61  ;;  %v9301_v33 = vrot.slane %v5077_v54, 9  ;;  %v11038_v57 = vadd.f32 %v4967_v10, %v3764_v39  ;;  %v7845_v61 = vsel %vm10330_vm9, %v7843_v12, %v7844_v17  ;;  %v5217_v39 = vsel %vm10330_vm9, %v5215_v23, %v5216_v52  ;;  %v6423_v23 = vld [vmem:[#allocation2 + $0x30] sm:$0xf] }
 0x2ca   :  { %v3116_v35 = vpop.f32.mrf.mxu2  ;;  %v8066_v24 = vunpack.c.l.b16 %v7845_v61  ;;  %v6555_v52 = vrot.slane %v6554_v42, 4  ;;  %v6565_v29 = vshll.u32 %v6423_v23, 16  ;;  %v9789_v42 = vld [vmem:[#allocation2 + $0x2c] sm:$0x1] }
 0x2cb   :  { %v3206_v5 = vadd.f32 %v3116_v35, %v2428_v7  ;;  %12447 = vst [vmem:[#allocation34_spill] sm:$0xff] %v11038_v57  ;;  %v5214_v38 = vsel %vm10330_vm9, %v9301_v33, %v5213_v47  ;;  %v6557_v35 = vshll.u32 %v11044_v25, 16  ;;  %v6545_v47 = vrot.slane %v6544_v37, 4  ;;  %v7712_v33 = vld [vmem:[#allocation2 + $0x24] sm:$0xe] }
 0x2cc   :  { %v5432_v17 = vunpack.c.l.b16 %v5214_v38  ;;  %v8129_v55 = vpack.c.b16 %v8066_v24, %v8065_v59  ;;  %v9560_v61 = vrot.slane %v7712_v33, 9  ;;  %v5078_v59 = vld [vmem:[#allocation2 + $0x24] sm:$0xe]  ;;  %v6562_v37 = vshrl.u32 %v6423_v23, 16 }
 0x2cd   :  { %v6575_v24 = vshrl.u32 %v11057_v45, 16  ;;  %v6567_v23 = vrot.slane %v6565_v29, 5  ;;  %v12452_v29 = vld [vmem:[#allocation9_spill] sm:$0xff] }
 0x2ce   :  { %v4969_v14 = vpop.f32.mrf.mxu0  ;;  %v3675_v7 = vpop.f32.mrf.mxu3 }
 0x2cf   :  { %9494 = vmatmul.msk.bf16.vlgmr.msra.gmra.mxu2 %vm1772_vm5, %v9688_v15  ;;  %v2432_v10 = vpop.f32.mrf.mxu1  ;;  %v3765_v54 = vadd.f32 %v3675_v7, %v3206_v5  ;;  %v5433_v15 = vunpack.c.l.b16 %v5217_v39  ;;  %v6559_v5 = vrot.slane %v6557_v35, 5  ;;  %v9788_v7 = vld [vmem:[#allocation2 + $0x28] sm:$0xf]  ;;  %v5223_v35 = vrot.slane %v9789_v42, 5 }
 0x2d0   :  { %v5220_v38 = vrot.slane %v9788_v7, 5 }
 0x2d1   :  { %v11054_v60 = vadd.f32 %v4969_v14, %v3765_v54  ;;  %v5495_v20 = vpack.c.b16 %v5433_v15, %v5432_v17  ;;  %v12450_v14 = vld [vmem:[#allocation7_spill] sm:$0xff]  ;;  %v6560_v63 = vsel %vm9938_vm6, %v6555_v52, %v6559_v5  ;;  %v6564_v5 = vrot.slane %v6562_v37, 4 }
 0x2d2   :  { %v3119_v12 = vpop.f32.mrf.mxu2  ;;  %v2433_v54 = vadd.f32 %v2432_v10, %v12450_v14  ;;  %v9689_v15 = vld [vmem:[#allocation2 + $0x24] sm:$0xff]  ;;  %v7286_v52 = vunpack.c.l.b16 %v6560_v63  ;;  %v6577_v14 = vrot.slane %v6575_v24, 4 }
 0x2d3   :  { %v3207_v57 = vadd.f32 %v3119_v12, %v2431_v22  ;;  %9527 = vmatmul.msk.bf16.vlgmr.msra.gmra.mxu3 %vm1772_vm5, %v7347_v31  ;;  %12449 = vst [vmem:[#allocation6_spill] sm:$0xff] %v11054_v60  ;;  %v6550_v31 = vsel %vm9938_vm6, %v6545_v47, %v6549_v13  ;;  %v6571_v22 = vshll.u32 %v11057_v45, 16  ;;  %v7850_v13 = vrot.slane %v7848_v43, 4 }
 0x2d4   :  { %v7851_v12 = vrot.slane %v11044_v25, 5  ;;  %v5222_v47 = vrot.slane %v5220_v38, 4  ;;  %v7285_v33 = vunpack.c.l.b16 %v6550_v31  ;;  %v11075_v25 = vld [vmem:[#allocation2 + $0x38] sm:$0x1]  ;;  %v6568_v37 = vor.u32 %v6567_v23, %v6564_v5  ;;  %v11088_v23 = vld [vmem:[#allocation2 + $0x40] sm:$0xf] }
 0x2d5   :  { %v6573_v7 = vrot.slane %v6571_v22, 5  ;;  %v7855_v5 = vrot.slane %v11057_v45, 5 }
 0x2d6   :  { %v4972_v26 = vpop.f32.mrf.mxu0  ;;  %v3678_v1 = vpop.f32.mrf.mxu3  ;;  %v5224_v31 = vsel %vm10330_vm9, %v5222_v47, %v5223_v35  ;;  %v6426_v47 = vld [vmem:[#allocation2 + $0x3c] sm:$0xf] }
 0x2d7   :  { %v2435_v9 = vpop.f32.mrf.mxu1  ;;  %v3766_v39 = vadd.f32 %v3678_v1, %v3207_v57  ;;  %v7849_v1 = vsel %vm10330_vm9, %v9560_v61, %v7848_v43  ;;  %v7348_v43 = vpack.c.b16 %v7286_v52, %v7285_v33  ;;  %v6578_v24 = vor.u32 %v6577_v14, %v6573_v7 }
 0x2d8   :  { %v8067_v61 = vunpack.c.l.b16 %v7849_v1  ;;  %v2436_v63 = vadd.f32 %v2435_v9, %v12452_v29  ;;  %v6589_v29 = vshll.u32 %v6426_v47, 16 }
 0x2d9   :  { %9592 = vmatmul.msk.bf16.vlgmr.msra.gmra.mxu0 %vm1772_vm5, %v8129_v55  ;;  %9334 = vmatmul.msk.bf16.gmra.mxu1 %vm1772_vm5, %v5495_v20  ;;  %v9302_v55 = vrot.slane %v5078_v59, 9  ;;  %v11069_v10 = vadd.f32 %v4972_v26, %v3766_v39  ;;  %v7852_v20 = vsel %vm10330_vm9, %v7850_v13, %v7851_v12  ;;  %v6579_v35 = vrot.slane %v6578_v24, 4  ;;  %v9791_v24 = vld [vmem:[#allocation2 + $0x38] sm:$0x1] }
 0x2da   :  { %v3121_v57 = vpop.f32.mrf.mxu2  ;;  %v8068_v22 = vunpack.c.l.b16 %v7852_v20 }
 0x2db   :  { %v3208_v17 = vadd.f32 %v3121_v57, %v2433_v54  ;;  %12451 = vst [vmem:[#allocation7_spill] sm:$0xff] %v11069_v10  ;;  %v5221_v39 = vsel %vm10330_vm9, %v9302_v55, %v5220_v38  ;;  %v6581_v57 = vshll.u32 %v11075_v25, 16  ;;  %v6569_v38 = vrot.slane %v6568_v37, 4  ;;  %v7713_v55 = vld [vmem:[#allocation2 + $0x30] sm:$0xe] }
 0x2dc   :  { %v5434_v12 = vunpack.c.l.b16 %v5221_v39  ;;  %v8130_v60 = vpack.c.b16 %v8068_v22, %v8067_v61  ;;  %v9561_v20 = vrot.slane %v7713_v55, 9  ;;  %v5079_v61 = vld [vmem:[#allocation2 + $0x30] sm:$0xe]  ;;  %v6586_v37 = vshrl.u32 %v6426_v47, 16 }
 0x2dd   :  { %v6599_v22 = vshrl.u32 %v11088_v23, 16  ;;  %v6591_v47 = vrot.slane %v6589_v29, 5  ;;  %v12456_v29 = vld [vmem:[#allocation13_spill] sm:$0xff] }
 0x2de   :  { %v4974_v42 = vpop.f32.mrf.mxu0  ;;  %v3680_v54 = vpop.f32.mrf.mxu3 }
 0x2df   :  { %9495 = vmatmul.msk.bf16.gmra.mxu2 %vm1772_vm5, %v9689_v15  ;;  %v2437_v26 = vpop.f32.mrf.mxu1  ;;  %v3767_v59 = vadd.f32 %v3680_v54, %v3208_v17  ;;  %v5435_v15 = vunpack.c.l.b16 %v5224_v31  ;;  %v6583_v17 = vrot.slane %v6581_v57, 5  ;;  %v9790_v54 = vld [vmem:[#allocation2 + $0x34] sm:$0xf]  ;;  %v5230_v57 = vrot.slane %v9791_v24, 5 }
 0x2e0   :  { %v5227_v39 = vrot.slane %v9790_v54, 5 }
 0x2e1   :  { %v11085_v33 = vadd.f32 %v4974_v42, %v3767_v59  ;;  %v5496_v9 = vpack.c.b16 %v5435_v15, %v5434_v12  ;;  %v12454_v42 = vld [vmem:[#allocation11_spill] sm:$0xff]  ;;  %v6584_v45 = vsel %vm9938_vm6, %v6579_v35, %v6583_v17  ;;  %v9690_v15 = vld [vmem:[#allocation2 + $0x30] sm:$0xff]  ;;  %v6588_v17 = vrot.slane %v6586_v37, 4 }
 0x2e2   :  { %v3124_v13 = vpop.f32.mrf.mxu2  ;;  %v2438_v59 = vadd.f32 %v2437_v26, %v12454_v42  ;;  %v7288_v35 = vunpack.c.l.b16 %v6584_v45  ;;  %v6601_v42 = vrot.slane %v6599_v22, 4 }
 0x2e3   :  { %v3209_v10 = vadd.f32 %v3124_v13, %v2436_v63  ;;  %9528 = vmatmul.msk.bf16.gmra.mxu3 %vm1772_vm5, %v7348_v43  ;;  %12453 = vst [vmem:[#allocation9_spill] sm:$0xff] %v11085_v33  ;;  %v6574_v43 = vsel %vm9938_vm6, %v6569_v38, %v6573_v7  ;;  %v6595_v63 = vshll.u32 %v11088_v23, 16  ;;  %v7857_v7 = vrot.slane %v7855_v5, 4 }
 0x2e4   :  { %v7858_v13 = vrot.slane %v11075_v25, 5  ;;  %v5229_v38 = vrot.slane %v5227_v39, 4  ;;  %v7287_v55 = vunpack.c.l.b16 %v6574_v43  ;;  %v11106_v25 = vld [vmem:[#allocation2 + $0x44] sm:$0x1]  ;;  %v6592_v37 = vor.u32 %v6591_v47, %v6588_v17  ;;  %v11119_v47 = vld [vmem:[#allocation2 + $0x4c] sm:$0xf] }
 0x2e5   :  { %v6597_v54 = vrot.slane %v6595_v63, 5  ;;  %v7862_v17 = vrot.slane %v11088_v23, 5 }
 0x2e6   :  { %v4977_v52 = vpop.f32.mrf.mxu0  ;;  %v3683_v1 = vpop.f32.mrf.mxu3  ;;  %v5231_v43 = vsel %vm10330_vm9, %v5229_v38, %v5230_v57  ;;  %v6429_v38 = vld [vmem:[#allocation2 + $0x48] sm:$0xf] }
 0x2e7   :  { %v2440_v14 = vpop.f32.mrf.mxu1  ;;  %v3768_v31 = vadd.f32 %v3683_v1, %v3209_v10  ;;  %v7856_v1 = vsel %vm10330_vm9, %v9561_v20, %v7855_v5  ;;  %v7349_v5 = vpack.c.b16 %v7288_v35, %v7287_v55  ;;  %v6602_v22 = vor.u32 %v6601_v42, %v6597_v54 }
 0x2e8   :  { %v8069_v20 = vunpack.c.l.b16 %v7856_v1  ;;  %v2441_v45 = vadd.f32 %v2440_v14, %v12456_v29  ;;  %v6613_v29 = vshll.u32 %v6429_v38, 16 }
 0x2e9   :  { %9593 = vmatmul.msk.bf16.gmra.mxu0 %vm1772_vm5, %v8130_v60  ;;  %9335 = vmatmul.msk.bf16.gmra.mxu1 %vm1772_vm5, %v5496_v9  ;;  %v9303_v60 = vrot.slane %v5079_v61, 9  ;;  %v11100_v26 = vadd.f32 %v4977_v52, %v3768_v31  ;;  %v7859_v9 = vsel %vm10330_vm9, %v7857_v7, %v7858_v13  ;;  %v6603_v57 = vrot.slane %v6602_v22, 4 }
 0x2ea   :  { %v3126_v10 = vpop.f32.mrf.mxu2  ;;  %v8070_v63 = vunpack.c.l.b16 %v7859_v9 }
 0x2eb   :  { %v3210_v12 = vadd.f32 %v3126_v10, %v2438_v59  ;;  %12455 = vst [vmem:[#allocation11_spill] sm:$0xff] %v11100_v26  ;;  %v5228_v31 = vsel %vm10330_vm9, %v9303_v60, %v5227_v39  ;;  %v6605_v10 = vshll.u32 %v11106_v25, 16  ;;  %v6593_v39 = vrot.slane %v6592_v37, 4  ;;  %v7714_v60 = vld [vmem:[#allocation2 + $0x3c] sm:$0xe] }
 0x2ec   :  { %v5436_v13 = vunpack.c.l.b16 %v5228_v31  ;;  %v8131_v33 = vpack.c.b16 %v8070_v63, %v8069_v20  ;;  %v9562_v9 = vrot.slane %v7714_v60, 9  ;;  %v9792_v31 = vld [vmem:[#allocation2 + $0x40] sm:$0xf]  ;;  %v6610_v37 = vshrl.u32 %v6429_v38, 16 }
 0x2ed   :  { %v6598_v20 = vsel %vm9938_vm6, %v6593_v39, %v6597_v54  ;;  %v6623_v63 = vshrl.u32 %v11119_v47, 16  ;;  %v6615_v38 = vrot.slane %v6613_v29, 5 }
 0x2ee   :  { %v4979_v24 = vpop.f32.mrf.mxu0  ;;  %v3685_v59 = vpop.f32.mrf.mxu3  ;;  %v7289_v60 = vunpack.c.l.b16 %v6598_v20 }
 0x2ef   :  { %9496 = vmatmul.msk.bf16.gmra.mxu2 %vm1772_vm5, %v9690_v15  ;;  %v2442_v52 = vpop.f32.mrf.mxu1  ;;  %v3769_v61 = vadd.f32 %v3685_v59, %v3210_v12  ;;  %v5437_v15 = vunpack.c.l.b16 %v5231_v43  ;;  %v6607_v12 = vrot.slane %v6605_v10, 5  ;;  %v5080_v59 = vld [vmem:[#allocation2 + $0x3c] sm:$0xe]  ;;  %v5234_v43 = vrot.slane %v9792_v31, 5 }
 0x2f0   :  { %v7865_v10 = vrot.slane %v11106_v25, 5  ;;  %v9304_v54 = vrot.slane %v5080_v59, 9  ;;  %v11137_v59 = vld [vmem:[#allocation2 + $0x50] sm:$0x1] }
 0x2f1   :  { %v11116_v55 = vadd.f32 %v4979_v24, %v3769_v61  ;;  %v5497_v14 = vpack.c.b16 %v5437_v15, %v5436_v13  ;;  %v12458_v24 = vld [vmem:[#allocation15_spill] sm:$0xff]  ;;  %v6608_v23 = vsel %vm9938_vm6, %v6603_v57, %v6607_v12  ;;  %v9691_v13 = vld [vmem:[#allocation2 + $0x3c] sm:$0xff]  ;;  %v5236_v15 = vrot.slane %v5234_v43, 4 }
 0x2f2   :  { %v3129_v7 = vpop.f32.mrf.mxu2  ;;  %v2443_v61 = vadd.f32 %v2442_v52, %v12458_v24  ;;  %v7290_v57 = vunpack.c.l.b16 %v6608_v23  ;;  %v6612_v12 = vrot.slane %v6610_v37, 4  ;;  %v12460_v23 = vld [vmem:[#allocation17_spill] sm:$0xff] }
 0x2f3   :  { %v3211_v26 = vadd.f32 %v3129_v7, %v2441_v45  ;;  %9529 = vmatmul.msk.bf16.gmra.mxu3 %vm1772_vm5, %v7349_v5  ;;  %12457 = vst [vmem:[#allocation13_spill] sm:$0xff] %v11116_v55  ;;  %v6619_v45 = vshll.u32 %v11119_v47, 16 }
 0x2f4   :  { %v6616_v29 = vor.u32 %v6615_v38, %v6612_v12  ;;  %v7869_v12 = vrot.slane %v11119_v47, 5  ;;  %v11150_v38 = vld [vmem:[#allocation2 + $0x58] sm:$0xf] }
 0x2f5   :  { %v6621_v31 = vrot.slane %v6619_v45, 5 }
 0x2f6   :  { %v4982_v35 = vpop.f32.mrf.mxu0  ;;  %v3688_v1 = vpop.f32.mrf.mxu3 }
 0x2f7   :  { %v2445_v42 = vpop.f32.mrf.mxu1  ;;  %v3770_v5 = vadd.f32 %v3688_v1, %v3211_v26  ;;  %v7864_v26 = vrot.slane %v7862_v17, 4  ;;  %v7863_v1 = vsel %vm10330_vm9, %v9562_v9, %v7862_v17  ;;  %v7350_v17 = vpack.c.b16 %v7290_v57, %v7289_v60 }
 0x2f8   :  { %v8071_v9 = vunpack.c.l.b16 %v7863_v1  ;;  %v2446_v45 = vadd.f32 %v2445_v42, %v12460_v23 }
 0x2f9   :  { %9594 = vmatmul.msk.bf16.gmra.mxu0 %vm1772_vm5, %v8131_v33  ;;  %9336 = vmatmul.msk.bf16.gmra.mxu1 %vm1772_vm5, %v5497_v14  ;;  %v9793_v33 = vld [vmem:[#allocation2 + $0x44] sm:$0x1]  ;;  %v11131_v52 = vadd.f32 %v4982_v35, %v3770_v5  ;;  %v6625_v14 = vrot.slane %v6623_v63, 4  ;;  %v7866_v25 = vsel %vm10330_vm9, %v7864_v26, %v7865_v10  ;;  %v5235_v5 = vsel %vm10330_vm9, %v9304_v54, %v5234_v43  ;;  %v7715_v54 = vld [vmem:[#allocation2 + $0x48] sm:$0xe] }
 0x2fa   :  { %v3131_v22 = vpop.f32.mrf.mxu2  ;;  %v5237_v39 = vrot.slane %v9793_v33, 5  ;;  %v8072_v63 = vunpack.c.l.b16 %v7866_v25  ;;  %v6629_v26 = vshll.u32 %v11137_v59, 16  ;;  %v5438_v33 = vunpack.c.l.b16 %v5235_v5  ;;  %v9794_v5 = vld [vmem:[#allocation2 + $0x4c] sm:$0xf] }
 0x2fb   :  { %v3212_v7 = vadd.f32 %v3131_v22, %v2443_v61  ;;  %12459 = vst [vmem:[#allocation15_spill] sm:$0xff] %v11131_v52  ;;  %v6626_v22 = vor.u32 %v6625_v14, %v6621_v31  ;;  %v6617_v43 = vrot.slane %v6616_v29, 4  ;;  %v9563_v25 = vrot.slane %v7715_v54, 9 }
 0x2fc   :  { %v5238_v20 = vsel %vm10330_vm9, %v5236_v15, %v5237_v39  ;;  %v8132_v55 = vpack.c.b16 %v8072_v63, %v8071_v9  ;;  %v6432_v39 = vld [vmem:[#allocation2 + $0x54] sm:$0xf]  ;;  %v6647_v63 = vshrl.u32 %v11150_v38, 16 }
 0x2fd   :  { %v6627_v15 = vrot.slane %v6626_v22, 4  ;;  %v6622_v9 = vsel %vm9938_vm6, %v6617_v43, %v6621_v31  ;;  %v6634_v29 = vshrl.u32 %v6432_v39, 16  ;;  %v6637_v23 = vshll.u32 %v6432_v39, 16 }
 0x2fe   :  { %v4984_v24 = vpop.f32.mrf.mxu0  ;;  %v3690_v61 = vpop.f32.mrf.mxu3  ;;  %v7291_v54 = vunpack.c.l.b16 %v6622_v9 }
 0x2ff   :  { %9497 = vmatmul.msk.bf16.gmra.mxu2 %vm1772_vm5, %v9691_v13  ;;  %v2447_v35 = vpop.f32.mrf.mxu1  ;;  %v3771_v37 = vadd.f32 %v3690_v61, %v3212_v7  ;;  %v5439_v13 = vunpack.c.l.b16 %v5238_v20  ;;  %v6631_v7 = vrot.slane %v6629_v26, 5  ;;  %v5081_v61 = vld [vmem:[#allocation2 + $0x48] sm:$0xe]  ;;  %v5241_v20 = vrot.slane %v9794_v5, 5 }
 0x300   :  { %v7872_v26 = vrot.slane %v11137_v59, 5  ;;  %v9305_v31 = vrot.slane %v5081_v61, 9  ;;  %v6639_v39 = vrot.slane %v6637_v23, 5  ;;  %v11168_v61 = vld [vmem:[#allocation2 + $0x5c] sm:$0x1] }
 0x301   :  { %v11147_v60 = vadd.f32 %v4984_v24, %v3771_v37  ;;  %v5498_v42 = vpack.c.b16 %v5439_v13, %v5438_v33  ;;  %v12462_v24 = vld [vmem:[#allocation19_spill] sm:$0xff]  ;;  %v6632_v47 = vsel %vm9938_vm6, %v6627_v15, %v6631_v7  ;;  %v5243_v13 = vrot.slane %v5241_v20, 4 }
 0x302   :  { %v3134_v10 = vpop.f32.mrf.mxu2  ;;  %v2448_v37 = vadd.f32 %v2447_v35, %v12462_v24  ;;  %v9692_v33 = vld [vmem:[#allocation2 + $0x48] sm:$0xff]  ;;  %v7292_v15 = vunpack.c.l.b16 %v6632_v47  ;;  %v6636_v7 = vrot.slane %v6634_v29, 4  ;;  %v12464_v47 = vld [vmem:[#allocation21_spill] sm:$0xff] }
 0x303   :  { %v3213_v52 = vadd.f32 %v3134_v10, %v2446_v45  ;;  %9530 = vmatmul.msk.bf16.gmra.mxu3 %vm1772_vm5, %v7350_v17  ;;  %12461 = vst [vmem:[#allocation17_spill] sm:$0xff] %v11147_v60  ;;  %v6643_v45 = vshll.u32 %v11150_v38, 16 }
 0x304   :  { %v6640_v23 = vor.u32 %v6639_v39, %v6636_v7  ;;  %v7876_v7 = vrot.slane %v11150_v38, 5  ;;  %v11181_v39 = vld [vmem:[#allocation2 + $0x64] sm:$0xf] }
 0x305   :  { %v6645_v5 = vrot.slane %v6643_v45, 5 }
 0x306   :  { %v4987_v57 = vpop.f32.mrf.mxu0  ;;  %v3693_v1 = vpop.f32.mrf.mxu3 }
 0x307   :  { %v2450_v14 = vpop.f32.mrf.mxu1  ;;  %v3772_v17 = vadd.f32 %v3693_v1, %v3213_v52  ;;  %v7871_v52 = vrot.slane %v7869_v12, 4  ;;  %v7870_v1 = vsel %vm10330_vm9, %v9563_v25, %v7869_v12  ;;  %v7351_v12 = vpack.c.b16 %v7292_v15, %v7291_v54 }
 0x308   :  { %v8073_v25 = vunpack.c.l.b16 %v7870_v1  ;;  %v2451_v45 = vadd.f32 %v2450_v14, %v12464_v47 }
 0x309   :  { %9595 = vmatmul.msk.bf16.gmra.mxu0 %vm1772_vm5, %v8132_v55  ;;  %9337 = vmatmul.msk.bf16.gmra.mxu1 %vm1772_vm5, %v5498_v42  ;;  %v9795_v55 = vld [vmem:[#allocation2 + $0x50] sm:$0x1]  ;;  %v11162_v35 = vadd.f32 %v4987_v57, %v3772_v17  ;;  %v6649_v42 = vrot.slane %v6647_v63, 4  ;;  %v7873_v59 = vsel %vm10330_vm9, %v7871_v52, %v7872_v26  ;;  %v5242_v17 = vsel %vm10330_vm9, %v9305_v31, %v5241_v20  ;;  %v7716_v31 = vld [vmem:[#allocation2 + $0x54] sm:$0xe] }
 0x30a   :  { %v3136_v22 = vpop.f32.mrf.mxu2  ;;  %v5244_v43 = vrot.slane %v9795_v55, 5  ;;  %v8074_v63 = vunpack.c.l.b16 %v7873_v59  ;;  %v6653_v52 = vshll.u32 %v11168_v61, 16  ;;  %v5440_v55 = vunpack.c.l.b16 %v5242_v17  ;;  %v9796_v17 = vld [vmem:[#allocation2 + $0x58] sm:$0xf] }
 0x30b   :  { %v3214_v10 = vadd.f32 %v3136_v22, %v2448_v37  ;;  %12463 = vst [vmem:[#allocation19_spill] sm:$0xff] %v11162_v35  ;;  %v6650_v22 = vor.u32 %v6649_v42, %v6645_v5  ;;  %v6641_v20 = vrot.slane %v6640_v23, 4  ;;  %v9564_v59 = vrot.slane %v7716_v31, 9 }
 0x30c   :  { %v5245_v9 = vsel %vm10330_vm9, %v5243_v13, %v5244_v43  ;;  %v8133_v60 = vpack.c.b16 %v8074_v63, %v8073_v25  ;;  %v6435_v43 = vld [vmem:[#allocation2 + $0x60] sm:$0xf]  ;;  %v6671_v63 = vshrl.u32 %v11181_v39, 16 }
 0x30d   :  { %v6651_v13 = vrot.slane %v6650_v22, 4  ;;  %v6646_v25 = vsel %vm9938_vm6, %v6641_v20, %v6645_v5  ;;  %v6658_v23 = vshrl.u32 %v6435_v43, 16  ;;  %v6661_v47 = vshll.u32 %v6435_v43, 16 }
 0x30e   :  { %v4989_v24 = vpop.f32.mrf.mxu0  ;;  %v3695_v37 = vpop.f32.mrf.mxu3  ;;  %v7293_v31 = vunpack.c.l.b16 %v6646_v25 }
 0x30f   :  { %9498 = vmatmul.msk.bf16.gmra.mxu2 %vm1772_vm5, %v9692_v33  ;;  %v2452_v57 = vpop.f32.mrf.mxu1  ;;  %v3773_v29 = vadd.f32 %v3695_v37, %v3214_v10  ;;  %v5441_v33 = vunpack.c.l.b16 %v5245_v9  ;;  %v6655_v10 = vrot.slane %v6653_v52, 5  ;;  %v5082_v37 = vld [vmem:[#allocation2 + $0x54] sm:$0xe]  ;;  %v5248_v9 = vrot.slane %v9796_v17, 5 }
 0x310   :  { %v7879_v52 = vrot.slane %v11168_v61, 5  ;;  %v9306_v5 = vrot.slane %v5082_v37, 9  ;;  %v6663_v43 = vrot.slane %v6661_v47, 5  ;;  %v11199_v37 = vld [vmem:[#allocation2 + $0x68] sm:$0x1] }
 0x311   :  { %v11178_v54 = vadd.f32 %v4989_v24, %v3773_v29  ;;  %v5499_v14 = vpack.c.b16 %v5441_v33, %v5440_v55  ;;  %v12466_v24 = vld [vmem:[#allocation23_spill] sm:$0xff]  ;;  %v6656_v38 = vsel %vm9938_vm6, %v6651_v13, %v6655_v10  ;;  %v9693_v55 = vld [vmem:[#allocation2 + $0x54] sm:$0xff]  ;;  %v5250_v33 = vrot.slane %v5248_v9, 4 }
 0x312   :  { %v3139_v26 = vpop.f32.mrf.mxu2  ;;  %v2453_v29 = vadd.f32 %v2452_v57, %v12466_v24  ;;  %v7294_v13 = vunpack.c.l.b16 %v6656_v38  ;;  %v6660_v10 = vrot.slane %v6658_v23, 4  ;;  %v12468_v38 = vld [vmem:[#allocation25_spill] sm:$0xff] }
 0x313   :  { %v3215_v35 = vadd.f32 %v3139_v26, %v2451_v45  ;;  %9531 = vmatmul.msk.bf16.gmra.mxu3 %vm1772_vm5, %v7351_v12  ;;  %12465 = vst [vmem:[#allocation21_spill] sm:$0xff] %v11178_v54  ;;  %v6667_v45 = vshll.u32 %v11181_v39, 16  ;;  %v6438_v54 = vld [vmem:[#allocation2 + $0x6c] sm:$0xf] }
 0x314   :  { %v6664_v47 = vor.u32 %v6663_v43, %v6660_v10  ;;  %v7883_v43 = vrot.slane %v11181_v39, 5 }
 0x315   :  { %v6669_v17 = vrot.slane %v6667_v45, 5 }
 0x316   :  { %v4992_v15 = vpop.f32.mrf.mxu0  ;;  %v3698_v1 = vpop.f32.mrf.mxu3 }
 0x317   :  { %v2455_v42 = vpop.f32.mrf.mxu1  ;;  %v3774_v12 = vadd.f32 %v3698_v1, %v3215_v35  ;;  %v7878_v35 = vrot.slane %v7876_v7, 4  ;;  %v7877_v1 = vsel %vm10330_vm9, %v9564_v59, %v7876_v7  ;;  %v7352_v7 = vpack.c.b16 %v7294_v13, %v7293_v31  ;;  %v11209_v31 = vld [vmem:[#allocation2 + $0x70] sm:$0xf] }
 0x318   :  { %v8075_v59 = vunpack.c.l.b16 %v7877_v1  ;;  %v2456_v45 = vadd.f32 %v2455_v42, %v12468_v38  ;;  %v6682_v1 = vshrl.u32 %v6438_v54, 16  ;;  %v6691_v38 = vshll.u32 %v11209_v31, 16 }
 0x319   :  { %9596 = vmatmul.msk.bf16.gmra.mxu0 %vm1772_vm5, %v8133_v60  ;;  %9338 = vmatmul.msk.bf16.gmra.mxu1 %vm1772_vm5, %v5499_v14  ;;  %v9797_v60 = vld [vmem:[#allocation2 + $0x5c] sm:$0x1]  ;;  %v11193_v57 = vadd.f32 %v4992_v15, %v3774_v12  ;;  %v6673_v14 = vrot.slane %v6671_v63, 4  ;;  %v7880_v61 = vsel %vm10330_vm9, %v7878_v35, %v7879_v52  ;;  %v5249_v12 = vsel %vm10330_vm9, %v9306_v5, %v5248_v9 }
 0x31a   :  { %v3141_v22 = vpop.f32.mrf.mxu2  ;;  %v5251_v20 = vrot.slane %v9797_v60, 5  ;;  %v8076_v63 = vunpack.c.l.b16 %v7880_v61  ;;  %v6677_v35 = vshll.u32 %v11199_v37, 16  ;;  %v5442_v60 = vunpack.c.l.b16 %v5249_v12  ;;  %v5083_v12 = vld [vmem:[#allocation2 + $0x60] sm:$0xe] }
 0x31b   :  { %v3216_v26 = vadd.f32 %v3141_v22, %v2453_v29  ;;  %12467 = vst [vmem:[#allocation23_spill] sm:$0xff] %v11193_v57  ;;  %v6674_v22 = vor.u32 %v6673_v14, %v6669_v17  ;;  %v6665_v9 = vrot.slane %v6664_v47, 4  ;;  %v6685_v14 = vshll.u32 %v6438_v54, 16 }
 0x31c   :  { %v5252_v25 = vsel %vm10330_vm9, %v5250_v33, %v5251_v20  ;;  %v8134_v5 = vpack.c.b16 %v8076_v63, %v8075_v59  ;;  %v7717_v20 = vld [vmem:[#allocation2 + $0x60] sm:$0xe]  ;;  %v7886_v63 = vrot.slane %v11199_v37, 5  ;;  %v11228_v37 = vld [vmem:[#allocation2 + $0x74] sm:$0x1] }
 0x31d   :  { %v6675_v33 = vrot.slane %v6674_v22, 4  ;;  %v9565_v59 = vrot.slane %v7717_v20, 9  ;;  %v6670_v39 = vsel %vm9938_vm6, %v6665_v9, %v6669_v17  ;;  %v9694_v20 = vld [vmem:[#allocation2 + $0x60] sm:$0xff] }
 0x31e   :  { %v4994_v24 = vpop.f32.mrf.mxu0  ;;  %v3700_v29 = vpop.f32.mrf.mxu3  ;;  %v7295_v17 = vunpack.c.l.b16 %v6670_v39 }
 0x31f   :  { %9499 = vmatmul.msk.bf16.gmra.mxu2 %vm1772_vm5, %v9693_v55  ;;  %v2457_v15 = vpop.f32.mrf.mxu1  ;;  %v3775_v23 = vadd.f32 %v3700_v29, %v3216_v26  ;;  %v5443_v55 = vunpack.c.l.b16 %v5252_v25  ;;  %v6679_v26 = vrot.slane %v6677_v35, 5  ;;  %v9798_v25 = vld [vmem:[#allocation2 + $0x64] sm:$0xf]  ;;  %v9307_v35 = vrot.slane %v5083_v12, 9 }
 0x321   :  { %v11211_v13 = vadd.f32 %v4994_v24, %v3775_v23  ;;  %v5500_v10 = vpack.c.b16 %v5443_v55, %v5442_v60  ;;  %v12470_v24 = vld [vmem:[#allocation27_spill] sm:$0xff]  ;;  %v6680_v54 = vsel %vm9938_vm6, %v6675_v33, %v6679_v26  ;;  %v6687_v60 = vrot.slane %v6685_v14, 5 }
 0x322   :  { %v3144_v52 = vpop.f32.mrf.mxu2  ;;  %v2458_v23 = vadd.f32 %v2457_v15, %v12470_v24  ;;  %v7296_v9 = vunpack.c.l.b16 %v6680_v54  ;;  %v11226_v24 = vrot.slane %v6691_v38, 5 }
 0x323   :  { %v3217_v57 = vadd.f32 %v3144_v52, %v2456_v45  ;;  %9532 = vmatmul.msk.bf16.gmra.mxu3 %vm1772_vm5, %v7352_v7  ;;  %12469 = vst [vmem:[#allocation25_spill] sm:$0xff] %v11211_v13  ;;  %v5255_v7 = vrot.slane %v9798_v25, 5  ;;  %v6695_v45 = vshrl.u32 %v11209_v31, 16  ;;  %v6684_v52 = vrot.slane %v6682_v1, 4 }
 0x325   :  { %v6697_v33 = vrot.slane %v6695_v45, 4  ;;  %v6688_v38 = vor.u32 %v6687_v60, %v6684_v52  ;;  %v7718_v60 = vld [vmem:[#allocation2 + $0x6c] sm:$0xe] }
 0x326   :  { %v4997_v42 = vpop.f32.mrf.mxu0  ;;  %v3703_v61 = vpop.f32.mrf.mxu3 }
 0x327   :  { %v2460_v29 = vpop.f32.mrf.mxu1  ;;  %v3776_v47 = vadd.f32 %v3703_v61, %v3217_v57  ;;  %v7885_v57 = vrot.slane %v7883_v43, 4  ;;  %v9799_v61 = vld [vmem:[#allocation2 + $0x68] sm:$0x1]  ;;  %v6698_v39 = vor.u32 %v6697_v33, %v11226_v24 }
 0x328   :  { %v5258_v15 = vrot.slane %v9799_v61, 5 }
 0x329   :  { %9597 = vmatmul.msk.bf16.gmra.mxu0 %vm1772_vm5, %v8134_v5  ;;  %9339 = vmatmul.msk.bf16.gmra.mxu1 %vm1772_vm5, %v5500_v10  ;;  %v5257_v5 = vrot.slane %v5255_v7, 4  ;;  %v11224_v25 = vadd.f32 %v4997_v42, %v3776_v47  ;;  %v7884_v10 = vsel %vm10330_vm9, %v9565_v59, %v7883_v43  ;;  %v7887_v1 = vsel %vm10330_vm9, %v7885_v57, %v7886_v63  ;;  %v12472_v59 = vld [vmem:[#allocation29_spill] sm:$0xff] }
 0x32a   :  { %v3146_v22 = vpop.f32.mrf.mxu2  ;;  %v5256_v42 = vsel %vm10330_vm9, %v9307_v35, %v5255_v7  ;;  %v6701_v43 = vshll.u32 %v11228_v37, 16  ;;  %v2461_v54 = vadd.f32 %v2460_v29, %v12472_v59  ;;  %v8077_v63 = vunpack.c.l.b16 %v7884_v10  ;;  %v12474_v59 = vld [vmem:[#allocation31_spill] sm:$0xff] }
 0x32b   :  { %v3218_v55 = vadd.f32 %v3146_v22, %v2458_v23  ;;  %12471 = vst [vmem:[#allocation27_spill] sm:$0xff] %v11224_v25  ;;  %v5259_v47 = vsel %vm10330_vm9, %v5257_v5, %v5258_v15  ;;  %v7353_v23 = vpack.c.b16 %v7296_v9, %v7295_v17  ;;  %v8078_v22 = vunpack.c.l.b16 %v7887_v1  ;;  %v6441_v25 = vld [vmem:[#allocation2 + $0x78] sm:$0xf]  ;;  %v11244_v15 = vld [vmem:[#allocation2 + $0x7c] sm:$0xf] }
 0x32c   :  { %v5445_v61 = vunpack.c.l.b16 %v5259_v47  ;;  %v6689_v7 = vrot.slane %v6688_v38, 4  ;;  %v6699_v35 = vrot.slane %v6698_v39, 4  ;;  %v6703_v52 = vrot.slane %v6701_v43, 5 }
 0x32d   :  { %v8135_v5 = vpack.c.b16 %v8078_v22, %v8077_v63  ;;  %v6706_v17 = vshrl.u32 %v6441_v25, 16  ;;  %v6709_v29 = vshll.u32 %v6441_v25, 16  ;;  %v9566_v47 = vrot.slane %v7718_v60, 9 }
 0x32e   :  { %v4999_v26 = vpop.f32.mrf.mxu0  ;;  %v3705_v14 = vpop.f32.mrf.mxu3  ;;  %v7893_v38 = vrot.slane %v11228_v37, 5  ;;  %v6704_v25 = vsel %vm9938_vm6, %v6699_v35, %v6703_v52 }
 0x32f   :  { %9500 = vmatmul.msk.bf16.gmra.mxu2 %vm1772_vm5, %v9694_v20  ;;  %v2462_v12 = vpop.f32.mrf.mxu1  ;;  %v3777_v45 = vadd.f32 %v3705_v14, %v3218_v55  ;;  %v5444_v20 = vunpack.c.l.b16 %v5256_v42  ;;  %v7890_v55 = vrot.slane %v11209_v31, 5  ;;  %v6694_v42 = vsel %vm9938_vm6, %v6689_v7, %v11226_v24  ;;  %v9800_v31 = vld [vmem:[#allocation2 + $0x70] sm:$0xf]  ;;  %v9801_v7 = vld [vmem:[#allocation2 + $0x74] sm:$0x1] }
 0x330   :  { %v5262_v39 = vrot.slane %v9800_v31, 5  ;;  %v6708_v63 = vrot.slane %v6706_v17, 4  ;;  %v6711_v22 = vrot.slane %v6709_v29, 5  ;;  %v6719_v24 = vshrl.u32 %v11244_v15, 16 }
 0x331   :  { %v11246_v9 = vadd.f32 %v4999_v26, %v3777_v45  ;;  %v5501_v10 = vpack.c.b16 %v5445_v61, %v5444_v20  ;;  %v7892_v26 = vrot.slane %v7890_v55, 4  ;;  %v6715_v45 = vshll.u32 %v11244_v15, 16 }
 0x332   :  { %v3149_v57 = vpop.f32.mrf.mxu2  ;;  %v5264_v61 = vrot.slane %v5262_v39, 4  ;;  %v5265_v35 = vrot.slane %v9801_v7, 5  ;;  %v7297_v60 = vunpack.c.l.b16 %v6694_v42  ;;  %v6712_v17 = vor.u32 %v6711_v22, %v6708_v63 }
 0x333   :  { %v3219_v13 = vadd.f32 %v3149_v57, %v2461_v54  ;;  %9533 = vmatmul.msk.bf16.gmra.mxu3 %vm1772_vm5, %v7353_v23  ;;  %12473 = vst [vmem:[#allocation29_spill] sm:$0xff] %v11246_v9  ;;  %v5084_v23 = vld [vmem:[#allocation2 + $0x6c] sm:$0xe]  ;;  %v2463_v54 = vadd.f32 %v2462_v12, %v12474_v59  ;;  %v7891_v12 = vsel %vm10330_vm9, %v9566_v47, %v7890_v55  ;;  %v6717_v29 = vrot.slane %v6715_v45, 5  ;;  %v6444_v9 = vld [vmem:[#allocation2 + $0x84] sm:$0xf] }
 0x334   :  { %v9308_v37 = vrot.slane %v5084_v23, 9  ;;  %v6721_v31 = vrot.slane %v6719_v24, 4  ;;  %v6443_v23 = vld [vmem:[#allocation2 + $0x80] sm:$0x1]  ;;  %v5266_v42 = vsel %vm10330_vm9, %v5264_v61, %v5265_v35  ;;  %v8079_v47 = vunpack.c.l.b16 %v7891_v12 }
 0x335   :  { %v6713_v45 = vrot.slane %v6712_v17, 4  ;;  %v6725_v22 = vshll.u32 %v6443_v23, 16  ;;  %v5447_v7 = vunpack.c.l.b16 %v5266_v42  ;;  %v6733_v17 = vshll.u32 %v6444_v9, 16 }
 0x336   :  { %v5002_v33 = vpop.f32.mrf.mxu0  ;;  %v3708_v1 = vpop.f32.mrf.mxu3  ;;  %v6722_v63 = vor.u32 %v6721_v31, %v6717_v29  ;;  %v7900_v42 = vrot.slane %v6443_v23, 5 }
 0x337   :  { %v2465_v14 = vpop.f32.mrf.mxu1  ;;  %v3778_v43 = vadd.f32 %v3708_v1, %v3219_v13  ;;  %v9695_v13 = vld [vmem:[#allocation2 + $0x6c] sm:$0xff]  ;;  %v7298_v1 = vunpack.c.l.b16 %v6704_v25  ;;  %v6727_v35 = vrot.slane %v6725_v22, 5 }
 0x338   :  { %v6723_v61 = vrot.slane %v6722_v63, 4 }
 0x339   :  { %9598 = vmatmul.msk.bf16.gmra.mxu0 %vm1772_vm5, %v8135_v5  ;;  %9340 = vmatmul.msk.bf16.gmra.mxu1 %vm1772_vm5, %v5501_v10  ;;  %v11259_v52 = vadd.f32 %v5002_v33, %v3778_v43  ;;  %v7894_v5 = vsel %vm10330_vm9, %v7892_v26, %v7893_v38  ;;  %v5263_v33 = vsel %vm10330_vm9, %v9308_v37, %v5262_v39  ;;  %v12476_v38 = vld [vmem:[#allocation33_spill] sm:$0xff]  ;;  %v7897_v37 = vrot.slane %v11244_v15, 5 }
 0x33a   :  { %v3151_v57 = vpop.f32.mrf.mxu2  ;;  %v7354_v55 = vpack.c.b16 %v7298_v1, %v7297_v60  ;;  %v8080_v25 = vunpack.c.l.b16 %v7894_v5  ;;  %v2466_v26 = vadd.f32 %v2465_v14, %v12476_v38  ;;  %v11275_v60 = vld [vmem:[#allocation2 + $0x88] sm:$0xf]  ;;  %v6730_v5 = vshrl.u32 %v6444_v9, 16 }
 0x33b   :  { %v3220_v20 = vadd.f32 %v3151_v57, %v2463_v54  ;;  %12475 = vst [vmem:[#allocation31_spill] sm:$0xff] %v11259_v52  ;;  %v5446_v57 = vunpack.c.l.b16 %v5263_v33  ;;  %v7899_v38 = vrot.slane %v7897_v37, 4  ;;  %v6728_v9 = vsel %vm9938_vm6, %v6723_v61, %v6727_v35 }
 0x33c   :  { %v8136_v39 = vpack.c.b16 %v8080_v25, %v8079_v47  ;;  %v9802_v47 = vld [vmem:[#allocation2 + $0x7c] sm:$0xf]  ;;  %v6732_v22 = vrot.slane %v6730_v5, 4 }
 0x33d   :  { %v5502_v12 = vpack.c.b16 %v5447_v7, %v5446_v57  ;;  %v5269_v15 = vrot.slane %v9802_v47, 5  ;;  %v9696_v7 = vld [vmem:[#allocation2 + $0x78] sm:$0xff] }
 0x33e   :  { %v5004_v10 = vpop.f32.mrf.mxu0  ;;  %v3710_v59 = vpop.f32.mrf.mxu3 }
 0x33f   :  { %9501 = vmatmul.msk.bf16.gmra.mxu2 %vm1772_vm5, %v9695_v13  ;;  %v2467_v54 = vpop.f32.mrf.mxu1  ;;  %v3779_v43 = vadd.f32 %v3710_v59, %v3220_v20  ;;  %v7719_v13 = vld [vmem:[#allocation2 + $0x78] sm:$0xe]  ;;  %v6718_v20 = vsel %vm9938_vm6, %v6713_v45, %v6717_v29  ;;  %v6739_v29 = vshll.u32 %v11275_v60, 16  ;;  %v12477_v45 = vld [vmem:[#allocation35_spill] sm:$0xff] }
 0x340   :  { %v9567_v14 = vrot.slane %v7719_v13, 9  ;;  %v2468_v63 = vadd.f32 %v2467_v54, %v12477_v45  ;;  %v5271_v13 = vrot.slane %v5269_v15, 4  ;;  %v7300_v54 = vunpack.c.l.b16 %v6728_v9  ;;  %v12479_v9 = vld [vmem:[#allocation36_spill] sm:$0xff] }
 0x341   :  { %v11277_v31 = vadd.f32 %v5004_v10, %v3779_v43  ;;  %v7299_v10 = vunpack.c.l.b16 %v6718_v20  ;;  %v7901_v20 = vsel %vm10330_vm9, %v7899_v38, %v7900_v42  ;;  %v11292_v61 = vrot.slane %v6739_v29, 5 }
 0x342   :  { %v3154_v24 = vpop.f32.mrf.mxu2  ;;  %v7898_v23 = vsel %vm10330_vm9, %v9567_v14, %v7897_v37 }
 0x343   :  { %v3221_v52 = vadd.f32 %v3154_v24, %v2466_v26  ;;  %9534 = vmatmul.msk.bf16.gmra.mxu3 %vm1772_vm5, %v7354_v55  ;;  %v5085_v55 = vld [vmem:[#allocation2 + $0x78] sm:$0xe]  ;;  %v6743_v26 = vshrl.u32 %v11275_v60, 16  ;;  %v6735_v24 = vrot.slane %v6733_v17, 5  ;;  %v8081_v14 = vunpack.c.l.b16 %v7898_v23 }
 0x344   :  { %v8082_v17 = vunpack.c.l.b16 %v7901_v20  ;;  %v7355_v38 = vpack.c.b16 %v7300_v54, %v7299_v10  ;;  %v11304_v20 = vld [vmem:[#allocation2 + $0x94] sm:$0xf] }
 0x345   :  { %v6745_v35 = vrot.slane %v6743_v26, 4  ;;  %v6736_v45 = vor.u32 %v6735_v24, %v6732_v22  ;;  %v6767_v54 = vshrl.u32 %v11304_v20, 16 }
 0x346   :  { %v5007_v1 = vpop.f32.mrf.mxu0  ;;  %v3713_v59 = vpop.f32.mrf.mxu3 }
 0x347   :  { %v5634_v33 = vpop.f32.mrf.mxu1  ;;  %v3780_v25 = vadd.f32 %v3713_v59, %v3221_v52  ;;  %v9309_v52 = vrot.slane %v5085_v55, 9  ;;  %v9803_v59 = vld [vmem:[#allocation2 + $0x80] sm:$0x1]  ;;  %v6746_v29 = vor.u32 %v6745_v35, %v11292_v61 }
 0x349   :  { %9599 = vmatmul.msk.bf16.gmra.mxu0 %vm1772_vm5, %v8136_v39  ;;  %9341 = vmatmul.msk.bf16.gmra.mxu1 %vm1772_vm5, %v5502_v12  ;;  %v5272_v39 = vrot.slane %v9803_v59, 5  ;;  %v11288_v47 = vadd.f32 %v5007_v1, %v3780_v25  ;;  %v11294_v12 = vld [vmem:[#allocation2 + $0x8c] sm:$0x1]  ;;  %v5270_v1 = vsel %vm10330_vm9, %v9309_v52, %v5269_v15  ;;  %v6737_v15 = vrot.slane %v6736_v45, 4 }
 0x34a   :  { %v3156_v43 = vpop.f32.mrf.mxu2  ;;  %v6749_v26 = vshll.u32 %v11294_v12, 16  ;;  %v6747_v22 = vrot.slane %v6746_v29, 4  ;;  %v11315_v29 = vld [vmem:[%s12378_s4] ss:$0 sm:$0xff] }
 0x34b   :  { %v3222_v57 = vadd.f32 %v3156_v43, %v2468_v63  ;;  %12478 = vst [vmem:[#allocation33_spill] sm:$0xff] %v11288_v47  ;;  %v5273_v25 = vsel %vm10330_vm9, %v5271_v13, %v5272_v39  ;;  %v6447_v63 = vld [vmem:[#allocation2 + $0x90] sm:$0xf]  ;;  %v5794_v43 = vadd.f32 %v5634_v33, %v12479_v9  ;;  %v8137_v47 = vpack.c.b16 %v8082_v17, %v8081_v14 }
 0x34c   :  { %v5449_v59 = vunpack.c.l.b16 %v5273_v25  ;;  %v6751_v24 = vrot.slane %v6749_v26, 5  ;;  %v6754_v10 = vshrl.u32 %v6447_v63, 16  ;;  %v6757_v13 = vshll.u32 %v6447_v63, 16  ;;  %v9804_v25 = vld [vmem:[#allocation2 + $0x88] sm:$0xf] }
 0x34d   :  { %v6763_v39 = vshll.u32 %v11304_v20, 16  ;;  %v5276_v45 = vrot.slane %v9804_v25, 5  ;;  %v6742_v26 = vsel %vm9938_vm6, %v6737_v15, %v11292_v61  ;;  %v5086_v63 = vld [vmem:[#allocation2 + $0x84] sm:$0xe]  ;;  %v7907_v61 = vrot.slane %v11294_v12, 5 }
 0x34e   :  { %v5009_v37 = vpop.f32.mrf.mxu0  ;;  %v3715_v5 = vpop.f32.mrf.mxu3  ;;  %v6759_v9 = vrot.slane %v6757_v13, 5  ;;  %v11328_v15 = vld [vmem:[#allocation2 + $0x98] sm:$0x1] }
 0x34f   :  { %9502 = vmatmul.msk.bf16.gmra.mxu2 %vm1772_vm5, %v9696_v7  ;;  %v5636_v55 = vpop.f32.mrf.mxu1  ;;  %v3781_v42 = vadd.f32 %v3715_v5, %v3222_v57  ;;  %v5448_v7 = vunpack.c.l.b16 %v5270_v1  ;;  %v7720_v57 = vld [vmem:[#allocation2 + $0x84] sm:$0xe]  ;;  %v7904_v1 = vrot.slane %v11275_v60, 5  ;;  %v6756_v60 = vrot.slane %v6754_v10, 4 }
 0x350   :  { %v6773_v12 = vshll.u32 %v11328_v15, 16 }
 0x351   :  { %v11309_v33 = vadd.f32 %v5009_v37, %v3781_v42  ;;  %v5503_v5 = vpack.c.b16 %v5449_v59, %v5448_v7  ;;  %v6752_v37 = vsel %vm9938_vm6, %v6747_v22, %v6751_v24  ;;  %v9568_v42 = vrot.slane %v7720_v57, 9  ;;  %v9697_v22 = vld [vmem:[#allocation2 + $0x84] sm:$0xff] }
 0x352   :  { %v6193_v23 = vpop.f32.mrf.mxu2  ;;  %v5795_v59 = vadd.f32 %v5636_v55, %v10598_v56  ;;  %v9310_v24 = vrot.slane %v5086_v63, 9  ;;  %v5278_v57 = vrot.slane %v5276_v45, 4  ;;  %v6760_v55 = vor.u32 %v6759_v9, %v6756_v60 }
 0x353   :  { %9535 = vmatmul.msk.bf16.gmra.mxu3 %vm1772_vm5, %v7355_v38  ;;  %v6353_v52 = vadd.f32 %v6193_v23, %v5794_v43  ;;  %12480 = vst [vmem:[#allocation35_spill] sm:$0xff] %v11309_v33  ;;  %v11323_v43 = vrot.slane %v6763_v39, 5  ;;  %v6769_v23 = vrot.slane %v6767_v54, 4  ;;  %v7301_v54 = vunpack.c.l.b16 %v6742_v26 }
 0x354   :  { %v7905_v56 = vsel %vm10330_vm9, %v9568_v42, %v7904_v1 }
 0x356   :  { %v8269_v35 = vpop.f32.mrf.mxu0  ;;  %v7487_v14 = vpop.f32.mrf.mxu3 }
 0x357   :  { %v5639_v17 = vpop.f32.mrf.mxu1  ;;  %v7647_v38 = vadd.f32 %v7487_v14, %v6353_v52  ;;  %v7906_v14 = vrot.slane %v7904_v1, 4 }
 0x359   :  { %9600 = vmatmul.msk.bf16.gmra.mxu0 %vm1772_vm5, %v8137_v47  ;;  %v8429_v7 = vadd.f32 %v8269_v35, %v7647_v38  ;;  %9342 = vmatmul.msk.bf16.gmra.mxu1 %vm1772_vm5, %v5503_v5  ;;  %v9805_v47 = vld [vmem:[#allocation2 + $0x8c] sm:$0x1]  ;;  %v7302_v35 = vunpack.c.l.b16 %v6752_v37  ;;  %v6770_v5 = vor.u32 %v6769_v23, %v11323_v43  ;;  %v7908_v63 = vsel %vm10330_vm9, %v7906_v14, %v7907_v61 }
 0x35a   :  { %v6195_v52 = vpop.f32.mrf.mxu2  ;;  %v5279_v10 = vrot.slane %v9805_v47, 5  ;;  %v5277_v37 = vsel %vm10330_vm9, %v9310_v24, %v5276_v45  ;;  %v8083_v23 = vunpack.c.l.b16 %v7905_v56  ;;  %v6775_v14 = vrot.slane %v6773_v12, 5  ;;  %v7721_v12 = vld [vmem:[#allocation2 + $0x90] sm:$0xe] }
 0x35b   :  { %v8497_v13 = vadd.f32 %v11315_v29, %v8429_v7  ;;  %v6354_v39 = vadd.f32 %v6195_v52, %v5795_v59  ;;  %v7356_v9 = vpack.c.b16 %v7302_v35, %v7301_v54  ;;  %v8084_v7 = vunpack.c.l.b16 %v7908_v63 }
 0x35c   :  { %v5280_v1 = vsel %vm10330_vm9, %v5278_v57, %v5279_v10  ;;  %v6761_v59 = vrot.slane %v6760_v55, 4  ;;  %v6771_v52 = vrot.slane %v6770_v5, 4  ;;  %v5450_v24 = vunpack.c.l.b16 %v5277_v37  ;;  %v6450_v57 = vld [vmem:[#allocation2 + $0x9c] sm:$0xf] }
 0x35d   :  { %vm8561_vm10 = vcmp.ge.f32.partialorder %v8497_v13, 0.0  ;;  %v8625_v25 = vmul.f32 0.01, %v8497_v13  ;;  %v5451_v33 = vunpack.c.l.b16 %v5280_v1  ;;  %v7911_v56 = vrot.slane %v11304_v20, 5 }
 0x35e   :  { %v8271_v38 = vpop.f32.mrf.mxu0  ;;  %v7489_v47 = vpop.f32.mrf.mxu3  ;;  %v6766_v54 = vsel %vm9938_vm6, %v6761_v59, %v11323_v43  ;;  %v6776_v35 = vsel %vm9938_vm6, %v6771_v52, %v6775_v14  ;;  %v6781_v1 = vshll.u32 %v6450_v57, 16  ;;  %v7914_v59 = vrot.slane %v11328_v15, 5 }
 0x35f   :  { %9503 = vmatmul.msk.bf16.gmra.mxu2 %vm1772_vm5, %v9697_v22  ;;  %v5641_v26 = vpop.f32.mrf.mxu1  ;;  %v8689_v42 = vsel %vm8561_vm10, %v8497_v13, %v8625_v25  ;;  %v7648_v60 = vadd.f32 %v7489_v47, %v6354_v39  ;;  %v5796_v22 = vadd.f32 %v5639_v17, %v10608_v46  ;;  %v8138_v39 = vpack.c.b16 %v8084_v7, %v8083_v23  ;;  %v11355_v46 = vld [vmem:[#allocation2 + $0xa0] sm:$0xf]  ;;  %v9806_v47 = vld [vmem:[#allocation2 + $0x94] sm:$0xf] }
 0x360   :  { %8754 = vst.msk [vmem:[%s12379_s5] sm:$0xff] %vm8753_vm11, %v8689_v42  ;;  %v5504_v5 = vpack.c.b16 %v5451_v33, %v5450_v24  ;;  %v6778_v25 = vshrl.u32 %v6450_v57, 16  ;;  %v5283_v37 = vrot.slane %v9806_v47, 5  ;;  %v6791_v20 = vshrl.u32 %v11355_v46, 16  ;;  %v9698_v24 = vld [vmem:[#allocation2 + $0x90] sm:$0xff] }
 0x361   :  { %v8430_v61 = vadd.f32 %v8271_v38, %v7648_v60  ;;  %v5087_v60 = vld [vmem:[#allocation2 + $0x90] sm:$0xe]  ;;  %v7303_v33 = vunpack.c.l.b16 %v6766_v54  ;;  %v7304_v23 = vunpack.c.l.b16 %v6776_v35  ;;  %v9569_v7 = vrot.slane %v7721_v12, 9 }
 0x362   :  { %v6198_v45 = vpop.f32.mrf.mxu2  ;;  %v5797_v14 = vadd.f32 %v5641_v26, %v10616_v27  ;;  %v9311_v57 = vrot.slane %v5087_v60, 9  ;;  %v6793_v15 = vrot.slane %v6791_v20, 4 }
 0x363   :  { %v8498_v10 = vadd.f32 %v11315_v29, %v8430_v61  ;;  %9536 = vmatmul.msk.bf16.gmra.mxu3 %vm1772_vm5, %v7356_v9  ;;  %v6355_v13 = vadd.f32 %v6198_v45, %v5796_v22  ;;  %v6787_v9 = vshll.u32 %v11355_v46, 16  ;;  %v7913_v22 = vrot.slane %v7911_v56, 4 }
 0x364   :  { %v6780_v45 = vrot.slane %v6778_v25, 4  ;;  %v7357_v47 = vpack.c.b16 %v7304_v23, %v7303_v33 }
 0x365   :  { %vm8562_vm12 = vcmp.ge.f32.partialorder %v8498_v10, 0.0  ;;  %v8626_v17 = vmul.f32 0.01, %v8498_v10  ;;  %v11368_v35 = vrot.slane %v6787_v9, 5  ;;  %v7915_v12 = vsel %vm10330_vm9, %v7913_v22, %v7914_v59  ;;  %v6453_v22 = vld [vmem:[#allocation2 + $0xa8] sm:$0xf] }
 0x366   :  { %v8274_v55 = vpop.f32.mrf.mxu0  ;;  %v7492_v38 = vpop.f32.mrf.mxu3  ;;  %v8086_v23 = vunpack.c.l.b16 %v7915_v12 }
 0x367   :  { %v5644_v63 = vpop.f32.mrf.mxu1  ;;  %v8690_v42 = vsel %vm8562_vm12, %v8498_v10, %v8626_v17  ;;  %v7649_v43 = vadd.f32 %v7492_v38, %v6355_v13  ;;  %v5285_v10 = vrot.slane %v5283_v37, 4  ;;  %v9807_v13 = vld [vmem:[#allocation2 + $0x98] sm:$0x1]  ;;  %v6783_v38 = vrot.slane %v6781_v1, 5 }
 0x368   :  { %8755 = vst.msk [vmem:[%s12379_s5 + $0x8] sm:$0xff] %vm8753_vm11, %v8690_v42  ;;  %v5286_v17 = vrot.slane %v9807_v13, 5  ;;  %v5284_v42 = vsel %vm10330_vm9, %v9311_v57, %v5283_v37  ;;  %v5798_v37 = vadd.f32 %v5644_v63, %v10626_v51 }
 0x369   :  { %9601 = vmatmul.msk.bf16.gmra.mxu0 %vm1772_vm5, %v8138_v39  ;;  %v8431_v52 = vadd.f32 %v8274_v55, %v7649_v43  ;;  %9343 = vmatmul.msk.bf16.gmra.mxu1 %vm1772_vm5, %v5504_v5  ;;  %v11370_v55 = vld [vmem:[#allocation2 + $0xa4] sm:$0x1]  ;;  %v7912_v5 = vsel %vm10330_vm9, %v9569_v7, %v7911_v56  ;;  %v6784_v60 = vor.u32 %v6783_v38, %v6780_v45 }
 0x36a   :  { %v6200_v61 = vpop.f32.mrf.mxu2  ;;  %v5287_v43 = vsel %vm10330_vm9, %v5285_v10, %v5286_v17  ;;  %v6797_v56 = vshll.u32 %v11370_v55, 16  ;;  %v8085_v33 = vunpack.c.l.b16 %v7912_v5 }
 0x36b   :  { %v8499_v39 = vadd.f32 %v11315_v29, %v8431_v52  ;;  %v6356_v54 = vadd.f32 %v6200_v61, %v5797_v14  ;;  %v6794_v52 = vor.u32 %v6793_v15, %v11368_v35  ;;  %v5452_v14 = vunpack.c.l.b16 %v5284_v42  ;;  %v9808_v42 = vld [vmem:[#allocation2 + $0xa0] sm:$0xf] }
 0x36c   :  { %v5453_v61 = vunpack.c.l.b16 %v5287_v43  ;;  %v6785_v45 = vrot.slane %v6784_v60, 4  ;;  %v6799_v17 = vrot.slane %v6797_v56, 5  ;;  %v8139_v38 = vpack.c.b16 %v8086_v23, %v8085_v33 }
 0x36d   :  { %vm8563_vm13 = vcmp.ge.f32.partialorder %v8499_v39, 0.0  ;;  %v8627_v27 = vmul.f32 0.01, %v8499_v39  ;;  %v6795_v13 = vrot.slane %v6794_v52, 4  ;;  %v6805_v15 = vshll.u32 %v6453_v22, 16 }
 0x36e   :  { %v8276_v26 = vpop.f32.mrf.mxu0  ;;  %v7494_v25 = vpop.f32.mrf.mxu3  ;;  %v5290_v43 = vrot.slane %v9808_v42, 5  ;;  %v5088_v52 = vld [vmem:[#allocation2 + $0x9c] sm:$0xe] }
 0x36f   :  { %9504 = vmatmul.msk.bf16.gmra.mxu2 %vm1772_vm5, %v9698_v24  ;;  %v5646_v1 = vpop.f32.mrf.mxu1  ;;  %v8691_v9 = vsel %vm8563_vm13, %v8499_v39, %v8627_v27  ;;  %v7650_v20 = vadd.f32 %v7494_v25, %v6356_v54  ;;  %v11388_v24 = vld [vmem:[#allocation2 + $0xac] sm:$0xf]  ;;  %v7918_v39 = vrot.slane %v11355_v46, 5  ;;  %v6802_v54 = vshrl.u32 %v6453_v22, 16  ;;  %v9699_v22 = vld [vmem:[#allocation2 + $0x9c] sm:$0xff] }
 0x370   :  { %8756 = vst.msk [vmem:[%s12379_s5 + $0x10] sm:$0xff] %vm8753_vm11, %v8691_v9  ;;  %v5505_v27 = vpack.c.b16 %v5453_v61, %v5452_v14  ;;  %v6811_v5 = vshll.u32 %v11388_v24, 16  ;;  %v6790_v46 = vsel %vm9938_vm6, %v6785_v45, %v11368_v35  ;;  %v7921_v35 = vrot.slane %v11370_v55, 5 }
 0x371   :  { %v8432_v7 = vadd.f32 %v8276_v26, %v7650_v20  ;;  %v7722_v26 = vld [vmem:[#allocation2 + $0x9c] sm:$0xe]  ;;  %v6800_v20 = vsel %vm9938_vm6, %v6795_v13, %v6799_v17  ;;  %v7920_v33 = vrot.slane %v7918_v39, 4  ;;  %v6804_v23 = vrot.slane %v6802_v54, 4 }
 0x372   :  { %v6203_v59 = vpop.f32.mrf.mxu2  ;;  %v9570_v56 = vrot.slane %v7722_v26, 9  ;;  %v11408_v61 = vrot.slane %v6811_v5, 5  ;;  %v9312_v45 = vrot.slane %v5088_v52, 9 }
 0x373   :  { %v8500_v57 = vadd.f32 %v11315_v29, %v8432_v7  ;;  %9537 = vmatmul.msk.bf16.gmra.mxu3 %vm1772_vm5, %v7357_v47  ;;  %v6357_v10 = vadd.f32 %v6203_v59, %v5798_v37  ;;  %v6815_v47 = vshrl.u32 %v11388_v24, 16  ;;  %v6807_v7 = vrot.slane %v6805_v15, 5 }
 0x374   :  { %v5799_v59 = vadd.f32 %v5646_v1, %v10634_v11  ;;  %v7305_v15 = vunpack.c.l.b16 %v6790_v46  ;;  %v7919_v55 = vsel %vm10330_vm9, %v9570_v56, %v7918_v39  ;;  %v7922_v26 = vsel %vm10330_vm9, %v7920_v33, %v7921_v35 }
 0x375   :  { %vm8564_vm14 = vcmp.ge.f32.partialorder %v8500_v57, 0.0  ;;  %v8628_v51 = vmul.f32 0.01, %v8500_v57  ;;  %v6817_v17 = vrot.slane %v6815_v47, 4  ;;  %v6808_v11 = vor.u32 %v6807_v7, %v6804_v23 }
 0x376   :  { %v8279_v63 = vpop.f32.mrf.mxu0  ;;  %v7497_v12 = vpop.f32.mrf.mxu3  ;;  %v5291_v42 = vsel %vm10330_vm9, %v9312_v45, %v5290_v43  ;;  %v8087_v52 = vunpack.c.l.b16 %v7919_v55  ;;  %v8088_v56 = vunpack.c.l.b16 %v7922_v26  ;;  %v9810_v26 = vld [vmem:[#allocation2 + $0xac] sm:$0xf] }
 0x377   :  { %v5649_v25 = vpop.f32.mrf.mxu1  ;;  %v8692_v60 = vsel %vm8564_vm14, %v8500_v57, %v8628_v51  ;;  %v7651_v9 = vadd.f32 %v7497_v12, %v6357_v10  ;;  %v5292_v57 = vrot.slane %v5290_v43, 4  ;;  %v9809_v10 = vld [vmem:[#allocation2 + $0xa4] sm:$0x1]  ;;  %v7306_v51 = vunpack.c.l.b16 %v6800_v20 }
 0x378   :  { %8757 = vst.msk [vmem:[%s12379_s5 + $0x18] sm:$0xff] %vm8753_vm11, %v8692_v60  ;;  %v5293_v13 = vrot.slane %v9809_v10, 5  ;;  %v6818_v60 = vor.u32 %v6817_v17, %v11408_v61  ;;  %v6809_v33 = vrot.slane %v6808_v11, 4  ;;  %v5800_v43 = vadd.f32 %v5649_v25, %v10644_v32  ;;  %v11432_v17 = vld [vmem:[#allocation2 + $0xb8] sm:$0xf] }
 0x379   :  { %9602 = vmatmul.msk.bf16.gmra.mxu0 %vm1772_vm5, %v8139_v38  ;;  %v8433_v37 = vadd.f32 %v8279_v63, %v7651_v9  ;;  %9344 = vmatmul.msk.bf16.gmra.mxu1 %vm1772_vm5, %v5505_v27  ;;  %v11411_v63 = vld [vmem:[#allocation2 + $0xb0] sm:$0x1]  ;;  %v7358_v39 = vpack.c.b16 %v7306_v51, %v7305_v15  ;;  %v8140_v10 = vpack.c.b16 %v8088_v56, %v8087_v52  ;;  %v7723_v11 = vld [vmem:[#allocation2 + $0xa8] sm:$0xe] }
 0x37a   :  { %v6205_v14 = vpop.f32.mrf.mxu2  ;;  %v5294_v47 = vsel %vm10330_vm9, %v5292_v57, %v5293_v13  ;;  %v6821_v9 = vshll.u32 %v11411_v63, 16  ;;  %v6819_v35 = vrot.slane %v6818_v60, 4  ;;  %v7925_v13 = vrot.slane %v11388_v24, 5  ;;  %v8842_v52 = vld [vmem:[%s12376_s2 + $0xcc] sm:$0xff]  }
 0x37b   :  { %v8501_v38 = vadd.f32 %v11315_v29, %v8433_v37  ;;  %v6358_v54 = vadd.f32 %v6205_v14, %v5799_v59  ;;  %v5454_v37 = vunpack.c.l.b16 %v5291_v42  ;;  %v5455_v59 = vunpack.c.l.b16 %v5294_v47  ;;  %v6456_v14 = vld [vmem:[#allocation2 + $0xb4] sm:$0xf]  ;;  %v5089_v47 = vld [vmem:[#allocation2 + $0xa8] sm:$0xe]  ;;  %526 = vst [vmem:[#allocation5] sm:$0xff] %v8842_v52  }
 0x37c   :  { %v6814_v51 = vsel %vm9938_vm6, %v6809_v33, %v11408_v61  ;;  %v5297_v24 = vrot.slane %v9810_v26, 5  ;;  %v6835_v60 = vshll.u32 %v11432_v17, 16 }
 0x37d   :  { %vm8565_vm15 = vcmp.ge.f32.partialorder %v8501_v38, 0.0  ;;  %v8629_v1 = vmul.f32 0.01, %v8501_v38  ;;  %v5506_v15 = vpack.c.b16 %v5455_v59, %v5454_v37  ;;  %v7307_v61 = vunpack.c.l.b16 %v6814_v51  ;;  %v9700_v37 = vld [vmem:[#allocation2 + $0xa8] sm:$0xff] }
 0x37e   :  { %v8281_v27 = vpop.f32.mrf.mxu0  ;;  %v7499_v5 = vpop.f32.mrf.mxu3 }
 0x37f   :  { %9505 = vmatmul.msk.bf16.gmra.mxu2 %vm1772_vm5, %v9699_v22  ;;  %v5651_v12 = vpop.f32.mrf.mxu1  ;;  %v8693_v46 = vsel %vm8565_vm15, %v8501_v38, %v8629_v1  ;;  %v7652_v20 = vadd.f32 %v7499_v5, %v6358_v54  ;;  %v6823_v22 = vrot.slane %v6821_v9, 5  ;;  %v6826_v38 = vshrl.u32 %v6456_v14, 16 }
 0x380   :  { %8758 = vst.msk [vmem:[%s12379_s5 + $0x20] sm:$0xff] %vm8753_vm11, %v8693_v46  ;;  %v6829_v54 = vshll.u32 %v6456_v14, 16  ;;  %v6839_v9 = vshrl.u32 %v11432_v17, 16  ;;  %v9571_v46 = vrot.slane %v7723_v11, 9  ;;  %v5801_v33 = vadd.f32 %v5651_v12, %v10658_v8  ;;  %v11455_v8 = vld [vmem:[#allocation2 + $0xbc] sm:$0x1] }
 0x381   :  { %v8434_v23 = vadd.f32 %v8281_v27, %v7652_v20  ;;  %v6824_v55 = vsel %vm9938_vm6, %v6819_v35, %v6823_v22  ;;  %v6828_v20 = vrot.slane %v6826_v38, 4  ;;  %v9313_v14 = vrot.slane %v5089_v47, 9  ;;  %v9811_v22 = vld [vmem:[#allocation2 + $0xb0] sm:$0x1] }
 0x382   :  { %v6208_v7 = vpop.f32.mrf.mxu2  ;;  %v7308_v59 = vunpack.c.l.b16 %v6824_v55  ;;  %v5299_v35 = vrot.slane %v5297_v24, 4  ;;  %v11453_v38 = vrot.slane %v6835_v60, 5 }
 0x383   :  { %v8502_v45 = vadd.f32 %v11315_v29, %v8434_v23  ;;  %9538 = vmatmul.msk.bf16.gmra.mxu3 %vm1772_vm5, %v7358_v39  ;;  %v6359_v57 = vadd.f32 %v6208_v7, %v5800_v43  ;;  %v6831_v39 = vrot.slane %v6829_v54, 5  ;;  %v7927_v43 = vrot.slane %v7925_v13, 4 }
 0x384   :  { %v7928_v7 = vrot.slane %v11411_v63, 5  ;;  %v6841_v54 = vrot.slane %v6839_v9, 4  ;;  %v8844_v63 = vld [vmem:[%s12376_s2 + $0xd4] sm:$0xf]  ;;  %v5298_v26 = vsel %vm10330_vm9, %v9313_v14, %v5297_v24 }
 0x385   :  { %vm8566_vm0 = vcmp.ge.f32.partialorder %v8502_v45, 0.0  ;;  %v8630_v32 = vmul.f32 0.01, %v8502_v45  ;;  %v6832_v12 = vor.u32 %v6831_v39, %v6828_v20  ;;  %530 = vst [vmem:[#allocation5 + $0x8] sm:$0xf] %v8844_v63  ;;  %v5456_v52 = vunpack.c.l.b16 %v5298_v26 }
 0x386   :  { %v8284_v25 = vpop.f32.mrf.mxu0  ;;  %v7502_v1 = vpop.f32.mrf.mxu3  ;;  %v7929_v51 = vsel %vm10330_vm9, %v7927_v43, %v7928_v7  ;;  %v6842_v60 = vor.u32 %v6841_v54, %v11453_v38  ;;  %v11476_v43 = vld [vmem:[#allocation2 + $0xc4] sm:$0xf]  ;;  %v794_v7 = vld [vmem:[#allocation5 + $0x4] sm:$0xf] }
 0x387   :  { %v5654_v27 = vpop.f32.mrf.mxu1  ;;  %v8694_v5 = vsel %vm8566_vm0, %v8502_v45, %v8630_v32  ;;  %v7653_v42 = vadd.f32 %v7502_v1, %v6359_v57  ;;  %v5300_v45 = vrot.slane %v9811_v22, 5  ;;  %v7359_v1 = vpack.c.b16 %v7308_v59, %v7307_v61  ;;  %v7724_v22 = vld [vmem:[#allocation2 + $0xb4] sm:$0xe]  ;;  %801 = vst.msk [vmem:[#allocation2 + $0xd0] sm:$0xf] %vm682_vm1, %v794_v7 }
 0x388   :  { %8759 = vst.msk [vmem:[%s12379_s5 + $0x28] sm:$0xff] %vm8753_vm11, %v8694_v5  ;;  %v8090_v61 = vunpack.c.l.b16 %v7929_v51  ;;  %v5802_v24 = vadd.f32 %v5654_v27, %v10671_v0  ;;  %v6843_v14 = vrot.slane %v6842_v60, 4  ;;  %v7932_v27 = vrot.slane %v11432_v17, 5  ;;  %v9812_v51 = vld [vmem:[#allocation2 + $0xb8] sm:$0xf] }
 0x389   :  { %9603 = vmatmul.msk.bf16.gmra.mxu0 %vm1772_vm5, %v8140_v10  ;;  %v8435_v56 = vadd.f32 %v8284_v25, %v7653_v42  ;;  %9345 = vmatmul.msk.bf16.gmra.mxu1 %vm1772_vm5, %v5506_v15  ;;  %v7926_v15 = vsel %vm10330_vm9, %v9571_v46, %v7925_v13  ;;  %v5301_v5 = vsel %vm10330_vm9, %v5299_v35, %v5300_v45  ;;  %v6845_v13 = vshll.u32 %v11455_v8, 16 }
 0x38a   :  { %v6210_v23 = vpop.f32.mrf.mxu2  ;;  %v8089_v9 = vunpack.c.l.b16 %v7926_v15  ;;  %v6833_v46 = vrot.slane %v6832_v12, 4  ;;  %v9572_v60 = vrot.slane %v7724_v22, 9 }
 0x38b   :  { %v8503_v57 = vadd.f32 %v11315_v29, %v8435_v56  ;;  %v6360_v10 = vadd.f32 %v6210_v23, %v5801_v33  ;;  %v5457_v56 = vunpack.c.l.b16 %v5301_v5  ;;  %v6459_v33 = vld [vmem:[#allocation2 + $0xc0] sm:$0xf]  ;;  %v793_v23 = vld [vmem:[#allocation5] sm:$0xf]  ;;  %v6847_v35 = vrot.slane %v6845_v13, 5 }
 0x38c   :  { %800 = vst.msk [vmem:[#allocation2 + $0xcc] sm:$0xf] %vm682_vm1, %v793_v23  ;;  %v8141_v0 = vpack.c.b16 %v8090_v61, %v8089_v9  ;;  %v6850_v45 = vshrl.u32 %v6459_v33, 16  ;;  %v6838_v17 = vsel %vm9938_vm6, %v6833_v46, %v11453_v38  ;;  %v7934_v13 = vrot.slane %v7932_v27, 4  ;;  %v9813_v23 = vld [vmem:[#allocation2 + $0xbc] sm:$0x1] }
 0x38d   :  { %vm8567_vm3 = vcmp.ge.f32.partialorder %v8503_v57, 0.0  ;;  %v8631_v32 = vmul.f32 0.01, %v8503_v57  ;;  %v5507_v63 = vpack.c.b16 %v5457_v56, %v5456_v52  ;;  %v7935_v38 = vrot.slane %v11455_v8, 5  ;;  %v9701_v52 = vld [vmem:[#allocation2 + $0xb4] sm:$0xff] }
 0x38e   :  { %v8286_v25 = vpop.f32.mrf.mxu0  ;;  %v7504_v11 = vpop.f32.mrf.mxu3  ;;  %v6852_v9 = vrot.slane %v6850_v45, 4  ;;  %v5307_v7 = vrot.slane %v9813_v23, 5  ;;  %v7933_v8 = vsel %vm10330_vm9, %v9572_v60, %v7932_v27 }
 0x38f   :  { %9506 = vmatmul.msk.bf16.gmra.mxu2 %vm1772_vm5, %v9700_v37  ;;  %v5656_v55 = vpop.f32.mrf.mxu1  ;;  %v8695_v42 = vsel %vm8567_vm3, %v8503_v57, %v8631_v32  ;;  %v7654_v47 = vadd.f32 %v7504_v11, %v6360_v10  ;;  %v6853_v57 = vshll.u32 %v6459_v33, 16  ;;  %v795_v10 = vld [vmem:[#allocation5 + $0x8] sm:$0x1]  ;;  %v6859_v32 = vshll.u32 %v11476_v43, 16 }
 0x390   :  { %8760 = vst.msk [vmem:[%s12379_s5 + $0x30] sm:$0xff] %vm8753_vm11, %v8695_v42  ;;  %v5304_v11 = vrot.slane %v9812_v51, 5  ;;  %v6848_v42 = vsel %vm9938_vm6, %v6843_v14, %v6847_v35  ;;  %v7309_v35 = vunpack.c.l.b16 %v6838_v17 }
 0x391   :  { %v8436_v20 = vadd.f32 %v8286_v25, %v7654_v47  ;;  %802 = vst.msk [vmem:[#allocation2 + $0xd4] sm:$0x1] %vm685_vm2, %v795_v10  ;;  %v5090_v47 = vld [vmem:[#allocation2 + $0xb4] sm:$0xe]  ;;  %v6855_v61 = vrot.slane %v6853_v57, 5  ;;  %v11499_v46 = vrot.slane %v6859_v32, 5  ;;  %v7310_v22 = vunpack.c.l.b16 %v6848_v42 }
 0x392   :  { %v6213_v39 = vpop.f32.mrf.mxu2  ;;  %v9314_v56 = vrot.slane %v5090_v47, 9  ;;  %v5306_v33 = vrot.slane %v5304_v11, 4  ;;  %v7936_v57 = vsel %vm10330_vm9, %v7934_v13, %v7935_v38  ;;  %v7725_v38 = vld [vmem:[#allocation2 + $0xc0] sm:$0xe] }
 0x393   :  { %v8504_v37 = vadd.f32 %v11315_v29, %v8436_v20  ;;  %9539 = vmatmul.msk.bf16.gmra.mxu3 %vm1772_vm5, %v7359_v1  ;;  %v6361_v59 = vadd.f32 %v6213_v39, %v5802_v24  ;;  %v6863_v1 = vshrl.u32 %v11476_v43, 16  ;;  %v5803_v24 = vadd.f32 %v5656_v55, %v10679_v30 }
 0x394   :  { %v6856_v30 = vor.u32 %v6855_v61, %v6852_v9  ;;  %v7360_v27 = vpack.c.b16 %v7310_v22, %v7309_v35  ;;  %v9573_v22 = vrot.slane %v7725_v38, 9 }
 0x395   :  { %vm8568_vm4 = vcmp.ge.f32.partialorder %v8504_v37, 0.0  ;;  %v8632_v54 = vmul.f32 0.01, %v8504_v37 }
 0x396   :  { %v8289_v12 = vpop.f32.mrf.mxu0  ;;  %v7507_v25 = vpop.f32.mrf.mxu3  ;;  %v6857_v17 = vrot.slane %v6856_v30, 4 }
 0x397   :  { %v5659_v15 = vpop.f32.mrf.mxu1  ;;  %v8696_v26 = vsel %vm8568_vm4, %v8504_v37, %v8632_v54  ;;  %v7655_v5 = vadd.f32 %v7507_v25, %v6361_v59  ;;  %v6865_v37 = vrot.slane %v6863_v1, 4 }
 0x398   :  { %8761 = vst.msk [vmem:[%s12379_s5 + $0x38] sm:$0xff] %vm8753_vm11, %v8696_v26  ;;  %v8091_v26 = vunpack.c.l.b16 %v7933_v8 }
 0x399   :  { %9604 = vmatmul.msk.bf16.gmra.mxu0 %vm1772_vm5, %v8141_v0  ;;  %v8437_v20 = vadd.f32 %v8289_v12, %v7655_v5  ;;  %9346 = vmatmul.msk.bf16.gmra.mxu1 %vm1772_vm5, %v5507_v63  ;;  %v11502_v0 = vld [vmem:[#allocation2 + $0xc8] sm:$0x1]  ;;  %v5305_v12 = vsel %vm10330_vm9, %v9314_v56, %v5304_v11  ;;  %v5308_v63 = vsel %vm10330_vm9, %v5306_v33, %v5307_v7  ;;  %v8092_v5 = vunpack.c.l.b16 %v7936_v57  ;;  %v6462_v33 = vld [vmem:[#allocation2 + $0xcc] sm:$0xf]  ;;  %v9814_v7 = vld [vmem:[#allocation2 + $0xc4] sm:$0xf] }
 0x39a   :  { %v6215_v39 = vpop.f32.mrf.mxu2  ;;  %v6866_v32 = vor.u32 %v6865_v37, %v11499_v46  ;;  %v6869_v25 = vshll.u32 %v11502_v0, 16  ;;  %v5804_v11 = vadd.f32 %v5659_v15, %v10689_v19  ;;  %v5458_v60 = vunpack.c.l.b16 %v5305_v12 }
 0x39b   :  { %v8505_v59 = vadd.f32 %v11315_v29, %v8437_v20  ;;  %v6362_v14 = vadd.f32 %v6215_v39, %v5803_v24  ;;  %v5459_v13 = vunpack.c.l.b16 %v5308_v63  ;;  %v7939_v20 = vrot.slane %v11476_v43, 5 }
 0x39c   :  { %v6867_v9 = vrot.slane %v6866_v32, 4  ;;  %v6871_v61 = vrot.slane %v6869_v25, 5  ;;  %v6862_v56 = vsel %vm9938_vm6, %v6857_v17, %v11499_v46  ;;  %v5311_v37 = vrot.slane %v9814_v7, 5 }
 0x39d   :  { %vm8569_vm7 = vcmp.ge.f32.partialorder %v8505_v59, 0.0  ;;  %v8633_v55 = vmul.f32 0.01, %v8505_v59  ;;  %v5508_v23 = vpack.c.b16 %v5459_v13, %v5458_v60  ;;  %v7941_v30 = vrot.slane %v7939_v20, 4 }
 0x39e   :  { %v8291_v45 = vpop.f32.mrf.mxu0  ;;  %v7509_v10 = vpop.f32.mrf.mxu3  ;;  %v6872_v35 = vsel %vm9938_vm6, %v6867_v9, %v6871_v61  ;;  %v6874_v57 = vshrl.u32 %v6462_v33, 16  ;;  %v7311_v17 = vunpack.c.l.b16 %v6862_v56  ;;  %v11545_v9 = vld [vmem:[#allocation2 + $0xd4] sm:$0x1] }
 0x39f   :  { %9507 = vmatmul.msk.bf16.gmra.mxu2 %vm1772_vm5, %v9701_v52  ;;  %v5661_v54 = vpop.f32.mrf.mxu1  ;;  %v8697_v51 = vsel %vm8569_vm7, %v8505_v59, %v8633_v55  ;;  %v7656_v1 = vadd.f32 %v7509_v10, %v6362_v14  ;;  %v8142_v52 = vpack.c.b16 %v8092_v5, %v8091_v26  ;;  %v11526_v59 = vld [vmem:[#allocation2 + $0xd0] sm:$0xf]  ;;  %v7942_v55 = vrot.slane %v11502_v0, 5  ;;  %v9702_v5 = vld [vmem:[#allocation2 + $0xc0] sm:$0xff] }
 0x3a0   :  { %8762 = vst.msk [vmem:[%s12379_s5 + $0x40] sm:$0xff] %vm8753_vm11, %v8697_v51  ;;  %v6877_v10 = vshll.u32 %v6462_v33, 16  ;;  %v5805_v12 = vadd.f32 %v5661_v54, %v10697_v3  ;;  %v6883_v63 = vshll.u32 %v11526_v59, 16  ;;  %v6887_v32 = vshrl.u32 %v11526_v59, 16 }
 0x3a1   :  { %v8438_v42 = vadd.f32 %v8291_v45, %v7656_v1  ;;  %v5091_v45 = vld [vmem:[#allocation2 + $0xc0] sm:$0xe]  ;;  %v5313_v1 = vrot.slane %v5311_v37, 4  ;;  %v7943_v3 = vsel %vm10330_vm9, %v7941_v30, %v7942_v55  ;;  %v6876_v60 = vrot.slane %v6874_v57, 4  ;;  %v6465_v57 = vld [vmem:[#allocation2 + $0xf0] sm:$0xf] }
 0x3a2   :  { %v6218_v47 = vpop.f32.mrf.mxu2  ;;  %v9315_v51 = vrot.slane %v5091_v45, 9  ;;  %v6879_v13 = vrot.slane %v6877_v10, 5  ;;  %v11547_v61 = vrot.slane %v6883_v63, 5 }
 0x3a3   :  { %v8506_v24 = vadd.f32 %v11315_v29, %v8438_v42  ;;  %9540 = vmatmul.msk.bf16.gmra.mxu3 %vm1772_vm5, %v7360_v27  ;;  %v6363_v39 = vadd.f32 %v6218_v47, %v5804_v11  ;;  %v9815_v27 = vld [vmem:[#allocation2 + $0xc8] sm:$0x1]  ;;  %v7312_v42 = vunpack.c.l.b16 %v6872_v35  ;;  %v7940_v11 = vsel %vm10330_vm9, %v9573_v22, %v7939_v20 }
 0x3a4   :  { %v5314_v26 = vrot.slane %v9815_v27, 5  ;;  %v6880_v35 = vor.u32 %v6879_v13, %v6876_v60  ;;  %v6893_v22 = vshll.u32 %v11545_v9, 16  ;;  %v7726_v27 = vld [vmem:[#allocation2 + $0xcc] sm:$0xe] }
 0x3a5   :  { %vm8570_vm8 = vcmp.ge.f32.partialorder %v8506_v24, 0.0  ;;  %v8634_v19 = vmul.f32 0.01, %v8506_v24  ;;  %v7361_v33 = vpack.c.b16 %v7312_v42, %v7311_v17  ;;  %v6901_v17 = vshll.u32 %v6465_v57, 16 }
 0x3a6   :  { %v8294_v15 = vpop.f32.mrf.mxu0  ;;  %v7512_v43 = vpop.f32.mrf.mxu3  ;;  %v5315_v20 = vsel %vm10330_vm9, %v5313_v1, %v5314_v26  ;;  %v7946_v26 = vrot.slane %v11526_v59, 5  ;;  %v9574_v59 = vrot.slane %v7726_v27, 9 }
 0x3a7   :  { %v5664_v14 = vpop.f32.mrf.mxu1  ;;  %v8698_v46 = vsel %vm8570_vm8, %v8506_v24, %v8634_v19  ;;  %v7657_v8 = vadd.f32 %v7512_v43, %v6363_v39  ;;  %v6889_v24 = vrot.slane %v6887_v32, 4  ;;  %v8093_v19 = vunpack.c.l.b16 %v7940_v11 }
 0x3a8   :  { %8763 = vst.msk [vmem:[%s12379_s5 + $0x48] sm:$0xff] %vm8753_vm11, %v8698_v46  ;;  %v5461_v30 = vunpack.c.l.b16 %v5315_v20  ;;  %v5806_v46 = vadd.f32 %v5664_v14, %v10707_v53  ;;  %v7948_v20 = vrot.slane %v7946_v26, 4 }
 0x3a9   :  { %9605 = vmatmul.msk.bf16.gmra.mxu0 %vm1772_vm5, %v8142_v52  ;;  %v8439_v25 = vadd.f32 %v8294_v15, %v7657_v8  ;;  %9347 = vmatmul.msk.bf16.gmra.mxu1 %vm1772_vm5, %v5508_v23  ;;  %v5312_v52 = vsel %vm10330_vm9, %v9315_v51, %v5311_v37  ;;  %v8094_v15 = vunpack.c.l.b16 %v7943_v3  ;;  %v6890_v55 = vor.u32 %v6889_v24, %v11547_v61 }
 0x3aa   :  { %v6220_v0 = vpop.f32.mrf.mxu2  ;;  %v5460_v37 = vunpack.c.l.b16 %v5312_v52 }
 0x3ab   :  { %v8507_v54 = vadd.f32 %v11315_v29, %v8439_v25  ;;  %v6364_v47 = vadd.f32 %v6220_v0, %v5805_v12  ;;  %v8143_v10 = vpack.c.b16 %v8094_v15, %v8093_v19  ;;  %v11561_v12 = vld [vmem:[#allocation2 + $0xf4] sm:$0xf]  ;;  %v6881_v25 = vrot.slane %v6880_v35, 4  ;;  %v9703_v35 = vld [vmem:[#allocation2 + $0xcc] sm:$0xff] }
 0x3ac   :  { %v6895_v0 = vrot.slane %v6893_v22, 5  ;;  %v5509_v51 = vpack.c.b16 %v5461_v30, %v5460_v37  ;;  %v6891_v1 = vrot.slane %v6890_v55, 4  ;;  %v6907_v42 = vshll.u32 %v11561_v12, 16  ;;  %v9817_v30 = vld [vmem:[#allocation2 + $0xec] sm:$0x1] }
 0x3ad   :  { %vm8571_vm10 = vcmp.ge.f32.partialorder %v8507_v54, 0.0  ;;  %v8635_v39 = vmul.f32 0.01, %v8507_v54  ;;  %v6911_v60 = vshrl.u32 %v11561_v12, 16  ;;  %v5321_v55 = vrot.slane %v9817_v30, 5 }
 0x3ae   :  { %v8296_v38 = vpop.f32.mrf.mxu0  ;;  %v7514_v56 = vpop.f32.mrf.mxu3  ;;  %v6896_v52 = vsel %vm9938_vm6, %v6891_v1, %v6895_v0 }
 0x3af   :  { %9508 = vmatmul.msk.bf16.gmra.mxu2 %vm1772_vm5, %v9702_v5  ;;  %v5666_v23 = vpop.f32.mrf.mxu1  ;;  %v8699_v7 = vsel %vm8571_vm10, %v8507_v54, %v8635_v39  ;;  %v7658_v43 = vadd.f32 %v7514_v56, %v6364_v47  ;;  %v6898_v5 = vshrl.u32 %v6465_v57, 16  ;;  %v9816_v54 = vld [vmem:[#allocation2 + $0xe8] sm:$0xf]  ;;  %v6886_v39 = vsel %vm9938_vm6, %v6881_v25, %v11547_v61 }
 0x3b0   :  { %8764 = vst.msk [vmem:[%s12379_s5 + $0x50] sm:$0xff] %vm8753_vm11, %v8699_v7  ;;  %v5318_v47 = vrot.slane %v9816_v54, 5  ;;  %v7949_v56 = vrot.slane %v11545_v9, 5  ;;  %v5807_v15 = vadd.f32 %v5666_v23, %v10715_v21  ;;  %v6903_v7 = vrot.slane %v6901_v17, 5 }
 0x3b1   :  { %v8440_v45 = vadd.f32 %v8296_v38, %v7658_v43  ;;  %v5092_v38 = vld [vmem:[#allocation2 + $0xe4] sm:$0xe]  ;;  %v11581_v43 = vrot.slane %v6907_v42, 5  ;;  %v7313_v9 = vunpack.c.l.b16 %v6886_v39  ;;  %v7314_v57 = vunpack.c.l.b16 %v6896_v52 }
 0x3b2   :  { %v6223_v8 = vpop.f32.mrf.mxu2  ;;  %v9316_v22 = vrot.slane %v5092_v38, 9  ;;  %v5320_v37 = vrot.slane %v5318_v47, 4  ;;  %v7947_v21 = vsel %vm10330_vm9, %v9574_v59, %v7946_v26 }
 0x3b3   :  { %v8508_v63 = vadd.f32 %v11315_v29, %v8440_v45  ;;  %9541 = vmatmul.msk.bf16.gmra.mxu3 %vm1772_vm5, %v7361_v33  ;;  %v6365_v32 = vadd.f32 %v6223_v8, %v5806_v46  ;;  %v6900_v33 = vrot.slane %v6898_v5, 4  ;;  %v6913_v45 = vrot.slane %v6911_v60, 4 }
 0x3b4   :  { %v5319_v1 = vsel %vm10330_vm9, %v9316_v22, %v5318_v47  ;;  %v5322_v27 = vsel %vm10330_vm9, %v5320_v37, %v5321_v55  ;;  %v7362_v17 = vpack.c.b16 %v7314_v57, %v7313_v9  ;;  %v8095_v42 = vunpack.c.l.b16 %v7947_v21 }
 0x3b5   :  { %vm8572_vm12 = vcmp.ge.f32.partialorder %v8508_v63, 0.0  ;;  %v8636_v53 = vmul.f32 0.01, %v8508_v63  ;;  %v6904_v25 = vor.u32 %v6903_v7, %v6900_v33  ;;  %v6914_v5 = vor.u32 %v6913_v45, %v11581_v43  ;;  %v7727_v7 = vld [vmem:[#allocation2 + $0xf0] sm:$0xe] }
 0x3b6   :  { %v8299_v14 = vpop.f32.mrf.mxu0  ;;  %v7517_v11 = vpop.f32.mrf.mxu3  ;;  %v5093_v45 = vld [vmem:[#allocation2 + $0xf0] sm:$0xe] }
 0x3b7   :  { %v5669_v3 = vpop.f32.mrf.mxu1  ;;  %v8700_v13 = vsel %vm8572_vm12, %v8508_v63, %v8636_v53  ;;  %v7659_v24 = vadd.f32 %v7517_v11, %v6365_v32  ;;  %v7950_v32 = vsel %vm10330_vm9, %v7948_v20, %v7949_v56  ;;  %v6905_v39 = vrot.slane %v6904_v25, 4  ;;  %v6468_v56 = vld [vmem:[#allocation2 + $0xfc] sm:$0xf] }
 0x3b8   :  { %8765 = vst.msk [vmem:[%s12379_s5 + $0x58] sm:$0xff] %vm8753_vm11, %v8700_v13  ;;  %v8096_v11 = vunpack.c.l.b16 %v7950_v32  ;;  %v5808_v47 = vadd.f32 %v5669_v3, %v10725_v2  ;;  %v5462_v13 = vunpack.c.l.b16 %v5319_v1  ;;  %v6915_v59 = vrot.slane %v6914_v5, 4  ;;  %v9819_v5 = vld [vmem:[#allocation2 + $0xf8] sm:$0x1] }
 0x3b9   :  { %9606 = vmatmul.msk.bf16.gmra.mxu0 %vm1772_vm5, %v8143_v10  ;;  %v8441_v19 = vadd.f32 %v8299_v14, %v7659_v24  ;;  %9348 = vmatmul.msk.bf16.gmra.mxu1 %vm1772_vm5, %v5509_v51  ;;  %v11584_v10 = vld [vmem:[#allocation2 + $0xf8] sm:$0x1]  ;;  %v5463_v24 = vunpack.c.l.b16 %v5322_v27  ;;  %v9317_v1 = vrot.slane %v5093_v45, 9 }
 0x3ba   :  { %v6225_v61 = vpop.f32.mrf.mxu2  ;;  %v6917_v26 = vshll.u32 %v11584_v10, 16  ;;  %v8144_v33 = vpack.c.b16 %v8096_v11, %v8095_v42  ;;  %v7956_v32 = vrot.slane %v11584_v10, 5 }
 0x3bb   :  { %v8509_v46 = vadd.f32 %v11315_v29, %v8441_v19  ;;  %v6366_v8 = vadd.f32 %v6225_v61, %v5807_v15  ;;  %v7953_v19 = vrot.slane %v11561_v12, 5  ;;  %v11605_v15 = vld [vmem:[#allocation2 + $0x100] sm:$0xf]  ;;  %v5510_v3 = vpack.c.b16 %v5463_v24, %v5462_v13  ;;  %v11634_v24 = vld [vmem:[#allocation2 + $0x104] sm:$0x1] }
 0x3bc   :  { %v6919_v38 = vrot.slane %v6917_v26, 5  ;;  %v6922_v12 = vshrl.u32 %v6468_v56, 16  ;;  %v6931_v57 = vshll.u32 %v11605_v15, 16  ;;  %v6935_v21 = vshrl.u32 %v11605_v15, 16 }
 0x3bd   :  { %vm8573_vm13 = vcmp.ge.f32.partialorder %v8509_v46, 0.0  ;;  %v8637_v23 = vmul.f32 0.01, %v8509_v46  ;;  %v5328_v26 = vrot.slane %v9819_v5, 5 }
 0x3be   :  { %v8301_v63 = vpop.f32.mrf.mxu0  ;;  %v7519_v0 = vpop.f32.mrf.mxu3  ;;  %v6920_v55 = vsel %vm9938_vm6, %v6915_v59, %v6919_v38  ;;  %v6924_v42 = vrot.slane %v6922_v12, 4 }
 0x3bf   :  { %9509 = vmatmul.msk.bf16.gmra.mxu2 %vm1772_vm5, %v9703_v35  ;;  %v5671_v51 = vpop.f32.mrf.mxu1  ;;  %v8701_v53 = vsel %vm8573_vm13, %v8509_v46, %v8637_v23  ;;  %v7660_v14 = vadd.f32 %v7519_v0, %v6366_v8  ;;  %v9818_v35 = vld [vmem:[#allocation2 + $0xf4] sm:$0xf]  ;;  %v6925_v46 = vshll.u32 %v6468_v56, 16  ;;  %v9575_v23 = vrot.slane %v7727_v7, 9 }
 0x3c0   :  { %8766 = vst.msk [vmem:[%s12379_s5 + $0x60] sm:$0xff] %vm8753_vm11, %v8701_v53  ;;  %v5325_v22 = vrot.slane %v9818_v35, 5  ;;  %v9704_v53 = vld [vmem:[#allocation2 + $0xf0] sm:$0xff]  ;;  %v6941_v7 = vshll.u32 %v11634_v24, 16 }
 0x3c1   :  { %v8442_v54 = vadd.f32 %v8301_v63, %v7660_v14  ;;  %v7955_v63 = vrot.slane %v7953_v19, 4  ;;  %v6927_v11 = vrot.slane %v6925_v46, 5  ;;  %v6471_v46 = vld [vmem:[#allocation2 + $0x108] sm:$0xf] }
 0x3c2   :  { %v6228_v60 = vpop.f32.mrf.mxu2  ;;  %v5327_v27 = vrot.slane %v5325_v22, 4  ;;  %v5326_v38 = vsel %vm10330_vm9, %v9317_v1, %v5325_v22  ;;  %v6946_v1 = vshrl.u32 %v6471_v46, 16 }
 0x3c3   :  { %v8510_v52 = vadd.f32 %v11315_v29, %v8442_v54  ;;  %9542 = vmatmul.msk.bf16.gmra.mxu3 %vm1772_vm5, %v7362_v17  ;;  %v6367_v20 = vadd.f32 %v6228_v60, %v5808_v47  ;;  %v6910_v29 = vsel %vm9938_vm6, %v6905_v39, %v11581_v43  ;;  %v5809_v43 = vadd.f32 %v5671_v51, %v10733_v16  ;;  %v11625_v16 = vld [vmem:[%s12378_s4] ss:$0 sm:$0xff] }
 0x3c4   :  { %v7315_v14 = vunpack.c.l.b16 %v6910_v29  ;;  %v7316_v17 = vunpack.c.l.b16 %v6920_v55  ;;  %v11628_v54 = vrot.slane %v6931_v57, 5  ;;  %v6937_v47 = vrot.slane %v6935_v21, 4 }
 0x3c5   :  { %vm8574_vm14 = vcmp.ge.f32.partialorder %v8510_v52, 0.0  ;;  %v8638_v61 = vmul.f32 0.01, %v8510_v52  ;;  %v7954_v60 = vsel %vm10330_vm9, %v9575_v23, %v7953_v19  ;;  %v7957_v13 = vsel %vm10330_vm9, %v7955_v63, %v7956_v32 }
 0x3c6   :  { %v8304_v2 = vpop.f32.mrf.mxu0  ;;  %v7522_v37 = vpop.f32.mrf.mxu3  ;;  %v7363_v56 = vpack.c.b16 %v7316_v17, %v7315_v14  ;;  %v6928_v19 = vor.u32 %v6927_v11, %v6924_v42  ;;  %v8097_v35 = vunpack.c.l.b16 %v7954_v60  ;;  %v8098_v22 = vunpack.c.l.b16 %v7957_v13  ;;  %v9821_v14 = vld [vmem:[#allocation2 + $0x100] sm:$0xf] }
 0x3c7   :  { %v5674_v30 = vpop.f32.mrf.mxu1  ;;  %v8702_v8 = vsel %vm8574_vm14, %v8510_v52, %v8638_v61  ;;  %v7661_v9 = vadd.f32 %v7522_v37, %v6367_v20  ;;  %v5329_v52 = vsel %vm10330_vm9, %v5327_v27, %v5328_v26  ;;  %v5464_v37 = vunpack.c.l.b16 %v5326_v38 }
 0x3c8   :  { %8767 = vst.msk [vmem:[%s12379_s5 + $0x68] sm:$0xff] %vm8753_vm11, %v8702_v8  ;;  %v5465_v29 = vunpack.c.l.b16 %v5329_v52  ;;  %v5810_v45 = vadd.f32 %v5674_v30, %v10743_v48  ;;  %v6929_v8 = vrot.slane %v6928_v19, 4  ;;  %v6943_v23 = vrot.slane %v6941_v7, 5  ;;  %v9705_v19 = vld [vmem:[#allocation2 + $0xfc] sm:$0xff] }
 0x3c9   :  { %9607 = vmatmul.msk.bf16.gmra.mxu0 %vm1772_vm5, %v8144_v33  ;;  %v8443_v25 = vadd.f32 %v8304_v2, %v7661_v9  ;;  %9349 = vmatmul.msk.bf16.gmra.mxu1 %vm1772_vm5, %v5510_v3  ;;  %v6938_v3 = vor.u32 %v6937_v47, %v11628_v54  ;;  %v11648_v9 = vld [vmem:[#allocation2 + $0x10c] sm:$0xf]  ;;  %v8145_v63 = vpack.c.b16 %v8098_v22, %v8097_v35  ;;  %v6949_v27 = vshll.u32 %v6471_v46, 16  ;;  %v5094_v47 = vld [vmem:[#allocation2 + $0xfc] sm:$0xe] }
 0x3ca   :  { %v6230_v0 = vpop.f32.mrf.mxu2  ;;  %v5511_v32 = vpack.c.b16 %v5465_v29, %v5464_v37  ;;  %v6955_v5 = vshll.u32 %v11648_v9, 16  ;;  %v5332_v17 = vrot.slane %v9821_v14, 5  ;;  %v6959_v42 = vshrl.u32 %v11648_v9, 16 }
 0x3cb   :  { %v8511_v10 = vadd.f32 %v11625_v16, %v8443_v25  ;;  %v6368_v51 = vadd.f32 %v6230_v0, %v5809_v43  ;;  %v6939_v43 = vrot.slane %v6938_v3, 4  ;;  %v7728_v25 = vld [vmem:[#allocation2 + $0xfc] sm:$0xe]  ;;  %v7960_v0 = vrot.slane %v11605_v15, 5  ;;  %v9822_v3 = vld [vmem:[#allocation2 + $0x104] sm:$0x1] }
 0x3cc   :  { %v9576_v60 = vrot.slane %v7728_v25, 9  ;;  %v5335_v7 = vrot.slane %v9822_v3, 5  ;;  %v6961_v35 = vrot.slane %v6959_v42, 4 }
 0x3cd   :  { %vm8575_vm15 = vcmp.ge.f32.partialorder %v8511_v10, 0.0  ;;  %v8639_v39 = vmul.f32 0.01, %v8511_v10  ;;  %v6944_v15 = vsel %vm9938_vm6, %v6939_v43, %v6943_v23  ;;  %v7962_v13 = vrot.slane %v7960_v0, 4 }
 0x3ce   :  { %v8306_v59 = vpop.f32.mrf.mxu0  ;;  %v7524_v20 = vpop.f32.mrf.mxu3  ;;  %v7318_v29 = vunpack.c.l.b16 %v6944_v15  ;;  %v6474_v15 = vld [vmem:[#allocation2 + $0x114] sm:$0xf] }
 0x3cf   :  { %9510 = vmatmul.msk.bf16.gmra.mxu2 %vm1772_vm5, %v9704_v53  ;;  %v5676_v33 = vpop.f32.mrf.mxu1  ;;  %v8703_v61 = vsel %vm8575_vm15, %v8511_v10, %v8639_v39  ;;  %v7662_v2 = vadd.f32 %v7524_v20, %v6368_v51  ;;  %v6934_v51 = vsel %vm9938_vm6, %v6929_v8, %v11628_v54  ;;  %v7963_v39 = vrot.slane %v11634_v24, 5 }
 0x3d0   :  { %8768 = vst.msk [vmem:[%s12379_s5 + $0x70] sm:$0xff] %vm8753_vm11, %v8703_v61  ;;  %v5811_v52 = vadd.f32 %v5676_v33, %v10751_v4  ;;  %v6951_v20 = vrot.slane %v6949_v27, 5  ;;  %v9318_v61 = vrot.slane %v5094_v47, 9  ;;  %v7317_v24 = vunpack.c.l.b16 %v6934_v51 }
 0x3d1   :  { %v8444_v55 = vadd.f32 %v8306_v59, %v7662_v2  ;;  %v6948_v59 = vrot.slane %v6946_v1, 4  ;;  %v5334_v2 = vrot.slane %v5332_v17, 4  ;;  %v7961_v4 = vsel %vm10330_vm9, %v9576_v60, %v7960_v0 }
 0x3d2   :  { %v6233_v12 = vpop.f32.mrf.mxu2  ;;  %v7364_v0 = vpack.c.b16 %v7318_v29, %v7317_v24  ;;  %v8099_v1 = vunpack.c.l.b16 %v7961_v4  ;;  %v7967_v60 = vrot.slane %v11648_v9, 5  ;;  %v6970_v9 = vshrl.u32 %v6474_v15, 16 }
 0x3d3   :  { %v8512_v57 = vadd.f32 %v11625_v16, %v8444_v55  ;;  %9543 = vmatmul.msk.bf16.gmra.mxu3 %vm1772_vm5, %v7363_v56  ;;  %v6369_v21 = vadd.f32 %v6233_v12, %v5810_v45  ;;  %v11668_v56 = vrot.slane %v6955_v5, 5  ;;  %v11671_v55 = vld [vmem:[#allocation2 + $0x110] sm:$0x1]  ;;  %v7964_v12 = vsel %vm10330_vm9, %v7962_v13, %v7963_v39  ;;  %v11692_v13 = vld [vmem:[#allocation2 + $0x118] sm:$0xf] }
 0x3d4   :  { %v6952_v46 = vor.u32 %v6951_v20, %v6948_v59  ;;  %v5336_v43 = vsel %vm10330_vm9, %v5334_v2, %v5335_v7  ;;  %v7729_v59 = vld [vmem:[#allocation2 + $0x108] sm:$0xe]  ;;  %v6973_v3 = vshll.u32 %v6474_v15, 16  ;;  %v7969_v29 = vrot.slane %v7967_v60, 4 }
 0x3d5   :  { %vm8576_vm0 = vcmp.ge.f32.partialorder %v8512_v57, 0.0  ;;  %v8640_v48 = vmul.f32 0.01, %v8512_v57  ;;  %v6962_v23 = vor.u32 %v6961_v35, %v11668_v56  ;;  %v5467_v14 = vunpack.c.l.b16 %v5336_v43  ;;  %v5095_v2 = vld [vmem:[#allocation2 + $0x108] sm:$0xe] }
 0x3d6   :  { %v8309_v30 = vpop.f32.mrf.mxu0  ;;  %v7527_v26 = vpop.f32.mrf.mxu3  ;;  %v9577_v24 = vrot.slane %v7729_v59, 9  ;;  %v7970_v4 = vrot.slane %v11671_v55, 5  ;;  %v9706_v43 = vld [vmem:[#allocation2 + $0x108] sm:$0xff] }
 0x3d7   :  { %v5679_v53 = vpop.f32.mrf.mxu1  ;;  %v8704_v11 = vsel %vm8576_vm0, %v8512_v57, %v8640_v48  ;;  %v7663_v10 = vadd.f32 %v7527_v26, %v6369_v21  ;;  %v5333_v21 = vsel %vm10330_vm9, %v9318_v61, %v5332_v17  ;;  %v8100_v48 = vunpack.c.l.b16 %v7964_v12 }
 0x3d8   :  { %8769 = vst.msk [vmem:[%s12379_s5 + $0x78] sm:$0xff] %vm8753_vm11, %v8704_v11  ;;  %v5812_v27 = vadd.f32 %v5679_v53, %v10761_v36  ;;  %v5466_v26 = vunpack.c.l.b16 %v5333_v21  ;;  %v6953_v17 = vrot.slane %v6952_v46, 4  ;;  %v6963_v42 = vrot.slane %v6962_v23, 4 }
 0x3d9   :  { %9608 = vmatmul.msk.bf16.gmra.mxu0 %vm1772_vm5, %v8145_v63  ;;  %v8445_v38 = vadd.f32 %v8309_v30, %v7663_v10  ;;  %9350 = vmatmul.msk.bf16.gmra.mxu1 %vm1772_vm5, %v5511_v32  ;;  %v6965_v63 = vshll.u32 %v11671_v55, 16  ;;  %v8146_v47 = vpack.c.b16 %v8100_v48, %v8099_v1  ;;  %v9319_v12 = vrot.slane %v5095_v2, 9  ;;  %v11730_v2 = vld [vmem:[#allocation2 + $0x124] sm:$0xf] }
 0x3da   :  { %v6235_v54 = vpop.f32.mrf.mxu2  ;;  %v5512_v53 = vpack.c.b16 %v5467_v14, %v5466_v26  ;;  %v7968_v55 = vsel %vm10330_vm9, %v9577_v24, %v7967_v60  ;;  %v7971_v48 = vsel %vm10330_vm9, %v7969_v29, %v7970_v4  ;;  %v7974_v24 = vrot.slane %v11692_v13, 5 }
 0x3db   :  { %v8513_v22 = vadd.f32 %v11625_v16, %v8445_v38  ;;  %v6370_v37 = vadd.f32 %v6235_v54, %v5811_v52  ;;  %v6967_v11 = vrot.slane %v6965_v63, 5  ;;  %v9823_v38 = vld [vmem:[#allocation2 + $0x10c] sm:$0xf] }
 0x3dc   :  { %v5339_v52 = vrot.slane %v9823_v38, 5 }
 0x3dd   :  { %vm8577_vm3 = vcmp.ge.f32.partialorder %v8513_v22, 0.0  ;;  %v8641_v33 = vmul.f32 0.01, %v8513_v22  ;;  %v6968_v61 = vsel %vm9938_vm6, %v6963_v42, %v6967_v11 }
 0x3de   :  { %v8311_v45 = vpop.f32.mrf.mxu0  ;;  %v7529_v8 = vpop.f32.mrf.mxu3  ;;  %v5341_v46 = vrot.slane %v5339_v52, 4  ;;  %v7320_v63 = vunpack.c.l.b16 %v6968_v61  ;;  %v5340_v26 = vsel %vm10330_vm9, %v9319_v12, %v5339_v52 }
 0x3df   :  { %9511 = vmatmul.msk.bf16.gmra.mxu2 %vm1772_vm5, %v9705_v19  ;;  %v5681_v57 = vpop.f32.mrf.mxu1  ;;  %v8705_v32 = vsel %vm8577_vm3, %v8513_v22, %v8641_v33  ;;  %v7664_v25 = vadd.f32 %v7529_v8, %v6370_v37  ;;  %v6958_v19 = vsel %vm9938_vm6, %v6953_v17, %v11668_v56  ;;  %v6979_v22 = vshll.u32 %v11692_v13, 16  ;;  %v9824_v8 = vld [vmem:[#allocation2 + $0x110] sm:$0x1] }
 0x3e0   :  { %8770 = vst.msk [vmem:[%s12379_s5 + $0x80] sm:$0xff] %vm8753_vm11, %v8705_v32  ;;  %v6983_v37 = vshrl.u32 %v11692_v13, 16  ;;  %v5813_v56 = vadd.f32 %v5681_v57, %v10769_v6  ;;  %v5342_v21 = vrot.slane %v9824_v8, 5  ;;  %v7319_v23 = vunpack.c.l.b16 %v6958_v19  ;;  %v6477_v19 = vld [vmem:[#allocation2 + $0x120] sm:$0xf] }
 0x3e1   :  { %v8446_v30 = vadd.f32 %v8311_v45, %v7664_v25  ;;  %v6972_v32 = vrot.slane %v6970_v9, 4  ;;  %v6975_v25 = vrot.slane %v6973_v3, 5  ;;  %v11710_v57 = vrot.slane %v6979_v22, 5 }
 0x3e2   :  { %v6238_v5 = vpop.f32.mrf.mxu2  ;;  %v6985_v1 = vrot.slane %v6983_v37, 4  ;;  %v5343_v14 = vsel %vm10330_vm9, %v5341_v46, %v5342_v21  ;;  %v7365_v42 = vpack.c.b16 %v7320_v63, %v7319_v23  ;;  %v6994_v29 = vshrl.u32 %v6477_v19, 16  ;;  %v9825_v46 = vld [vmem:[#allocation2 + $0x118] sm:$0xf] }
 0x3e3   :  { %v8514_v10 = vadd.f32 %v11625_v16, %v8446_v30  ;;  %9544 = vmatmul.msk.bf16.gmra.mxu3 %vm1772_vm5, %v7364_v0  ;;  %v6371_v51 = vadd.f32 %v6238_v5, %v5812_v27  ;;  %v11716_v30 = vld [vmem:[#allocation2 + $0x11c] sm:$0x1]  ;;  %v5469_v59 = vunpack.c.l.b16 %v5343_v14  ;;  %v6997_v4 = vshll.u32 %v6477_v19, 16 }
 0x3e4   :  { %v6989_v60 = vshll.u32 %v11716_v30, 16  ;;  %v5346_v8 = vrot.slane %v9825_v46, 5  ;;  %v7007_v21 = vshrl.u32 %v11730_v2, 16 }
 0x3e5   :  { %vm8578_vm4 = vcmp.ge.f32.partialorder %v8514_v10, 0.0  ;;  %v8642_v39 = vmul.f32 0.01, %v8514_v10 }
 0x3e6   :  { %v8314_v36 = vpop.f32.mrf.mxu0  ;;  %v7532_v54 = vpop.f32.mrf.mxu3 }
 0x3e7   :  { %v5684_v20 = vpop.f32.mrf.mxu1  ;;  %v8706_v7 = vsel %vm8578_vm4, %v8514_v10, %v8642_v39  ;;  %v7665_v35 = vadd.f32 %v7532_v54, %v6371_v51  ;;  %v6976_v10 = vor.u32 %v6975_v25, %v6972_v32  ;;  %v8101_v39 = vunpack.c.l.b16 %v7968_v55  ;;  %v5096_v32 = vld [vmem:[#allocation2 + $0x114] sm:$0xe] }
 0x3e8   :  { %8771 = vst.msk [vmem:[%s12379_s5 + $0x88] sm:$0xff] %vm8753_vm11, %v8706_v7  ;;  %v5814_v52 = vadd.f32 %v5684_v20, %v10779_v34  ;;  %v9320_v14 = vrot.slane %v5096_v32, 9  ;;  %v7731_v32 = vld [vmem:[#allocation2 + $0x120] sm:$0xe] }
 0x3e9   :  { %9609 = vmatmul.msk.bf16.gmra.mxu0 %vm1772_vm5, %v8146_v47  ;;  %v8447_v33 = vadd.f32 %v8314_v36, %v7665_v35  ;;  %9351 = vmatmul.msk.bf16.gmra.mxu1 %vm1772_vm5, %v5512_v53  ;;  %v6986_v47 = vor.u32 %v6985_v1, %v11710_v57  ;;  %v8102_v36 = vunpack.c.l.b16 %v7971_v48  ;;  %v5468_v53 = vunpack.c.l.b16 %v5340_v26  ;;  %v9707_v26 = vld [vmem:[#allocation2 + $0x114] sm:$0xff] }
 0x3ea   :  { %v6240_v45 = vpop.f32.mrf.mxu2  ;;  %v6977_v61 = vrot.slane %v6976_v10, 4  ;;  %v6991_v35 = vrot.slane %v6989_v60, 5  ;;  %v6996_v1 = vrot.slane %v6994_v29, 4 }
 0x3eb   :  { %v8515_v0 = vadd.f32 %v11625_v16, %v8447_v33  ;;  %v6372_v6 = vadd.f32 %v6240_v45, %v5813_v56  ;;  %v6987_v7 = vrot.slane %v6986_v47, 4  ;;  %v8147_v22 = vpack.c.b16 %v8102_v36, %v8101_v39  ;;  %v7730_v56 = vld [vmem:[#allocation2 + $0x114] sm:$0xe]  ;;  %v11753_v39 = vld [vmem:[#allocation2 + $0x128] sm:$0x1] }
 0x3ec   :  { %v5513_v37 = vpack.c.b16 %v5469_v59, %v5468_v53  ;;  %v7003_v33 = vshll.u32 %v11730_v2, 16  ;;  %v6982_v63 = vsel %vm9938_vm6, %v6977_v61, %v11710_v57  ;;  %v9578_v25 = vrot.slane %v7730_v56, 9 }
 0x3ed   :  { %vm8579_vm7 = vcmp.ge.f32.partialorder %v8515_v0, 0.0  ;;  %v8643_v27 = vmul.f32 0.01, %v8515_v0  ;;  %v6992_v13 = vsel %vm9938_vm6, %v6987_v7, %v6991_v35 }
 0x3ee   :  { %v8316_v5 = vpop.f32.mrf.mxu0  ;;  %v7534_v17 = vpop.f32.mrf.mxu3  ;;  %v7322_v60 = vunpack.c.l.b16 %v6992_v13 }
 0x3ef   :  { %9512 = vmatmul.msk.bf16.gmra.mxu2 %vm1772_vm5, %v9706_v43  ;;  %v5686_v11 = vpop.f32.mrf.mxu1  ;;  %v8707_v51 = vsel %vm8579_vm7, %v8515_v0, %v8643_v27  ;;  %v7666_v15 = vadd.f32 %v7534_v17, %v6372_v6  ;;  %v7976_v0 = vrot.slane %v7974_v24, 4  ;;  %v7977_v6 = vrot.slane %v11716_v30, 5 }
 0x3f0   :  { %8772 = vst.msk [vmem:[%s12379_s5 + $0x90] sm:$0xff] %vm8753_vm11, %v8707_v51  ;;  %v5815_v48 = vadd.f32 %v5686_v11, %v10787_v44  ;;  %v6999_v27 = vrot.slane %v6997_v4, 5  ;;  %v5348_v17 = vrot.slane %v5346_v8, 4  ;;  %v7009_v51 = vrot.slane %v7007_v21, 4  ;;  %v6480_v21 = vld [vmem:[#allocation2 + $0x12c] sm:$0xf] }
 0x3f1   :  { %v8448_v38 = vadd.f32 %v8316_v5, %v7666_v15  ;;  %v11750_v5 = vrot.slane %v7003_v33, 5  ;;  %v7321_v30 = vunpack.c.l.b16 %v6982_v63  ;;  %v7975_v44 = vsel %vm10330_vm9, %v9578_v25, %v7974_v24  ;;  %v11774_v63 = vld [vmem:[#allocation2 + $0x130] sm:$0xf]  ;;  %v9827_v25 = vld [vmem:[#allocation2 + $0x124] sm:$0xf] }
 0x3f2   :  { %v6243_v54 = vpop.f32.mrf.mxu2  ;;  %v7978_v53 = vsel %vm10330_vm9, %v7976_v0, %v7977_v6  ;;  %v7000_v59 = vor.u32 %v6999_v27, %v6996_v1  ;;  %v5353_v0 = vrot.slane %v9827_v25, 5  ;;  %v7021_v27 = vshll.u32 %v6480_v21, 16 }
 0x3f3   :  { %v8516_v9 = vadd.f32 %v11625_v16, %v8448_v38  ;;  %9545 = vmatmul.msk.bf16.gmra.mxu3 %vm1772_vm5, %v7365_v42  ;;  %v6373_v3 = vadd.f32 %v6243_v54, %v5814_v52  ;;  %v9826_v42 = vld [vmem:[#allocation2 + $0x11c] sm:$0x1]  ;;  %v5347_v54 = vsel %vm10330_vm9, %v9320_v14, %v5346_v8  ;;  %v7010_v61 = vor.u32 %v7009_v51, %v11750_v5 }
 0x3f4   :  { %v5349_v10 = vrot.slane %v9826_v42, 5  ;;  %v7366_v35 = vpack.c.b16 %v7322_v60, %v7321_v30  ;;  %v7001_v4 = vrot.slane %v7000_v59, 4  ;;  %v7031_v42 = vshrl.u32 %v11774_v63, 16 }
 0x3f5   :  { %vm8580_vm8 = vcmp.ge.f32.partialorder %v8516_v9, 0.0  ;;  %v8644_v34 = vmul.f32 0.01, %v8516_v9  ;;  %v7011_v33 = vrot.slane %v7010_v61, 4 }
 0x3f6   :  { %v8319_v20 = vpop.f32.mrf.mxu0  ;;  %v7537_v45 = vpop.f32.mrf.mxu3  ;;  %v5350_v19 = vsel %vm10330_vm9, %v5348_v17, %v5349_v10  ;;  %v7027_v17 = vshll.u32 %v11774_v63, 16  ;;  %v9579_v10 = vrot.slane %v7731_v32, 9  ;;  %v6483_v32 = vld [vmem:[#allocation2 + $0x138] sm:$0xf] }
 0x3f7   :  { %v5689_v12 = vpop.f32.mrf.mxu1  ;;  %v8708_v43 = vsel %vm8580_vm8, %v8516_v9, %v8644_v34  ;;  %v7667_v23 = vadd.f32 %v7537_v45, %v6373_v3  ;;  %v7013_v9 = vshll.u32 %v11753_v39, 16  ;;  %v5470_v34 = vunpack.c.l.b16 %v5347_v54 }
 0x3f8   :  { %8773 = vst.msk [vmem:[%s12379_s5 + $0x98] sm:$0xff] %vm8753_vm11, %v8708_v43  ;;  %v5816_v24 = vadd.f32 %v5689_v12, %v10797_v62 }
 0x3f9   :  { %9610 = vmatmul.msk.bf16.gmra.mxu0 %vm1772_vm5, %v8147_v22  ;;  %v8449_v55 = vadd.f32 %v8319_v20, %v7667_v23  ;;  %9352 = vmatmul.msk.bf16.gmra.mxu1 %vm1772_vm5, %v5513_v37  ;;  %v8103_v22 = vunpack.c.l.b16 %v7975_v44  ;;  %v8104_v37 = vunpack.c.l.b16 %v7978_v53  ;;  %v5471_v20 = vunpack.c.l.b16 %v5350_v19  ;;  %v9708_v53 = vld [vmem:[#allocation2 + $0x120] sm:$0xff] }
 0x3fa   :  { %v6245_v57 = vpop.f32.mrf.mxu2  ;;  %v7015_v45 = vrot.slane %v7013_v9, 5  ;;  %v7981_v23 = vrot.slane %v11730_v2, 5  ;;  %v7018_v2 = vshrl.u32 %v6480_v21, 16  ;;  %v5355_v44 = vrot.slane %v5353_v0, 4 }
 0x3fb   :  { %v8517_v15 = vadd.f32 %v11625_v16, %v8449_v55  ;;  %v6374_v47 = vadd.f32 %v6245_v57, %v5815_v48  ;;  %v8148_v43 = vpack.c.b16 %v8104_v37, %v8103_v22  ;;  %v5514_v12 = vpack.c.b16 %v5471_v20, %v5470_v34  ;;  %v5097_v57 = vld [vmem:[#allocation2 + $0x120] sm:$0xe] }
 0x3fc   :  { %v7006_v55 = vsel %vm9938_vm6, %v7001_v4, %v11750_v5  ;;  %v7016_v48 = vsel %vm9938_vm6, %v7011_v33, %v7015_v45  ;;  %v7983_v51 = vrot.slane %v7981_v23, 4  ;;  %v9321_v60 = vrot.slane %v5097_v57, 9 }
 0x3fd   :  { %vm8581_vm10 = vcmp.ge.f32.partialorder %v8517_v15, 0.0  ;;  %v8645_v11 = vmul.f32 0.01, %v8517_v15  ;;  %v7323_v59 = vunpack.c.l.b16 %v7006_v55  ;;  %v7020_v54 = vrot.slane %v7018_v2, 4 }
 0x3fe   :  { %v8321_v36 = vpop.f32.mrf.mxu0  ;;  %v7539_v38 = vpop.f32.mrf.mxu3  ;;  %v7023_v19 = vrot.slane %v7021_v27, 5  ;;  %v7033_v9 = vrot.slane %v7031_v42, 4  ;;  %v5354_v37 = vsel %vm10330_vm9, %v9321_v60, %v5353_v0  ;;  %v11812_v0 = vld [vmem:[#allocation2 + $0x13c] sm:$0xf]  ;;  %v7045_v42 = vshll.u32 %v6483_v32, 16 }
 0x3ff   :  { %9513 = vmatmul.msk.bf16.gmra.mxu2 %vm1772_vm5, %v9707_v26  ;;  %v5691_v52 = vpop.f32.mrf.mxu1  ;;  %v8709_v3 = vsel %vm8581_vm10, %v8517_v15, %v8645_v11  ;;  %v7668_v7 = vadd.f32 %v7539_v38, %v6374_v47  ;;  %v7984_v15 = vrot.slane %v11753_v39, 5  ;;  %v9828_v11 = vld [vmem:[#allocation2 + $0x128] sm:$0x1]  ;;  %v7324_v38 = vunpack.c.l.b16 %v7016_v48 }
 0x400   :  { %8774 = vst.msk [vmem:[%s12379_s5 + $0xa0] sm:$0xff] %vm8753_vm11, %v8709_v3  ;;  %v5817_v5 = vadd.f32 %v5691_v52, %v10805_v18  ;;  %v11792_v52 = vrot.slane %v7027_v17, 5  ;;  %v7982_v39 = vsel %vm10330_vm9, %v9579_v10, %v7981_v23  ;;  %v7024_v20 = vor.u32 %v7023_v19, %v7020_v54 }
 0x401   :  { %v8450_v56 = vadd.f32 %v8321_v36, %v7668_v7  ;;  %v5356_v36 = vrot.slane %v9828_v11, 5  ;;  %v7985_v3 = vsel %vm10330_vm9, %v7983_v51, %v7984_v15  ;;  %v11798_v7 = vld [vmem:[#allocation2 + $0x134] sm:$0x1]  ;;  %v7042_v17 = vshrl.u32 %v6483_v32, 16  ;;  %v9829_v15 = vld [vmem:[#allocation2 + $0x130] sm:$0xf] }
 0x402   :  { %v6248_v29 = vpop.f32.mrf.mxu2  ;;  %v7034_v45 = vor.u32 %v7033_v9, %v11792_v52  ;;  %v8106_v21 = vunpack.c.l.b16 %v7985_v3  ;;  %v7025_v25 = vrot.slane %v7024_v20, 4 }
 0x403   :  { %v8518_v46 = vadd.f32 %v11625_v16, %v8450_v56  ;;  %9546 = vmatmul.msk.bf16.gmra.mxu3 %vm1772_vm5, %v7366_v35  ;;  %v6375_v8 = vadd.f32 %v6248_v29, %v5816_v24  ;;  %v5357_v56 = vsel %vm10330_vm9, %v5355_v44, %v5356_v36  ;;  %v7367_v29 = vpack.c.b16 %v7324_v38, %v7323_v59  ;;  %v5098_v36 = vld [vmem:[#allocation2 + $0x12c] sm:$0xe] }
 0x404   :  { %v5473_v23 = vunpack.c.l.b16 %v5357_v56  ;;  %v7035_v48 = vrot.slane %v7034_v45, 4  ;;  %v7030_v11 = vsel %vm9938_vm6, %v7025_v25, %v11792_v52  ;;  %v7991_v38 = vrot.slane %v11798_v7, 5 }
 0x405   :  { %vm8582_vm12 = vcmp.ge.f32.partialorder %v8518_v46, 0.0  ;;  %v8646_v13 = vmul.f32 0.01, %v8518_v46  ;;  %v7044_v54 = vrot.slane %v7042_v17, 4  ;;  %v7047_v52 = vrot.slane %v7045_v42, 5 }
 0x406   :  { %v8324_v62 = vpop.f32.mrf.mxu0  ;;  %v7542_v6 = vpop.f32.mrf.mxu3  ;;  %v9322_v3 = vrot.slane %v5098_v36, 9 }
 0x407   :  { %v5694_v1 = vpop.f32.mrf.mxu1  ;;  %v8710_v26 = vsel %vm8582_vm12, %v8518_v46, %v8646_v13  ;;  %v7669_v14 = vadd.f32 %v7542_v6, %v6375_v8  ;;  %v7037_v46 = vshll.u32 %v11798_v7, 16  ;;  %v8105_v8 = vunpack.c.l.b16 %v7982_v39  ;;  %v9709_v39 = vld [vmem:[#allocation2 + $0x12c] sm:$0xff] }
 0x408   :  { %8775 = vst.msk [vmem:[%s12379_s5 + $0xa8] sm:$0xff] %vm8753_vm11, %v8710_v26  ;;  %v7732_v26 = vld [vmem:[#allocation2 + $0x12c] sm:$0xe]  ;;  %v7325_v7 = vunpack.c.l.b16 %v7030_v11 }
 0x409   :  { %9611 = vmatmul.msk.bf16.gmra.mxu0 %vm1772_vm5, %v8148_v43  ;;  %v8451_v47 = vadd.f32 %v8324_v62, %v7669_v14  ;;  %9353 = vmatmul.msk.bf16.gmra.mxu1 %vm1772_vm5, %v5514_v12  ;;  %v5472_v43 = vunpack.c.l.b16 %v5354_v37  ;;  %v5818_v62 = vadd.f32 %v5694_v1, %v10815_v28  ;;  %v7039_v57 = vrot.slane %v7037_v46, 5 }
 0x40a   :  { %v6250_v30 = vpop.f32.mrf.mxu2  ;;  %v8149_v2 = vpack.c.b16 %v8106_v21, %v8105_v8  ;;  %v7988_v14 = vrot.slane %v11774_v63, 5  ;;  %v7048_v46 = vor.u32 %v7047_v52, %v7044_v54 }
 0x40b   :  { %v8519_v61 = vadd.f32 %v11625_v16, %v8451_v47  ;;  %v6376_v18 = vadd.f32 %v6250_v30, %v5817_v5  ;;  %v5515_v27 = vpack.c.b16 %v5473_v23, %v5472_v43  ;;  %v7051_v5 = vshll.u32 %v11812_v0, 16 }
 0x40c   :  { %v5360_v47 = vrot.slane %v9829_v15, 5  ;;  %v7055_v30 = vshrl.u32 %v11812_v0, 16  ;;  %v7040_v63 = vsel %vm9938_vm6, %v7035_v48, %v7039_v57  ;;  %v7990_v59 = vrot.slane %v7988_v14, 4 }
 0x40d   :  { %vm8583_vm13 = vcmp.ge.f32.partialorder %v8519_v61, 0.0  ;;  %v8647_v35 = vmul.f32 0.01, %v8519_v61  ;;  %v11832_v9 = vrot.slane %v7051_v5, 5  ;;  %v7326_v20 = vunpack.c.l.b16 %v7040_v63  ;;  %v6486_v5 = vld [vmem:[#allocation2 + $0x144] sm:$0xf] }
 0x40e   :  { %v8326_v22 = vpop.f32.mrf.mxu0  ;;  %v7544_v24 = vpop.f32.mrf.mxu3  ;;  %v7057_v56 = vrot.slane %v7055_v30, 4  ;;  %v7992_v45 = vsel %vm10330_vm9, %v7990_v59, %v7991_v38  ;;  %v5361_v43 = vsel %vm10330_vm9, %v9322_v3, %v5360_v47  ;;  %v7995_v15 = vrot.slane %v11812_v0, 5  ;;  %v5099_v38 = vld [vmem:[#allocation2 + $0x138] sm:$0xe] }
 0x40f   :  { %9514 = vmatmul.msk.bf16.gmra.mxu2 %vm1772_vm5, %v9708_v53  ;;  %v5696_v34 = vpop.f32.mrf.mxu1  ;;  %v8711_v4 = vsel %vm8583_vm13, %v8519_v61, %v8647_v35  ;;  %v7670_v33 = vadd.f32 %v7544_v24, %v6376_v18  ;;  %v9580_v53 = vrot.slane %v7732_v26, 9  ;;  %v5362_v35 = vrot.slane %v5360_v47, 4  ;;  %v11856_v47 = vld [vmem:[#allocation2 + $0x148] sm:$0xf] }
 0x410   :  { %8776 = vst.msk [vmem:[%s12379_s5 + $0xb0] sm:$0xff] %vm8753_vm11, %v8711_v4  ;;  %v5819_v61 = vadd.f32 %v5696_v34, %v10823_v41  ;;  %v11835_v4 = vld [vmem:[#allocation2 + $0x140] sm:$0x1]  ;;  %v7368_v25 = vpack.c.b16 %v7326_v20, %v7325_v7  ;;  %v7066_v0 = vshrl.u32 %v6486_v5, 16  ;;  %v7069_v54 = vshll.u32 %v6486_v5, 16  ;;  %v9710_v20 = vld [vmem:[#allocation2 + $0x138] sm:$0xff] }
 0x411   :  { %v8452_v13 = vadd.f32 %v8326_v22, %v7670_v33  ;;  %v9830_v22 = vld [vmem:[#allocation2 + $0x134] sm:$0x1]  ;;  %v7989_v41 = vsel %vm10330_vm9, %v9580_v53, %v7988_v14  ;;  %v7049_v14 = vrot.slane %v7048_v46, 4  ;;  %v7079_v52 = vshrl.u32 %v11856_v47, 16  ;;  %v12481_v5 = vld [vmem:[#allocation37_spill] sm:$0xff] }
 0x412   :  { %v6253_v12 = vpop.f32.mrf.mxu2  ;;  %v5363_v37 = vrot.slane %v9830_v22, 5  ;;  %v7997_v3 = vrot.slane %v7995_v15, 4 }
 0x413   :  { %v8520_v6 = vadd.f32 %v11625_v16, %v8452_v13  ;;  %9547 = vmatmul.msk.bf16.gmra.mxu3 %vm1772_vm5, %v7367_v29  ;;  %v6377_v55 = vadd.f32 %v6253_v12, %v5818_v62  ;;  %v7058_v13 = vor.u32 %v7057_v56, %v11832_v9  ;;  %v7061_v62 = vshll.u32 %v11835_v4, 16 }
 0x414   :  { %v5364_v23 = vsel %vm10330_vm9, %v5362_v35, %v5363_v37  ;;  %v7054_v53 = vsel %vm9938_vm6, %v7049_v14, %v11832_v9  ;;  %v7998_v35 = vrot.slane %v11835_v4, 5  ;;  %v9323_v56 = vrot.slane %v5099_v38, 9  ;;  %v7734_v38 = vld [vmem:[#allocation2 + $0x144] sm:$0xe] }
 0x415   :  { %vm8584_vm14 = vcmp.ge.f32.partialorder %v8520_v6, 0.0  ;;  %v8648_v28 = vmul.f32 0.01, %v8520_v6  ;;  %v5475_v26 = vunpack.c.l.b16 %v5364_v23  ;;  %v7059_v17 = vrot.slane %v7058_v13, 4  ;;  %v11880_v23 = vld [vmem:[#allocation2 + $0x14c] sm:$0x1] }
 0x416   :  { %v8329_v1 = vpop.f32.mrf.mxu0  ;;  %v7547_v10 = vpop.f32.mrf.mxu3 }
 0x417   :  { %v5699_v51 = vpop.f32.mrf.mxu1  ;;  %v8712_v60 = vsel %vm8584_vm14, %v8520_v6, %v8648_v28  ;;  %v7671_v44 = vadd.f32 %v7547_v10, %v6377_v55  ;;  %v8107_v6 = vunpack.c.l.b16 %v7989_v41  ;;  %v8108_v55 = vunpack.c.l.b16 %v7992_v45 }
 0x418   :  { %8777 = vst.msk [vmem:[%s12379_s5 + $0xb8] sm:$0xff] %vm8753_vm11, %v8712_v60  ;;  %v5820_v57 = vadd.f32 %v5699_v51, %v10833_v40  ;;  %v7063_v28 = vrot.slane %v7061_v62, 5  ;;  %v7733_v60 = vld [vmem:[#allocation2 + $0x138] sm:$0xe]  ;;  %v7327_v41 = vunpack.c.l.b16 %v7054_v53  ;;  %v7071_v45 = vrot.slane %v7069_v54, 5 }
 0x419   :  { %9612 = vmatmul.msk.bf16.gmra.mxu0 %vm1772_vm5, %v8149_v2  ;;  %v8453_v19 = vadd.f32 %v8329_v1, %v7671_v44  ;;  %9354 = vmatmul.msk.bf16.gmra.mxu1 %vm1772_vm5, %v5515_v27  ;;  %v5474_v27 = vunpack.c.l.b16 %v5361_v43  ;;  %v8150_v10 = vpack.c.b16 %v8108_v55, %v8107_v6  ;;  %v9831_v44 = vld [vmem:[#allocation2 + $0x13c] sm:$0xf]  ;;  %v7999_v43 = vsel %vm10330_vm9, %v7997_v3, %v7998_v35 }
 0x41a   :  { %v6255_v18 = vpop.f32.mrf.mxu2  ;;  %v5367_v11 = vrot.slane %v9831_v44, 5  ;;  %v7064_v59 = vsel %vm9938_vm6, %v7059_v17, %v7063_v28  ;;  %v8110_v17 = vunpack.c.l.b16 %v7999_v43 }
 0x41b   :  { %v8521_v24 = vadd.f32 %v11625_v16, %v8453_v19  ;;  %v6378_v29 = vadd.f32 %v6255_v18, %v5819_v61  ;;  %v5516_v51 = vpack.c.b16 %v5475_v26, %v5474_v27  ;;  %v7075_v18 = vshll.u32 %v11856_v47, 16 }
 0x41c   :  { %v7085_v26 = vshll.u32 %v11880_v23, 16 }
 0x41d   :  { %vm8585_vm15 = vcmp.ge.f32.partialorder %v8521_v24, 0.0  ;;  %v8649_v34 = vmul.f32 0.01, %v8521_v24 }
 0x41e   :  { %v8331_v33 = vpop.f32.mrf.mxu0  ;;  %v7549_v8 = vpop.f32.mrf.mxu3 }
 0x41f   :  { %9515 = vmatmul.msk.bf16.gmra.mxu2 %vm1772_vm5, %v9709_v39  ;;  %v5701_v21 = vpop.f32.mrf.mxu1  ;;  %v8713_v12 = vsel %vm8585_vm15, %v8521_v24, %v8649_v34  ;;  %v7672_v32 = vadd.f32 %v7549_v8, %v6378_v29  ;;  %v9581_v39 = vrot.slane %v7733_v60, 9  ;;  %v5369_v24 = vrot.slane %v5367_v11, 4  ;;  %v9832_v29 = vld [vmem:[#allocation2 + $0x140] sm:$0x1] }
 0x420   :  { %8778 = vst.msk [vmem:[%s12379_s5 + $0xc0] sm:$0xff] %vm8753_vm11, %v8713_v12  ;;  %v5821_v9 = vadd.f32 %v5701_v21, %v10841_v58  ;;  %v5370_v7 = vrot.slane %v9832_v29, 5  ;;  %v7328_v34 = vunpack.c.l.b16 %v7064_v59  ;;  %v11874_v8 = vrot.slane %v7075_v18, 5 }
 0x421   :  { %v8454_v48 = vadd.f32 %v8331_v33, %v7672_v32  ;;  %v7068_v33 = vrot.slane %v7066_v0, 4  ;;  %v7081_v21 = vrot.slane %v7079_v52, 4  ;;  %v7996_v4 = vsel %vm10330_vm9, %v9581_v39, %v7995_v15  ;;  %v9833_v39 = vld [vmem:[#allocation2 + $0x148] sm:$0xf] }
 0x422   :  { %v6258_v2 = vpop.f32.mrf.mxu2  ;;  %v5368_v12 = vsel %vm10330_vm9, %v9323_v56, %v5367_v11  ;;  %v5371_v32 = vsel %vm10330_vm9, %v5369_v24, %v5370_v7  ;;  %v7369_v6 = vpack.c.b16 %v7328_v34, %v7327_v41  ;;  %v8109_v14 = vunpack.c.l.b16 %v7996_v4  ;;  %v5100_v24 = vld [vmem:[#allocation2 + $0x144] sm:$0xe] }
 0x423   :  { %v8522_v1 = vadd.f32 %v11625_v16, %v8454_v48  ;;  %9548 = vmatmul.msk.bf16.gmra.mxu3 %vm1772_vm5, %v7368_v25  ;;  %v6379_v42 = vadd.f32 %v6258_v2, %v5820_v57  ;;  %v7072_v48 = vor.u32 %v7071_v45, %v7068_v33  ;;  %v7082_v27 = vor.u32 %v7081_v21, %v11874_v8  ;;  %v12482_v33 = vld [vmem:[#allocation38_spill] sm:$0xff] }
 0x424   :  { %v5476_v28 = vunpack.c.l.b16 %v5368_v12  ;;  %v8151_v53 = vpack.c.b16 %v8110_v17, %v8109_v14  ;;  %v8002_v0 = vrot.slane %v11856_v47, 5  ;;  %v5374_v3 = vrot.slane %v9833_v39, 5  ;;  %v9711_v21 = vld [vmem:[#allocation2 + $0x144] sm:$0xff]  ;;  %v11943_v39 = vld [vmem:[#allocation2 + $0x160] sm:$0xf] }
 0x425   :  { %vm8586_vm0 = vcmp.ge.f32.partialorder %v8522_v1, 0.0  ;;  %v8650_v30 = vmul.f32 0.01, %v8522_v1  ;;  %v7083_v11 = vrot.slane %v7082_v27, 4  ;;  %v9582_v29 = vrot.slane %v7734_v38, 9 }
 0x426   :  { %v8334_v40 = vpop.f32.mrf.mxu0  ;;  %v7552_v63 = vpop.f32.mrf.mxu3  ;;  %v8004_v7 = vrot.slane %v8002_v0, 4  ;;  %v9324_v4 = vrot.slane %v5100_v24, 9  ;;  %v5376_v43 = vrot.slane %v5374_v3, 4 }
 0x427   :  { %v5704_v36 = vpop.f32.mrf.mxu1  ;;  %v8714_v19 = vsel %vm8586_vm0, %v8522_v1, %v8650_v30  ;;  %v7673_v61 = vadd.f32 %v7552_v63, %v6379_v42  ;;  %v5477_v1 = vunpack.c.l.b16 %v5371_v32  ;;  %v6489_v30 = vld [vmem:[#allocation2 + $0x150] sm:$0xf]  ;;  %v7087_v63 = vrot.slane %v7085_v26, 5 }
 0x428   :  { %8779 = vst.msk [vmem:[%s12379_s5 + $0xc8] sm:$0xff] %vm8753_vm11, %v8714_v19  ;;  %v7090_v54 = vshrl.u32 %v6489_v30, 16 }
 0x429   :  { %9613 = vmatmul.msk.bf16.gmra.mxu0 %vm1772_vm5, %v8150_v10  ;;  %v8455_v22 = vadd.f32 %v8334_v40, %v7673_v61  ;;  %9355 = vmatmul.msk.bf16.gmra.mxu1 %vm1772_vm5, %v5516_v51  ;;  %v5822_v10 = vadd.f32 %v5704_v36, %v12481_v5  ;;  %v7073_v40 = vrot.slane %v7072_v48, 4  ;;  %v11894_v51 = vld [vmem:[#allocation2 + $0x154] sm:$0xf]  ;;  %v5517_v59 = vpack.c.b16 %v5477_v1, %v5476_v28  ;;  %v11917_v48 = vld [vmem:[#allocation2 + $0x158] sm:$0x1] }
 0x42a   :  { %v6260_v37 = vpop.f32.mrf.mxu2  ;;  %v7093_v61 = vshll.u32 %v6489_v30, 16  ;;  %v7099_v18 = vshll.u32 %v11894_v51, 16  ;;  %v7103_v35 = vshrl.u32 %v11894_v51, 16  ;;  %v7088_v47 = vsel %vm9938_vm6, %v7083_v11, %v7087_v63 }
 0x42b   :  { %v8523_v46 = vadd.f32 %v11625_v16, %v8455_v22  ;;  %v6380_v58 = vadd.f32 %v6260_v37, %v5821_v9  ;;  %v7078_v56 = vsel %vm9938_vm6, %v7073_v40, %v11874_v8  ;;  %v7092_v41 = vrot.slane %v7090_v54, 4 }
 0x42c   :  { %v11914_v8 = vrot.slane %v7099_v18, 5  ;;  %v7105_v12 = vrot.slane %v7103_v35, 4  ;;  %v6492_v18 = vld [vmem:[#allocation2 + $0x15c] sm:$0xf] }
 0x42d   :  { %vm8587_vm3 = vcmp.ge.f32.partialorder %v8523_v46, 0.0  ;;  %v8651_v13 = vmul.f32 0.01, %v8523_v46 }
 0x42e   :  { %v8336_v62 = vpop.f32.mrf.mxu0  ;;  %v7554_v25 = vpop.f32.mrf.mxu3  ;;  %v7106_v1 = vor.u32 %v7105_v12, %v11914_v8 }
 0x42f   :  { %9516 = vmatmul.msk.bf16.gmra.mxu2 %vm1772_vm5, %v9710_v20  ;;  %v5706_v55 = vpop.f32.mrf.mxu1  ;;  %v8715_v57 = vsel %vm8587_vm3, %v8523_v46, %v8651_v13  ;;  %v7674_v2 = vadd.f32 %v7554_v25, %v6380_v58  ;;  %v8005_v20 = vrot.slane %v11880_v23, 5  ;;  %v7095_v58 = vrot.slane %v7093_v61, 5  ;;  %v9834_v13 = vld [vmem:[#allocation2 + $0x14c] sm:$0x1] }
 0x430   :  { %8780 = vst.msk [vmem:[%s12379_s5 + $0xd0] sm:$0xff] %vm8753_vm11, %v8715_v57  ;;  %v5823_v45 = vadd.f32 %v5706_v55, %v12482_v33  ;;  %v7329_v23 = vunpack.c.l.b16 %v7078_v56  ;;  %v8003_v55 = vsel %vm10330_vm9, %v9582_v29, %v8002_v0  ;;  %v7107_v0 = vrot.slane %v7106_v1, 4  ;;  %v9836_v56 = vld [vmem:[#allocation2 + $0x154] sm:$0xf] }
 0x431   :  { %v8456_v42 = vadd.f32 %v8336_v62, %v7674_v2  ;;  %v5377_v62 = vrot.slane %v9834_v13, 5  ;;  %v8006_v27 = vsel %vm10330_vm9, %v8004_v7, %v8005_v20  ;;  %v7096_v26 = vor.u32 %v7095_v58, %v7092_v41  ;;  %v5101_v41 = vld [vmem:[#allocation2 + $0x150] sm:$0xe] }
 0x432   :  { %v6263_v15 = vpop.f32.mrf.mxu2  ;;  %v8111_v30 = vunpack.c.l.b16 %v8003_v55  ;;  %v8112_v40 = vunpack.c.l.b16 %v8006_v27  ;;  %v7127_v58 = vshrl.u32 %v11943_v39, 16  ;;  %v8012_v13 = vrot.slane %v11917_v48, 5  ;;  %v9712_v55 = vld [vmem:[#allocation2 + $0x150] sm:$0xff] }
 0x433   :  { %v8524_v60 = vadd.f32 %v11625_v16, %v8456_v42  ;;  %9549 = vmatmul.msk.bf16.gmra.mxu3 %vm1772_vm5, %v7369_v6  ;;  %v6381_v44 = vadd.f32 %v6263_v15, %v5822_v10  ;;  %v7330_v6 = vunpack.c.l.b16 %v7088_v47  ;;  %v5378_v28 = vsel %vm10330_vm9, %v5376_v43, %v5377_v62 }
 0x434   :  { %v7109_v42 = vshll.u32 %v11917_v48, 16  ;;  %v7097_v38 = vrot.slane %v7096_v26, 4  ;;  %v5381_v47 = vrot.slane %v9836_v56, 5 }
 0x435   :  { %vm8588_vm4 = vcmp.ge.f32.partialorder %v8524_v60, 0.0  ;;  %v8652_v36 = vmul.f32 0.01, %v8524_v60  ;;  %v7370_v15 = vpack.c.b16 %v7330_v6, %v7329_v23  ;;  %v9837_v23 = vld [vmem:[#allocation2 + $0x158] sm:$0x1] }
 0x436   :  { %v8339_v19 = vpop.f32.mrf.mxu0  ;;  %v7557_v52 = vpop.f32.mrf.mxu3  ;;  %v7111_v54 = vrot.slane %v7109_v42, 5  ;;  %v7102_v7 = vsel %vm9938_vm6, %v7097_v38, %v11914_v8  ;;  %v12484_v8 = vld [vmem:[#allocation40_spill] sm:$0xff]  ;;  %v5384_v6 = vrot.slane %v9837_v23, 5  ;;  %v11967_v42 = vld [vmem:[#allocation2 + $0x164] sm:$0x1] }
 0x437   :  { %v5709_v9 = vpop.f32.mrf.mxu1  ;;  %v8716_v22 = vsel %vm8588_vm4, %v8524_v60, %v8652_v36  ;;  %v7675_v37 = vadd.f32 %v7557_v52, %v6381_v44  ;;  %v12483_v44 = vld [vmem:[#allocation39_spill] sm:$0xff]  ;;  %v11938_v36 = vld [vmem:[%s12378_s4] ss:$0 sm:$0xff]  ;;  %v8152_v52 = vpack.c.b16 %v8112_v40, %v8111_v30  ;;  %v7133_v38 = vshll.u32 %v11967_v42, 16 }
 0x438   :  { %8781 = vst.msk [vmem:[%s12379_s5 + $0xd8] sm:$0xff] %vm8753_vm11, %v8716_v22  ;;  %v5824_v11 = vadd.f32 %v5709_v9, %v12483_v44  ;;  %v8009_v9 = vrot.slane %v11894_v51, 5  ;;  %v7112_v20 = vsel %vm9938_vm6, %v7107_v0, %v7111_v54  ;;  %v7114_v51 = vshrl.u32 %v6492_v18, 16 }
 0x439   :  { %9614 = vmatmul.msk.bf16.gmra.mxu0 %vm1772_vm5, %v8151_v53  ;;  %v8457_v34 = vadd.f32 %v8339_v19, %v7675_v37  ;;  %9356 = vmatmul.msk.bf16.gmra.mxu1 %vm1772_vm5, %v5517_v59  ;;  %v5479_v59 = vunpack.c.l.b16 %v5378_v28  ;;  %v7735_v37 = vld [vmem:[#allocation2 + $0x150] sm:$0xe]  ;;  %v7129_v28 = vrot.slane %v7127_v58, 4 }
 0x43a   :  { %v6265_v46 = vpop.f32.mrf.mxu2  ;;  %v8011_v43 = vrot.slane %v8009_v9, 4  ;;  %v7116_v27 = vrot.slane %v7114_v51, 4  ;;  %v7736_v51 = vld [vmem:[#allocation2 + $0x15c] sm:$0xe] }
 0x43b   :  { %v8525_v32 = vadd.f32 %v11625_v16, %v8457_v34  ;;  %v6382_v25 = vadd.f32 %v6265_v46, %v5823_v45  ;;  %v5375_v16 = vsel %vm10330_vm9, %v9324_v4, %v5374_v3  ;;  %v7117_v34 = vshll.u32 %v6492_v18, 16 }
 0x43c   :  { %v5478_v53 = vunpack.c.l.b16 %v5375_v16  ;;  %v7123_v46 = vshll.u32 %v11943_v39, 16  ;;  %v9583_v4 = vrot.slane %v7735_v37, 9  ;;  %v8013_v1 = vsel %vm10330_vm9, %v8011_v43, %v8012_v13  ;;  %v11981_v37 = vld [vmem:[#allocation2 + $0x16c] sm:$0xf] }
 0x43d   :  { %vm8589_vm7 = vcmp.ge.f32.partialorder %v8525_v32, 0.0  ;;  %v8653_v57 = vmul.f32 0.01, %v8525_v32  ;;  %v7119_v26 = vrot.slane %v7117_v34, 5  ;;  %v8114_v54 = vunpack.c.l.b16 %v8013_v1 }
 0x43e   :  { %v8341_v2 = vpop.f32.mrf.mxu0  ;;  %v7559_v14 = vpop.f32.mrf.mxu3  ;;  %v5518_v22 = vpack.c.b16 %v5479_v59, %v5478_v53  ;;  %v11961_v16 = vrot.slane %v7123_v46, 5  ;;  %v8010_v48 = vsel %vm10330_vm9, %v9583_v4, %v8009_v9  ;;  %v8016_v34 = vrot.slane %v11943_v39, 5  ;;  %v9838_v4 = vld [vmem:[#allocation2 + $0x160] sm:$0xf] }
 0x43f   :  { %9517 = vmatmul.msk.bf16.gmra.mxu2 %vm1772_vm5, %v9711_v21  ;;  %v5711_v17 = vpop.f32.mrf.mxu1  ;;  %v8717_v5 = vsel %vm8589_vm7, %v8525_v32, %v8653_v57  ;;  %v7676_v10 = vadd.f32 %v7559_v14, %v6382_v25  ;;  %v9325_v32 = vrot.slane %v5101_v41, 9  ;;  %v5383_v25 = vrot.slane %v5381_v47, 4 }
 0x440   :  { %8782 = vst.msk [vmem:[%s12379_s5 + $0xe0] sm:$0xff] %vm8753_vm11, %v8717_v5  ;;  %v5825_v21 = vadd.f32 %v5711_v17, %v12484_v8  ;;  %v7331_v57 = vunpack.c.l.b16 %v7102_v7  ;;  %v7130_v59 = vor.u32 %v7129_v28, %v11961_v16  ;;  %v8113_v0 = vunpack.c.l.b16 %v8010_v48  ;;  %v9713_v28 = vld [vmem:[#allocation2 + $0x15c] sm:$0xff] }
 0x441   :  { %v8458_v60 = vadd.f32 %v8341_v2, %v7676_v10  ;;  %v7332_v2 = vunpack.c.l.b16 %v7112_v20  ;;  %v5385_v30 = vsel %vm10330_vm9, %v5383_v25, %v5384_v6  ;;  %v7135_v7 = vrot.slane %v7133_v38, 5  ;;  %v5102_v25 = vld [vmem:[#allocation2 + $0x15c] sm:$0xe] }
 0x442   :  { %v6268_v63 = vpop.f32.mrf.mxu2  ;;  %v8153_v20 = vpack.c.b16 %v8114_v54, %v8113_v0  ;;  %v7147_v58 = vshll.u32 %v11981_v37, 16  ;;  %v5388_v43 = vrot.slane %v9838_v4, 5  ;;  %v7151_v13 = vshrl.u32 %v11981_v37, 16  ;;  %v7737_v4 = vld [vmem:[#allocation2 + $0x168] sm:$0xe] }
 0x443   :  { %v8526_v19 = vadd.f32 %v11938_v36, %v8458_v60  ;;  %9550 = vmatmul.msk.bf16.gmra.mxu3 %vm1772_vm5, %v7370_v15  ;;  %v6383_v61 = vadd.f32 %v6268_v63, %v5824_v11  ;;  %v5382_v15 = vsel %vm10330_vm9, %v9325_v32, %v5381_v47  ;;  %v7371_v60 = vpack.c.b16 %v7332_v2, %v7331_v57 }
 0x444   :  { %v7120_v11 = vor.u32 %v7119_v26, %v7116_v27  ;;  %v9584_v23 = vrot.slane %v7736_v51, 9  ;;  %v8018_v6 = vrot.slane %v8016_v34, 4  ;;  %v12486_v27 = vld [vmem:[#allocation8_spill] sm:$0xff]  ;;  %v9326_v48 = vrot.slane %v5102_v25, 9 }
 0x445   :  { %vm8590_vm8 = vcmp.ge.f32.partialorder %v8526_v19, 0.0  ;;  %v8654_v3 = vmul.f32 0.01, %v8526_v19  ;;  %v5390_v1 = vrot.slane %v5388_v43, 4 }
 0x446   :  { %v8344_v35 = vpop.f32.mrf.mxu0  ;;  %v7562_v24 = vpop.f32.mrf.mxu3 }
 0x447   :  { %v5714_v29 = vpop.f32.mrf.mxu1  ;;  %v8718_v33 = vsel %vm8590_vm8, %v8526_v19, %v8654_v3  ;;  %v7677_v45 = vadd.f32 %v7562_v24, %v6383_v61  ;;  %v5480_v19 = vunpack.c.l.b16 %v5382_v15  ;;  %v5481_v61 = vunpack.c.l.b16 %v5385_v30 }
 0x448   :  { %8783 = vst.msk [vmem:[%s12379_s5 + $0xe8] sm:$0xff] %vm8753_vm11, %v8718_v33  ;;  %v7131_v24 = vrot.slane %v7130_v59, 4  ;;  %v7153_v15 = vrot.slane %v7151_v13, 4 }
 0x449   :  { %9615 = vmatmul.msk.bf16.gmra.mxu0 %vm1772_vm5, %v8152_v52  ;;  %v8459_v62 = vadd.f32 %v8344_v35, %v7677_v45  ;;  %9357 = vmatmul.msk.bf16.gmra.mxu1 %vm1772_vm5, %v5518_v22  ;;  %v12485_v52 = vld [vmem:[#allocation41_spill] sm:$0xff]  ;;  %v6495_v35 = vld [vmem:[#allocation2 + $0x168] sm:$0xf]  ;;  %v7121_v22 = vrot.slane %v7120_v11, 4  ;;  %v5519_v41 = vpack.c.b16 %v5481_v61, %v5480_v19  ;;  %v12004_v11 = vld [vmem:[#allocation2 + $0x170] sm:$0x1]  ;;  %v5389_v19 = vsel %vm10330_vm9, %v9326_v48, %v5388_v43 }
 0x44a   :  { %v6270_v12 = vpop.f32.mrf.mxu2  ;;  %v5826_v9 = vadd.f32 %v5714_v29, %v12485_v52  ;;  %v7138_v33 = vshrl.u32 %v6495_v35, 16  ;;  %v7141_v46 = vshll.u32 %v6495_v35, 16  ;;  %v7136_v39 = vsel %vm9938_vm6, %v7131_v24, %v7135_v7  ;;  %v12487_v7 = vld [vmem:[#allocation10_spill] sm:$0xff] }
 0x44b   :  { %v8527_v14 = vadd.f32 %v11938_v36, %v8459_v62  ;;  %v6384_v17 = vadd.f32 %v6270_v12, %v5825_v21  ;;  %v7126_v32 = vsel %vm9938_vm6, %v7121_v22, %v11961_v16  ;;  %v12001_v16 = vrot.slane %v7147_v58, 5 }
 0x44c   :  { %v7140_v57 = vrot.slane %v7138_v33, 4  ;;  %v7157_v52 = vshll.u32 %v12004_v11, 16  ;;  %v5482_v51 = vunpack.c.l.b16 %v5389_v19  ;;  %v12022_v33 = vld [vmem:[#allocation2 + $0x178] sm:$0xf]  ;;  %v9841_v19 = vld [vmem:[#allocation2 + $0x170] sm:$0x1] }
 0x44d   :  { %vm8591_vm10 = vcmp.ge.f32.partialorder %v8527_v14, 0.0  ;;  %v8655_v5 = vmul.f32 0.01, %v8527_v14 }
 0x44e   :  { %v8346_v10 = vpop.f32.mrf.mxu0  ;;  %v7564_v40 = vpop.f32.mrf.mxu3 }
 0x44f   :  { %9518 = vmatmul.msk.bf16.gmra.mxu2 %vm1772_vm5, %v9712_v55  ;;  %v5716_v44 = vpop.f32.mrf.mxu1  ;;  %v8719_v63 = vsel %vm8591_vm10, %v8527_v14, %v8655_v5  ;;  %v7678_v53 = vadd.f32 %v7564_v40, %v6384_v17  ;;  %v8019_v55 = vrot.slane %v11967_v42, 5  ;;  %v7143_v17 = vrot.slane %v7141_v46, 5  ;;  %v9839_v5 = vld [vmem:[#allocation2 + $0x164] sm:$0x1] }
 0x450   :  { %8784 = vst.msk [vmem:[%s12379_s5 + $0xf0] sm:$0xff] %vm8753_vm11, %v8719_v63  ;;  %v5827_v26 = vadd.f32 %v5716_v44, %v12486_v27  ;;  %v7333_v42 = vunpack.c.l.b16 %v7126_v32  ;;  %v8017_v44 = vsel %vm10330_vm9, %v9584_v23, %v8016_v34  ;;  %v7159_v46 = vrot.slane %v7157_v52, 5 }
 0x451   :  { %v8460_v18 = vadd.f32 %v8346_v10, %v7678_v53  ;;  %v5391_v10 = vrot.slane %v9839_v5, 5  ;;  %v8020_v59 = vsel %vm10330_vm9, %v8018_v6, %v8019_v55  ;;  %v7144_v38 = vor.u32 %v7143_v17, %v7140_v57 }
 0x452   :  { %v6273_v3 = vpop.f32.mrf.mxu2  ;;  %v8115_v22 = vunpack.c.l.b16 %v8017_v44  ;;  %v7175_v32 = vshrl.u32 %v12022_v33, 16  ;;  %v9585_v27 = vrot.slane %v7737_v4, 9  ;;  %v8030_v4 = vrot.slane %v12022_v33, 5 }
 0x453   :  { %v8528_v56 = vadd.f32 %v11938_v36, %v8460_v18  ;;  %9551 = vmatmul.msk.bf16.gmra.mxu3 %vm1772_vm5, %v7371_v60  ;;  %v6385_v47 = vadd.f32 %v6273_v3, %v5826_v9  ;;  %v7334_v60 = vunpack.c.l.b16 %v7136_v39  ;;  %v5392_v61 = vsel %vm10330_vm9, %v5390_v1, %v5391_v10 }
 0x454   :  { %v7154_v18 = vor.u32 %v7153_v15, %v12001_v16  ;;  %v5483_v34 = vunpack.c.l.b16 %v5392_v61  ;;  %v7177_v15 = vrot.slane %v7175_v32, 4  ;;  %v5398_v61 = vrot.slane %v9841_v19, 5 }
 0x455   :  { %vm8592_vm12 = vcmp.ge.f32.partialorder %v8528_v56, 0.0  ;;  %v8656_v29 = vmul.f32 0.01, %v8528_v56  ;;  %v7372_v35 = vpack.c.b16 %v7334_v60, %v7333_v42 }
 0x456   :  { %v8349_v45 = vpop.f32.mrf.mxu0  ;;  %v7567_v8 = vpop.f32.mrf.mxu3  ;;  %v5520_v23 = vpack.c.b16 %v5483_v34, %v5482_v51 }
 0x457   :  { %v5719_v21 = vpop.f32.mrf.mxu1  ;;  %v8720_v62 = vsel %vm8592_vm12, %v8528_v56, %v8656_v29  ;;  %v7679_v12 = vadd.f32 %v7567_v8, %v6385_v47  ;;  %v8116_v56 = vunpack.c.l.b16 %v8020_v59  ;;  %v6498_v47 = vld [vmem:[#allocation2 + $0x174] sm:$0xf]  ;;  %v7145_v29 = vrot.slane %v7144_v38, 4 }
 0x458   :  { %8785 = vst.msk [vmem:[%s12379_s5 + $0xf8] sm:$0xff] %vm8753_vm11, %v8720_v62  ;;  %v7162_v43 = vshrl.u32 %v6498_v47, 16  ;;  %v7165_v13 = vshll.u32 %v6498_v47, 16 }
 0x459   :  { %9616 = vmatmul.msk.bf16.gmra.mxu0 %vm1772_vm5, %v8153_v20  ;;  %v8461_v2 = vadd.f32 %v8349_v45, %v7679_v12  ;;  %9358 = vmatmul.msk.bf16.gmra.mxu1 %vm1772_vm5, %v5519_v41  ;;  %v5828_v20 = vadd.f32 %v5719_v21, %v12487_v7  ;;  %v7155_v45 = vrot.slane %v7154_v18, 4  ;;  %v8154_v62 = vpack.c.b16 %v8116_v56, %v8115_v22 }
 0x45a   :  { %v6275_v14 = vpop.f32.mrf.mxu2  ;;  %v8023_v12 = vrot.slane %v11981_v37, 5  ;;  %v7171_v21 = vshll.u32 %v12022_v33, 16  ;;  %v7150_v57 = vsel %vm9938_vm6, %v7145_v29, %v12001_v16  ;;  %v7164_v48 = vrot.slane %v7162_v43, 4 }
 0x45b   :  { %v8529_v30 = vadd.f32 %v11938_v36, %v8461_v2  ;;  %v6386_v40 = vadd.f32 %v6275_v14, %v5827_v26  ;;  %v7160_v2 = vsel %vm9938_vm6, %v7155_v45, %v7159_v46  ;;  %v9840_v26 = vld [vmem:[#allocation2 + $0x16c] sm:$0xf]  ;;  %v7167_v1 = vrot.slane %v7165_v13, 5  ;;  %v12489_v13 = vld [vmem:[#allocation14_spill] sm:$0xff] }
 0x45c   :  { %v5395_v37 = vrot.slane %v9840_v26, 5  ;;  %v8025_v5 = vrot.slane %v8023_v12, 4  ;;  %v8026_v16 = vrot.slane %v12004_v11, 5  ;;  %v12040_v10 = vrot.slane %v7171_v21, 5 }
 0x45d   :  { %vm8593_vm13 = vcmp.ge.f32.partialorder %v8529_v30, 0.0  ;;  %v8657_v63 = vmul.f32 0.01, %v8529_v30  ;;  %v7335_v44 = vunpack.c.l.b16 %v7150_v57  ;;  %v7336_v59 = vunpack.c.l.b16 %v7160_v2 }
 0x45e   :  { %v8351_v53 = vpop.f32.mrf.mxu0  ;;  %v7569_v0 = vpop.f32.mrf.mxu3  ;;  %v8024_v52 = vsel %vm10330_vm9, %v9585_v27, %v8023_v12 }
 0x45f   :  { %9519 = vmatmul.msk.bf16.gmra.mxu2 %vm1772_vm5, %v9713_v28  ;;  %v5721_v54 = vpop.f32.mrf.mxu1  ;;  %v8721_v9 = vsel %vm8593_vm13, %v8529_v30, %v8657_v63  ;;  %v7680_v3 = vadd.f32 %v7569_v0, %v6386_v40  ;;  %v5103_v28 = vld [vmem:[#allocation2 + $0x168] sm:$0xe]  ;;  %v12488_v40 = vld [vmem:[#allocation12_spill] sm:$0xff]  ;;  %v12044_v63 = vld [vmem:[#allocation2 + $0x17c] sm:$0x1]  ;;  %v5397_v0 = vrot.slane %v5395_v37, 4  ;;  %v8117_v7 = vunpack.c.l.b16 %v8024_v52 }
 0x460   :  { %8786 = vst.msk [vmem:[%s12379_s5 + $0x100] sm:$0xff] %vm8753_vm11, %v8721_v9  ;;  %v5829_v42 = vadd.f32 %v5721_v54, %v12488_v40  ;;  %v9327_v38 = vrot.slane %v5103_v28, 9  ;;  %v7168_v9 = vor.u32 %v7167_v1, %v7164_v48  ;;  %v8027_v54 = vsel %vm10330_vm9, %v8025_v5, %v8026_v16  ;;  %v9842_v16 = vld [vmem:[#allocation2 + $0x178] sm:$0xf] }
 0x461   :  { %v8462_v24 = vadd.f32 %v8351_v53, %v7680_v3  ;;  %v9714_v53 = vld [vmem:[#allocation2 + $0x168] sm:$0xff]  ;;  %v7178_v3 = vor.u32 %v7177_v15, %v12040_v10  ;;  %v5399_v51 = vsel %vm10330_vm9, %v5397_v0, %v5398_v61  ;;  %v8118_v45 = vunpack.c.l.b16 %v8027_v54  ;;  %v12490_v0 = vld [vmem:[#allocation16_spill] sm:$0xff] }
 0x462   :  { %v6278_v41 = vpop.f32.mrf.mxu2  ;;  %v7169_v46 = vrot.slane %v7168_v9, 4  ;;  %v5485_v32 = vunpack.c.l.b16 %v5399_v51  ;;  %v8033_v26 = vrot.slane %v12044_v63, 5  ;;  %v5402_v15 = vrot.slane %v9842_v16, 5  ;;  %v9715_v52 = vld [vmem:[#allocation2 + $0x174] sm:$0xff] }
 0x463   :  { %v8530_v58 = vadd.f32 %v11938_v36, %v8462_v24  ;;  %9552 = vmatmul.msk.bf16.gmra.mxu3 %vm1772_vm5, %v7372_v35  ;;  %v6387_v8 = vadd.f32 %v6278_v41, %v5828_v20  ;;  %v7181_v35 = vshll.u32 %v12044_v63, 16  ;;  %v7373_v24 = vpack.c.b16 %v7336_v59, %v7335_v44 }
 0x464   :  { %v5396_v41 = vsel %vm10330_vm9, %v9327_v38, %v5395_v37  ;;  %v7174_v2 = vsel %vm9938_vm6, %v7169_v46, %v12040_v10  ;;  %v12072_v37 = vld [vmem:[#allocation2 + $0x184] sm:$0xf]  ;;  %v5404_v54 = vrot.slane %v5402_v15, 4 }
 0x465   :  { %vm8594_vm14 = vcmp.ge.f32.partialorder %v8530_v58, 0.0  ;;  %v8658_v39 = vmul.f32 0.01, %v8530_v58  ;;  %v5484_v21 = vunpack.c.l.b16 %v5396_v41  ;;  %v7199_v44 = vshrl.u32 %v12072_v37, 16 }
 0x466   :  { %v8354_v25 = vpop.f32.mrf.mxu0  ;;  %v7572_v6 = vpop.f32.mrf.mxu3  ;;  %v7337_v63 = vunpack.c.l.b16 %v7174_v2  ;;  %v6504_v2 = vld [vmem:[#allocation2 + $0x18c] sm:$0xf] }
 0x467   :  { %v5724_v55 = vpop.f32.mrf.mxu1  ;;  %v8722_v14 = vsel %vm8594_vm14, %v8530_v58, %v8658_v39  ;;  %v7681_v17 = vadd.f32 %v7572_v6, %v6387_v8  ;;  %v7179_v58 = vrot.slane %v7178_v3, 4  ;;  %v7183_v8 = vrot.slane %v7181_v35, 5  ;;  %v7738_v39 = vld [vmem:[#allocation2 + $0x174] sm:$0xe]  ;;  %v9843_v3 = vld [vmem:[#allocation2 + $0x17c] sm:$0x1] }
 0x468   :  { %8787 = vst.msk [vmem:[%s12379_s5 + $0x108] sm:$0xff] %vm8753_vm11, %v8722_v14  ;;  %v8155_v6 = vpack.c.b16 %v8118_v45, %v8117_v7  ;;  %v9586_v27 = vrot.slane %v7738_v39, 9  ;;  %v5521_v28 = vpack.c.b16 %v5485_v32, %v5484_v21  ;;  %v5405_v35 = vrot.slane %v9843_v3, 5  ;;  %v12491_v39 = vld [vmem:[#allocation18_spill] sm:$0xff] }
 0x469   :  { %9617 = vmatmul.msk.bf16.gmra.mxu0 %vm1772_vm5, %v8154_v62  ;;  %v8463_v30 = vadd.f32 %v8354_v25, %v7681_v17  ;;  %9359 = vmatmul.msk.bf16.gmra.mxu1 %vm1772_vm5, %v5520_v23  ;;  %v5830_v62 = vadd.f32 %v5724_v55, %v12489_v13  ;;  %v6501_v25 = vld [vmem:[#allocation2 + $0x180] sm:$0xf]  ;;  %v7184_v33 = vsel %vm9938_vm6, %v7179_v58, %v7183_v8  ;;  %v8032_v55 = vrot.slane %v8030_v4, 4 }
 0x46a   :  { %v6280_v60 = vpop.f32.mrf.mxu2  ;;  %v7186_v48 = vshrl.u32 %v6501_v25, 16  ;;  %v8031_v59 = vsel %vm10330_vm9, %v9586_v27, %v8030_v4  ;;  %v7201_v7 = vrot.slane %v7199_v44, 4  ;;  %v5406_v4 = vsel %vm10330_vm9, %v5404_v54, %v5405_v35  ;;  %v8845_v54 = vld [vmem:[%s12376_s2 + $0x1a4] sm:$0xff]   ;;  %v12492_v35 = vld [vmem:[#allocation20_spill] sm:$0xff] }
 0x46b   :  { %v8531_v11 = vadd.f32 %v11938_v36, %v8463_v30  ;;  %v6388_v18 = vadd.f32 %v6280_v60, %v5829_v42  ;;  %v7189_v30 = vshll.u32 %v6501_v25, 16  ;;  %v5104_v42 = vld [vmem:[#allocation2 + $0x174] sm:$0xe]  ;;  %v7195_v60 = vshll.u32 %v12072_v37, 16  ;;  %532 = vst [vmem:[#allocation5 + $0xc] sm:$0xff] %v8845_v54  }
 0x46c   :  { %v9328_v9 = vrot.slane %v5104_v42, 9  ;;  %v7213_v16 = vshll.u32 %v6504_v2, 16  ;;  %v8037_v42 = vrot.slane %v12072_v37, 5 }
 0x46d   :  { %vm8595_vm15 = vcmp.ge.f32.partialorder %v8531_v11, 0.0  ;;  %v8659_v22 = vmul.f32 0.01, %v8531_v11 }
 0x46e   :  { %v8356_v56 = vpop.f32.mrf.mxu0  ;;  %v7574_v47 = vpop.f32.mrf.mxu3  ;;  %v5403_v8 = vsel %vm10330_vm9, %v9328_v9, %v5402_v15 }
 0x46f   :  { %9520 = vmatmul.msk.bf16.gmra.mxu2 %vm1772_vm5, %v9714_v53  ;;  %v5726_v20 = vpop.f32.mrf.mxu1  ;;  %v8723_v34 = vsel %vm8595_vm15, %v8531_v11, %v8659_v22  ;;  %v7682_v29 = vadd.f32 %v7574_v47, %v6388_v18  ;;  %v7338_v53 = vunpack.c.l.b16 %v7184_v33  ;;  %v8034_v11 = vsel %vm10330_vm9, %v8032_v55, %v8033_v26  ;;  %v12104_v33 = vld [vmem:[#allocation2 + $0x190] sm:$0xf] }
 0x470   :  { %8788 = vst.msk [vmem:[%s12379_s5 + $0x110] sm:$0xff] %vm8753_vm11, %v8723_v34  ;;  %v5831_v19 = vadd.f32 %v5726_v20, %v12490_v0  ;;  %v7188_v18 = vrot.slane %v7186_v48, 4  ;;  %v7191_v22 = vrot.slane %v7189_v30, 5  ;;  %v12090_v20 = vld [vmem:[#allocation2 + $0x188] sm:$0x1]  ;;  %v8120_v46 = vunpack.c.l.b16 %v8034_v11 }
 0x471   :  { %v8464_v43 = vadd.f32 %v8356_v56, %v7682_v29  ;;  %v7374_v34 = vpack.c.b16 %v7338_v53, %v7337_v63  ;;  %v8119_v29 = vunpack.c.l.b16 %v8031_v59  ;;  %v7205_v21 = vshll.u32 %v12090_v20, 16  ;;  %v7739_v48 = vld [vmem:[#allocation2 + $0x180] sm:$0xe]  ;;  %v9844_v53 = vld [vmem:[#allocation2 + $0x184] sm:$0xf] }
 0x472   :  { %v6283_v12 = vpop.f32.mrf.mxu2  ;;  %v7223_v15 = vshrl.u32 %v12104_v33, 16  ;;  %v5409_v59 = vrot.slane %v9844_v53, 5  ;;  %v5105_v11 = vld [vmem:[#allocation2 + $0x180] sm:$0xe] }
 0x473   :  { %v8532_v23 = vadd.f32 %v11938_v36, %v8464_v43  ;;  %9553 = vmatmul.msk.bf16.gmra.mxu3 %vm1772_vm5, %v7373_v24  ;;  %v6389_v57 = vadd.f32 %v6283_v12, %v5830_v62  ;;  %v12088_v24 = vrot.slane %v7195_v60, 5  ;;  %v7192_v43 = vor.u32 %v7191_v22, %v7188_v18 }
 0x474   :  { %v8156_v27 = vpack.c.b16 %v8120_v46, %v8119_v29  ;;  %v7215_v18 = vrot.slane %v7213_v16, 5  ;;  %v7225_v9 = vrot.slane %v7223_v15, 4  ;;  %v9845_v29 = vld [vmem:[#allocation2 + $0x188] sm:$0x1]  ;;  %v12493_v16 = vld [vmem:[#allocation22_spill] sm:$0xff] }
 0x475   :  { %vm8596_vm0 = vcmp.ge.f32.partialorder %v8532_v23, 0.0  ;;  %v8660_v14 = vmul.f32 0.01, %v8532_v23  ;;  %v7202_v12 = vor.u32 %v7201_v7, %v12088_v24  ;;  %v7193_v55 = vrot.slane %v7192_v43, 4  ;;  %v12129_v7 = vld [vmem:[#allocation2 + $0x194] sm:$0x1] }
 0x476   :  { %v8359_v17 = vpop.f32.mrf.mxu0  ;;  %v7577_v1 = vpop.f32.mrf.mxu3 }
 0x477   :  { %v5729_v5 = vpop.f32.mrf.mxu1  ;;  %v8724_v10 = vsel %vm8596_vm0, %v8532_v23, %v8660_v14  ;;  %v7683_v40 = vadd.f32 %v7577_v1, %v6389_v57  ;;  %v5487_v57 = vunpack.c.l.b16 %v5406_v4  ;;  %v7210_v1 = vshrl.u32 %v6504_v2, 16 }
 0x478   :  { %8789 = vst.msk [vmem:[%s12379_s5 + $0x118] sm:$0xff] %vm8753_vm11, %v8724_v10  ;;  %v5832_v25 = vadd.f32 %v5729_v5, %v12491_v39  ;;  %v7219_v5 = vshll.u32 %v12104_v33, 16  ;;  %v7198_v63 = vsel %vm9938_vm6, %v7193_v55, %v12088_v24  ;;  %v8040_v24 = vrot.slane %v12090_v20, 5 }
 0x479   :  { %9618 = vmatmul.msk.bf16.gmra.mxu0 %vm1772_vm5, %v8155_v6  ;;  %v8465_v38 = vadd.f32 %v8359_v17, %v7683_v40  ;;  %9360 = vmatmul.msk.bf16.gmra.mxu1 %vm1772_vm5, %v5521_v28  ;;  %v5486_v6 = vunpack.c.l.b16 %v5403_v8  ;;  %v7203_v17 = vrot.slane %v7202_v12, 4  ;;  %v7207_v28 = vrot.slane %v7205_v21, 5  ;;  %v8847_v12 = vld [vmem:[%s12376_s2 + $0x1ac] sm:$0xf] }
 0x47a   :  { %v6285_v61 = vpop.f32.mrf.mxu2  ;;  %v7212_v37 = vrot.slane %v7210_v1, 4  ;;  %v7339_v4 = vunpack.c.l.b16 %v7198_v63  ;;  %v7229_v20 = vshll.u32 %v12129_v7, 16  ;;  %536 = vst [vmem:[#allocation5 + $0x14] sm:$0xf] %v8847_v12 }
 0x47b   :  { %v8533_v56 = vadd.f32 %v11938_v36, %v8465_v38  ;;  %v6390_v47 = vadd.f32 %v6285_v61, %v5831_v19  ;;  %v5522_v40 = vpack.c.b16 %v5487_v57, %v5486_v6  ;;  %v7208_v19 = vsel %vm9938_vm6, %v7203_v17, %v7207_v28 }
 0x47c   :  { %v9587_v61 = vrot.slane %v7739_v48, 9  ;;  %v7340_v43 = vunpack.c.l.b16 %v7208_v19  ;;  %v7231_v48 = vrot.slane %v7229_v20, 5  ;;  %v8044_v19 = vrot.slane %v12104_v33, 5  ;;  %v9717_v20 = vld [vmem:[#allocation2 + $0x18c] sm:$0xff] }
 0x47d   :  { %vm8597_vm3 = vcmp.ge.f32.partialorder %v8533_v56, 0.0  ;;  %v8661_v41 = vmul.f32 0.01, %v8533_v56 }
 0x47e   :  { %v8361_v51 = vpop.f32.mrf.mxu0  ;;  %v7579_v45 = vpop.f32.mrf.mxu3  ;;  %v7375_v55 = vpack.c.b16 %v7340_v43, %v7339_v4  ;;  %v12494_v4 = vld [vmem:[#allocation24_spill] sm:$0xff] }
 0x47f   :  { %9521 = vmatmul.msk.bf16.gmra.mxu2 %vm1772_vm5, %v9715_v52  ;;  %v5731_v58 = vpop.f32.mrf.mxu1  ;;  %v8725_v13 = vsel %vm8597_vm3, %v8533_v56, %v8661_v41  ;;  %v7684_v62 = vadd.f32 %v7579_v45, %v6390_v47  ;;  %v12121_v52 = vrot.slane %v7219_v5, 5  ;;  %v8039_v47 = vrot.slane %v8037_v42, 4  ;;  %v9716_v41 = vld [vmem:[#allocation2 + $0x180] sm:$0xff] }
 0x480   :  { %8790 = vst.msk [vmem:[%s12379_s5 + $0x120] sm:$0xff] %vm8753_vm11, %v8725_v13  ;;  %v5833_v22 = vadd.f32 %v5731_v58, %v12492_v35  ;;  %v5412_v45 = vrot.slane %v9845_v29, 5  ;;  %v8038_v58 = vsel %vm10330_vm9, %v9587_v61, %v8037_v42  ;;  %v7216_v13 = vor.u32 %v7215_v18, %v7212_v37  ;;  %v6507_v42 = vld [vmem:[#allocation2 + $0x198] sm:$0xf]  ;;  %v12161_v61 = vld [vmem:[#allocation2 + $0x19c] sm:$0xf] }
 0x481   :  { %v8466_v32 = vadd.f32 %v8361_v51, %v7684_v62  ;;  %v9329_v51 = vrot.slane %v5105_v11, 9  ;;  %v7226_v62 = vor.u32 %v7225_v9, %v12121_v52  ;;  %v8041_v39 = vsel %vm10330_vm9, %v8039_v47, %v8040_v24  ;;  %v798_v11 = vld [vmem:[#allocation5 + $0x14] sm:$0x1] }
 0x482   :  { %v6288_v23 = vpop.f32.mrf.mxu2  ;;  %v7217_v17 = vrot.slane %v7216_v13, 4  ;;  %v7234_v54 = vshrl.u32 %v6507_v42, 16  ;;  %805 = vst.msk [vmem:[#allocation2 + $0x1ac] sm:$0x1] %vm685_vm2, %v798_v11  ;;  %v7243_v33 = vshll.u32 %v12161_v61, 16  ;;  %v8047_v13 = vrot.slane %v12129_v7, 5 }
 0x483   :  { %v8534_v26 = vadd.f32 %v11938_v36, %v8466_v32  ;;  %9554 = vmatmul.msk.bf16.gmra.mxu3 %vm1772_vm5, %v7374_v34  ;;  %v6391_v14 = vadd.f32 %v6288_v23, %v5832_v25  ;;  %v5411_v34 = vrot.slane %v5409_v59, 4  ;;  %v5410_v6 = vsel %vm10330_vm9, %v9329_v51, %v5409_v59  ;;  %v7740_v59 = vld [vmem:[#allocation2 + $0x18c] sm:$0xe] }
 0x484   :  { %v7227_v28 = vrot.slane %v7226_v62, 4  ;;  %v7247_v51 = vshrl.u32 %v12161_v61, 16  ;;  %v7236_v62 = vrot.slane %v7234_v54, 4 }
 0x485   :  { %vm8598_vm4 = vcmp.ge.f32.partialorder %v8534_v26, 0.0  ;;  %v8662_v30 = vmul.f32 0.01, %v8534_v26  ;;  %v5413_v57 = vsel %vm10330_vm9, %v5411_v34, %v5412_v45  ;;  %v9588_v45 = vrot.slane %v7740_v59, 9 }
 0x486   :  { %v8364_v10 = vpop.f32.mrf.mxu0  ;;  %v7582_v60 = vpop.f32.mrf.mxu3 }
 0x487   :  { %v5734_v44 = vpop.f32.mrf.mxu1  ;;  %v8726_v38 = vsel %vm8598_vm4, %v8534_v26, %v8662_v30  ;;  %v7685_v0 = vadd.f32 %v7582_v60, %v6391_v14  ;;  %v8121_v26 = vunpack.c.l.b16 %v8038_v58  ;;  %v8122_v14 = vunpack.c.l.b16 %v8041_v39  ;;  %v797_v60 = vld [vmem:[#allocation5 + $0x10] sm:$0xf] }
 0x488   :  { %8791 = vst.msk [vmem:[%s12379_s5 + $0x128] sm:$0xff] %vm8753_vm11, %v8726_v38  ;;  %v5834_v5 = vadd.f32 %v5734_v44, %v12493_v16  ;;  %v5488_v30 = vunpack.c.l.b16 %v5410_v6  ;;  %v7222_v44 = vsel %vm9938_vm6, %v7217_v17, %v12121_v52  ;;  %v7237_v52 = vshll.u32 %v6507_v42, 16 }
 0x489   :  { %9619 = vmatmul.msk.bf16.gmra.mxu0 %vm1772_vm5, %v8156_v27  ;;  %v8467_v3 = vadd.f32 %v8364_v10, %v7685_v0  ;;  %9361 = vmatmul.msk.bf16.gmra.mxu1 %vm1772_vm5, %v5522_v40  ;;  %v5489_v10 = vunpack.c.l.b16 %v5413_v57  ;;  %v796_v40 = vld [vmem:[#allocation5 + $0xc] sm:$0xf]  ;;  %804 = vst.msk [vmem:[#allocation2 + $0x1a8] sm:$0xf] %vm682_vm1, %v797_v60  ;;  %v8157_v38 = vpack.c.b16 %v8122_v14, %v8121_v26  ;;  %v7341_v34 = vunpack.c.l.b16 %v7222_v44 }
 0x48a   :  { %v6290_v56 = vpop.f32.mrf.mxu2  ;;  %803 = vst.msk [vmem:[#allocation2 + $0x1a4] sm:$0xf] %vm682_vm1, %v796_v40  ;;  %v7232_v0 = vsel %vm9938_vm6, %v7227_v28, %v7231_v48  ;;  %v8045_v7 = vsel %vm10330_vm9, %v9588_v45, %v8044_v19 }
 0x48b   :  { %v8535_v46 = vadd.f32 %v11938_v36, %v8467_v3  ;;  %v6392_v8 = vadd.f32 %v6290_v56, %v5833_v22  ;;  %v5523_v9 = vpack.c.b16 %v5489_v10, %v5488_v30  ;;  %v9846_v22 = vld [vmem:[#allocation2 + $0x190] sm:$0xf]  ;;  %v7342_v29 = vunpack.c.l.b16 %v7232_v0 }
 0x48c   :  { %v5416_v56 = vrot.slane %v9846_v22, 5  ;;  %v8123_v42 = vunpack.c.l.b16 %v8045_v7 }
 0x48d   :  { %vm8599_vm7 = vcmp.ge.f32.partialorder %v8535_v46, 0.0  ;;  %v8663_v21 = vmul.f32 0.01, %v8535_v46  ;;  %v7376_v28 = vpack.c.b16 %v7342_v29, %v7341_v34  ;;  %v9848_v34 = vld [vmem:[#allocation2 + $0x19c] sm:$0xf] }
 0x48e   :  { %v8366_v32 = vpop.f32.mrf.mxu0  ;;  %v7584_v25 = vpop.f32.mrf.mxu3  ;;  %v5423_v29 = vrot.slane %v9848_v34, 5 }
 0x48f   :  { %9522 = vmatmul.msk.bf16.gmra.mxu2 %vm1772_vm5, %v9716_v41  ;;  %v5736_v23 = vpop.f32.mrf.mxu1  ;;  %v8727_v2 = vsel %vm8599_vm7, %v8535_v46, %v8663_v21  ;;  %v7686_v27 = vadd.f32 %v7584_v25, %v6392_v8  ;;  %v5106_v41 = vld [vmem:[#allocation2 + $0x18c] sm:$0xe]  ;;  %v8046_v46 = vrot.slane %v8044_v19, 4  ;;  %v5418_v21 = vrot.slane %v5416_v56, 4 }
 0x490   :  { %8792 = vst.msk [vmem:[%s12379_s5 + $0x130] sm:$0xff] %vm8753_vm11, %v8727_v2  ;;  %v5835_v43 = vadd.f32 %v5736_v23, %v12494_v4  ;;  %v9330_v12 = vrot.slane %v5106_v41, 9  ;;  %v7239_v25 = vrot.slane %v7237_v52, 5  ;;  %v12175_v2 = vrot.slane %v7243_v33, 5 }
 0x491   :  { %v8468_v1 = vadd.f32 %v8366_v32, %v7686_v27  ;;  %v9847_v32 = vld [vmem:[#allocation2 + $0x194] sm:$0x1]  ;;  %v7249_v27 = vrot.slane %v7247_v51, 4  ;;  %v8048_v14 = vsel %vm10330_vm9, %v8046_v46, %v8047_v13  ;;  %v6510_v22 = vld [vmem:[#allocation2 + $0x1a4] sm:$0xf] }
 0x492   :  { %v6293_v15 = vpop.f32.mrf.mxu2  ;;  %v5419_v39 = vrot.slane %v9847_v32, 5  ;;  %v8124_v60 = vunpack.c.l.b16 %v8048_v14 }
 0x493   :  { %v8536_v63 = vadd.f32 %v11938_v36, %v8468_v1  ;;  %9555 = vmatmul.msk.bf16.gmra.mxu3 %vm1772_vm5, %v7375_v55  ;;  %v6393_v53 = vadd.f32 %v6293_v15, %v5834_v5  ;;  %v12177_v55 = vld [vmem:[#allocation2 + $0x1a0] sm:$0x1]  ;;  %v5417_v1 = vsel %vm10330_vm9, %v9330_v12, %v5416_v56  ;;  %v7240_v5 = vor.u32 %v7239_v25, %v7236_v62  ;;  %v12496_v12 = vld [vmem:[#allocation28_spill] sm:$0xff] }
 0x494   :  { %v5420_v16 = vsel %vm10330_vm9, %v5418_v21, %v5419_v39  ;;  %v7250_v10 = vor.u32 %v7249_v27, %v12175_v2  ;;  %v7253_v40 = vshll.u32 %v12177_v55, 16  ;;  %v5490_v44 = vunpack.c.l.b16 %v5417_v1 }
 0x495   :  { %vm8600_vm8 = vcmp.ge.f32.partialorder %v8536_v63, 0.0  ;;  %v8664_v37 = vmul.f32 0.01, %v8536_v63  ;;  %v5491_v0 = vunpack.c.l.b16 %v5420_v16  ;;  %v7241_v19 = vrot.slane %v7240_v5, 4 }
 0x496   :  { %v8369_v18 = vpop.f32.mrf.mxu0  ;;  %v7587_v3 = vpop.f32.mrf.mxu3  ;;  %v8158_v54 = vpack.c.b16 %v8124_v60, %v8123_v42  ;;  %v8054_v25 = vrot.slane %v12177_v55, 5  ;;  %v5425_v27 = vrot.slane %v5423_v29, 4 }
 0x497   :  { %v5739_v35 = vpop.f32.mrf.mxu1  ;;  %v8728_v47 = vsel %vm8600_vm8, %v8536_v63, %v8664_v37  ;;  %v7687_v24 = vadd.f32 %v7587_v3, %v6393_v53  ;;  %v12495_v53 = vld [vmem:[#allocation26_spill] sm:$0xff]  ;;  %v7741_v3 = vld [vmem:[#allocation2 + $0x198] sm:$0xe]  ;;  %v7246_v51 = vsel %vm9938_vm6, %v7241_v19, %v12175_v2 }
 0x498   :  { %8793 = vst.msk [vmem:[%s12379_s5 + $0x138] sm:$0xff] %vm8753_vm11, %v8728_v47  ;;  %v5836_v59 = vadd.f32 %v5739_v35, %v12495_v53  ;;  %v5524_v47 = vpack.c.b16 %v5491_v0, %v5490_v44  ;;  %v8051_v35 = vrot.slane %v12161_v61, 5  ;;  %v9589_v4 = vrot.slane %v7741_v3, 9 }
 0x499   :  { %9620 = vmatmul.msk.bf16.gmra.mxu0 %vm1772_vm5, %v8157_v38  ;;  %v8469_v8 = vadd.f32 %v8369_v18, %v7687_v24  ;;  %9362 = vmatmul.msk.bf16.gmra.mxu1 %vm1772_vm5, %v5523_v9  ;;  %v7251_v18 = vrot.slane %v7250_v10, 4  ;;  %v7255_v9 = vrot.slane %v7253_v40, 5  ;;  %v12198_v24 = vld [vmem:[#allocation2 + $0x1a8] sm:$0xf]  ;;  %v7258_v61 = vshrl.u32 %v6510_v22, 16 }
 0x49a   :  { %v6295_v58 = vpop.f32.mrf.mxu2  ;;  %v7267_v13 = vshll.u32 %v12198_v24, 16  ;;  %v7271_v62 = vshrl.u32 %v12198_v24, 16  ;;  %v8053_v39 = vrot.slane %v8051_v35, 4  ;;  %v6512_v10 = vld [vmem:[#allocation2 + $0x1ac] sm:$0x1] }
 0x49b   :  { %v8537_v6 = vadd.f32 %v11938_v36, %v8469_v8  ;;  %v6394_v57 = vadd.f32 %v6295_v58, %v5835_v43  ;;  %v7256_v8 = vsel %vm9938_vm6, %v7251_v18, %v7255_v9  ;;  %v5107_v43 = vld [vmem:[#allocation2 + $0x198] sm:$0xe]  ;;  %v7261_v58 = vshll.u32 %v6510_v22, 16  ;;  %v12497_v18 = vld [vmem:[#allocation30_spill] sm:$0xff] }
 0x49c   :  { %v9331_v2 = vrot.slane %v5107_v43, 9  ;;  %v7269_v16 = vrot.slane %v7267_v13, 5  ;;  %v7273_v5 = vrot.slane %v7271_v62, 4 }
 0x49d   :  { %vm8601_vm1 = vcmp.ge.f32.partialorder %v8537_v6, 0.0  ;;  %v8665_v23 = vmul.f32 0.01, %v8537_v6  ;;  %v7263_v1 = vrot.slane %v7261_v58, 5 }
 0x49e   :  { %v8371_v26 = vpop.f32.mrf.mxu0  ;;  %v7589_v17 = vpop.f32.mrf.mxu3  ;;  %v5424_v42 = vsel %vm10330_vm9, %v9331_v2, %v5423_v29  ;;  %v7274_v19 = vor.u32 %v7273_v5, %v7269_v16 }
 0x49f   :  { %9523 = vmatmul.msk.bf16.gmra.mxu2 %vm1772_vm5, %v9717_v20  ;;  %v5741_v48 = vpop.f32.mrf.mxu1  ;;  %v8729_v15 = vsel %vm8601_vm1, %v8537_v6, %v8665_v23  ;;  %v7688_v30 = vadd.f32 %v7589_v17, %v6394_v57  ;;  %v9718_v6 = vld [vmem:[#allocation2 + $0x198] sm:$0xff]  ;;  %v7343_v57 = vunpack.c.l.b16 %v7246_v51  ;;  %v9849_v23 = vld [vmem:[#allocation2 + $0x1a0] sm:$0x1]  ;;  %v7344_v17 = vunpack.c.l.b16 %v7256_v8 }
 0x4a0   :  { %8794 = vst.msk [vmem:[%s12379_s5 + $0x140] sm:$0xff] %vm8753_vm11, %v8729_v15  ;;  %v5837_v21 = vadd.f32 %v5741_v48, %v12496_v12  ;;  %v7260_v48 = vrot.slane %v7258_v61, 4  ;;  %v5492_v3 = vunpack.c.l.b16 %v5424_v42  ;;  %v7275_v51 = vrot.slane %v7274_v19, 4  ;;  %v12500_v19 = vld [vmem:[#allocation6_spill] sm:$0xff] }
 0x4a1   :  { %v8470_v63 = vadd.f32 %v8371_v26, %v7688_v30  ;;  %v5426_v26 = vrot.slane %v9849_v23, 5  ;;  %v8055_v30 = vsel %vm10330_vm9, %v8053_v39, %v8054_v25  ;;  %v8058_v8 = vrot.slane %v12198_v24, 5  ;;  %v12498_v24 = vld [vmem:[#allocation32_spill] sm:$0xff] }
 0x4a2   :  { %v6298_v38 = vpop.f32.mrf.mxu2  ;;  %v8126_v44 = vunpack.c.l.b16 %v8055_v30  ;;  %v7264_v0 = vor.u32 %v7263_v1, %v7260_v48  ;;  %v8061_v25 = vrot.slane %v6512_v10, 5  ;;  %v12499_v30 = vld [vmem:[#allocation34_spill] sm:$0xff] }
 0x4a3   :  { %v8538_v11 = vadd.f32 %v11938_v36, %v8470_v63  ;;  %9556 = vmatmul.msk.bf16.gmra.mxu3 %vm1772_vm5, %v7376_v28  ;;  %v6395_v37 = vadd.f32 %v6298_v38, %v5836_v59  ;;  %v8052_v28 = vsel %vm10330_vm9, %v9589_v4, %v8051_v35  ;;  %v5427_v60 = vsel %vm10330_vm9, %v5425_v27, %v5426_v26 }
 0x4a4   :  { %v7377_v59 = vpack.c.b16 %v7344_v17, %v7343_v57  ;;  %v8125_v38 = vunpack.c.l.b16 %v8052_v28  ;;  %v5493_v22 = vunpack.c.l.b16 %v5427_v60  ;;  %v8060_v39 = vrot.slane %v8058_v8, 4 }
 0x4a5   :  { %vm8602_vm2 = vcmp.ge.f32.partialorder %v8538_v11, 0.0  ;;  %v8666_v56 = vmul.f32 0.01, %v8538_v11 }
 0x4a6   :  { %v8374_v52 = vpop.f32.mrf.mxu0  ;;  %v7592_v41 = vpop.f32.mrf.mxu3  ;;  %v8159_v35 = vpack.c.b16 %v8126_v44, %v8125_v38 }
 0x4a7   :  { %v5744_v33 = vpop.f32.mrf.mxu1  ;;  %v8730_v45 = vsel %vm8602_vm2, %v8538_v11, %v8666_v56  ;;  %v7689_v46 = vadd.f32 %v7592_v41, %v6395_v37  ;;  %v7277_v11 = vshll.u32 %v6512_v10, 16  ;;  %v12233_v56 = vld [vmem:[%s12378_s4] ss:$0 sm:$0xff]  ;;  %v7265_v41 = vrot.slane %v7264_v0, 4 }
 0x4a8   :  { %8795 = vst.msk [vmem:[%s12379_s5 + $0x148] sm:$0xff] %vm8753_vm11, %v8730_v45  ;;  %v5838_v9 = vadd.f32 %v5744_v33, %v12497_v18  ;;  %v5525_v45 = vpack.c.b16 %v5493_v22, %v5492_v3 }
 0x4a9   :  { %9621 = vmatmul.msk.bf16.gmra.mxu0 %vm1772_vm5, %v8158_v54  ;;  %v8471_v20 = vadd.f32 %v8374_v52, %v7689_v46  ;;  %9363 = vmatmul.msk.bf16.gmra.mxu1 %vm1772_vm5, %v5524_v47  ;;  %v7279_v34 = vrot.slane %v7277_v11, 5  ;;  %v7742_v46 = vld [vmem:[#allocation2 + $0x1a4] sm:$0xe]  ;;  %v7270_v13 = vsel %vm9938_vm6, %v7265_v41, %v7269_v16 }
 0x4aa   :  { %v6300_v32 = vpop.f32.mrf.mxu2  ;;  %v7345_v27 = vunpack.c.l.b16 %v7270_v13 }
 0x4ab   :  { %v8539_v7 = vadd.f32 %v11938_v36, %v8471_v20  ;;  %v6396_v14 = vadd.f32 %v6300_v32, %v5837_v21  ;;  %v7280_v62 = vsel %vm9938_vm6, %v7275_v51, %v7279_v34  ;;  %v9590_v20 = vrot.slane %v7742_v46, 9  ;;  %v12501_v51 = vld [vmem:[#allocation7_spill] sm:$0xff] }
 0x4ac   :  { %v7346_v23 = vunpack.c.l.b16 %v7280_v62  ;;  %v12502_v62 = vld [vmem:[#allocation9_spill] sm:$0xff] }
 0x4ad   :  { %vm8603_vm10 = vcmp.ge.f32.partialorder %v8539_v7, 0.0  ;;  %v8667_v15 = vmul.f32 0.01, %v8539_v7  ;;  %v8059_v50 = vsel %vm10330_vm9, %v9590_v20, %v8058_v8 }
 0x4ae   :  { %v8376_v55 = vpop.f32.mrf.mxu0  ;;  %v7594_v40 = vpop.f32.mrf.mxu3  ;;  %v7378_v16 = vpack.c.b16 %v7346_v23, %v7345_v27  ;;  %v8127_v5 = vunpack.c.l.b16 %v8059_v50  ;;  %v12503_v23 = vld [vmem:[#allocation11_spill] sm:$0xff] }
 0x4af   :  { %9524 = vmatmul.msk.bf16.gmra.mxu2 %vm1772_vm5, %v9718_v6  ;;  %v5746_v36 = vpop.f32.mrf.mxu1  ;;  %v8731_v63 = vsel %vm8603_vm10, %v8539_v7, %v8667_v15  ;;  %v7690_v53 = vadd.f32 %v7594_v40, %v6396_v14  ;;  %v9719_v6 = vld [vmem:[#allocation2 + $0x1a4] sm:$0xff]  ;;  %v8062_v14 = vsel %vm10330_vm9, %v8060_v39, %v8061_v25 }
 0x4b0   :  { %8796 = vst.msk [vmem:[%s12379_s5 + $0x150] sm:$0xff] %vm8753_vm11, %v8731_v63  ;;  %v5839_v21 = vadd.f32 %v5746_v36, %v12498_v24  ;;  %v8128_v15 = vunpack.c.l.b16 %v8062_v14 }
 0x4b1   :  { %v8472_v37 = vadd.f32 %v8376_v55, %v7690_v53 }
 0x4b2   :  { %v6303_v54 = vpop.f32.mrf.mxu2  ;;  %v8160_v42 = vpack.c.b16 %v8128_v15, %v8127_v5 }
 0x4b3   :  { %v8540_v52 = vadd.f32 %v12233_v56, %v8472_v37  ;;  %9557 = vmatmul.msk.bf16.gmra.mxu3 %vm1772_vm5, %v7377_v59  ;;  %v6397_v47 = vadd.f32 %v6303_v54, %v5838_v9 }
 0x4b5   :  { %vm8604_vm12 = vcmp.ge.f32.partialorder %v8540_v52, 0.0  ;;  %v8668_v29 = vmul.f32 0.01, %v8540_v52 }
 0x4b6   :  { %v8379_v33 = vpop.f32.mrf.mxu0  ;;  %v7597_v4 = vpop.f32.mrf.mxu3 }
 0x4b7   :  { %v5749_v43 = vpop.f32.mrf.mxu1  ;;  %v8732_v61 = vsel %vm8604_vm12, %v8540_v52, %v8668_v29  ;;  %v7691_v58 = vadd.f32 %v7597_v4, %v6397_v47 }
 0x4b8   :  { %8797 = vst.msk [vmem:[%s12379_s5 + $0x158] sm:$0xff] %vm8753_vm11, %v8732_v61  ;;  %v5840_v10 = vadd.f32 %v5749_v43, %v12499_v30 }
 0x4b9   :  { %9622 = vmatmul.msk.bf16.gmra.mxu0 %vm1772_vm5, %v8159_v35  ;;  %v8473_v12 = vadd.f32 %v8379_v33, %v7691_v58  ;;  %9364 = vmatmul.msk.bf16.gmra.mxu1 %vm1772_vm5, %v5525_v45 }
 0x4ba   :  { %v6305_v32 = vpop.f32.mrf.mxu2 }
 0x4bb   :  { %v8541_v57 = vadd.f32 %v12233_v56, %v8473_v12  ;;  %v6398_v2 = vadd.f32 %v6305_v32, %v5839_v21 }
 0x4bd   :  { %vm8605_vm13 = vcmp.ge.f32.partialorder %v8541_v57, 0.0  ;;  %v8669_v26 = vmul.f32 0.01, %v8541_v57 }
 0x4be   :  { %v8381_v7 = vpop.f32.mrf.mxu0  ;;  %v7599_v17 = vpop.f32.mrf.mxu3 }
 0x4bf   :  { %9525 = vmatmul.msk.bf16.gmra.mxu2 %vm1772_vm5, %v9719_v6  ;;  %v5751_v28 = vpop.f32.mrf.mxu1  ;;  %v8733_v48 = vsel %vm8605_vm13, %v8541_v57, %v8669_v26  ;;  %v7692_v1 = vadd.f32 %v7599_v17, %v6398_v2 }
 0x4c0   :  { %8798 = vst.msk [vmem:[%s12379_s5 + $0x160] sm:$0xff] %vm8753_vm11, %v8733_v48  ;;  %v5841_v11 = vadd.f32 %v5751_v28, %v12500_v19 }
 0x4c1   :  { %v8474_v55 = vadd.f32 %v8381_v7, %v7692_v1 }
 0x4c2   :  { %v6308_v40 = vpop.f32.mrf.mxu2 }
 0x4c3   :  { %v8542_v49 = vadd.f32 %v12233_v56, %v8474_v55  ;;  %9558 = vmatmul.msk.bf16.gmra.mxu3 %vm1772_vm5, %v7378_v16  ;;  %v6399_v36 = vadd.f32 %v6308_v40, %v5840_v10  ;;  %v12504_v55 = vld [vmem:[#allocation13_spill] sm:$0xff] }
 0x4c5   :  { %vm8606_vm6 = vcmp.ge.f32.partialorder %v8542_v49, 0.0  ;;  %v8670_v60 = vmul.f32 0.01, %v8542_v49 }
 0x4c6   :  { %v8384_v63 = vpop.f32.mrf.mxu0  ;;  %v7602_v53 = vpop.f32.mrf.mxu3 }
 0x4c7   :  { %v5754_v59 = vpop.f32.mrf.mxu1  ;;  %v8734_v38 = vsel %vm8606_vm6, %v8542_v49, %v8670_v60  ;;  %v7693_v44 = vadd.f32 %v7602_v53, %v6399_v36 }
 0x4c8   :  { %8799 = vst.msk [vmem:[%s12379_s5 + $0x168] sm:$0xff] %vm8753_vm11, %v8734_v38  ;;  %v5842_v34 = vadd.f32 %v5754_v59, %v12501_v51 }
 0x4c9   :  { %9623 = vmatmul.msk.bf16.gmra.mxu0 %vm1772_vm5, %v8160_v42  ;;  %v8475_v0 = vadd.f32 %v8384_v63, %v7693_v44  ;;  %v12505_v44 = vld [vmem:[#allocation15_spill] sm:$0xff] }
 0x4ca   :  { %v6310_v37 = vpop.f32.mrf.mxu2 }
 0x4cb   :  { %v8543_v18 = vadd.f32 %v12233_v56, %v8475_v0  ;;  %v6400_v9 = vadd.f32 %v6310_v37, %v5841_v11 }
 0x4cd   :  { %vm8607_vm9 = vcmp.ge.f32.partialorder %v8543_v18, 0.0  ;;  %v8671_v54 = vmul.f32 0.01, %v8543_v18 }
 0x4ce   :  { %v8386_v3 = vpop.f32.mrf.mxu0  ;;  %v7604_v22 = vpop.f32.mrf.mxu3 }
 0x4cf   :  { %v5756_v52 = vpop.f32.mrf.mxu1  ;;  %v8735_v47 = vsel %vm8607_vm9, %v8543_v18, %v8671_v54  ;;  %v7694_v35 = vadd.f32 %v7604_v22, %v6400_v9 }
 0x4d0   :  { %8800 = vst.msk [vmem:[%s12379_s5 + $0x170] sm:$0xff] %vm8753_vm11, %v8735_v47  ;;  %v5843_v20 = vadd.f32 %v5756_v52, %v12502_v62 }
 0x4d1   :  { %v8476_v41 = vadd.f32 %v8386_v3, %v7694_v35  ;;  %v12506_v35 = vld [vmem:[#allocation17_spill] sm:$0xff] }
 0x4d2   :  { %v6313_v29 = vpop.f32.mrf.mxu2 }
 0x4d3   :  { %v8544_v33 = vadd.f32 %v12233_v56, %v8476_v41  ;;  %v6401_v45 = vadd.f32 %v6313_v29, %v5842_v34 }
 0x4d5   :  { %vm8608_vm5 = vcmp.ge.f32.partialorder %v8544_v33, 0.0  ;;  %v8672_v46 = vmul.f32 0.01, %v8544_v33 }
 0x4d6   :  { %v8389_v8 = vpop.f32.mrf.mxu0  ;;  %v7607_v4 = vpop.f32.mrf.mxu3 }
 0x4d7   :  { %v5759_v43 = vpop.f32.mrf.mxu1  ;;  %v8736_v61 = vsel %vm8608_vm5, %v8544_v33, %v8672_v46  ;;  %v7695_v58 = vadd.f32 %v7607_v4, %v6401_v45 }
 0x4d8   :  { %8801 = vst.msk [vmem:[%s12379_s5 + $0x178] sm:$0xff] %vm8753_vm11, %v8736_v61  ;;  %v5844_v26 = vadd.f32 %v5759_v43, %v12503_v23 }
 0x4d9   :  { %v8477_v13 = vadd.f32 %v8389_v8, %v7695_v58  ;;  %v12507_v58 = vld [vmem:[#allocation19_spill] sm:$0xff] }
 0x4da   :  { %v6315_v12 = vpop.f32.mrf.mxu2 }
 0x4db   :  { %v8545_v24 = vadd.f32 %v12233_v56, %v8477_v13  ;;  %v6402_v21 = vadd.f32 %v6315_v12, %v5843_v20 }
 0x4dd   :  { %vm8609_vm14 = vcmp.ge.f32.partialorder %v8545_v24, 0.0  ;;  %v8673_v32 = vmul.f32 0.01, %v8545_v24 }
 0x4de   :  { %v8391_v39 = vpop.f32.mrf.mxu0  ;;  %v7609_v25 = vpop.f32.mrf.mxu3 }
 0x4df   :  { %v5761_v6 = vpop.f32.mrf.mxu1  ;;  %v8737_v57 = vsel %vm8609_vm14, %v8545_v24, %v8673_v32  ;;  %v7696_v2 = vadd.f32 %v7609_v25, %v6402_v21 }
 0x4e0   :  { %8802 = vst.msk [vmem:[%s12379_s5 + $0x180] sm:$0xff] %vm8753_vm11, %v8737_v57  ;;  %v5845_v30 = vadd.f32 %v5761_v6, %v12504_v55 }
 0x4e1   :  { %v8478_v27 = vadd.f32 %v8391_v39, %v7696_v2  ;;  %v12508_v2 = vld [vmem:[#allocation21_spill] sm:$0xff] }
 0x4e2   :  { %v6318_v7 = vpop.f32.mrf.mxu2 }
 0x4e3   :  { %v8546_v50 = vadd.f32 %v12233_v56, %v8478_v27  ;;  %v6403_v14 = vadd.f32 %v6318_v7, %v5844_v26 }
 0x4e5   :  { %vm8610_vm15 = vcmp.ge.f32.partialorder %v8546_v50, 0.0  ;;  %v8674_v17 = vmul.f32 0.01, %v8546_v50 }
 0x4e6   :  { %v8394_v28 = vpop.f32.mrf.mxu0  ;;  %v7612_v48 = vpop.f32.mrf.mxu3 }
 0x4e7   :  { %v5764_v1 = vpop.f32.mrf.mxu1  ;;  %v8738_v16 = vsel %vm8610_vm15, %v8546_v50, %v8674_v17  ;;  %v7697_v5 = vadd.f32 %v7612_v48, %v6403_v14 }
 0x4e8   :  { %8803 = vst.msk [vmem:[%s12379_s5 + $0x188] sm:$0xff] %vm8753_vm11, %v8738_v16  ;;  %v5846_v0 = vadd.f32 %v5764_v1, %v12505_v44 }
 0x4e9   :  { %v8479_v15 = vadd.f32 %v8394_v28, %v7697_v5  ;;  %v12509_v5 = vld [vmem:[#allocation23_spill] sm:$0xff] }
 0x4ea   :  { %v6320_v10 = vpop.f32.mrf.mxu2 }
 0x4eb   :  { %v8547_v40 = vadd.f32 %v12233_v56, %v8479_v15  ;;  %v6404_v49 = vadd.f32 %v6320_v10, %v5845_v30 }
 0x4ed   :  { %vm8611_vm0 = vcmp.ge.f32.partialorder %v8547_v40, 0.0  ;;  %v8675_v36 = vmul.f32 0.01, %v8547_v40 }
 0x4ee   :  { %v8396_v42 = vpop.f32.mrf.mxu0  ;;  %v7614_v60 = vpop.f32.mrf.mxu3 }
 0x4ef   :  { %v5766_v63 = vpop.f32.mrf.mxu1  ;;  %v8739_v53 = vsel %vm8611_vm0, %v8547_v40, %v8675_v36  ;;  %v7698_v59 = vadd.f32 %v7614_v60, %v6404_v49 }
 0x4f0   :  { %8804 = vst.msk [vmem:[%s12379_s5 + $0x190] sm:$0xff] %vm8753_vm11, %v8739_v53  ;;  %v5847_v41 = vadd.f32 %v5766_v63, %v12506_v35 }
 0x4f1   :  { %v8480_v38 = vadd.f32 %v8396_v42, %v7698_v59  ;;  %v12510_v59 = vld [vmem:[#allocation25_spill] sm:$0xff] }
 0x4f2   :  { %v6323_v19 = vpop.f32.mrf.mxu2 }
 0x4f3   :  { %v8548_v11 = vadd.f32 %v12233_v56, %v8480_v38  ;;  %v6405_v37 = vadd.f32 %v6323_v19, %v5846_v0 }
 0x4f5   :  { %vm8612_vm3 = vcmp.ge.f32.partialorder %v8548_v11, 0.0  ;;  %v8676_v18 = vmul.f32 0.01, %v8548_v11 }
 0x4f6   :  { %v8399_v9 = vpop.f32.mrf.mxu0  ;;  %v7617_v54 = vpop.f32.mrf.mxu3 }
 0x4f7   :  { %v5769_v3 = vpop.f32.mrf.mxu1  ;;  %v8740_v22 = vsel %vm8612_vm3, %v8548_v11, %v8676_v18  ;;  %v7699_v52 = vadd.f32 %v7617_v54, %v6405_v37 }
 0x4f8   :  { %8805 = vst.msk [vmem:[%s12379_s5 + $0x198] sm:$0xff] %vm8753_vm11, %v8740_v22  ;;  %v5848_v13 = vadd.f32 %v5769_v3, %v12507_v58 }
 0x4f9   :  { %v8481_v47 = vadd.f32 %v8399_v9, %v7699_v52  ;;  %v12511_v52 = vld [vmem:[#allocation27_spill] sm:$0xff] }
 0x4fa   :  { %v6325_v51 = vpop.f32.mrf.mxu2 }
 0x4fb   :  { %v8549_v34 = vadd.f32 %v12233_v56, %v8481_v47  ;;  %v6406_v29 = vadd.f32 %v6325_v51, %v5847_v41 }
 0x4fd   :  { %vm8613_vm4 = vcmp.ge.f32.partialorder %v8549_v34, 0.0  ;;  %v8677_v33 = vmul.f32 0.01, %v8549_v34 }
 0x4fe   :  { %v8401_v45 = vpop.f32.mrf.mxu0  ;;  %v7619_v46 = vpop.f32.mrf.mxu3 }
 0x4ff   :  { %v5771_v8 = vpop.f32.mrf.mxu1  ;;  %v8741_v4 = vsel %vm8613_vm4, %v8549_v34, %v8677_v33  ;;  %v7700_v43 = vadd.f32 %v7619_v46, %v6406_v29 }
 0x500   :  { %8806 = vst.msk [vmem:[%s12379_s5 + $0x1a0] sm:$0xff] %vm8753_vm11, %v8741_v4  ;;  %v5849_v27 = vadd.f32 %v5771_v8, %v12508_v2 }
 0x501   :  { %v8482_v61 = vadd.f32 %v8401_v45, %v7700_v43  ;;  %v12512_v43 = vld [vmem:[#allocation29_spill] sm:$0xff] }
 0x502   :  { %v6328_v62 = vpop.f32.mrf.mxu2 }
 0x503   :  { %v8550_v20 = vadd.f32 %v12233_v56, %v8482_v61  ;;  %v6407_v12 = vadd.f32 %v6328_v62, %v5848_v13 }
 0x505   :  { %vm8614_vm7 = vcmp.ge.f32.partialorder %v8550_v20, 0.0  ;;  %v8678_v24 = vmul.f32 0.01, %v8550_v20 }
 0x506   :  { %v8404_v21 = vpop.f32.mrf.mxu0  ;;  %v7622_v32 = vpop.f32.mrf.mxu3 }
 0x507   :  { %v5774_v39 = vpop.f32.mrf.mxu1  ;;  %v8742_v25 = vsel %vm8614_vm7, %v8550_v20, %v8678_v24  ;;  %v7701_v6 = vadd.f32 %v7622_v32, %v6407_v12 }
 0x508   :  { %8807 = vst.msk [vmem:[%s12379_s5 + $0x1a8] sm:$0xff] %vm8753_vm11, %v8742_v25  ;;  %v5850_v15 = vadd.f32 %v5774_v39, %v12509_v5  ;;  %v12513_v25 = vld [vmem:[#allocation31_spill] sm:$0xff] }
 0x509   :  { %v8483_v57 = vadd.f32 %v8404_v21, %v7701_v6 }
 0x50a   :  { %v6330_v23 = vpop.f32.mrf.mxu2 }
 0x50b   :  { %v8551_v26 = vadd.f32 %v12233_v56, %v8483_v57  ;;  %v6408_v7 = vadd.f32 %v6330_v23, %v5849_v27 }
 0x50d   :  { %vm8615_vm8 = vcmp.ge.f32.partialorder %v8551_v26, 0.0  ;;  %v8679_v50 = vmul.f32 0.01, %v8551_v26 }
 0x50e   :  { %v8406_v14 = vpop.f32.mrf.mxu0  ;;  %v7624_v17 = vpop.f32.mrf.mxu3 }
 0x50f   :  { %v5776_v28 = vpop.f32.mrf.mxu1  ;;  %v8743_v48 = vsel %vm8615_vm8, %v8551_v26, %v8679_v50  ;;  %v7702_v1 = vadd.f32 %v7624_v17, %v6408_v7 }
 0x510   :  { %8808 = vst.msk [vmem:[%s12379_s5 + $0x1b0] sm:$0xff] %vm8753_vm11, %v8743_v48  ;;  %v5851_v38 = vadd.f32 %v5776_v28, %v12510_v59 }
 0x511   :  { %v8484_v16 = vadd.f32 %v8406_v14, %v7702_v1 }
 0x512   :  { %v6333_v55 = vpop.f32.mrf.mxu2 }
 0x513   :  { %v8552_v30 = vadd.f32 %v12233_v56, %v8484_v16  ;;  %v6409_v10 = vadd.f32 %v6333_v55, %v5850_v15 }
 0x515   :  { %vm8616_vm1 = vcmp.ge.f32.partialorder %v8552_v30, 0.0  ;;  %v8680_v40 = vmul.f32 0.01, %v8552_v30 }
 0x516   :  { %v8409_v49 = vpop.f32.mrf.mxu0  ;;  %v7627_v36 = vpop.f32.mrf.mxu3 }
 0x517   :  { %v5779_v42 = vpop.f32.mrf.mxu1  ;;  %v8744_v60 = vsel %vm8616_vm1, %v8552_v30, %v8680_v40  ;;  %v7703_v63 = vadd.f32 %v7627_v36, %v6409_v10 }
 0x518   :  { %8809 = vst.msk [vmem:[%s12379_s5 + $0x1b8] sm:$0xff] %vm8753_vm11, %v8744_v60  ;;  %v5852_v47 = vadd.f32 %v5779_v42, %v12511_v52  ;;  %v12514_v42 = vld [vmem:[#allocation33_spill] sm:$0xff] }
 0x519   :  { %v8485_v53 = vadd.f32 %v8409_v49, %v7703_v63 }
 0x51a   :  { %v6335_v44 = vpop.f32.mrf.mxu2 }
 0x51b   :  { %v8553_v0 = vadd.f32 %v12233_v56, %v8485_v53  ;;  %v6410_v19 = vadd.f32 %v6335_v44, %v5851_v38 }
 0x51d   :  { %vm8617_vm2 = vcmp.ge.f32.partialorder %v8553_v0, 0.0  ;;  %v8681_v11 = vmul.f32 0.01, %v8553_v0 }
 0x51e   :  { %v8411_v37 = vpop.f32.mrf.mxu0  ;;  %v7629_v18 = vpop.f32.mrf.mxu3 }
 0x51f   :  { %v5781_v9 = vpop.f32.mrf.mxu1  ;;  %v8745_v54 = vsel %vm8617_vm2, %v8553_v0, %v8681_v11  ;;  %v7704_v3 = vadd.f32 %v7629_v18, %v6410_v19  ;;  %v12515_v18 = vld [vmem:[#allocation35_spill] sm:$0xff] }
 0x520   :  { %8810 = vst.msk [vmem:[%s12379_s5 + $0x1c0] sm:$0xff] %vm8753_vm11, %v8745_v54  ;;  %v5853_v61 = vadd.f32 %v5781_v9, %v12512_v43 }
 0x521   :  { %v8486_v22 = vadd.f32 %v8411_v37, %v7704_v3 }
 0x522   :  { %v6338_v35 = vpop.f32.mrf.mxu2 }
 0x523   :  { %v8554_v41 = vadd.f32 %v12233_v56, %v8486_v22  ;;  %v6411_v51 = vadd.f32 %v6338_v35, %v5852_v47 }
 0x525   :  { %vm8618_vm10 = vcmp.ge.f32.partialorder %v8554_v41, 0.0  ;;  %v8682_v34 = vmul.f32 0.01, %v8554_v41 }
 0x526   :  { %v8414_v29 = vpop.f32.mrf.mxu0  ;;  %v7632_v33 = vpop.f32.mrf.mxu3 }
 0x527   :  { %v8746_v45 = vsel %vm8618_vm10, %v8554_v41, %v8682_v34  ;;  %v7705_v46 = vadd.f32 %v7632_v33, %v6411_v51  ;;  %v5784_v8 = vpop.f32.mrf.mxu1 }
 0x528   :  { %8811 = vst.msk [vmem:[%s12379_s5 + $0x1c8] sm:$0xff] %vm8753_vm11, %v8746_v45  ;;  %v5854_v6 = vadd.f32 %v5784_v8, %v12513_v25 }
 0x529   :  { %v8487_v4 = vadd.f32 %v8414_v29, %v7705_v46 }
 0x52a   :  { %v6340_v58 = vpop.f32.mrf.mxu2 }
 0x52b   :  { %v8555_v13 = vadd.f32 %v12233_v56, %v8487_v4  ;;  %v6412_v62 = vadd.f32 %v6340_v58, %v5853_v61 }
 0x52d   :  { %vm8619_vm12 = vcmp.ge.f32.partialorder %v8555_v13, 0.0  ;;  %v8683_v20 = vmul.f32 0.01, %v8555_v13 }
 0x52e   :  { %v8416_v12 = vpop.f32.mrf.mxu0  ;;  %v7634_v24 = vpop.f32.mrf.mxu3 }
 0x52f   :  { %v8747_v21 = vsel %vm8619_vm12, %v8555_v13, %v8683_v20  ;;  %v7706_v32 = vadd.f32 %v7634_v24, %v6412_v62  ;;  %v5786_v2 = vpop.f32.mrf.mxu1 }
 0x530   :  { %8812 = vst.msk [vmem:[%s12379_s5 + $0x1d0] sm:$0xff] %vm8753_vm11, %v8747_v21  ;;  %v5855_v48 = vadd.f32 %v5786_v2, %v11277_v31 }
 0x531   :  { %v8488_v39 = vadd.f32 %v8416_v12, %v7706_v32 }
 0x532   :  { %v6343_v57 = vpop.f32.mrf.mxu2 }
 0x533   :  { %v8556_v27 = vadd.f32 %v12233_v56, %v8488_v39  ;;  %v6413_v23 = vadd.f32 %v6343_v57, %v5854_v6 }
 0x535   :  { %vm8620_vm13 = vcmp.ge.f32.partialorder %v8556_v27, 0.0  ;;  %v8684_v26 = vmul.f32 0.01, %v8556_v27 }
 0x536   :  { %v8419_v7 = vpop.f32.mrf.mxu0  ;;  %v7637_v50 = vpop.f32.mrf.mxu3 }
 0x537   :  { %v8748_v14 = vsel %vm8620_vm13, %v8556_v27, %v8684_v26  ;;  %v7707_v17 = vadd.f32 %v7637_v50, %v6413_v23  ;;  %v5789_v15 = vpop.f32.mrf.mxu1 }
 0x538   :  { %8813 = vst.msk [vmem:[%s12379_s5 + $0x1d8] sm:$0xff] %vm8753_vm11, %v8748_v14  ;;  %v5856_v60 = vadd.f32 %v5789_v15, %v12514_v42 }
 0x539   :  { %v8489_v28 = vadd.f32 %v8419_v7, %v7707_v17 }
 0x53a   :  { %v6345_v1 = vpop.f32.mrf.mxu2 }
 0x53b   :  { %v8557_v16 = vadd.f32 %v12233_v56, %v8489_v28  ;;  %v6414_v5 = vadd.f32 %v6345_v1, %v5855_v48 }
 0x53d   :  { %vm8621_vm6 = vcmp.ge.f32.partialorder %v8557_v16, 0.0  ;;  %v8685_v55 = vmul.f32 0.01, %v8557_v16 }
 0x53e   :  { %v8421_v30 = vpop.f32.mrf.mxu0  ;;  %v7639_v10 = vpop.f32.mrf.mxu3 }
 0x53f   :  { %v8749_v40 = vsel %vm8621_vm6, %v8557_v16, %v8685_v55  ;;  %v7708_v49 = vadd.f32 %v7639_v10, %v6414_v5  ;;  %v5791_v38 = vpop.f32.mrf.mxu1 }
 0x540   :  { %8814 = vst.msk [vmem:[%s12379_s5 + $0x1e0] sm:$0xff] %vm8753_vm11, %v8749_v40  ;;  %v5857_v9 = vadd.f32 %v5791_v38, %v12515_v18 }
 0x541   :  { %v8490_v36 = vadd.f32 %v8421_v30, %v7708_v49 }
 0x542   :  { %v6348_v31 = vpop.f32.mrf.mxu2 }
 0x543   :  { %v8558_v63 = vadd.f32 %v12233_v56, %v8490_v36  ;;  %v6415_v53 = vadd.f32 %v6348_v31, %v5856_v60 }
 0x545   :  { %vm8622_vm9 = vcmp.ge.f32.partialorder %v8558_v63, 0.0  ;;  %v8686_v59 = vmul.f32 0.01, %v8558_v63 }
 0x546   :  { %v8424_v44 = vpop.f32.mrf.mxu0  ;;  %v7642_v0 = vpop.f32.mrf.mxu3 }
 0x547   :  { %v8750_v19 = vsel %vm8622_vm9, %v8558_v63, %v8686_v59  ;;  %v7709_v11 = vadd.f32 %v7642_v0, %v6415_v53 }
 0x548   :  { %8815 = vst.msk [vmem:[%s12379_s5 + $0x1e8] sm:$0xff] %vm8753_vm11, %v8750_v19 }
 0x549   :  { %v8491_v37 = vadd.f32 %v8424_v44, %v7709_v11 }
 0x54a   :  { %v6350_v54 = vpop.f32.mrf.mxu2 }
 0x54b   :  { %v8559_v3 = vadd.f32 %v12233_v56, %v8491_v37  ;;  %v6416_v22 = vadd.f32 %v6350_v54, %v5857_v9 }
 0x54d   :  { %vm8623_vm5 = vcmp.ge.f32.partialorder %v8559_v3, 0.0  ;;  %v8687_v52 = vmul.f32 0.01, %v8559_v3 }
 0x54e   :  { %v7644_v47 = vpop.f32.mrf.mxu3  ;;  %v8426_v51 = vpop.f32.mrf.mxu0 }
 0x54f   :  { %v8751_v35 = vsel %vm8623_vm5, %v8559_v3, %v8687_v52  ;;  %v7710_v41 = vadd.f32 %v7644_v47, %v6416_v22 }
 0x550   :  { %8816 = vst.msk [vmem:[%s12379_s5 + $0x1f0] sm:$0xff] %vm8753_vm11, %v8751_v35 }
 0x551   :  { %v8492_v34 = vadd.f32 %v8426_v51, %v7710_v41 }
 0x553   :  { %v8560_v29 = vadd.f32 %v12233_v56, %v8492_v34 }
 0x555   :  { %vm8624_vm14 = vcmp.ge.f32.partialorder %v8560_v29, 0.0  ;;  %v8688_v33 = vmul.f32 0.01, %v8560_v29 }
 0x557   :  { %v8752_v45 = vsel %vm8624_vm14, %v8560_v29, %v8688_v33 }
 0x558   :  { %8817 = vst.msk [vmem:[%s12379_s5 + $0x1f8] sm:$0xff] %vm8753_vm11, %v8752_v45 }

</bundles_post_ra>
